<compile_context>
chip_gen: v5e
topology: v5e:2x2
jax: 0.10.0
libtpu: 0.0.40
codegen_flags: <defaults>
</compile_context>

<pallas_src>
import functools

import jax
import jax.numpy as jnp
import numpy as np
from jax.experimental import pallas as pl
from jax.experimental.pallas import tpu as pltpu

NUM_CLASSES = 7
C, H, W = 256, 7, 7                 # box_head_input_shape
K_IN = C * H * W                    # 12544 = flattened fc input
FC_DIM = 1024                       # box_head_fc_dims
TK = 1792                           # K tile: 12544 / 7, multiple of 128


def _rcnn_head_kernel(x_ref, w1_ref, b1_ref, w2_ref, b2_ref, wc_ref, bc_ref,
                      pred_ref, frame_ref, acc_ref, *, batch, n_frames):
    """Fused: fc1 (K-tiled, bf16 weights, f32 accum) -> relu -> fc2 -> relu ->
    cls_score -> slice -> softmax (frame-level) + per-video max over frames."""
    k = pl.program_id(0)

    @pl.when(k == 0)
    def _():
        acc_ref[...] = jnp.zeros_like(acc_ref)

    # fc1 partial matmul over the K tiles: native bf16 MXU path, f32 accumulate.
    acc_ref[...] += jnp.dot(x_ref[...].astype(jnp.bfloat16), w1_ref[...],
                            preferred_element_type=jnp.float32)

    @pl.when(k == pl.num_programs(0) - 1)
    def _():
        # fc1 bias + relu
        h1 = jnp.maximum(acc_ref[...] + b1_ref[...], 0.0)
        # fc2 + relu (bf16 weights, f32 accumulation)
        h2 = jnp.maximum(
            jnp.dot(h1.astype(jnp.bfloat16), w2_ref[...],
                    preferred_element_type=jnp.float32) + b2_ref[...], 0.0)
        # cls_score (num_classes + 1 logits), then keep first num_classes
        scores = jnp.dot(h2, wc_ref[...],
                         preferred_element_type=jnp.float32) + bc_ref[...]
        preds = scores[:, :NUM_CLASSES]                       # (M, 7)

        # frame-level softmax over classes (dim=1): one full-tile store.
        m = jnp.max(preds, axis=1, keepdims=True)
        e = jnp.exp(preds - m)
        frame_ref[...] = e / jnp.sum(e, axis=1, keepdims=True)

        # per-video max over the N frames: build the whole (B, 7) slab in
        # vregs and store it once (no per-row masked partial stores).
        row_ids = jax.lax.broadcasted_iota(jnp.int32, (batch, NUM_CLASSES), 0)
        vid = jnp.zeros((batch, NUM_CLASSES), jnp.float32)
        for b in range(batch):        # static; B lane-wide selects on one vreg
            gmax = jnp.max(preds[b * n_frames:(b + 1) * n_frames, :],
                           axis=0, keepdims=True)             # (1, 7)
            vid = jnp.where(row_ids == b, gmax, vid)
        pred_ref[...] = vid


def rcnn_head_forward(x, params):
    """x: (B, N, C, H, W) float32.  params: (w1 bf16, b1 f32, w2 bf16, b2 f32,
    wc f32, bc f32).  Returns (predictions (B, 7), frame_level_predictions
    (B*N, 7))."""
    B, N, c, h, w = x.shape
    assert (c, h, w) == (C, H, W)
    M = B * N
    x_flat = x.reshape(M, c * h * w)
    w1, b1, w2, b2, wc, bc = params
    # Large fc weights are streamed from HBM in bf16 (the kernel is
    # bandwidth-bound on them).  astype is a no-op if already stored as bf16.
    w1 = w1.astype(jnp.bfloat16)
    w2 = w2.astype(jnp.bfloat16)

    kernel = functools.partial(_rcnn_head_kernel, batch=B, n_frames=N)

    # Advisory cost hint: kernel traffic is dominated by the ~27 MB of bf16
    # weights, so tell XLA's scheduler about it.
    bytes_accessed = int(
        M * K_IN * 4                       # x (f32)
        + K_IN * FC_DIM * 2                # W1 (bf16)
        + FC_DIM * FC_DIM * 2              # W2 (bf16)
        + 2 * FC_DIM * 4                   # b1, b2
        + (FC_DIM + 1) * (NUM_CLASSES + 1) * 4   # Wc, bc
        + (M + B) * NUM_CLASSES * 4)       # outputs
    flops = int(2 * M * (K_IN * FC_DIM + FC_DIM * FC_DIM
                         + FC_DIM * (NUM_CLASSES + 1)))
    cost = pl.CostEstimate(flops=flops, transcendentals=M * NUM_CLASSES,
                           bytes_accessed=bytes_accessed)

    preds, frame = pl.pallas_call(
        kernel,
        out_shape=(jax.ShapeDtypeStruct((B, NUM_CLASSES), jnp.float32),
                   jax.ShapeDtypeStruct((M, NUM_CLASSES), jnp.float32)),
        grid_spec=pltpu.PrefetchScalarGridSpec(
            num_scalar_prefetch=0,
            grid=(K_IN // TK,),
            in_specs=[
                pl.BlockSpec((M, TK), lambda k: (0, k)),            # x tile
                pl.BlockSpec((TK, FC_DIM), lambda k: (k, 0)),       # W1 tile (bf16)
                pl.BlockSpec((1, FC_DIM), lambda k: (0, 0)),        # b1
                pl.BlockSpec((FC_DIM, FC_DIM), lambda k: (0, 0)),   # W2 (bf16)
                pl.BlockSpec((1, FC_DIM), lambda k: (0, 0)),        # b2
                pl.BlockSpec((FC_DIM, NUM_CLASSES + 1), lambda k: (0, 0)),  # Wc
                pl.BlockSpec((1, NUM_CLASSES + 1), lambda k: (0, 0)),       # bc
            ],
            out_specs=(
                pl.BlockSpec((B, NUM_CLASSES), lambda k: (0, 0)),
                pl.BlockSpec((M, NUM_CLASSES), lambda k: (0, 0)),
            ),
            scratch_shapes=[pltpu.VMEM((M, FC_DIM), jnp.float32)],
        ),
        compiler_params=pltpu.CompilerParams(
            dimension_semantics=("arbitrary",),
            # ~13 MiB actual working set; 40 MiB leaves headroom while staying
            # well under v7x's 64 MiB physical VMEM per TensorCore.
            vmem_limit_bytes=40 * 1024 * 1024,
        ),
        cost_estimate=cost,
    )(x_flat, w1, b1, w2, b2, wc, bc)
    return preds, frame


def init_params(key):
    """Deterministic synthetic parameters (PyTorch Linear shapes, pre-transposed).
    The two large fc weight matrices are stored in bfloat16."""
    ks = jax.random.split(key, 6)

    def lin(kw, kb, fan_in, fan_out):
        s = 1.0 / np.sqrt(fan_in)
        w = jax.random.uniform(kw, (fan_in, fan_out), jnp.float32, -s, s)
        b = jax.random.uniform(kb, (1, fan_out), jnp.float32, -s, s)
        return w, b

    w1, b1 = lin(ks[0], ks[1], K_IN, FC_DIM)            # box_head fc1
    w2, b2 = lin(ks[2], ks[3], FC_DIM, FC_DIM)          # box_head fc2
    wc, bc = lin(ks[4], ks[5], FC_DIM, NUM_CLASSES + 1) # box_predictor cls_score
    return (w1.astype(jnp.bfloat16), b1,
            w2.astype(jnp.bfloat16), b2, wc, bc)


def reference_forward(x, params):
    """Plain-JAX f32 reference mirroring the PyTorch forward (bf16 weights
    dequantized back to f32)."""
    w1, b1, w2, b2, wc, bc = params
    w1 = w1.astype(jnp.float32)
    w2 = w2.astype(jnp.float32)
    B, N = x.shape[:2]
    xf = x.reshape(B * N, -1)
    h1 = jax.nn.relu(xf @ w1 + b1)
    h2 = jax.nn.relu(h1 @ w2 + b2)
    scores = h2 @ wc + bc
    preds = scores[:, :NUM_CLASSES]
    frame = jax.nn.softmax(preds, axis=1)
    vid = jnp.max(preds.reshape(B, N, NUM_CLASSES), axis=1)
    return vid, frame


if __name__ == "__main__":
    key = jax.random.PRNGKey(0)
    kx, kp = jax.random.split(key)

    B, N = 2, 4                                 # small batch / frames-per-video
    x = jax.random.normal(kx, (B, N, C, H, W), jnp.float32)
    params = init_params(kp)

    preds, frame = rcnn_head_forward(x, params)
    preds = jax.block_until_ready(preds)
    frame = jax.block_until_ready(frame)

    ref_preds, ref_frame = reference_forward(x, params)
    # Tolerance loosened vs f32-only version: fc1/fc2 run on the bf16 MXU path.
    np.testing.assert_allclose(np.asarray(preds), np.asarray(ref_preds),
                               rtol=2e-2, atol=2e-2)
    np.testing.assert_allclose(np.asarray(frame), np.asarray(ref_frame),
                               rtol=2e-2, atol=2e-2)

    print("KERNEL_OK")
</pallas_src>

<mosaic_0001>
module attributes {stable_mosaic.version = 11 : i64} {
  func.func @_rcnn_head_kernel(%arg0: i32, %arg1: memref<8x1792xf32, #tpu.memory_space<vmem>>, %arg2: memref<1792x1024xbf16, #tpu.memory_space<vmem>>, %arg3: memref<1x1024xf32, #tpu.memory_space<vmem>>, %arg4: memref<1024x1024xbf16, #tpu.memory_space<vmem>>, %arg5: memref<1x1024xf32, #tpu.memory_space<vmem>>, %arg6: memref<1024x8xf32, #tpu.memory_space<vmem>>, %arg7: memref<1x8xf32, #tpu.memory_space<vmem>>, %arg8: memref<2x7xf32, #tpu.memory_space<vmem>>, %arg9: memref<8x7xf32, #tpu.memory_space<vmem>>, %arg10: memref<8x1024xf32, #tpu.memory_space<vmem>>) attributes {dimension_semantics = [#tpu.dimension_semantics<arbitrary>], iteration_bounds = array<i64: 7>, scalar_prefetch = 0 : i64, scratch_operands = 1 : i64, tpu.core_type = #tpu.core_type<tc>, window_params = [{transform_indices = @transform_0, window_bounds = array<i64: 8, 1792>}, {transform_indices = @transform_1, window_bounds = array<i64: 1792, 1024>}, {pipeline_mode = #tpu.pipeline_mode<synchronous>, transform_indices = @transform_2, window_bounds = array<i64: 1, 1024>}, {pipeline_mode = #tpu.pipeline_mode<synchronous>, transform_indices = @transform_3, window_bounds = array<i64: 1024, 1024>}, {pipeline_mode = #tpu.pipeline_mode<synchronous>, transform_indices = @transform_4, window_bounds = array<i64: 1, 1024>}, {pipeline_mode = #tpu.pipeline_mode<synchronous>, transform_indices = @transform_5, window_bounds = array<i64: 1024, 8>}, {pipeline_mode = #tpu.pipeline_mode<synchronous>, transform_indices = @transform_6, window_bounds = array<i64: 1, 8>}, {pipeline_mode = #tpu.pipeline_mode<synchronous>, transform_indices = @transform_7, window_bounds = array<i64: 2, 7>}, {pipeline_mode = #tpu.pipeline_mode<synchronous>, transform_indices = @transform_8, window_bounds = array<i64: 8, 7>}]} {
    %c0_i32 = arith.constant 0 : i32
    %0 = arith.cmpi eq, %arg0, %c0_i32 : i32
    %1 = arith.extui %0 : i1 to i32
    %c0_i32_0 = arith.constant 0 : i32
    %2 = arith.cmpi ne, %1, %c0_i32_0 : i32
    scf.if %2 {
      %cst_9 = arith.constant 0.000000e+00 : f32
      %13 = vector.broadcast %cst_9 : f32 to vector<8x1024xf32>
      %c0_10 = arith.constant 0 : index
      %c0_11 = arith.constant 0 : index
      %14 = vector.load %arg10[%c0_10, %c0_11] : memref<8x1024xf32, #tpu.memory_space<vmem>>, vector<8x1024xf32>
      tpu.vector_store %arg10[%c0_10, %c0_11], %13 {strides = array<i32>} : memref<8x1024xf32, #tpu.memory_space<vmem>>, vector<8x1024xf32>,
    } else {
    }
    %c0 = arith.constant 0 : index
    %c0_1 = arith.constant 0 : index
    %3 = vector.load %arg10[%c0, %c0_1] : memref<8x1024xf32, #tpu.memory_space<vmem>>, vector<8x1024xf32>
    %c0_2 = arith.constant 0 : index
    %c0_3 = arith.constant 0 : index
    %4 = vector.load %arg1[%c0_2, %c0_3] : memref<8x1792xf32, #tpu.memory_space<vmem>>, vector<8x1792xf32>
    %5 = arith.truncf %4 : vector<8x1792xf32> to vector<8x1792xbf16>
    %c0_4 = arith.constant 0 : index
    %c0_5 = arith.constant 0 : index
    %6 = vector.load %arg2[%c0_4, %c0_5] : memref<1792x1024xbf16, #tpu.memory_space<vmem>>, vector<1792x1024xbf16>
    %cst = arith.constant dense<0.000000e+00> : vector<8x1024xf32>
    %7 = tpu.matmul %5, %6, %cst {dimension_numbers = #tpu.dot_dimension_numbers<[1], [0], [0], [1], [0, 0, 1, 1], [], []>} : vector<8x1792xbf16>, vector<1792x1024xbf16>, vector<8x1024xf32> -> vector<8x1024xf32>
    %8 = arith.addf %3, %7 : vector<8x1024xf32>
    %c0_6 = arith.constant 0 : index
    %c0_7 = arith.constant 0 : index
    %9 = vector.load %arg10[%c0_6, %c0_7] : memref<8x1024xf32, #tpu.memory_space<vmem>>, vector<8x1024xf32>
    tpu.vector_store %arg10[%c0_6, %c0_7], %8 {strides = array<i32>} : memref<8x1024xf32, #tpu.memory_space<vmem>>, vector<8x1024xf32>,
    %c6_i32 = arith.constant 6 : i32
    %10 = arith.cmpi eq, %arg0, %c6_i32 : i32
    %11 = arith.extui %10 : i1 to i32
    %c0_i32_8 = arith.constant 0 : i32
    %12 = arith.cmpi ne, %11, %c0_i32_8 : i32
    scf.if %12 {
      %c0_9 = arith.constant 0 : index
      %c0_10 = arith.constant 0 : index
      %13 = vector.load %arg10[%c0_9, %c0_10] : memref<8x1024xf32, #tpu.memory_space<vmem>>, vector<8x1024xf32>
      %c0_11 = arith.constant 0 : index
      %c0_12 = arith.constant 0 : index
      %14 = vector.load %arg3[%c0_11, %c0_12] : memref<1x1024xf32, #tpu.memory_space<vmem>>, vector<1x1024xf32>
      %15 = vector.broadcast %14 : vector<1x1024xf32> to vector<8x1024xf32>
      %16 = arith.addf %13, %15 : vector<8x1024xf32>
      %cst_13 = arith.constant 0.000000e+00 : f32
      %17 = vector.broadcast %cst_13 : f32 to vector<8x1024xf32>
      %18 = arith.maximumf %16, %17 : vector<8x1024xf32>
      %19 = arith.truncf %18 : vector<8x1024xf32> to vector<8x1024xbf16>
      %c0_14 = arith.constant 0 : index
      %c0_15 = arith.constant 0 : index
      %20 = vector.load %arg4[%c0_14, %c0_15] : memref<1024x1024xbf16, #tpu.memory_space<vmem>>, vector<1024x1024xbf16>
      %cst_16 = arith.constant dense<0.000000e+00> : vector<8x1024xf32>
      %21 = tpu.matmul %19, %20, %cst_16 {dimension_numbers = #tpu.dot_dimension_numbers<[1], [0], [0], [1], [0, 0, 1, 1], [], []>} : vector<8x1024xbf16>, vector<1024x1024xbf16>, vector<8x1024xf32> -> vector<8x1024xf32>
      %c0_17 = arith.constant 0 : index
      %c0_18 = arith.constant 0 : index
      %22 = vector.load %arg5[%c0_17, %c0_18] : memref<1x1024xf32, #tpu.memory_space<vmem>>, vector<1x1024xf32>
      %23 = vector.broadcast %22 : vector<1x1024xf32> to vector<8x1024xf32>
      %24 = arith.addf %21, %23 : vector<8x1024xf32>
      %cst_19 = arith.constant 0.000000e+00 : f32
      %25 = vector.broadcast %cst_19 : f32 to vector<8x1024xf32>
      %26 = arith.maximumf %24, %25 : vector<8x1024xf32>
      %c0_20 = arith.constant 0 : index
      %c0_21 = arith.constant 0 : index
      %27 = vector.load %arg6[%c0_20, %c0_21] : memref<1024x8xf32, #tpu.memory_space<vmem>>, vector<1024x8xf32>
      %cst_22 = arith.constant dense<0.000000e+00> : vector<8x8xf32>
      %28 = tpu.matmul %26, %27, %cst_22 {dimension_numbers = #tpu.dot_dimension_numbers<[1], [0], [0], [1], [0, 0, 1, 1], [], []>} : vector<8x1024xf32>, vector<1024x8xf32>, vector<8x8xf32> -> vector<8x8xf32>
      %c0_23 = arith.constant 0 : index
      %c0_24 = arith.constant 0 : index
      %29 = vector.load %arg7[%c0_23, %c0_24] : memref<1x8xf32, #tpu.memory_space<vmem>>, vector<1x8xf32>
      %30 = vector.broadcast %29 : vector<1x8xf32> to vector<8x8xf32>
      %31 = arith.addf %28, %30 : vector<8x8xf32>
      %32 = vector.extract_strided_slice %31 {offsets = [0, 0], sizes = [8, 7], strides = [1, 1]} : vector<8x8xf32> to vector<8x7xf32>
      %cst_25 = arith.constant dense<0xFF800000> : vector<8xf32>
      %33 = vector.multi_reduction <maximumf>, %32, %cst_25 [1] : vector<8x7xf32> to vector<8xf32>
      %34 = vector.shape_cast %33 : vector<8xf32> to vector<8x1xf32>
      %35 = vector.broadcast %34 : vector<8x1xf32> to vector<8x7xf32>
      %36 = arith.subf %32, %35 : vector<8x7xf32>
      %37 = math.exp %36 : vector<8x7xf32>
      %cst_26 = arith.constant dense<0.000000e+00> : vector<8xf32>
      %38 = vector.multi_reduction <add>, %37, %cst_26 [1] : vector<8x7xf32> to vector<8xf32>
      %39 = vector.shape_cast %38 : vector<8xf32> to vector<8x1xf32>
      %40 = vector.broadcast %39 : vector<8x1xf32> to vector<8x7xf32>
      %41 = arith.divf %37, %40 : vector<8x7xf32>
      %c0_27 = arith.constant 0 : index
      %c0_28 = arith.constant 0 : index
      %42 = vector.load %arg9[%c0_27, %c0_28] : memref<8x7xf32, #tpu.memory_space<vmem>>, vector<8x7xf32>
      tpu.vector_store %arg9[%c0_27, %c0_28], %41 {strides = array<i32>} : memref<8x7xf32, #tpu.memory_space<vmem>>, vector<8x7xf32>,
      %43 = tpu.iota {dimensions = array<i32: 0>} : vector<2x7xi32>
      %cst_29 = arith.constant 0.000000e+00 : f32
      %44 = vector.broadcast %cst_29 : f32 to vector<2x7xf32>
      %45 = vector.extract_strided_slice %32 {offsets = [0, 0], sizes = [4, 7], strides = [1, 1]} : vector<8x7xf32> to vector<4x7xf32>
      %cst_30 = arith.constant dense<0xFF800000> : vector<7xf32>
      %46 = vector.multi_reduction <maximumf>, %45, %cst_30 [0] : vector<4x7xf32> to vector<7xf32>
      %47 = vector.shape_cast %46 : vector<7xf32> to vector<1x7xf32>
      %c0_i32_31 = arith.constant 0 : i32
      %48 = vector.broadcast %c0_i32_31 : i32 to vector<2x7xi32>
      %49 = arith.cmpi eq, %43, %48 : vector<2x7xi32>
      %50 = vector.shape_cast %47 : vector<1x7xf32> to vector<1x7xf32>
      %51 = vector.broadcast %50 : vector<1x7xf32> to vector<2x7xf32>
      %52 = arith.select %49, %51, %44 : vector<2x7xi1>, vector<2x7xf32>
      %53 = vector.extract_strided_slice %32 {offsets = [4, 0], sizes = [4, 7], strides = [1, 1]} : vector<8x7xf32> to vector<4x7xf32>
      %cst_32 = arith.constant dense<0xFF800000> : vector<7xf32>
      %54 = vector.multi_reduction <maximumf>, %53, %cst_32 [0] : vector<4x7xf32> to vector<7xf32>
      %55 = vector.shape_cast %54 : vector<7xf32> to vector<1x7xf32>
      %c1_i32 = arith.constant 1 : i32
      %56 = vector.broadcast %c1_i32 : i32 to vector<2x7xi32>
      %57 = arith.cmpi eq, %43, %56 : vector<2x7xi32>
      %58 = vector.shape_cast %55 : vector<1x7xf32> to vector<1x7xf32>
      %59 = vector.broadcast %58 : vector<1x7xf32> to vector<2x7xf32>
      %60 = arith.select %57, %59, %52 : vector<2x7xi1>, vector<2x7xf32>
      %c0_33 = arith.constant 0 : index
      %c0_34 = arith.constant 0 : index
      %61 = vector.load %arg8[%c0_33, %c0_34] : memref<2x7xf32, #tpu.memory_space<vmem>>, vector<2x7xf32>
      tpu.vector_store %arg8[%c0_33, %c0_34], %60 {strides = array<i32>} : memref<2x7xf32, #tpu.memory_space<vmem>>, vector<2x7xf32>,
    } else {
    }
    return
  }
  func.func @transform_0(%arg0: i32) -> (i32, i32) {
    %c0_i32 = arith.constant 0 : i32
    %c0_i32_0 = arith.constant 0 : i32
    return %c0_i32, %arg0 : i32, i32
  }
  func.func @transform_1(%arg0: i32) -> (i32, i32) {
    %c0_i32 = arith.constant 0 : i32
    %c0_i32_0 = arith.constant 0 : i32
    return %arg0, %c0_i32 : i32, i32
  }
  func.func @transform_2(%arg0: i32) -> (i32, i32) {
    %c0_i32 = arith.constant 0 : i32
    %c0_i32_0 = arith.constant 0 : i32
    %c0_i32_1 = arith.constant 0 : i32
    return %c0_i32, %c0_i32_0 : i32, i32
  }
  func.func @transform_3(%arg0: i32) -> (i32, i32) {
    %c0_i32 = arith.constant 0 : i32
    %c0_i32_0 = arith.constant 0 : i32
    %c0_i32_1 = arith.constant 0 : i32
    return %c0_i32, %c0_i32_0 : i32, i32
  }
  func.func @transform_4(%arg0: i32) -> (i32, i32) {
    %c0_i32 = arith.constant 0 : i32
    %c0_i32_0 = arith.constant 0 : i32
    %c0_i32_1 = arith.constant 0 : i32
    return %c0_i32, %c0_i32_0 : i32, i32
  }
  func.func @transform_5(%arg0: i32) -> (i32, i32) {
    %c0_i32 = arith.constant 0 : i32
    %c0_i32_0 = arith.constant 0 : i32
    %c0_i32_1 = arith.constant 0 : i32
    return %c0_i32, %c0_i32_0 : i32, i32
  }
  func.func @transform_6(%arg0: i32) -> (i32, i32) {
    %c0_i32 = arith.constant 0 : i32
    %c0_i32_0 = arith.constant 0 : i32
    %c0_i32_1 = arith.constant 0 : i32
    return %c0_i32, %c0_i32_0 : i32, i32
  }
  func.func @transform_7(%arg0: i32) -> (i32, i32) {
    %c0_i32 = arith.constant 0 : i32
    %c0_i32_0 = arith.constant 0 : i32
    %c0_i32_1 = arith.constant 0 : i32
    return %c0_i32, %c0_i32_0 : i32, i32
  }
  func.func @transform_8(%arg0: i32) -> (i32, i32) {
    %c0_i32 = arith.constant 0 : i32
    %c0_i32_0 = arith.constant 0 : i32
    %c0_i32_1 = arith.constant 0 : i32
    return %c0_i32, %c0_i32_0 : i32, i32
  }
}

</mosaic_0001>

<bundles_post_ra>
// kernel: tpu_custom_call.1
= control target key start
LH: loop header
LB: loop body
LE: loop exit
PB: predicated region body
PF: predicated region fallthrough
CT: control target
= control target key end

     0   :  { %s22185_s0 = inlined_call_operand.hbm [shape: f32[8,12544], index: 0, kind: input, shape index: {}]   ;;  %s22186_s1 = inlined_call_operand.hbm [shape: bf16[12544,1024], index: 1, kind: input, shape index: {}]   ;;  %s22187_s2 = inlined_call_operand.hbm [shape: f32[1,1024], index: 2, kind: input, shape index: {}]   ;;  %s22188_s3 = inlined_call_operand.hbm [shape: bf16[1024,1024], index: 3, kind: input, shape index: {}]   ;;  %s22189_s4 = inlined_call_operand.hbm [shape: f32[1,1024], index: 4, kind: input, shape index: {}]   ;;  %s22190_s5 = inlined_call_operand.vmem [shape: f32[1024,8], index: 5, kind: input, shape index: {}]   ;;  %s22191_s6 = inlined_call_operand.hbm [shape: f32[1,8], index: 6, kind: input, shape index: {}]   ;;  %s22192_s7 = inlined_call_operand.hbm [shape: f32[2,7], index: 7, kind: output, shape index: {0}]   ;;  %s22193_s8 = inlined_call_operand.hbm [shape: f32[8,7], index: 8, kind: output, shape index: {1}]  }
   0x1   :  { %22196 = sst [smem:[#allocation24_spill]] %s22187_s2 }
   0x2   :  { %22197 = sst [smem:[#allocation25_spill]] %s22188_s3 }
   0x3   :  { %22198 = sst [smem:[#allocation26_spill]] %s22189_s4 }
   0x4   :  { %14 = vsyncpa [#allocation4], 0 }
   0x5   :  { %16 = vsyncpa [#allocation4 + $0x1], 0 }
   0x6   :  { %17 = vsyncpa [#allocation7], 0 }
   0x7   :  { %19 = vsyncpa [#allocation7 + $0x1], 0 }
   0x8   :  { %20 = vsyncpa [#allocation10], 0 }
   0x9   :  { %21 = vsyncpa [#allocation13], 0 }
   0xa   :  { %22 = vsyncpa [#allocation5], 0 }
   0xb   :  { %23 = vsyncpa [#allocation16], 0  ;;  %s19313_s27 = smov 0   ;;  %s19315_s28 = smov 0  }
   0xc   :  { %s19317_s29 = smov 0   ;;  %s19319_s30 = smov 0  }
   0xd LB: > { %s22199_s2 = sld [smem:[#allocation24_spill]]  ;;  %s19337_s12 = sadd.s32 4294967295, %s19257_s30   ;;  %s19257_s30 = sphi %s19319_s30, %s22211_s30   ;;  %s19253_s29 = sphi %s19317_s29, %s22210_s29   ;;  %s19249_s28 = sphi %s19315_s28, %s22209_s28   ;;  %s19245_s27 = sphi %s19313_s27, %s22208_s27  }
   0xe   : > { %p11783_p0 = scmp.ge.s32.totalorder %s19257_s30, 1  ;;  %p50_p1 = scmp.eq.s32.totalorder %s19337_s12, 0 }
   0xf   : > { %p233_p2 = scmp.lt.s32.totalorder %s19257_s30, 8  ;;  %p11784_p3 = scmp.ne.s32.totalorder %s19337_s12, 0 }
  0x10   : > { %s19259_s14 = smov [#allocation8]   ;;  %s22201_s3 = sld [smem:[#allocation25_spill]] }
  0x11   : > { %p19343_p4 = pnand %p11783_p0, %p233_p2  ;;  %s247_s15 = sshll.u32 %s19259_s14, 4  ;;  %s248_s15 = int_to_ptr.vmem [resolvable:$true] %s247_s15 }
  0x12   : > { %s19260_s20 = smov [#allocation9]   ;;  %s22194_s22 = smov 512  }
  0x13   : > { %s245_s11 = sshll.u32 %s22199_s2, 4  ;;  %p18881_p5 = pneg %p19343_p4  ;;  %s246_s11 = int_to_ptr.hbm [resolvable:$true] %s245_s11 }
  0x14   : > { %s258_s21 = sshll.u32 %s19260_s20, 4  ;;  %s22195_s23 = smov 32   ;;  %s259_s21 = int_to_ptr.vmem [resolvable:$true] %s258_s21 }
  0x15   : > { %p19354_p6 = pnand %p18881_p5, %p50_p1  ;;  %s22203_s4 = sld [smem:[#allocation26_spill]] }
  0x16   : > { %s256_s18 = sshll.u32 %s22201_s3, 4  ;;  %s19263_s9 = smov [#allocation11]   ;;  %s257_s18 = int_to_ptr.hbm [resolvable:$true] %s256_s18 }
  0x17   : > { %18884 = dma.hbm_to_vmem [thread:$0]  (!%p19354_p6), %s246_s11, 128, %s248_s15, [#allocation7]  }
  0x18   : > { %18887 = dma.hbm_to_vmem [thread:$0]  (!%p19354_p6), %s257_s18, 65536, %s259_s21, [#allocation10], %s22194_s22, %s22194_s22, %s22195_s23  }
  0x19   : > { %s273_s10 = sshll.u32 %s19263_s9, 4  ;;  %s286_s15 = sshll.u32 %s22191_s6, 4  ;;  %s274_s10 = int_to_ptr.vmem [resolvable:$true] %s273_s10  ;;  %s287_s15 = int_to_ptr.hbm [resolvable:$true] %s286_s15 }
  0x1a   : > { %s19264_s16 = smov [#allocation12]   ;;  %s19376_s18 = sadd.s32 1, %s19257_s30  }
  0x1b   : > { %s271_s26 = sshll.u32 %s22203_s4, 4  ;;  %s288_s17 = sshll.u32 %s19264_s16, 4  ;;  %s272_s26 = int_to_ptr.hbm [resolvable:$true] %s271_s26  ;;  %s289_s17 = int_to_ptr.vmem [resolvable:$true] %s288_s17 }
  0x1c   : > { %18890 = dma.hbm_to_vmem [thread:$0]  (!%p19354_p6), %s272_s26, 128, %s274_s10, [#allocation10]  }
  0x1d   : > { %18893 = dma.hbm_to_vmem [thread:$0]  (!%p19354_p6), %s287_s15, 16, %s289_s17, [#allocation13]  }
  0x1e   : > { %s36_s20 = sadd.s32 1, %s19253_s29  ;;  %s33_s21 = ssub.s32 %s19257_s30, %s19376_s18 }
  0x1f   : > { %p43_p7 = scmp.ne.s32.totalorder %s19253_s29, %s19249_s28  ;;  %p34_p8 = scmp.eq.s32.totalorder %s33_s21, 0 }
  0x20   : > { %p44_p9 = scmp.eq.s32.totalorder %s19257_s30, 0  ;;  %p49_p10 = scmp.ne.s32.totalorder %s19249_s28, %s19245_s27 }
  0x21   : > { %p18905_p11 = scmp.lt.s32.totalorder %s19257_s30, 7  ;;  %s299_s19 = sand.u32 1, %s19253_s29  }
  0x22   : > { %s19388_s24 = scalar_select %p34_p8, %s19253_s29, %s36_s20  }
  0x23   : > { %p45_p12 = por %p44_p9, %p43_p7  ;;  %p19392_p13 = por %p50_p1, %p49_p10 }
  0x24   : > { %s17437_s26 = smul.u32 112, %s19257_s30  ;;  %s300_s20 = scalar_lea.sflag [#allocation4], %s299_s19 }
  0x25   : > { %s18849_s9 = smul.u32 112, %s299_s19  ;;  %p19401_p0 = pnand %p18905_p11, %p45_p12 }
  0x26   : > { %s308_s14 = scalar_lea.hbm %s22185_s0, %s17437_s26  ;;  %s19090_s11 = scalar_lea.hbm %s22185_s0, 784 }
  0x27   : > { %s310_s27 = sshll.u32 %s308_s14, 4  ;;  %s303_s16 = scalar_lea.vmem [#allocation3], %s18849_s9  ;;  %s311_s27 = int_to_ptr.hbm [resolvable:$true] %s310_s27 }
  0x28   : > { %s312_s17 = sshll.u32 %s303_s16, 4  ;;  %s19083_s21 = sshra.s32 %s311_s27, 4  ;;  %s313_s17 = int_to_ptr.vmem [resolvable:$true] %s312_s17  ;;  %s19084_s21 = int_to_ptr.hbm [resolvable:$true] %s19083_s21 }
  0x29   : > { %s19085_s22 = scalar_lea.hbm %s19084_s21, 112  ;;  %p19087_p5 = pneg %p19401_p0 }
  0x2a   : > { %p19086_p2 = scmp.ne.s32.totalorder %s19084_s21, %s19085_s22  ;;  %p19091_p8 = scmp.lt.s32.totalorder %s19084_s21, %s22185_s0 }
  0x2b   : > { %p19092_p9 = scmp.lt.s32.totalorder %s19090_s11, %s19085_s22 }
  0x2c   : > { %p19088_p6 = pnand %p19087_p5, %p19086_p2 }
  0x2d   : > { %p19093_p10 = por %p19092_p9, %p19091_p8 }
  0x2e   : > { %p19089_p7 = pneg %p19088_p6 }
  0x30   : > { %p19094_p11 = pnand %p19093_p10, %p19089_p7 }
  0x32   : > { %19097 = shalt.err (!%p19094_p11)
}
  0x33   : > { %18897 = dma.hbm_to_vmem [thread:$0]  (!%p19401_p0), %s311_s27, 1792, %s313_s17, %s300_s20  }
  0x34   : > { %s18850_s9 = smul.u32 7168, %s299_s19  ;;  %s319_s16 = sand.u32 1, %s19257_s30  }
  0x35   : > { %s18848_s2 = smul.u32 7168, %s19257_s30  ;;  %s320_s21 = scalar_lea.sflag [#allocation7], %s319_s16 }
  0x36   : > { %s323_s3 = scalar_lea.vmem [#allocation6], %s18850_s9 }
  0x37   : > { %s332_s26 = sshll.u32 %s323_s3, 4  ;;  %s329_s23 = scalar_lea.hbm %s22186_s1, %s18848_s2  ;;  %s333_s26 = int_to_ptr.vmem [resolvable:$true] %s332_s26 }
  0x38   : > { %s330_s22 = sshll.u32 %s329_s23, 4  ;;  %s19120_s3 = scalar_lea.hbm %s22186_s1, 50176  ;;  %s331_s22 = int_to_ptr.hbm [resolvable:$true] %s330_s22 }
  0x39   : > { %s19113_s11 = sshra.s32 %s331_s22, 4  ;;  %s19114_s11 = int_to_ptr.hbm [resolvable:$true] %s19113_s11 }
  0x3a   : > { %s19115_s14 = scalar_lea.hbm %s19114_s11, 7168  ;;  %p19121_p7 = scmp.lt.s32.totalorder %s19114_s11, %s22186_s1 }
  0x3b   : > { %p19116_p12 = scmp.ne.s32.totalorder %s19114_s11, %s19115_s14  ;;  %p19122_p8 = scmp.lt.s32.totalorder %s19120_s3, %s19115_s14 }
  0x3d   : > { %p19118_p2 = pnand %p19116_p12, %p19087_p5  ;;  %p19123_p9 = por %p19122_p8, %p19121_p7 }
  0x3f   : > { %p19119_p6 = pneg %p19118_p2 }
  0x41   : > { %p19124_p10 = pnand %p19123_p9, %p19119_p6 }
  0x43   : > { %19127 = shalt.err (!%p19124_p10)
}
  0x44   : > { %s22206_s2 = smov 32   ;;  %s22207_s4 = smov 512  }
  0x45   : > { %18900 = dma.hbm_to_vmem [thread:$0]  (!%p19401_p0), %s331_s22, 114688, %s333_s26, %s320_s21, %s22207_s4, %s22207_s4, %s22206_s2  }
  0x46   : > { %344 = sbr.rel (%p19343_p4) target bundleno = 3111 (0xc27), region = 48  ;;  %s346_s20 = sand.u32 (!%p19343_p4), 1, %s19249_s28  }
  0x47   : > { %s18851_s9 = smul.u32 (!%p19343_p4), 112, %s346_s20  ;;  %s347_s16 = scalar_lea.sflag (!%p19343_p4), [#allocation4], %s346_s20 }
  0x49   : > { %s19440_s10 = scalar_lea.vmem (!%p19343_p4), [#allocation3], %s18851_s9 }
  0x4b   : > { %19216 = dma.done.wait (%p19392_p13), %s347_s16, 1792  }
  0x4c   : > { %19218 = vsyncadd (%p19392_p13), %s347_s16, 4294965504  ;;  %s356_s15 = sand.u32 1, %s19337_s12   ;;  %s18852_s23 = smul.u32 7168, %s346_s20 }
  0x4d   : > { %s357_s26 = scalar_lea.sflag [#allocation7], %s356_s15 }
  0x4e   : > { %s19447_s22 = scalar_lea.vmem [#allocation6], %s18852_s23 }
  0x4f   : > { %19220 = dma.done.wait (%p19392_p13), %s357_s26, 114688  }
  0x50   : > { %19222 = vsyncadd (%p19392_p13), %s357_s26, 4294852608 }
  0x51   : > { %19224 = dma.done.wait (%p50_p1), [#allocation7], 128  }
  0x52   : > { %19226 = vsyncadd (%p50_p1), [#allocation7], 4294967168 }
  0x53   : > { %19228 = dma.done.wait (%p50_p1), [#allocation10], 65664  }
  0x54   : > { %19230 = vsyncadd (%p50_p1), [#allocation10], 4294901632 }
  0x55   : > { %19232 = dma.done.wait (%p50_p1), [#allocation13], 16  }
  0x56   : > { %19234 = vsyncadd (%p50_p1), [#allocation13], 4294967280  ;;  %419 = sbr.rel (%p11784_p3) target bundleno = 100 (0x64), region = 76 }
  0x5b   : > { %v19265_v0 = vmov 0.0  }
  0x5c   : > { %420 = vst [vmem:[#allocation2 + $0x30] sm:$0xff] %v19265_v0 }
  0x5d   : > { %421 = vst [vmem:[#allocation2] sm:$0xff] %v19265_v0 }
  0x5e   : > { %422 = vst [vmem:[#allocation2 + $0x18] sm:$0xff] %v19265_v0 }
  0x5f   : > { %423 = vst [vmem:[#allocation2 + $0x10] sm:$0xff] %v19265_v0 }
  0x60   : > { %424 = vst [vmem:[#allocation2 + $0x8] sm:$0xff] %v19265_v0 }
  0x61   : > { %425 = vst [vmem:[#allocation2 + $0x20] sm:$0xff] %v19265_v0 }
  0x62   : > { %426 = vst [vmem:[#allocation2 + $0x28] sm:$0xff] %v19265_v0 }
  0x63   : > { %427 = vst [vmem:[#allocation2 + $0x38] sm:$0xff] %v19265_v0 }
  0x64 PF: > { %v12024_v1 = vld [vmem:[%s19447_s22 + $0x1c0] sm:$0xf]  ;;  %p15382_p1 = scmp.ne.s32.totalorder %s19337_s12, 6 }
  0x65   : > { %v17500_v2 = vld [vmem:[%s19447_s22 + $0x1dc] sm:$0xf0] }
  0x66   : > { %v12280_v3 = vld [vmem:[%s19447_s22 + $0x3c0] sm:$0xf]  ;;  %v12025_v4 = vor.u32 %v17500_v2, %v12024_v1 }
  0x67   : > { %v17564_v5 = vld [vmem:[%s19447_s22 + $0x3dc] sm:$0xf0] }
  0x68   : > { %v12536_v6 = vld [vmem:[%s19447_s22 + $0x5c0] sm:$0xf]  ;;  %v12281_v8 = vor.u32 %v17564_v5, %v12280_v3  ;;  %5840 = vmatpush.bf16.msra.mxu0 %v12025_v4 }
  0x69   : > { %v17628_v7 = vld [vmem:[%s19447_s22 + $0x5dc] sm:$0xf0] }
  0x6a   : > { %v12537_v9 = vor.u32 %v17628_v7, %v12536_v6  ;;  %v12792_v10 = vld [vmem:[%s19447_s22 + $0x7c0] sm:$0xf]  ;;  %5853 = vmatpush.bf16.msra.mxu1 %v12281_v8 }
  0x6b   : > { %v17692_v11 = vld [vmem:[%s19447_s22 + $0x7dc] sm:$0xf0] }
  0x6c   : > { %v11992_v12 = vld [vmem:[%s19447_s22 + $0x180] sm:$0xf]  ;;  %v12793_v13 = vor.u32 %v17692_v11, %v12792_v10  ;;  %5866 = vmatpush.bf16.msra.mxu2 %v12537_v9 }
  0x6d   : > { %v17492_v14 = vld [vmem:[%s19447_s22 + $0x19c] sm:$0xf0] }
  0x6e   : > { %v12248_v15 = vld [vmem:[%s19447_s22 + $0x380] sm:$0xf]  ;;  %v11993_v17 = vor.u32 %v17492_v14, %v11992_v12  ;;  %5879 = vmatpush.bf16.msra.mxu3 %v12793_v13 }
  0x6f   : > { %v17556_v16 = vld [vmem:[%s19447_s22 + $0x39c] sm:$0xf0] }
  0x70   : > { %v12249_v18 = vor.u32 %v17556_v16, %v12248_v15  ;;  %v12504_v19 = vld [vmem:[%s19447_s22 + $0x580] sm:$0xf]  ;;  %5841 = vmatpush.bf16.msra.mxu0 %v11993_v17 }
  0x71   : > { %v17620_v20 = vld [vmem:[%s19447_s22 + $0x59c] sm:$0xf0] }
  0x72   : > { %v12760_v21 = vld [vmem:[%s19447_s22 + $0x780] sm:$0xf]  ;;  %v12505_v22 = vor.u32 %v17620_v20, %v12504_v19  ;;  %5854 = vmatpush.bf16.msra.mxu1 %v12249_v18 }
  0x73   : > { %v17684_v23 = vld [vmem:[%s19447_s22 + $0x79c] sm:$0xf0] }
  0x74   : > { %v11960_v24 = vld [vmem:[%s19447_s22 + $0x140] sm:$0xf]  ;;  %v12761_v26 = vor.u32 %v17684_v23, %v12760_v21  ;;  %5867 = vmatpush.bf16.msra.mxu2 %v12505_v22 }
  0x75   : > { %v17484_v25 = vld [vmem:[%s19447_s22 + $0x15c] sm:$0xf0] }
  0x76   : > { %v12216_v27 = vld [vmem:[%s19447_s22 + $0x340] sm:$0xf]  ;;  %v11961_v30 = vor.u32 %v17484_v25, %v11960_v24  ;;  %5880 = vmatpush.bf16.msra.mxu3 %v12761_v26 }
  0x77   : > { %v17548_v28 = vld [vmem:[%s19447_s22 + $0x35c] sm:$0xf0] }
  0x78   : > { %v12472_v29 = vld [vmem:[%s19447_s22 + $0x540] sm:$0xf]  ;;  %v12217_v34 = vor.u32 %v17548_v28, %v12216_v27  ;;  %5842 = vmatpush.bf16.msra.mxu0 %v11961_v30 }
  0x79   : > { %v17612_v31 = vld [vmem:[%s19447_s22 + $0x55c] sm:$0xf0] }
  0x7a   : > { %v12728_v32 = vld [vmem:[%s19447_s22 + $0x740] sm:$0xf]  ;;  %v12473_v35 = vor.u32 %v17612_v31, %v12472_v29  ;;  %5855 = vmatpush.bf16.msra.mxu1 %v12217_v34 }
  0x7b   : > { %v17676_v33 = vld [vmem:[%s19447_s22 + $0x75c] sm:$0xf0] }
  0x7c   : > { %v11928_v36 = vld [vmem:[%s19447_s22 + $0x100] sm:$0xf]  ;;  %v12729_v39 = vor.u32 %v17676_v33, %v12728_v32  ;;  %5868 = vmatpush.bf16.msra.mxu2 %v12473_v35 }
  0x7d   : > { %v17476_v37 = vld [vmem:[%s19447_s22 + $0x11c] sm:$0xf0] }
  0x7e   : > { %v12184_v38 = vld [vmem:[%s19447_s22 + $0x300] sm:$0xf]  ;;  %v11929_v45 = vor.u32 %v17476_v37, %v11928_v36  ;;  %5881 = vmatpush.bf16.msra.mxu3 %v12729_v39 }
  0x7f   : > { %v17540_v40 = vld [vmem:[%s19447_s22 + $0x31c] sm:$0xf0] }
  0x80   : > { %v12440_v41 = vld [vmem:[%s19447_s22 + $0x500] sm:$0xf]  ;;  %v12185_v46 = vor.u32 %v17540_v40, %v12184_v38  ;;  %5843 = vmatpush.bf16.msra.mxu0 %v11929_v45 }
  0x81   : > { %v17604_v42 = vld [vmem:[%s19447_s22 + $0x51c] sm:$0xf0] }
  0x82   : > { %v12696_v43 = vld [vmem:[%s19447_s22 + $0x700] sm:$0xf]  ;;  %v12441_v47 = vor.u32 %v17604_v42, %v12440_v41  ;;  %5856 = vmatpush.bf16.msra.mxu1 %v12185_v46 }
  0x83   : > { %v17668_v44 = vld [vmem:[%s19447_s22 + $0x71c] sm:$0xf0] }
  0x84   : > { %v11896_v48 = vld [vmem:[%s19447_s22 + $0xc0] sm:$0xf]  ;;  %v12697_v51 = vor.u32 %v17668_v44, %v12696_v43  ;;  %5869 = vmatpush.bf16.msra.mxu2 %v12441_v47 }
  0x85   : > { %v17468_v49 = vld [vmem:[%s19447_s22 + $0xdc] sm:$0xf0] }
  0x86   : > { %v12152_v50 = vld [vmem:[%s19447_s22 + $0x2c0] sm:$0xf]  ;;  %v11897_v57 = vor.u32 %v17468_v49, %v11896_v48  ;;  %5882 = vmatpush.bf16.msra.mxu3 %v12697_v51 }
  0x87   : > { %v17532_v52 = vld [vmem:[%s19447_s22 + $0x2dc] sm:$0xf0] }
  0x88   : > { %v12408_v53 = vld [vmem:[%s19447_s22 + $0x4c0] sm:$0xf]  ;;  %v12153_v58 = vor.u32 %v17532_v52, %v12152_v50  ;;  %5844 = vmatpush.bf16.msra.mxu0 %v11897_v57 }
  0x89   : > { %v17596_v54 = vld [vmem:[%s19447_s22 + $0x4dc] sm:$0xf0] }
  0x8a   : > { %v12664_v55 = vld [vmem:[%s19447_s22 + $0x6c0] sm:$0xf]  ;;  %v12409_v59 = vor.u32 %v17596_v54, %v12408_v53  ;;  %5857 = vmatpush.bf16.msra.mxu1 %v12153_v58 }
  0x8b   : > { %v17660_v56 = vld [vmem:[%s19447_s22 + $0x6dc] sm:$0xf0] }
  0x8c   : > { %v11864_v60 = vld [vmem:[%s19447_s22 + $0x80] sm:$0xf]  ;;  %v12665_v63 = vor.u32 %v17660_v56, %v12664_v55  ;;  %5870 = vmatpush.bf16.msra.mxu2 %v12409_v59 }
  0x8d   : > { %v17460_v61 = vld [vmem:[%s19447_s22 + $0x9c] sm:$0xf0] }
  0x8e   : > { %v12120_v62 = vld [vmem:[%s19447_s22 + $0x280] sm:$0xf]  ;;  %v11865_v5 = vor.u32 %v17460_v61, %v11864_v60  ;;  %5883 = vmatpush.bf16.msra.mxu3 %v12665_v63 }
  0x8f   : > { %v17524_v0 = vld [vmem:[%s19447_s22 + $0x29c] sm:$0xf0] }
  0x90   : > { %v12376_v1 = vld [vmem:[%s19447_s22 + $0x480] sm:$0xf]  ;;  %v12121_v6 = vor.u32 %v17524_v0, %v12120_v62  ;;  %5845 = vmatpush.bf16.msra.mxu0 %v11865_v5 }
  0x91   : > { %v17588_v2 = vld [vmem:[%s19447_s22 + $0x49c] sm:$0xf0] }
  0x92   : > { %v12632_v3 = vld [vmem:[%s19447_s22 + $0x680] sm:$0xf]  ;;  %v12377_v7 = vor.u32 %v17588_v2, %v12376_v1  ;;  %5858 = vmatpush.bf16.msra.mxu1 %v12121_v6 }
  0x93   : > { %v17652_v4 = vld [vmem:[%s19447_s22 + $0x69c] sm:$0xf0] }
  0x94   : > { %v11832_v8 = vld [vmem:[%s19447_s22 + $0x40] sm:$0xf]  ;;  %v12633_v11 = vor.u32 %v17652_v4, %v12632_v3  ;;  %5871 = vmatpush.bf16.msra.mxu2 %v12377_v7 }
  0x95   : > { %v17452_v9 = vld [vmem:[%s19447_s22 + $0x5c] sm:$0xf0] }
  0x96   : > { %v12088_v10 = vld [vmem:[%s19447_s22 + $0x240] sm:$0xf]  ;;  %v11833_v17 = vor.u32 %v17452_v9, %v11832_v8  ;;  %5884 = vmatpush.bf16.msra.mxu3 %v12633_v11  ;;  %v439_v11 = vld [vmem:[%s19440_s10 + $0x18] sm:$0xff] }
  0x97   : > { %v17516_v12 = vld [vmem:[%s19447_s22 + $0x25c] sm:$0xf0] }
  0x98   : > { %v12344_v13 = vld [vmem:[%s19447_s22 + $0x440] sm:$0xf]  ;;  %v12089_v20 = vor.u32 %v17516_v12, %v12088_v10  ;;  %5846 = vmatpush.bf16.msra.mxu0 %v11833_v17  ;;  %v437_v12 = vld [vmem:[%s19440_s10 + $0x8] sm:$0xff]  ;;  %v19570_v17 = vpack.c.bf16 %v439_v11, %v439_v11 }
  0x99   : > { %v17580_v14 = vld [vmem:[%s19447_s22 + $0x45c] sm:$0xf0] }
  0x9a   : > { %v12600_v15 = vld [vmem:[%s19447_s22 + $0x640] sm:$0xf]  ;;  %v12345_v21 = vor.u32 %v17580_v14, %v12344_v13  ;;  %5859 = vmatpush.bf16.msra.mxu1 %v12089_v20 }
  0x9b   : > { %v17644_v16 = vld [vmem:[%s19447_s22 + $0x65c] sm:$0xf0] }
  0x9c   : > { %v11800_v18 = vld [vmem:[%s19447_s22] sm:$0xf]  ;;  %v12601_v25 = vor.u32 %v17644_v16, %v12600_v15  ;;  %5872 = vmatpush.bf16.msra.mxu2 %v12345_v21 }
  0x9d   : > { %v17444_v19 = vld [vmem:[%s19447_s22 + $0x1c] sm:$0xf0] }
  0x9e   : > { %v12056_v22 = vld [vmem:[%s19447_s22 + $0x200] sm:$0xf]  ;;  %v11801_v32 = vor.u32 %v17444_v19, %v11800_v18  ;;  %5885 = vmatpush.bf16.msra.mxu3 %v12601_v25  ;;  %v19572_v18 = vpack.c.bf16 %v437_v12, %v437_v12 }
  0x9f   : > { %v17508_v23 = vld [vmem:[%s19447_s22 + $0x21c] sm:$0xf0] }
  0xa0   : > { %v12312_v24 = vld [vmem:[%s19447_s22 + $0x400] sm:$0xf]  ;;  %v12057_v36 = vor.u32 %v17508_v23, %v12056_v22  ;;  %5847 = vmatpush.bf16.msra.mxu0 %v11801_v32 }
  0xa1   : > { %v17572_v26 = vld [vmem:[%s19447_s22 + $0x41c] sm:$0xf0] }
  0xa2   : > { %v12568_v27 = vld [vmem:[%s19447_s22 + $0x600] sm:$0xf]  ;;  %v12313_v37 = vor.u32 %v17572_v26, %v12312_v24  ;;  %5860 = vmatpush.bf16.msra.mxu1 %v12057_v36 }
  0xa3   : > { %v17636_v28 = vld [vmem:[%s19447_s22 + $0x61c] sm:$0xf0] }
  0xa4   : > { %v13048_v29 = vld [vmem:[%s19447_s22 + $0x9c0] sm:$0xf]  ;;  %v12569_v40 = vor.u32 %v17636_v28, %v12568_v27  ;;  %5873 = vmatpush.bf16.msra.mxu2 %v12313_v37 }
  0xa5   : > { %v17756_v30 = vld [vmem:[%s19447_s22 + $0x9dc] sm:$0xf0]  ;;  %5861 = vmatmul.bf16.vlgmr.msra.gmra.mxu1 %v19572_v18 }
  0xa6   : > { %v13304_v31 = vld [vmem:[%s19447_s22 + $0xbc0] sm:$0xf]  ;;  %v13049_v41 = vor.u32 %v17756_v30, %v13048_v29  ;;  %5886 = vmatpush.bf16.msra.mxu3 %v12569_v40 }
  0xa7   : > { %v17820_v33 = vld [vmem:[%s19447_s22 + $0xbdc] sm:$0xf0] }
  0xa8   : > { %v13560_v34 = vld [vmem:[%s19447_s22 + $0xdc0] sm:$0xf]  ;;  %v13305_v42 = vor.u32 %v17820_v33, %v13304_v31  ;;  %5892 = vmatpush.bf16.msrb.mxu0 %v13049_v41 }
  0xa9   : > { %v17884_v35 = vld [vmem:[%s19447_s22 + $0xddc] sm:$0xf0]  ;;  %5887 = vmatmul.bf16.vlgmr.msra.gmra.mxu3 %v19570_v17 }
  0xaa   : > { %v13816_v38 = vld [vmem:[%s19447_s22 + $0xfc0] sm:$0xf]  ;;  %v13561_v43 = vor.u32 %v17884_v35, %v13560_v34  ;;  %5905 = vmatpush.bf16.msrb.mxu1 %v13305_v42 }
  0xab   : > { %v17948_v39 = vld [vmem:[%s19447_s22 + $0xfdc] sm:$0xf0] }
  0xac   : > { %v13016_v44 = vld [vmem:[%s19447_s22 + $0x980] sm:$0xf]  ;;  %v13817_v47 = vor.u32 %v17948_v39, %v13816_v38  ;;  %5918 = vmatpush.bf16.msrb.mxu2 %v13561_v43 }
  0xad   : > { %v17748_v45 = vld [vmem:[%s19447_s22 + $0x99c] sm:$0xf0] }
  0xae   : > { %v13272_v46 = vld [vmem:[%s19447_s22 + $0xb80] sm:$0xf]  ;;  %v13017_v53 = vor.u32 %v17748_v45, %v13016_v44  ;;  %5931 = vmatpush.bf16.msrb.mxu3 %v13817_v47 }
  0xaf   : > { %v17812_v48 = vld [vmem:[%s19447_s22 + $0xb9c] sm:$0xf0] }
  0xb0   : > { %v13528_v49 = vld [vmem:[%s19447_s22 + $0xd80] sm:$0xf]  ;;  %v13273_v55 = vor.u32 %v17812_v48, %v13272_v46  ;;  %5893 = vmatpush.bf16.msrb.mxu0 %v13017_v53 }
  0xb1   : > { %v17876_v50 = vld [vmem:[%s19447_s22 + $0xd9c] sm:$0xf0] }
  0xb2   : > { %v13784_v51 = vld [vmem:[%s19447_s22 + $0xf80] sm:$0xf]  ;;  %v13529_v56 = vor.u32 %v17876_v50, %v13528_v49  ;;  %5906 = vmatpush.bf16.msrb.mxu1 %v13273_v55 }
  0xb3   : > { %v17940_v52 = vld [vmem:[%s19447_s22 + $0xf9c] sm:$0xf0] }
  0xb4   : > { %v12984_v54 = vld [vmem:[%s19447_s22 + $0x940] sm:$0xf]  ;;  %v13785_v60 = vor.u32 %v17940_v52, %v13784_v51  ;;  %5919 = vmatpush.bf16.msrb.mxu2 %v13529_v56 }
  0xb5   : > { %v17740_v57 = vld [vmem:[%s19447_s22 + $0x95c] sm:$0xf0] }
  0xb6   : > { %v13240_v58 = vld [vmem:[%s19447_s22 + $0xb40] sm:$0xf]  ;;  %v12985_v3 = vor.u32 %v17740_v57, %v12984_v54  ;;  %5932 = vmatpush.bf16.msrb.mxu3 %v13785_v60 }
  0xb7   : > { %v438_v59 = vld [vmem:[%s19440_s10 + $0x10] sm:$0xff]  ;;  %v436_v6 = vld [vmem:[%s19440_s10] sm:$0xff] }
  0xb8   : > { %v17804_v61 = vld [vmem:[%s19447_s22 + $0xb5c] sm:$0xf0]  ;;  %v19554_v0 = vpack.c.bf16 %v438_v59, %v438_v59  ;;  %v19563_v10 = vpack.c.bf16 %v436_v6, %v436_v6  ;;  %5894 = vmatpush.bf16.msrb.mxu0 %v12985_v3 }
  0xb9   : > { %v13496_v62 = vld [vmem:[%s19447_s22 + $0xd40] sm:$0xf]  ;;  %v13241_v7 = vor.u32 %v17804_v61, %v13240_v58 }
  0xba   : > { %v17868_v63 = vld [vmem:[%s19447_s22 + $0xd5c] sm:$0xf0]  ;;  %5874 = vmatmul.bf16.vlgmr.msra.gmra.mxu2 %v19554_v0  ;;  %5848 = vmatmul.bf16.vlgmr.msra.gmra.mxu0 %v19563_v10 }
  0xbb   : > { %v13752_v1 = vld [vmem:[%s19447_s22 + $0xf40] sm:$0xf]  ;;  %v13497_v8 = vor.u32 %v17868_v63, %v13496_v62  ;;  %5907 = vmatpush.bf16.msrb.mxu1 %v13241_v7 }
  0xbc   : > { %v17932_v2 = vld [vmem:[%s19447_s22 + $0xf5c] sm:$0xf0] }
  0xbd   : > { %v12952_v4 = vld [vmem:[%s19447_s22 + $0x900] sm:$0xf]  ;;  %v13753_v13 = vor.u32 %v17932_v2, %v13752_v1  ;;  %5920 = vmatpush.bf16.msrb.mxu2 %v13497_v8 }
  0xbe   : > { %v17732_v5 = vld [vmem:[%s19447_s22 + $0x91c] sm:$0xf0] }
  0xbf   : > { %v13208_v9 = vld [vmem:[%s19447_s22 + $0xb00] sm:$0xf]  ;;  %v12953_v21 = vor.u32 %v17732_v5, %v12952_v4  ;;  %5933 = vmatpush.bf16.msrb.mxu3 %v13753_v13 }
  0xc0   : > { %v17796_v14 = vld [vmem:[%s19447_s22 + $0xb1c] sm:$0xf0] }
  0xc1   : > { %v13464_v15 = vld [vmem:[%s19447_s22 + $0xd00] sm:$0xf]  ;;  %v13209_v22 = vor.u32 %v17796_v14, %v13208_v9  ;;  %5895 = vmatpush.bf16.msrb.mxu0 %v12953_v21 }
  0xc2   : > { %v17860_v16 = vld [vmem:[%s19447_s22 + $0xd1c] sm:$0xf0] }
  0xc3   : > { %v13720_v19 = vld [vmem:[%s19447_s22 + $0xf00] sm:$0xf]  ;;  %v13465_v23 = vor.u32 %v17860_v16, %v13464_v15  ;;  %5908 = vmatpush.bf16.msrb.mxu1 %v13209_v22 }
  0xc4   : > { %v17924_v20 = vld [vmem:[%s19447_s22 + $0xf1c] sm:$0xf0] }
  0xc5   : > { %v12920_v24 = vld [vmem:[%s19447_s22 + $0x8c0] sm:$0xf]  ;;  %v13721_v27 = vor.u32 %v17924_v20, %v13720_v19  ;;  %5921 = vmatpush.bf16.msrb.mxu2 %v13465_v23 }
  0xc6   : > { %v17724_v25 = vld [vmem:[%s19447_s22 + $0x8dc] sm:$0xf0] }
  0xc7   : > { %v13176_v26 = vld [vmem:[%s19447_s22 + $0xac0] sm:$0xf]  ;;  %v12921_v33 = vor.u32 %v17724_v25, %v12920_v24  ;;  %5934 = vmatpush.bf16.msrb.mxu3 %v13721_v27  ;;  %v443_v25 = vld [vmem:[%s19440_s10 + $0x38] sm:$0xff] }
  0xc8   : > { %v17788_v28 = vld [vmem:[%s19447_s22 + $0xadc] sm:$0xf0] }
  0xc9   : > { %v13432_v29 = vld [vmem:[%s19447_s22 + $0xcc0] sm:$0xf]  ;;  %v13177_v34 = vor.u32 %v17788_v28, %v13176_v26  ;;  %5896 = vmatpush.bf16.msrb.mxu0 %v12921_v33 }
  0xca   : > { %v17852_v30 = vld [vmem:[%s19447_s22 + $0xcdc] sm:$0xf0] }
  0xcb   : > { %v13688_v31 = vld [vmem:[%s19447_s22 + $0xec0] sm:$0xf]  ;;  %v13433_v35 = vor.u32 %v17852_v30, %v13432_v29  ;;  %5909 = vmatpush.bf16.msrb.mxu1 %v13177_v34  ;;  %v441_v30 = vld [vmem:[%s19440_s10 + $0x28] sm:$0xff] }
  0xcc   : > { %v17916_v32 = vld [vmem:[%s19447_s22 + $0xedc] sm:$0xf0] }
  0xcd   : > { %v12888_v36 = vld [vmem:[%s19447_s22 + $0x880] sm:$0xf]  ;;  %v13689_v39 = vor.u32 %v17916_v32, %v13688_v31  ;;  %5922 = vmatpush.bf16.msrb.mxu2 %v13433_v35 }
  0xce   : > { %v17716_v37 = vld [vmem:[%s19447_s22 + $0x89c] sm:$0xf0] }
  0xcf   : > { %v13144_v38 = vld [vmem:[%s19447_s22 + $0xa80] sm:$0xf]  ;;  %v12889_v45 = vor.u32 %v17716_v37, %v12888_v36  ;;  %5935 = vmatpush.bf16.msrb.mxu3 %v13689_v39  ;;  %v19635_v39 = vpack.c.bf16 %v443_v25, %v443_v25 }
  0xd0   : > { %v17780_v40 = vld [vmem:[%s19447_s22 + $0xa9c] sm:$0xf0] }
  0xd1   : > { %v13400_v41 = vld [vmem:[%s19447_s22 + $0xc80] sm:$0xf]  ;;  %v13145_v46 = vor.u32 %v17780_v40, %v13144_v38  ;;  %5897 = vmatpush.bf16.msrb.mxu0 %v12889_v45 }
  0xd2   : > { %v17844_v42 = vld [vmem:[%s19447_s22 + $0xc9c] sm:$0xf0] }
  0xd3   : > { %v13656_v43 = vld [vmem:[%s19447_s22 + $0xe80] sm:$0xf]  ;;  %v13401_v47 = vor.u32 %v17844_v42, %v13400_v41  ;;  %5910 = vmatpush.bf16.msrb.mxu1 %v13145_v46  ;;  %v19637_v41 = vpack.c.bf16 %v441_v30, %v441_v30 }
  0xd4   : > { %v17908_v44 = vld [vmem:[%s19447_s22 + $0xe9c] sm:$0xf0] }
  0xd5   : > { %v12856_v48 = vld [vmem:[%s19447_s22 + $0x840] sm:$0xf]  ;;  %v13657_v51 = vor.u32 %v17908_v44, %v13656_v43  ;;  %5923 = vmatpush.bf16.msrb.mxu2 %v13401_v47 }
  0xd6   : > { %v17708_v49 = vld [vmem:[%s19447_s22 + $0x85c] sm:$0xf0] }
  0xd7   : > { %v13112_v50 = vld [vmem:[%s19447_s22 + $0xa40] sm:$0xf]  ;;  %v12857_v57 = vor.u32 %v17708_v49, %v12856_v48  ;;  %5936 = vmatpush.bf16.msrb.mxu3 %v13657_v51 }
  0xd8   : > { %v17772_v52 = vld [vmem:[%s19447_s22 + $0xa5c] sm:$0xf0] }
  0xd9   : > { %v13368_v53 = vld [vmem:[%s19447_s22 + $0xc40] sm:$0xf]  ;;  %v13113_v60 = vor.u32 %v17772_v52, %v13112_v50  ;;  %5898 = vmatpush.bf16.msrb.mxu0 %v12857_v57 }
  0xda   : > { %v17836_v54 = vld [vmem:[%s19447_s22 + $0xc5c] sm:$0xf0] }
  0xdb   : > { %v13624_v55 = vld [vmem:[%s19447_s22 + $0xe40] sm:$0xf]  ;;  %v13369_v61 = vor.u32 %v17836_v54, %v13368_v53  ;;  %5911 = vmatpush.bf16.msrb.mxu1 %v13113_v60 }
  0xdc   : > { %v17900_v56 = vld [vmem:[%s19447_s22 + $0xe5c] sm:$0xf0] }
  0xdd   : > { %v12824_v58 = vld [vmem:[%s19447_s22 + $0x800] sm:$0xf]  ;;  %v13625_v2 = vor.u32 %v17900_v56, %v13624_v55  ;;  %5924 = vmatpush.bf16.msrb.mxu2 %v13369_v61 }
  0xde   : > { %v17700_v59 = vld [vmem:[%s19447_s22 + $0x81c] sm:$0xf0] }
  0xdf   : > { %v13080_v62 = vld [vmem:[%s19447_s22 + $0xa00] sm:$0xf]  ;;  %v12825_v9 = vor.u32 %v17700_v59, %v12824_v58  ;;  %5937 = vmatpush.bf16.msrb.mxu3 %v13625_v2 }
  0xe0   : > { %v17764_v63 = vld [vmem:[%s19447_s22 + $0xa1c] sm:$0xf0] }
  0xe1   : > { %v13336_v1 = vld [vmem:[%s19447_s22 + $0xc00] sm:$0xf]  ;;  %v13081_v14 = vor.u32 %v17764_v63, %v13080_v62  ;;  %5899 = vmatpush.bf16.msrb.mxu0 %v12825_v9 }
  0xe2   : > { %v17828_v3 = vld [vmem:[%s19447_s22 + $0xc1c] sm:$0xf0] }
  0xe3   : > { %v13592_v4 = vld [vmem:[%s19447_s22 + $0xe00] sm:$0xf]  ;;  %v13337_v15 = vor.u32 %v17828_v3, %v13336_v1  ;;  %5912 = vmatpush.bf16.msrb.mxu1 %v13081_v14 }
  0xe4   : > { %v17892_v5 = vld [vmem:[%s19447_s22 + $0xe1c] sm:$0xf0] }
  0xe5   : > { %v14072_v6 = vld [vmem:[%s19447_s22 + $0x11c0] sm:$0xf]  ;;  %v13593_v21 = vor.u32 %v17892_v5, %v13592_v4  ;;  %5925 = vmatpush.bf16.msrb.mxu2 %v13337_v15 }
  0xe6   : > { %v18012_v7 = vld [vmem:[%s19447_s22 + $0x11dc] sm:$0xf0]  ;;  %5913 = vmatmul.bf16.vlgmr.msrb.gmra.mxu1 %v19637_v41 }
  0xe7   : > { %v14328_v8 = vld [vmem:[%s19447_s22 + $0x13c0] sm:$0xf]  ;;  %v14073_v22 = vor.u32 %v18012_v7, %v14072_v6  ;;  %5938 = vmatpush.bf16.msrb.mxu3 %v13593_v21 }
  0xe8   : > { %v18076_v11 = vld [vmem:[%s19447_s22 + $0x13dc] sm:$0xf0] }
  0xe9   : > { %v14584_v12 = vld [vmem:[%s19447_s22 + $0x15c0] sm:$0xf]  ;;  %v14329_v26 = vor.u32 %v18076_v11, %v14328_v8  ;;  %5944 = vmatpush.bf16.msra.mxu0 %v14073_v22 }
  0xea   : > { %v18140_v13 = vld [vmem:[%s19447_s22 + $0x15dc] sm:$0xf0]  ;;  %5939 = vmatmul.bf16.vlgmr.msrb.gmra.mxu3 %v19635_v39 }
  0xeb   : > { %v14840_v16 = vld [vmem:[%s19447_s22 + $0x17c0] sm:$0xf]  ;;  %v14585_v27 = vor.u32 %v18140_v13, %v14584_v12  ;;  %5957 = vmatpush.bf16.msra.mxu1 %v14329_v26 }
  0xec   : > { %v18204_v19 = vld [vmem:[%s19447_s22 + $0x17dc] sm:$0xf0] }
  0xed   : > { %v442_v20 = vld [vmem:[%s19440_s10 + $0x30] sm:$0xff]  ;;  %v440_v24 = vld [vmem:[%s19440_s10 + $0x20] sm:$0xff]  ;;  %v14841_v31 = vor.u32 %v18204_v19, %v14840_v16  ;;  %5970 = vmatpush.bf16.msra.mxu2 %v14585_v27 }
  0xee   : > { %v14040_v23 = vld [vmem:[%s19447_s22 + $0x1180] sm:$0xf]  ;;  %v19629_v35 = vpack.c.bf16 %v442_v20, %v442_v20  ;;  %v19633_v38 = vpack.c.bf16 %v440_v24, %v440_v24 }
  0xef   : > { %v18004_v28 = vld [vmem:[%s19447_s22 + $0x119c] sm:$0xf0]  ;;  %5983 = vmatpush.bf16.msra.mxu3 %v14841_v31 }
  0xf0   : > { %v14296_v29 = vld [vmem:[%s19447_s22 + $0x1380] sm:$0xf]  ;;  %v14041_v40 = vor.u32 %v18004_v28, %v14040_v23  ;;  %5926 = vmatmul.bf16.vlgmr.msrb.gmra.mxu2 %v19629_v35  ;;  %5900 = vmatmul.bf16.vlgmr.msrb.gmra.mxu0 %v19633_v38 }
  0xf1   : > { %v18068_v32 = vld [vmem:[%s19447_s22 + $0x139c] sm:$0xf0] }
  0xf2   : > { %v14552_v33 = vld [vmem:[%s19447_s22 + $0x1580] sm:$0xf]  ;;  %v14297_v42 = vor.u32 %v18068_v32, %v14296_v29  ;;  %5945 = vmatpush.bf16.msra.mxu0 %v14041_v40 }
  0xf3   : > { %v18132_v34 = vld [vmem:[%s19447_s22 + $0x159c] sm:$0xf0] }
  0xf4   : > { %v14808_v36 = vld [vmem:[%s19447_s22 + $0x1780] sm:$0xf]  ;;  %v14553_v43 = vor.u32 %v18132_v34, %v14552_v33  ;;  %5958 = vmatpush.bf16.msra.mxu1 %v14297_v42 }
  0xf5   : > { %v18196_v37 = vld [vmem:[%s19447_s22 + $0x179c] sm:$0xf0] }
  0xf6   : > { %v14008_v44 = vld [vmem:[%s19447_s22 + $0x1140] sm:$0xf]  ;;  %v14809_v47 = vor.u32 %v18196_v37, %v14808_v36  ;;  %5971 = vmatpush.bf16.msra.mxu2 %v14553_v43 }
  0xf7   : > { %v17996_v45 = vld [vmem:[%s19447_s22 + $0x115c] sm:$0xf0] }
  0xf8   : > { %v14264_v46 = vld [vmem:[%s19447_s22 + $0x1340] sm:$0xf]  ;;  %v14009_v53 = vor.u32 %v17996_v45, %v14008_v44  ;;  %5984 = vmatpush.bf16.msra.mxu3 %v14809_v47 }
  0xf9   : > { %v18060_v48 = vld [vmem:[%s19447_s22 + $0x135c] sm:$0xf0] }
  0xfa   : > { %v14520_v49 = vld [vmem:[%s19447_s22 + $0x1540] sm:$0xf]  ;;  %v14265_v54 = vor.u32 %v18060_v48, %v14264_v46  ;;  %5946 = vmatpush.bf16.msra.mxu0 %v14009_v53 }
  0xfb   : > { %v18124_v50 = vld [vmem:[%s19447_s22 + $0x155c] sm:$0xf0] }
  0xfc   : > { %v14776_v51 = vld [vmem:[%s19447_s22 + $0x1740] sm:$0xf]  ;;  %v14521_v55 = vor.u32 %v18124_v50, %v14520_v49  ;;  %5959 = vmatpush.bf16.msra.mxu1 %v14265_v54 }
  0xfd   : > { %v18188_v52 = vld [vmem:[%s19447_s22 + $0x175c] sm:$0xf0] }
  0xfe   : > { %v13976_v56 = vld [vmem:[%s19447_s22 + $0x1100] sm:$0xf]  ;;  %v14777_v59 = vor.u32 %v18188_v52, %v14776_v51  ;;  %5972 = vmatpush.bf16.msra.mxu2 %v14521_v55 }
  0xff   : > { %v17988_v57 = vld [vmem:[%s19447_s22 + $0x111c] sm:$0xf0] }
 0x100   : > { %v14232_v58 = vld [vmem:[%s19447_s22 + $0x1300] sm:$0xf]  ;;  %v13977_v2 = vor.u32 %v17988_v57, %v13976_v56  ;;  %5985 = vmatpush.bf16.msra.mxu3 %v14777_v59 }
 0x101   : > { %v18052_v60 = vld [vmem:[%s19447_s22 + $0x131c] sm:$0xf0] }
 0x102   : > { %v14488_v61 = vld [vmem:[%s19447_s22 + $0x1500] sm:$0xf]  ;;  %v14233_v3 = vor.u32 %v18052_v60, %v14232_v58  ;;  %5947 = vmatpush.bf16.msra.mxu0 %v13977_v2 }
 0x103   : > { %v18116_v62 = vld [vmem:[%s19447_s22 + $0x151c] sm:$0xf0] }
 0x104   : > { %v14744_v63 = vld [vmem:[%s19447_s22 + $0x1700] sm:$0xf]  ;;  %v14489_v4 = vor.u32 %v18116_v62, %v14488_v61  ;;  %5960 = vmatpush.bf16.msra.mxu1 %v14233_v3  ;;  %v17496_v62 = vld [vmem:[%s19447_s22 + $0x1c4] sm:$0xf] }
 0x105   : > { %v18180_v1 = vld [vmem:[%s19447_s22 + $0x171c] sm:$0xf0]  ;;  %v17560_v3 = vld [vmem:[%s19447_s22 + $0x3c4] sm:$0xf] }
 0x106   : > { %v13944_v5 = vld [vmem:[%s19447_s22 + $0x10c0] sm:$0xf]  ;;  %v14745_v8 = vor.u32 %v18180_v1, %v14744_v63  ;;  %5973 = vmatpush.bf16.msra.mxu2 %v14489_v4  ;;  %v12026_v63 = vld [vmem:[%s19447_s22 + $0x1e0] sm:$0xf0] }
 0x107   : > { %v17980_v6 = vld [vmem:[%s19447_s22 + $0x10dc] sm:$0xf0]  ;;  %v12282_v4 = vld [vmem:[%s19447_s22 + $0x3e0] sm:$0xf0] }
 0x108   : > { %v14200_v7 = vld [vmem:[%s19447_s22 + $0x12c0] sm:$0xf]  ;;  %v13945_v15 = vor.u32 %v17980_v6, %v13944_v5  ;;  %5986 = vmatpush.bf16.msra.mxu3 %v14745_v8 }
 0x109   : > { %v18044_v9 = vld [vmem:[%s19447_s22 + $0x12dc] sm:$0xf0] }
 0x10a   : > { %v14456_v11 = vld [vmem:[%s19447_s22 + $0x14c0] sm:$0xf]  ;;  %v14201_v16 = vor.u32 %v18044_v9, %v14200_v7  ;;  %5948 = vmatpush.bf16.msra.mxu0 %v13945_v15  ;;  %v445_v9 = vld [vmem:[%s19440_s10 + $0x48] sm:$0xff] }
 0x10b   : > { %v18108_v12 = vld [vmem:[%s19447_s22 + $0x14dc] sm:$0xf0] }
 0x10c   : > { %v14712_v13 = vld [vmem:[%s19447_s22 + $0x16c0] sm:$0xf]  ;;  %v14457_v19 = vor.u32 %v18108_v12, %v14456_v11  ;;  %5961 = vmatpush.bf16.msra.mxu1 %v14201_v16  ;;  %v447_v11 = vld [vmem:[%s19440_s10 + $0x58] sm:$0xff] }
 0x10d   : > { %v18172_v14 = vld [vmem:[%s19447_s22 + $0x16dc] sm:$0xf0] }
 0x10e   : > { %v13912_v20 = vld [vmem:[%s19447_s22 + $0x1080] sm:$0xf]  ;;  %v14713_v23 = vor.u32 %v18172_v14, %v14712_v13  ;;  %5974 = vmatpush.bf16.msra.mxu2 %v14457_v19  ;;  %v12029_v13 = vor.u32 %v17496_v62, %v12026_v63  ;;  %v12285_v19 = vor.u32 %v17560_v3, %v12282_v4  ;;  %v11898_v3 = vld [vmem:[%s19447_s22 + $0xe0] sm:$0xf0] }
 0x10f   : > { %v17972_v21 = vld [vmem:[%s19447_s22 + $0x109c] sm:$0xf0]  ;;  %v17528_v4 = vld [vmem:[%s19447_s22 + $0x2c4] sm:$0xf] }
 0x110   : > { %v14168_v22 = vld [vmem:[%s19447_s22 + $0x1280] sm:$0xf]  ;;  %v13913_v29 = vor.u32 %v17972_v21, %v13912_v20  ;;  %5987 = vmatpush.bf16.msra.mxu3 %v14713_v23  ;;  %v11994_v23 = vld [vmem:[%s19447_s22 + $0x1a0] sm:$0xf0] }
 0x111   : > { %v18036_v24 = vld [vmem:[%s19447_s22 + $0x129c] sm:$0xf0] }
 0x112   : > { %v14424_v25 = vld [vmem:[%s19447_s22 + $0x1480] sm:$0xf]  ;;  %v14169_v30 = vor.u32 %v18036_v24, %v14168_v22  ;;  %5949 = vmatpush.bf16.msra.mxu0 %v13913_v29  ;;  %v17488_v22 = vld [vmem:[%s19447_s22 + $0x184] sm:$0xf] }
 0x113   : > { %v18100_v26 = vld [vmem:[%s19447_s22 + $0x149c] sm:$0xf0] }
 0x114   : > { %v14680_v27 = vld [vmem:[%s19447_s22 + $0x1680] sm:$0xf]  ;;  %v14425_v31 = vor.u32 %v18100_v26, %v14424_v25  ;;  %5962 = vmatpush.bf16.msra.mxu1 %v14169_v30  ;;  %v19713_v25 = vpack.c.bf16 %v445_v9, %v445_v9  ;;  %v17552_v26 = vld [vmem:[%s19447_s22 + $0x384] sm:$0xf] }
 0x115   : > { %v18164_v28 = vld [vmem:[%s19447_s22 + $0x169c] sm:$0xf0] }
 0x116   : > { %v13880_v32 = vld [vmem:[%s19447_s22 + $0x1040] sm:$0xf]  ;;  %v14681_v36 = vor.u32 %v18164_v28, %v14680_v27  ;;  %5975 = vmatpush.bf16.msra.mxu2 %v14425_v31  ;;  %v12250_v27 = vld [vmem:[%s19447_s22 + $0x3a0] sm:$0xf0]  ;;  %v19717_v28 = vpack.c.bf16 %v447_v11, %v447_v11  ;;  %v11997_v31 = vor.u32 %v17488_v22, %v11994_v23 }
 0x117   : > { %v17964_v33 = vld [vmem:[%s19447_s22 + $0x105c] sm:$0xf0] }
 0x118   : > { %v14136_v34 = vld [vmem:[%s19447_s22 + $0x1240] sm:$0xf]  ;;  %v13881_v45 = vor.u32 %v17964_v33, %v13880_v32  ;;  %5988 = vmatpush.bf16.msra.mxu3 %v14681_v36  ;;  %v12253_v36 = vor.u32 %v17552_v26, %v12250_v27 }
 0x119   : > { %v18028_v37 = vld [vmem:[%s19447_s22 + $0x125c] sm:$0xf0] }
 0x11a   : > { %v14392_v40 = vld [vmem:[%s19447_s22 + $0x1440] sm:$0xf]  ;;  %v14137_v48 = vor.u32 %v18028_v37, %v14136_v34  ;;  %5950 = vmatpush.bf16.msra.mxu0 %v13881_v45 }
 0x11b   : > { %v18092_v42 = vld [vmem:[%s19447_s22 + $0x145c] sm:$0xf0] }
 0x11c   : > { %v14648_v43 = vld [vmem:[%s19447_s22 + $0x1640] sm:$0xf]  ;;  %v14393_v49 = vor.u32 %v18092_v42, %v14392_v40  ;;  %5963 = vmatpush.bf16.msra.mxu1 %v14137_v48  ;;  %v17480_v40 = vld [vmem:[%s19447_s22 + $0x144] sm:$0xf] }
 0x11d   : > { %v18156_v44 = vld [vmem:[%s19447_s22 + $0x165c] sm:$0xf0]  ;;  %v11962_v42 = vld [vmem:[%s19447_s22 + $0x160] sm:$0xf0] }
 0x11e   : > { %v13848_v46 = vld [vmem:[%s19447_s22 + $0x1000] sm:$0xf]  ;;  %v14649_v53 = vor.u32 %v18156_v44, %v14648_v43  ;;  %5976 = vmatpush.bf16.msra.mxu2 %v14393_v49  ;;  %v17544_v43 = vld [vmem:[%s19447_s22 + $0x344] sm:$0xf] }
 0x11f   : > { %v17956_v47 = vld [vmem:[%s19447_s22 + $0x101c] sm:$0xf0]  ;;  %v12218_v44 = vld [vmem:[%s19447_s22 + $0x360] sm:$0xf0] }
 0x120   : > { %v14104_v50 = vld [vmem:[%s19447_s22 + $0x1200] sm:$0xf]  ;;  %v13849_v60 = vor.u32 %v17956_v47, %v13848_v46  ;;  %5989 = vmatpush.bf16.msra.mxu3 %v14649_v53  ;;  %v11965_v47 = vor.u32 %v17480_v40, %v11962_v42  ;;  %v17472_v53 = vld [vmem:[%s19447_s22 + $0x104] sm:$0xf] }
 0x121   : > { %v18020_v51 = vld [vmem:[%s19447_s22 + $0x121c] sm:$0xf0] }
 0x122   : > { %v14360_v52 = vld [vmem:[%s19447_s22 + $0x1400] sm:$0xf]  ;;  %v14105_v1 = vor.u32 %v18020_v51, %v14104_v50  ;;  %5951 = vmatpush.bf16.msra.mxu0 %v13849_v60  ;;  %v12221_v51 = vor.u32 %v17544_v43, %v12218_v44 }
 0x123   : > { %v18084_v54 = vld [vmem:[%s19447_s22 + $0x141c] sm:$0xf0] }
 0x124   : > { %v14616_v55 = vld [vmem:[%s19447_s22 + $0x1600] sm:$0xf]  ;;  %v14361_v2 = vor.u32 %v18084_v54, %v14360_v52  ;;  %5964 = vmatpush.bf16.msra.mxu1 %v14105_v1  ;;  %v11930_v54 = vld [vmem:[%s19447_s22 + $0x120] sm:$0xf0] }
 0x125   : > { %v18148_v56 = vld [vmem:[%s19447_s22 + $0x161c] sm:$0xf0] }
 0x126   : > { %v15096_v57 = vld [vmem:[%s19447_s22 + $0x19c0] sm:$0xf]  ;;  %v14617_v6 = vor.u32 %v18148_v56, %v14616_v55  ;;  %5977 = vmatpush.bf16.msra.mxu2 %v14361_v2  ;;  %v17536_v55 = vld [vmem:[%s19447_s22 + $0x304] sm:$0xf] }
 0x127   : > { %v18268_v58 = vld [vmem:[%s19447_s22 + $0x19dc] sm:$0xf0]  ;;  %5965 = vmatmul.bf16.vlgmr.msra.gmra.mxu1 %v19713_v25  ;;  %v12186_v56 = vld [vmem:[%s19447_s22 + $0x320] sm:$0xf0] }
 0x128   : > { %v15352_v59 = vld [vmem:[%s19447_s22 + $0x1bc0] sm:$0xf]  ;;  %v15097_v7 = vor.u32 %v18268_v58, %v15096_v57  ;;  %5990 = vmatpush.bf16.msra.mxu3 %v14617_v6  ;;  %v12189_v63 = vor.u32 %v17536_v55, %v12186_v56  ;;  %v17464_v2 = vld [vmem:[%s19447_s22 + $0xc4] sm:$0xf] }
 0x129   : > { %v18332_v61 = vld [vmem:[%s19447_s22 + $0x1bdc] sm:$0xf0]  ;;  %v17688_v55 = vld [vmem:[%s19447_s22 + $0x7c4] sm:$0xf] }
 0x12a   : > { %v444_v5 = vld [vmem:[%s19440_s10 + $0x40] sm:$0xff]  ;;  %v446_v8 = vld [vmem:[%s19440_s10 + $0x50] sm:$0xff]  ;;  %v15353_v12 = vor.u32 %v18332_v61, %v15352_v59  ;;  %5996 = vmatpush.bf16.msrb.mxu0 %v15097_v7  ;;  %6022 = vmatpush.bf16.msrb.mxu2 %v12029_v13  ;;  %v11933_v59 = vor.u32 %v17472_v53, %v11930_v54 }
 0x12b   : > { %v15064_v14 = vld [vmem:[%s19447_s22 + $0x1980] sm:$0xf]  ;;  %v19706_v20 = vpack.c.bf16 %v444_v5, %v444_v5  ;;  %v19711_v24 = vpack.c.bf16 %v446_v8, %v446_v8  ;;  %5991 = vmatmul.bf16.vlgmr.msra.gmra.mxu3 %v19717_v28  ;;  %v12154_v5 = vld [vmem:[%s19447_s22 + $0x2e0] sm:$0xf0]  ;;  %v11901_v8 = vor.u32 %v17464_v2, %v11898_v3 }
 0x12c   : > { %v18260_v15 = vld [vmem:[%s19447_s22 + $0x199c] sm:$0xf0]  ;;  %6009 = vmatpush.bf16.msrb.mxu1 %v15353_v12  ;;  %6035 = vmatpush.bf16.msrb.mxu3 %v12285_v19  ;;  %v12157_v13 = vor.u32 %v17528_v4, %v12154_v5  ;;  %v17520_v19 = vld [vmem:[%s19447_s22 + $0x284] sm:$0xf]  ;;  %v449_v4 = vld [vmem:[%s19440_s10 + $0x68] sm:$0xff] }
 0x12d   : > { %v15320_v16 = vld [vmem:[%s19447_s22 + $0x1b80] sm:$0xf]  ;;  %v15065_v29 = vor.u32 %v18260_v15, %v15064_v14  ;;  %5952 = vmatmul.bf16.vlgmr.msra.gmra.mxu0 %v19706_v20  ;;  %5978 = vmatmul.bf16.vlgmr.msra.gmra.mxu2 %v19711_v24  ;;  %v17456_v15 = vld [vmem:[%s19447_s22 + $0x84] sm:$0xf] }
 0x12e   : > { %v18324_v21 = vld [vmem:[%s19447_s22 + $0x1b9c] sm:$0xf0]  ;;  %6023 = vmatpush.bf16.msrb.mxu2 %v11997_v31  ;;  %v17624_v53 = vld [vmem:[%s19447_s22 + $0x5c4] sm:$0xf] }
 0x12f   : > { %v15321_v30 = vor.u32 %v18324_v21, %v15320_v16  ;;  %v15032_v32 = vld [vmem:[%s19447_s22 + $0x1940] sm:$0xf]  ;;  %5997 = vmatpush.bf16.msrb.mxu0 %v15065_v29  ;;  %v11866_v16 = vld [vmem:[%s19447_s22 + $0xa0] sm:$0xf0] }
 0x130   : > { %v18252_v33 = vld [vmem:[%s19447_s22 + $0x195c] sm:$0xf0]  ;;  %6036 = vmatpush.bf16.msrb.mxu3 %v12253_v36  ;;  %v12122_v21 = vld [vmem:[%s19447_s22 + $0x2a0] sm:$0xf0]  ;;  %v11869_v26 = vor.u32 %v17456_v15, %v11866_v16  ;;  %v19789_v16 = vpack.c.bf16 %v449_v4, %v449_v4 }
 0x131   : > { %v15288_v34 = vld [vmem:[%s19447_s22 + $0x1b40] sm:$0xf]  ;;  %v15033_v45 = vor.u32 %v18252_v33, %v15032_v32  ;;  %6010 = vmatpush.bf16.msrb.mxu1 %v15321_v30  ;;  %v12125_v31 = vor.u32 %v17520_v19, %v12122_v21  ;;  %v17448_v33 = vld [vmem:[%s19447_s22 + $0x44] sm:$0xf] }
 0x132   : > { %v18316_v37 = vld [vmem:[%s19447_s22 + $0x1b5c] sm:$0xf0]  ;;  %6024 = vmatpush.bf16.msrb.mxu2 %v11965_v47  ;;  %v17512_v36 = vld [vmem:[%s19447_s22 + $0x244] sm:$0xf] }
 0x133   : > { %v15289_v46 = vor.u32 %v18316_v37, %v15288_v34  ;;  %v15000_v48 = vld [vmem:[%s19447_s22 + $0x1900] sm:$0xf]  ;;  %5998 = vmatpush.bf16.msrb.mxu0 %v15033_v45  ;;  %v11834_v34 = vld [vmem:[%s19447_s22 + $0x60] sm:$0xf0] }
 0x134   : > { %v18244_v49 = vld [vmem:[%s19447_s22 + $0x191c] sm:$0xf0]  ;;  %6037 = vmatpush.bf16.msrb.mxu3 %v12221_v51  ;;  %v12090_v37 = vld [vmem:[%s19447_s22 + $0x260] sm:$0xf0]  ;;  %v11837_v45 = vor.u32 %v17448_v33, %v11834_v34 }
 0x135   : > { %v15256_v50 = vld [vmem:[%s19447_s22 + $0x1b00] sm:$0xf]  ;;  %v15001_v57 = vor.u32 %v18244_v49, %v15000_v48  ;;  %6011 = vmatpush.bf16.msrb.mxu1 %v15289_v46  ;;  %v17440_v48 = vld [vmem:[%s19447_s22 + $0x4] sm:$0xf]  ;;  %v12093_v49 = vor.u32 %v17512_v36, %v12090_v37 }
 0x136   : > { %v18308_v52 = vld [vmem:[%s19447_s22 + $0x1b1c] sm:$0xf0]  ;;  %6025 = vmatpush.bf16.msrb.mxu2 %v11933_v59  ;;  %v17504_v51 = vld [vmem:[%s19447_s22 + $0x204] sm:$0xf] }
 0x137   : > { %v15257_v58 = vor.u32 %v18308_v52, %v15256_v50  ;;  %v14968_v60 = vld [vmem:[%s19447_s22 + $0x18c0] sm:$0xf]  ;;  %5999 = vmatpush.bf16.msrb.mxu0 %v15001_v57  ;;  %v11802_v50 = vld [vmem:[%s19447_s22 + $0x20] sm:$0xf0] }
 0x138   : > { %v18236_v61 = vld [vmem:[%s19447_s22 + $0x18dc] sm:$0xf0]  ;;  %6038 = vmatpush.bf16.msrb.mxu3 %v12189_v63  ;;  %v12058_v52 = vld [vmem:[%s19447_s22 + $0x220] sm:$0xf0] }
 0x139   : > { %v15224_v62 = vld [vmem:[%s19447_s22 + $0x1ac0] sm:$0xf]  ;;  %v14969_v6 = vor.u32 %v18236_v61, %v14968_v60  ;;  %6012 = vmatpush.bf16.msrb.mxu1 %v15257_v58  ;;  %v12538_v54 = vld [vmem:[%s19447_s22 + $0x5e0] sm:$0xf0]  ;;  %v11805_v61 = vor.u32 %v17440_v48, %v11802_v50  ;;  %v12061_v2 = vor.u32 %v17504_v51, %v12058_v52 }
 0x13a   : > { %v18300_v1 = vld [vmem:[%s19447_s22 + $0x1adc] sm:$0xf0]  ;;  %6026 = vmatpush.bf16.msrb.mxu2 %v11901_v8  ;;  %v12794_v57 = vld [vmem:[%s19447_s22 + $0x7e0] sm:$0xf0]  ;;  %v12541_v3 = vor.u32 %v17624_v53, %v12538_v54 }
 0x13b   : > { %v15225_v7 = vor.u32 %v18300_v1, %v15224_v62  ;;  %v14936_v9 = vld [vmem:[%s19447_s22 + $0x1880] sm:$0xf]  ;;  %6000 = vmatpush.bf16.msrb.mxu0 %v14969_v6  ;;  %v17752_v58 = vld [vmem:[%s19447_s22 + $0x9c4] sm:$0xf]  ;;  %v12797_v5 = vor.u32 %v17688_v55, %v12794_v57 }
 0x13c   : > { %v18228_v11 = vld [vmem:[%s19447_s22 + $0x189c] sm:$0xf0]  ;;  %6039 = vmatpush.bf16.msrb.mxu3 %v12157_v13  ;;  %v13050_v59 = vld [vmem:[%s19447_s22 + $0x9e0] sm:$0xf0] }
 0x13d   : > { %v15192_v12 = vld [vmem:[%s19447_s22 + $0x1a80] sm:$0xf]  ;;  %v14937_v22 = vor.u32 %v18228_v11, %v14936_v9  ;;  %6013 = vmatpush.bf16.msrb.mxu1 %v15225_v7  ;;  %v17816_v62 = vld [vmem:[%s19447_s22 + $0xbc4] sm:$0xf]  ;;  %v13053_v6 = vor.u32 %v17752_v58, %v13050_v59 }
 0x13e   : > { %v18292_v14 = vld [vmem:[%s19447_s22 + $0x1a9c] sm:$0xf0]  ;;  %6027 = vmatpush.bf16.msrb.mxu2 %v11869_v26  ;;  %v13306_v63 = vld [vmem:[%s19447_s22 + $0xbe0] sm:$0xf0] }
 0x13f   : > { %v15193_v23 = vor.u32 %v18292_v14, %v15192_v12  ;;  %v14904_v27 = vld [vmem:[%s19447_s22 + $0x1840] sm:$0xf]  ;;  %6001 = vmatpush.bf16.msrb.mxu0 %v14937_v22  ;;  %v17616_v7 = vld [vmem:[%s19447_s22 + $0x584] sm:$0xf]  ;;  %v13309_v11 = vor.u32 %v17816_v62, %v13306_v63 }
 0x140   : > { %v18220_v29 = vld [vmem:[%s19447_s22 + $0x185c] sm:$0xf0]  ;;  %6040 = vmatpush.bf16.msrb.mxu3 %v12125_v31  ;;  %v12506_v8 = vld [vmem:[%s19447_s22 + $0x5a0] sm:$0xf0] }
 0x141   : > { %v15160_v30 = vld [vmem:[%s19447_s22 + $0x1a40] sm:$0xf]  ;;  %v14905_v40 = vor.u32 %v18220_v29, %v14904_v27  ;;  %6014 = vmatpush.bf16.msrb.mxu1 %v15193_v23  ;;  %v17680_v9 = vld [vmem:[%s19447_s22 + $0x784] sm:$0xf]  ;;  %v12509_v22 = vor.u32 %v17616_v7, %v12506_v8 }
 0x142   : > { %v18284_v32 = vld [vmem:[%s19447_s22 + $0x1a5c] sm:$0xf0]  ;;  %6028 = vmatpush.bf16.msrb.mxu2 %v11837_v45  ;;  %v12762_v13 = vld [vmem:[%s19447_s22 + $0x7a0] sm:$0xf0] }
 0x143   : > { %v14872_v42 = vld [vmem:[%s19447_s22 + $0x1800] sm:$0xf]  ;;  %v15161_v44 = vor.u32 %v18284_v32, %v15160_v30  ;;  %6002 = vmatpush.bf16.msrb.mxu0 %v14905_v40  ;;  %v17744_v14 = vld [vmem:[%s19447_s22 + $0x984] sm:$0xf]  ;;  %v12765_v23 = vor.u32 %v17680_v9, %v12762_v13 }
 0x144   : > { %v18212_v43 = vld [vmem:[%s19447_s22 + $0x181c] sm:$0xf0]  ;;  %6041 = vmatpush.bf16.msrb.mxu3 %v12093_v49  ;;  %v13018_v15 = vld [vmem:[%s19447_s22 + $0x9a0] sm:$0xf0] }
 0x145   : > { %v15128_v46 = vld [vmem:[%s19447_s22 + $0x1a00] sm:$0xf]  ;;  %v14873_v56 = vor.u32 %v18212_v43, %v14872_v42  ;;  %6015 = vmatpush.bf16.msrb.mxu1 %v15161_v44  ;;  %v17808_v19 = vld [vmem:[%s19447_s22 + $0xb84] sm:$0xf]  ;;  %v13021_v26 = vor.u32 %v17744_v14, %v13018_v15 }
 0x146   : > { %v18276_v47 = vld [vmem:[%s19447_s22 + $0x1a1c] sm:$0xf0]  ;;  %6029 = vmatpush.bf16.msrb.mxu2 %v11805_v61  ;;  %v13274_v21 = vld [vmem:[%s19447_s22 + $0xba0] sm:$0xf0] }
 0x147   : > { %v15129_v60 = vor.u32 %v18276_v47, %v15128_v46  ;;  %v448_v1 = vld [vmem:[%s19440_s10 + $0x60] sm:$0xff]  ;;  %6003 = vmatpush.bf16.msrb.mxu0 %v14873_v56  ;;  %v13277_v31 = vor.u32 %v17808_v19, %v13274_v21 }
 0x148   : > { %v19784_v12 = vpack.c.bf16 %v448_v1, %v448_v1  ;;  %6042 = vmatpush.bf16.msrb.mxu3 %v12061_v2  ;;  %v17608_v27 = vld [vmem:[%s19447_s22 + $0x544] sm:$0xf] }
 0x149   : > { %6016 = vmatpush.bf16.msrb.mxu1 %v15129_v60  ;;  %v12474_v29 = vld [vmem:[%s19447_s22 + $0x560] sm:$0xf0]  ;;  %6030 = vmatmul.bf16.vlgmr.msrb.gmra.mxu2 %v19563_v10 }
 0x14a   : > { %6074 = vmatpush.bf16.msra.mxu2 %v13053_v6  ;;  %v17672_v30 = vld [vmem:[%s19447_s22 + $0x744] sm:$0xf]  ;;  %6004 = vmatmul.bf16.vlgmr.msrb.gmra.mxu0 %v19784_v12  ;;  %v12477_v40 = vor.u32 %v17608_v27, %v12474_v29 }
 0x14b   : > { %6048 = vmatpush.bf16.msra.mxu0 %v12541_v3  ;;  %v12730_v32 = vld [vmem:[%s19447_s22 + $0x760] sm:$0xf0]  ;;  %6043 = vmatmul.bf16.vlgmr.msrb.gmra.mxu3 %v19572_v18 }
 0x14c   : > { %6087 = vmatpush.bf16.msra.mxu3 %v13309_v11  ;;  %v17736_v33 = vld [vmem:[%s19447_s22 + $0x944] sm:$0xf]  ;;  %6017 = vmatmul.bf16.vlgmr.msrb.gmra.mxu1 %v19789_v16  ;;  %v12733_v42 = vor.u32 %v17672_v30, %v12730_v32 }
 0x14d   : > { %6061 = vmatpush.bf16.msra.mxu1 %v12797_v5  ;;  %v12986_v34 = vld [vmem:[%s19447_s22 + $0x960] sm:$0xf0] }
 0x14e   : > { %v17800_v36 = vld [vmem:[%s19447_s22 + $0xb44] sm:$0xf]  ;;  %6075 = vmatpush.bf16.msra.mxu2 %v13021_v26  ;;  %v12989_v43 = vor.u32 %v17736_v33, %v12986_v34 }
 0x14f   : > { %v13242_v37 = vld [vmem:[%s19447_s22 + $0xb60] sm:$0xf0]  ;;  %6049 = vmatpush.bf16.msra.mxu0 %v12509_v22 }
 0x150   : > { %v17600_v44 = vld [vmem:[%s19447_s22 + $0x504] sm:$0xf]  ;;  %6088 = vmatpush.bf16.msra.mxu3 %v13277_v31  ;;  %v13245_v47 = vor.u32 %v17800_v36, %v13242_v37 }
 0x151   : > { %6062 = vmatpush.bf16.msra.mxu1 %v12765_v23  ;;  %v12442_v45 = vld [vmem:[%s19447_s22 + $0x520] sm:$0xf0] }
 0x152   : > { %v17664_v46 = vld [vmem:[%s19447_s22 + $0x704] sm:$0xf]  ;;  %v12445_v53 = vor.u32 %v17600_v44, %v12442_v45  ;;  %6076 = vmatpush.bf16.msra.mxu2 %v12989_v43 }
 0x153   : > { %v12698_v48 = vld [vmem:[%s19447_s22 + $0x720] sm:$0xf0]  ;;  %6050 = vmatpush.bf16.msra.mxu0 %v12477_v40 }
 0x154   : > { %v17728_v49 = vld [vmem:[%s19447_s22 + $0x904] sm:$0xf]  ;;  %v12701_v54 = vor.u32 %v17664_v46, %v12698_v48  ;;  %6089 = vmatpush.bf16.msra.mxu3 %v13245_v47 }
 0x155   : > { %v12954_v50 = vld [vmem:[%s19447_s22 + $0x920] sm:$0xf0]  ;;  %6063 = vmatpush.bf16.msra.mxu1 %v12733_v42 }
 0x156   : > { %v17792_v51 = vld [vmem:[%s19447_s22 + $0xb04] sm:$0xf]  ;;  %v12957_v55 = vor.u32 %v17728_v49, %v12954_v50 }
 0x157   : > { %v13210_v52 = vld [vmem:[%s19447_s22 + $0xb20] sm:$0xf0]  ;;  %6051 = vmatpush.bf16.msra.mxu0 %v12445_v53 }
 0x158   : > { %v17592_v56 = vld [vmem:[%s19447_s22 + $0x4c4] sm:$0xf]  ;;  %v13213_v59 = vor.u32 %v17792_v51, %v13210_v52  ;;  %6077 = vmatpush.bf16.msra.mxu2 %v12957_v55 }
 0x159   : > { %v12410_v57 = vld [vmem:[%s19447_s22 + $0x4e0] sm:$0xf0]  ;;  %6064 = vmatpush.bf16.msra.mxu1 %v12701_v54 }
 0x15a   : > { %v17656_v58 = vld [vmem:[%s19447_s22 + $0x6c4] sm:$0xf]  ;;  %v12413_v2 = vor.u32 %v17592_v56, %v12410_v57  ;;  %6090 = vmatpush.bf16.msra.mxu3 %v13213_v59 }
 0x15b   : > { %v12666_v60 = vld [vmem:[%s19447_s22 + $0x6e0] sm:$0xf0] }
 0x15c   : > { %v17720_v61 = vld [vmem:[%s19447_s22 + $0x8c4] sm:$0xf]  ;;  %v12669_v3 = vor.u32 %v17656_v58, %v12666_v60  ;;  %6052 = vmatpush.bf16.msra.mxu0 %v12413_v2 }
 0x15d   : > { %v12922_v62 = vld [vmem:[%s19447_s22 + $0x8e0] sm:$0xf0] }
 0x15e   : > { %v17784_v63 = vld [vmem:[%s19447_s22 + $0xac4] sm:$0xf]  ;;  %v12925_v4 = vor.u32 %v17720_v61, %v12922_v62  ;;  %6065 = vmatpush.bf16.msra.mxu1 %v12669_v3 }
 0x15f   : > { %v13178_v1 = vld [vmem:[%s19447_s22 + $0xae0] sm:$0xf0] }
 0x160   : > { %v17584_v5 = vld [vmem:[%s19447_s22 + $0x484] sm:$0xf]  ;;  %v13181_v8 = vor.u32 %v17784_v63, %v13178_v1  ;;  %6078 = vmatpush.bf16.msra.mxu2 %v12925_v4 }
 0x161   : > { %v12378_v6 = vld [vmem:[%s19447_s22 + $0x4a0] sm:$0xf0] }
 0x162   : > { %v17648_v7 = vld [vmem:[%s19447_s22 + $0x684] sm:$0xf]  ;;  %v12381_v19 = vor.u32 %v17584_v5, %v12378_v6  ;;  %6091 = vmatpush.bf16.msra.mxu3 %v13181_v8 }
 0x163   : > { %v12634_v9 = vld [vmem:[%s19447_s22 + $0x6a0] sm:$0xf0] }
 0x164   : > { %v17712_v11 = vld [vmem:[%s19447_s22 + $0x884] sm:$0xf]  ;;  %v12637_v21 = vor.u32 %v17648_v7, %v12634_v9  ;;  %6053 = vmatpush.bf16.msra.mxu0 %v12381_v19 }
 0x165   : > { %v12890_v13 = vld [vmem:[%s19447_s22 + $0x8a0] sm:$0xf0] }
 0x166   : > { %v17776_v14 = vld [vmem:[%s19447_s22 + $0xa84] sm:$0xf]  ;;  %v12893_v22 = vor.u32 %v17712_v11, %v12890_v13  ;;  %6066 = vmatpush.bf16.msra.mxu1 %v12637_v21 }
 0x167   : > { %v13146_v15 = vld [vmem:[%s19447_s22 + $0xaa0] sm:$0xf0] }
 0x168   : > { %v17576_v23 = vld [vmem:[%s19447_s22 + $0x444] sm:$0xf]  ;;  %v13149_v29 = vor.u32 %v17776_v14, %v13146_v15  ;;  %6079 = vmatpush.bf16.msra.mxu2 %v12893_v22 }
 0x169   : > { %v12346_v26 = vld [vmem:[%s19447_s22 + $0x460] sm:$0xf0] }
 0x16a   : > { %v17640_v27 = vld [vmem:[%s19447_s22 + $0x644] sm:$0xf]  ;;  %v12349_v36 = vor.u32 %v17576_v23, %v12346_v26  ;;  %6092 = vmatpush.bf16.msra.mxu3 %v13149_v29 }
 0x16b   : > { %v12602_v30 = vld [vmem:[%s19447_s22 + $0x660] sm:$0xf0] }
 0x16c   : > { %v17704_v31 = vld [vmem:[%s19447_s22 + $0x844] sm:$0xf]  ;;  %v12605_v42 = vor.u32 %v17640_v27, %v12602_v30  ;;  %6054 = vmatpush.bf16.msra.mxu0 %v12349_v36 }
 0x16d   : > { %v12858_v32 = vld [vmem:[%s19447_s22 + $0x860] sm:$0xf0] }
 0x16e   : > { %v17768_v33 = vld [vmem:[%s19447_s22 + $0xa44] sm:$0xf]  ;;  %v12861_v43 = vor.u32 %v17704_v31, %v12858_v32  ;;  %6067 = vmatpush.bf16.msra.mxu1 %v12605_v42 }
 0x16f   : > { %v13114_v34 = vld [vmem:[%s19447_s22 + $0xa60] sm:$0xf0] }
 0x170   : > { %v17568_v37 = vld [vmem:[%s19447_s22 + $0x404] sm:$0xf]  ;;  %v13117_v47 = vor.u32 %v17768_v33, %v13114_v34  ;;  %6080 = vmatpush.bf16.msra.mxu2 %v12861_v43 }
 0x171   : > { %v12314_v40 = vld [vmem:[%s19447_s22 + $0x420] sm:$0xf0] }
 0x172   : > { %v17632_v44 = vld [vmem:[%s19447_s22 + $0x604] sm:$0xf]  ;;  %v12317_v54 = vor.u32 %v17568_v37, %v12314_v40  ;;  %6093 = vmatpush.bf16.msra.mxu3 %v13117_v47 }
 0x173   : > { %v12570_v45 = vld [vmem:[%s19447_s22 + $0x620] sm:$0xf0] }
 0x174   : > { %v17696_v46 = vld [vmem:[%s19447_s22 + $0x804] sm:$0xf]  ;;  %v12573_v58 = vor.u32 %v17632_v44, %v12570_v45  ;;  %6055 = vmatpush.bf16.msra.mxu0 %v12317_v54 }
 0x175   : > { %v12826_v48 = vld [vmem:[%s19447_s22 + $0x820] sm:$0xf0] }
 0x176   : > { %v17760_v49 = vld [vmem:[%s19447_s22 + $0xa04] sm:$0xf]  ;;  %v12829_v59 = vor.u32 %v17696_v46, %v12826_v48  ;;  %6068 = vmatpush.bf16.msra.mxu1 %v12573_v58 }
 0x177   : > { %v13082_v50 = vld [vmem:[%s19447_s22 + $0xa20] sm:$0xf0]  ;;  %6056 = vmatmul.bf16.vlgmr.msra.gmra.mxu0 %v19554_v0 }
 0x178   : > { %v17880_v51 = vld [vmem:[%s19447_s22 + $0xdc4] sm:$0xf]  ;;  %v13085_v62 = vor.u32 %v17760_v49, %v13082_v50  ;;  %6081 = vmatpush.bf16.msra.mxu2 %v12829_v59 }
 0x179   : > { %v13562_v52 = vld [vmem:[%s19447_s22 + $0xde0] sm:$0xf0]  ;;  %6069 = vmatmul.bf16.vlgmr.msra.gmra.mxu1 %v19570_v17 }
 0x17a   : > { %v17944_v53 = vld [vmem:[%s19447_s22 + $0xfc4] sm:$0xf]  ;;  %v13565_v63 = vor.u32 %v17880_v51, %v13562_v52  ;;  %6094 = vmatpush.bf16.msra.mxu3 %v13085_v62  ;;  %v19889_v62 = vpop.f32.mrf.mxu0 }
 0x17b   : > { %v13818_v55 = vld [vmem:[%s19447_s22 + $0xfe0] sm:$0xf0]  ;;  %6082 = vmatmul.bf16.vlgmr.msra.gmra.mxu2 %v19633_v38 }
 0x17c   : > { %v18008_v56 = vld [vmem:[%s19447_s22 + $0x11c4] sm:$0xf]  ;;  %v13821_v1 = vor.u32 %v17944_v53, %v13818_v55  ;;  %6100 = vmatpush.bf16.msrb.mxu0 %v13565_v63 }
 0x17d   : > { %v14074_v57 = vld [vmem:[%s19447_s22 + $0x11e0] sm:$0xf0]  ;;  %6095 = vmatmul.bf16.vlgmr.msra.gmra.mxu3 %v19637_v41 }
 0x17e   : > { %v18072_v60 = vld [vmem:[%s19447_s22 + $0x13c4] sm:$0xf]  ;;  %v14077_v2 = vor.u32 %v18008_v56, %v14074_v57  ;;  %6113 = vmatpush.bf16.msrb.mxu1 %v13821_v1 }
 0x17f   : > { %v14330_v61 = vld [vmem:[%s19447_s22 + $0x13e0] sm:$0xf0] }
 0x180   : > { %v17872_v3 = vld [vmem:[%s19447_s22 + $0xd84] sm:$0xf]  ;;  %v14333_v6 = vor.u32 %v18072_v60, %v14330_v61  ;;  %6126 = vmatpush.bf16.msrb.mxu2 %v14077_v2 }
 0x181   : > { %v13530_v4 = vld [vmem:[%s19447_s22 + $0xda0] sm:$0xf0] }
 0x182   : > { %v17936_v5 = vld [vmem:[%s19447_s22 + $0xf84] sm:$0xf]  ;;  %v13533_v14 = vor.u32 %v17872_v3, %v13530_v4  ;;  %6139 = vmatpush.bf16.msrb.mxu3 %v14333_v6 }
 0x183   : > { %v13786_v7 = vld [vmem:[%s19447_s22 + $0xfa0] sm:$0xf0] }
 0x184   : > { %v18000_v8 = vld [vmem:[%s19447_s22 + $0x1184] sm:$0xf]  ;;  %v13789_v15 = vor.u32 %v17936_v5, %v13786_v7  ;;  %6101 = vmatpush.bf16.msrb.mxu0 %v13533_v14  ;;  %v19901_v14 = vpop.f32.mrf.mxu2 }
 0x185   : > { %v14042_v9 = vld [vmem:[%s19447_s22 + $0x11a0] sm:$0xf0] }
 0x186   : > { %v18064_v11 = vld [vmem:[%s19447_s22 + $0x1384] sm:$0xf]  ;;  %v14045_v19 = vor.u32 %v18000_v8, %v14042_v9  ;;  %6114 = vmatpush.bf16.msrb.mxu1 %v13789_v15 }
 0x187   : > { %v14298_v13 = vld [vmem:[%s19447_s22 + $0x13a0] sm:$0xf0] }
 0x188   : > { %v17864_v21 = vld [vmem:[%s19447_s22 + $0xd44] sm:$0xf]  ;;  %v14301_v26 = vor.u32 %v18064_v11, %v14298_v13  ;;  %6127 = vmatpush.bf16.msrb.mxu2 %v14045_v19  ;;  %v19899_v13 = vpop.f32.mrf.mxu1 }
 0x189   : > { %v13498_v22 = vld [vmem:[%s19447_s22 + $0xd60] sm:$0xf0] }
 0x18a   : > { %v17928_v23 = vld [vmem:[%s19447_s22 + $0xf44] sm:$0xf]  ;;  %v13501_v33 = vor.u32 %v17864_v21, %v13498_v22  ;;  %6140 = vmatpush.bf16.msrb.mxu3 %v14301_v26 }
 0x18b   : > { %v13754_v27 = vld [vmem:[%s19447_s22 + $0xf60] sm:$0xf0] }
 0x18c   : > { %v17992_v29 = vld [vmem:[%s19447_s22 + $0x1144] sm:$0xf]  ;;  %v13757_v34 = vor.u32 %v17928_v23, %v13754_v27  ;;  %6102 = vmatpush.bf16.msrb.mxu0 %v13501_v33 }
 0x18d   : > { %v14010_v30 = vld [vmem:[%s19447_s22 + $0x1160] sm:$0xf0] }
 0x18e   : > { %v18056_v31 = vld [vmem:[%s19447_s22 + $0x1344] sm:$0xf]  ;;  %v14013_v36 = vor.u32 %v17992_v29, %v14010_v30  ;;  %6115 = vmatpush.bf16.msrb.mxu1 %v13757_v34  ;;  %v19911_v34 = vpop.f32.mrf.mxu3 }
 0x18f   : > { %v14266_v32 = vld [vmem:[%s19447_s22 + $0x1360] sm:$0xf0] }
 0x190   : > { %v17856_v37 = vld [vmem:[%s19447_s22 + $0xd04] sm:$0xf]  ;;  %v14269_v43 = vor.u32 %v18056_v31, %v14266_v32  ;;  %6128 = vmatpush.bf16.msrb.mxu2 %v14013_v36 }
 0x191   : > { %v13466_v40 = vld [vmem:[%s19447_s22 + $0xd20] sm:$0xf0] }
 0x192   : > { %v17920_v42 = vld [vmem:[%s19447_s22 + $0xf04] sm:$0xf]  ;;  %v13469_v49 = vor.u32 %v17856_v37, %v13466_v40  ;;  %6141 = vmatpush.bf16.msrb.mxu3 %v14269_v43 }
 0x193   : > { %v13722_v44 = vld [vmem:[%s19447_s22 + $0xf20] sm:$0xf0] }
 0x194   : > { %v17984_v45 = vld [vmem:[%s19447_s22 + $0x1104] sm:$0xf]  ;;  %v13725_v50 = vor.u32 %v17920_v42, %v13722_v44  ;;  %6103 = vmatpush.bf16.msrb.mxu0 %v13469_v49  ;;  %v5851_v42 = vpop.f32.mrf.mxu0 }
 0x195   : > { %v13978_v46 = vld [vmem:[%s19447_s22 + $0x1120] sm:$0xf0] }
 0x196   : > { %v18048_v47 = vld [vmem:[%s19447_s22 + $0x1304] sm:$0xf]  ;;  %v13981_v51 = vor.u32 %v17984_v45, %v13978_v46  ;;  %6116 = vmatpush.bf16.msrb.mxu1 %v13725_v50 }
 0x197   : > { %v14234_v48 = vld [vmem:[%s19447_s22 + $0x1320] sm:$0xf0] }
 0x198   : > { %v17848_v52 = vld [vmem:[%s19447_s22 + $0xcc4] sm:$0xf]  ;;  %v14237_v55 = vor.u32 %v18048_v47, %v14234_v48  ;;  %6129 = vmatpush.bf16.msrb.mxu2 %v13981_v51 }
 0x199   : > { %v13434_v53 = vld [vmem:[%s19447_s22 + $0xce0] sm:$0xf0] }
 0x19a   : > { %v17912_v54 = vld [vmem:[%s19447_s22 + $0xec4] sm:$0xf]  ;;  %v13437_v61 = vor.u32 %v17848_v52, %v13434_v53  ;;  %6142 = vmatpush.bf16.msrb.mxu3 %v14237_v55  ;;  %v5864_v55 = vpop.f32.mrf.mxu1 }
 0x19b   : > { %v13690_v56 = vld [vmem:[%s19447_s22 + $0xee0] sm:$0xf0] }
 0x19c   : > { %v17976_v57 = vld [vmem:[%s19447_s22 + $0x10c4] sm:$0xf]  ;;  %v13693_v63 = vor.u32 %v17912_v54, %v13690_v56  ;;  %6104 = vmatpush.bf16.msrb.mxu0 %v13437_v61  ;;  %v5877_v56 = vpop.f32.mrf.mxu2 }
 0x19d   : > { %v13946_v58 = vld [vmem:[%s19447_s22 + $0x10e0] sm:$0xf0] }
 0x19e   : > { %v18040_v59 = vld [vmem:[%s19447_s22 + $0x12c4] sm:$0xf]  ;;  %v13949_v1 = vor.u32 %v17976_v57, %v13946_v58  ;;  %6117 = vmatpush.bf16.msrb.mxu1 %v13693_v63 }
 0x19f   : > { %v14202_v60 = vld [vmem:[%s19447_s22 + $0x12e0] sm:$0xf0] }
 0x1a0   : > { %v17840_v2 = vld [vmem:[%s19447_s22 + $0xc84] sm:$0xf]  ;;  %v14205_v5 = vor.u32 %v18040_v59, %v14202_v60  ;;  %6130 = vmatpush.bf16.msrb.mxu2 %v13949_v1 }
 0x1a1   : > { %v13402_v3 = vld [vmem:[%s19447_s22 + $0xca0] sm:$0xf0] }
 0x1a2   : > { %v17904_v4 = vld [vmem:[%s19447_s22 + $0xe84] sm:$0xf]  ;;  %v13405_v15 = vor.u32 %v17840_v2, %v13402_v3  ;;  %6143 = vmatpush.bf16.msrb.mxu3 %v14205_v5 }
 0x1a3   : > { %v13658_v6 = vld [vmem:[%s19447_s22 + $0xea0] sm:$0xf0] }
 0x1a4   : > { %v17968_v7 = vld [vmem:[%s19447_s22 + $0x1084] sm:$0xf]  ;;  %v13661_v19 = vor.u32 %v17904_v4, %v13658_v6  ;;  %6105 = vmatpush.bf16.msrb.mxu0 %v13405_v15 }
 0x1a5   : > { %v13914_v8 = vld [vmem:[%s19447_s22 + $0x10a0] sm:$0xf0] }
 0x1a6   : > { %v18032_v9 = vld [vmem:[%s19447_s22 + $0x1284] sm:$0xf]  ;;  %v13917_v21 = vor.u32 %v17968_v7, %v13914_v8  ;;  %6118 = vmatpush.bf16.msrb.mxu1 %v13661_v19 }
 0x1a7   : > { %v14170_v11 = vld [vmem:[%s19447_s22 + $0x12a0] sm:$0xf0] }
 0x1a8   : > { %v17832_v22 = vld [vmem:[%s19447_s22 + $0xc44] sm:$0xf]  ;;  %v14173_v27 = vor.u32 %v18032_v9, %v14170_v11  ;;  %6131 = vmatpush.bf16.msrb.mxu2 %v13917_v21  ;;  %v5890_v11 = vpop.f32.mrf.mxu3 }
 0x1a9   : > { %v13370_v23 = vld [vmem:[%s19447_s22 + $0xc60] sm:$0xf0] }
 0x1aa   : > { %v17896_v26 = vld [vmem:[%s19447_s22 + $0xe44] sm:$0xf]  ;;  %v13373_v36 = vor.u32 %v17832_v22, %v13370_v23  ;;  %6144 = vmatpush.bf16.msrb.mxu3 %v14173_v27 }
 0x1ab   : > { %v13626_v29 = vld [vmem:[%s19447_s22 + $0xe60] sm:$0xf0] }
 0x1ac   : > { %v17960_v30 = vld [vmem:[%s19447_s22 + $0x1044] sm:$0xf]  ;;  %v13629_v43 = vor.u32 %v17896_v26, %v13626_v29  ;;  %6106 = vmatpush.bf16.msrb.mxu0 %v13373_v36 }
 0x1ad   : > { %v13882_v31 = vld [vmem:[%s19447_s22 + $0x1060] sm:$0xf0] }
 0x1ae   : > { %v18024_v32 = vld [vmem:[%s19447_s22 + $0x1244] sm:$0xf]  ;;  %v13885_v44 = vor.u32 %v17960_v30, %v13882_v31  ;;  %6119 = vmatpush.bf16.msrb.mxu1 %v13629_v43 }
 0x1af   : > { %v14138_v33 = vld [vmem:[%s19447_s22 + $0x1260] sm:$0xf0] }
 0x1b0   : > { %v17824_v37 = vld [vmem:[%s19447_s22 + $0xc04] sm:$0xf]  ;;  %v14141_v48 = vor.u32 %v18024_v32, %v14138_v33  ;;  %6132 = vmatpush.bf16.msrb.mxu2 %v13885_v44 }
 0x1b1   : > { %v13338_v40 = vld [vmem:[%s19447_s22 + $0xc20] sm:$0xf0] }
 0x1b2   : > { %v17888_v45 = vld [vmem:[%s19447_s22 + $0xe04] sm:$0xf]  ;;  %v13341_v57 = vor.u32 %v17824_v37, %v13338_v40  ;;  %6145 = vmatpush.bf16.msrb.mxu3 %v14141_v48 }
 0x1b3   : > { %v13594_v46 = vld [vmem:[%s19447_s22 + $0xe20] sm:$0xf0] }
 0x1b4   : > { %v17952_v47 = vld [vmem:[%s19447_s22 + $0x1004] sm:$0xf]  ;;  %v13597_v61 = vor.u32 %v17888_v45, %v13594_v46  ;;  %6107 = vmatpush.bf16.msrb.mxu0 %v13341_v57 }
 0x1b5   : > { %v13850_v49 = vld [vmem:[%s19447_s22 + $0x1020] sm:$0xf0] }
 0x1b6   : > { %v18016_v50 = vld [vmem:[%s19447_s22 + $0x1204] sm:$0xf]  ;;  %v13853_v63 = vor.u32 %v17952_v47, %v13850_v49  ;;  %6120 = vmatpush.bf16.msrb.mxu1 %v13597_v61 }
 0x1b7   : > { %v14106_v51 = vld [vmem:[%s19447_s22 + $0x1220] sm:$0xf0]  ;;  %6108 = vmatmul.bf16.vlgmr.msrb.gmra.mxu0 %v19629_v35 }
 0x1b8   : > { %v18136_v52 = vld [vmem:[%s19447_s22 + $0x15c4] sm:$0xf]  ;;  %v14109_v3 = vor.u32 %v18016_v50, %v14106_v51  ;;  %6133 = vmatpush.bf16.msrb.mxu2 %v13853_v63 }
 0x1b9   : > { %v14586_v53 = vld [vmem:[%s19447_s22 + $0x15e0] sm:$0xf0]  ;;  %6121 = vmatmul.bf16.vlgmr.msrb.gmra.mxu1 %v19635_v39 }
 0x1ba   : > { %v18200_v54 = vld [vmem:[%s19447_s22 + $0x17c4] sm:$0xf]  ;;  %v14589_v4 = vor.u32 %v18136_v52, %v14586_v53  ;;  %6146 = vmatpush.bf16.msrb.mxu3 %v14109_v3 }
 0x1bb   : > { %v14842_v58 = vld [vmem:[%s19447_s22 + $0x17e0] sm:$0xf0]  ;;  %6134 = vmatmul.bf16.vlgmr.msrb.gmra.mxu2 %v19706_v20 }
 0x1bc   : > { %v18264_v59 = vld [vmem:[%s19447_s22 + $0x19c4] sm:$0xf]  ;;  %v14845_v5 = vor.u32 %v18200_v54, %v14842_v58  ;;  %6152 = vmatpush.bf16.msra.mxu0 %v14589_v4  ;;  %v19957_v58 = vpop.f32.mrf.mxu0 }
 0x1bd   : > { %v15098_v60 = vld [vmem:[%s19447_s22 + $0x19e0] sm:$0xf0]  ;;  %6147 = vmatmul.bf16.vlgmr.msrb.gmra.mxu3 %v19713_v25 }
 0x1be   : > { %v18328_v1 = vld [vmem:[%s19447_s22 + $0x1bc4] sm:$0xf]  ;;  %v15101_v6 = vor.u32 %v18264_v59, %v15098_v60  ;;  %6165 = vmatpush.bf16.msra.mxu1 %v14845_v5 }
 0x1bf   : > { %v15354_v2 = vld [vmem:[%s19447_s22 + $0x1be0] sm:$0xf0] }
 0x1c0   : > { %v18128_v7 = vld [vmem:[%s19447_s22 + $0x1584] sm:$0xf]  ;;  %v15357_v15 = vor.u32 %v18328_v1, %v15354_v2  ;;  %6178 = vmatpush.bf16.msra.mxu2 %v15101_v6  ;;  %v19962_v2 = vpop.f32.mrf.mxu1 }
 0x1c1   : > { %v14554_v8 = vld [vmem:[%s19447_s22 + $0x15a0] sm:$0xf0] }
 0x1c2   : > { %v18192_v9 = vld [vmem:[%s19447_s22 + $0x1784] sm:$0xf]  ;;  %v14557_v27 = vor.u32 %v18128_v7, %v14554_v8  ;;  %6191 = vmatpush.bf16.msra.mxu3 %v15357_v15 }
 0x1c3   : > { %v14810_v19 = vld [vmem:[%s19447_s22 + $0x17a0] sm:$0xf0] }
 0x1c4   : > { %v18256_v21 = vld [vmem:[%s19447_s22 + $0x1984] sm:$0xf]  ;;  %v14813_v29 = vor.u32 %v18192_v9, %v14810_v19  ;;  %6153 = vmatpush.bf16.msra.mxu0 %v14557_v27 }
 0x1c5   : > { %v15066_v22 = vld [vmem:[%s19447_s22 + $0x19a0] sm:$0xf0] }
 0x1c6   : > { %v18320_v23 = vld [vmem:[%s19447_s22 + $0x1b84] sm:$0xf]  ;;  %v15069_v30 = vor.u32 %v18256_v21, %v15066_v22  ;;  %6166 = vmatpush.bf16.msra.mxu1 %v14813_v29 }
 0x1c7   : > { %v15322_v26 = vld [vmem:[%s19447_s22 + $0x1ba0] sm:$0xf0] }
 0x1c8   : > { %v18120_v31 = vld [vmem:[%s19447_s22 + $0x1544] sm:$0xf]  ;;  %v15325_v36 = vor.u32 %v18320_v23, %v15322_v26  ;;  %6179 = vmatpush.bf16.msra.mxu2 %v15069_v30  ;;  %v19972_v23 = vpop.f32.mrf.mxu2 }
 0x1c9   : > { %v14522_v32 = vld [vmem:[%s19447_s22 + $0x1560] sm:$0xf0] }
 0x1ca   : > { %v18184_v33 = vld [vmem:[%s19447_s22 + $0x1744] sm:$0xf]  ;;  %v14525_v45 = vor.u32 %v18120_v31, %v14522_v32  ;;  %6192 = vmatpush.bf16.msra.mxu3 %v15325_v36  ;;  %v19977_v31 = vpop.f32.mrf.mxu3 }
 0x1cb   : > { %v14778_v37 = vld [vmem:[%s19447_s22 + $0x1760] sm:$0xf0] }
 0x1cc   : > { %v18248_v40 = vld [vmem:[%s19447_s22 + $0x1944] sm:$0xf]  ;;  %v14781_v46 = vor.u32 %v18184_v33, %v14778_v37  ;;  %6154 = vmatpush.bf16.msra.mxu0 %v14525_v45  ;;  %v5903_v37 = vpop.f32.mrf.mxu0 }
 0x1cd   : > { %v15034_v42 = vld [vmem:[%s19447_s22 + $0x1960] sm:$0xf0]  ;;  %v12000_v37 = vld [vmem:[%s19447_s22 + $0x188] sm:$0xf] }
 0x1ce   : > { %v18312_v43 = vld [vmem:[%s19447_s22 + $0x1b44] sm:$0xf]  ;;  %v15037_v47 = vor.u32 %v18248_v40, %v15034_v42  ;;  %6167 = vmatpush.bf16.msra.mxu1 %v14781_v46  ;;  %v5916_v46 = vpop.f32.mrf.mxu1 }
 0x1cf   : > { %v15290_v44 = vld [vmem:[%s19447_s22 + $0x1b60] sm:$0xf0]  ;;  %v17621_v46 = vld [vmem:[%s19447_s22 + $0x5a4] sm:$0xf0] }
 0x1d0   : > { %v18112_v48 = vld [vmem:[%s19447_s22 + $0x1504] sm:$0xf]  ;;  %v15293_v51 = vor.u32 %v18312_v43, %v15290_v44  ;;  %6180 = vmatpush.bf16.msra.mxu2 %v15037_v47 }
 0x1d1   : > { %v14490_v49 = vld [vmem:[%s19447_s22 + $0x1520] sm:$0xf0] }
 0x1d2   : > { %v18176_v50 = vld [vmem:[%s19447_s22 + $0x1704] sm:$0xf]  ;;  %v14493_v57 = vor.u32 %v18112_v48, %v14490_v49  ;;  %6193 = vmatpush.bf16.msra.mxu3 %v15293_v51 }
 0x1d3   : > { %v14746_v52 = vld [vmem:[%s19447_s22 + $0x1720] sm:$0xf0] }
 0x1d4   : > { %v18240_v53 = vld [vmem:[%s19447_s22 + $0x1904] sm:$0xf]  ;;  %v14749_v59 = vor.u32 %v18176_v50, %v14746_v52  ;;  %6155 = vmatpush.bf16.msra.mxu0 %v14493_v57 }
 0x1d5   : > { %v15002_v54 = vld [vmem:[%s19447_s22 + $0x1920] sm:$0xf0] }
 0x1d6   : > { %v18304_v55 = vld [vmem:[%s19447_s22 + $0x1b04] sm:$0xf]  ;;  %v15005_v60 = vor.u32 %v18240_v53, %v15002_v54  ;;  %6168 = vmatpush.bf16.msra.mxu1 %v14749_v59 }
 0x1d7   : > { %v15258_v56 = vld [vmem:[%s19447_s22 + $0x1b20] sm:$0xf0] }
 0x1d8   : > { %v18104_v61 = vld [vmem:[%s19447_s22 + $0x14c4] sm:$0xf]  ;;  %v15261_v3 = vor.u32 %v18304_v55, %v15258_v56  ;;  %6181 = vmatpush.bf16.msra.mxu2 %v15005_v60 }
 0x1d9   : > { %v14458_v63 = vld [vmem:[%s19447_s22 + $0x14e0] sm:$0xf0] }
 0x1da   : > { %v18168_v1 = vld [vmem:[%s19447_s22 + $0x16c4] sm:$0xf]  ;;  %v14461_v9 = vor.u32 %v18104_v61, %v14458_v63  ;;  %6194 = vmatpush.bf16.msra.mxu3 %v15261_v3  ;;  %v5929_v63 = vpop.f32.mrf.mxu2 }
 0x1db   : > { %v14714_v4 = vld [vmem:[%s19447_s22 + $0x16e0] sm:$0xf0] }
 0x1dc   : > { %v18232_v5 = vld [vmem:[%s19447_s22 + $0x18c4] sm:$0xf]  ;;  %v14717_v11 = vor.u32 %v18168_v1, %v14714_v4  ;;  %6156 = vmatpush.bf16.msra.mxu0 %v14461_v9  ;;  %v12288_v9 = vld [vmem:[%s19447_s22 + $0x3c8] sm:$0xf] }
 0x1dd   : > { %v14970_v6 = vld [vmem:[%s19447_s22 + $0x18e0] sm:$0xf0] }
 0x1de   : > { %v18296_v7 = vld [vmem:[%s19447_s22 + $0x1ac4] sm:$0xf]  ;;  %v14973_v15 = vor.u32 %v18232_v5, %v14970_v6  ;;  %6169 = vmatpush.bf16.msra.mxu1 %v14717_v11  ;;  %v5942_v6 = vpop.f32.mrf.mxu3 }
 0x1df   : > { %v15226_v8 = vld [vmem:[%s19447_s22 + $0x1ae0] sm:$0xf0]  ;;  %v12192_v6 = vld [vmem:[%s19447_s22 + $0x308] sm:$0xf] }
 0x1e0   : > { %v18096_v19 = vld [vmem:[%s19447_s22 + $0x1484] sm:$0xf]  ;;  %v15229_v26 = vor.u32 %v18296_v7, %v15226_v8  ;;  %6182 = vmatpush.bf16.msra.mxu2 %v14973_v15  ;;  %v12032_v7 = vld [vmem:[%s19447_s22 + $0x1c8] sm:$0xf] }
 0x1e1   : > { %v14426_v21 = vld [vmem:[%s19447_s22 + $0x14a0] sm:$0xf0]  ;;  %v17501_v8 = vld [vmem:[%s19447_s22 + $0x1e4] sm:$0xf0] }
 0x1e2   : > { %v18160_v22 = vld [vmem:[%s19447_s22 + $0x1684] sm:$0xf]  ;;  %v14429_v36 = vor.u32 %v18096_v19, %v14426_v21  ;;  %6195 = vmatpush.bf16.msra.mxu3 %v15229_v26  ;;  %v17565_v15 = vld [vmem:[%s19447_s22 + $0x3e4] sm:$0xf0] }
 0x1e3   : > { %v14682_v27 = vld [vmem:[%s19447_s22 + $0x16a0] sm:$0xf0]  ;;  %v12544_v19 = vld [vmem:[%s19447_s22 + $0x5c8] sm:$0xf] }
 0x1e4   : > { %v18224_v29 = vld [vmem:[%s19447_s22 + $0x1884] sm:$0xf]  ;;  %v14685_v40 = vor.u32 %v18160_v22, %v14682_v27  ;;  %6157 = vmatpush.bf16.msra.mxu0 %v14429_v36  ;;  %v17629_v21 = vld [vmem:[%s19447_s22 + $0x5e4] sm:$0xf0] }
 0x1e5   : > { %v14938_v30 = vld [vmem:[%s19447_s22 + $0x18a0] sm:$0xf0]  ;;  %v12800_v27 = vld [vmem:[%s19447_s22 + $0x7c8] sm:$0xf]  ;;  %v12545_v36 = vor.u32 %v17629_v21, %v12544_v19 }
 0x1e6   : > { %v18288_v32 = vld [vmem:[%s19447_s22 + $0x1a84] sm:$0xf]  ;;  %v14941_v42 = vor.u32 %v18224_v29, %v14938_v30  ;;  %6170 = vmatpush.bf16.msra.mxu1 %v14685_v40  ;;  %v17693_v29 = vld [vmem:[%s19447_s22 + $0x7e4] sm:$0xf0] }
 0x1e7   : > { %v15194_v33 = vld [vmem:[%s19447_s22 + $0x1aa0] sm:$0xf0]  ;;  %v17493_v40 = vld [vmem:[%s19447_s22 + $0x1a4] sm:$0xf0] }
 0x1e8   : > { %v18088_v43 = vld [vmem:[%s19447_s22 + $0x1444] sm:$0xf]  ;;  %v15197_v47 = vor.u32 %v18288_v32, %v15194_v33  ;;  %6183 = vmatpush.bf16.msra.mxu2 %v14941_v42  ;;  %v12033_v32 = vor.u32 %v17501_v8, %v12032_v7  ;;  %v12289_v33 = vor.u32 %v17565_v15, %v12288_v9  ;;  %v12256_v42 = vld [vmem:[%s19447_s22 + $0x388] sm:$0xf] }
 0x1e9   : > { %v14394_v44 = vld [vmem:[%s19447_s22 + $0x1460] sm:$0xf0]  ;;  %v17541_v8 = vld [vmem:[%s19447_s22 + $0x324] sm:$0xf0] }
 0x1ea   : > { %v18152_v45 = vld [vmem:[%s19447_s22 + $0x1644] sm:$0xf]  ;;  %v14397_v53 = vor.u32 %v18088_v43, %v14394_v44  ;;  %6196 = vmatpush.bf16.msra.mxu3 %v15197_v47  ;;  %v12801_v43 = vor.u32 %v17693_v29, %v12800_v27  ;;  %v17557_v44 = vld [vmem:[%s19447_s22 + $0x3a4] sm:$0xf0]  ;;  %v12193_v27 = vor.u32 %v17541_v8, %v12192_v6 }
 0x1eb   : > { %v14650_v48 = vld [vmem:[%s19447_s22 + $0x1660] sm:$0xf0]  ;;  %v12768_v47 = vld [vmem:[%s19447_s22 + $0x788] sm:$0xf] }
 0x1ec   : > { %v18216_v49 = vld [vmem:[%s19447_s22 + $0x1844] sm:$0xf]  ;;  %v14653_v56 = vor.u32 %v18152_v45, %v14650_v48  ;;  %6158 = vmatpush.bf16.msra.mxu0 %v14397_v53  ;;  %v12512_v45 = vld [vmem:[%s19447_s22 + $0x588] sm:$0xf] }
 0x1ed   : > { %v14906_v50 = vld [vmem:[%s19447_s22 + $0x1860] sm:$0xf0]  ;;  %v17685_v48 = vld [vmem:[%s19447_s22 + $0x7a4] sm:$0xf0] }
 0x1ee   : > { %v18280_v51 = vld [vmem:[%s19447_s22 + $0x1a44] sm:$0xf]  ;;  %v14909_v57 = vor.u32 %v18216_v49, %v14906_v50  ;;  %6171 = vmatpush.bf16.msra.mxu1 %v14653_v56  ;;  %v5863_v49 = vadd.f32 %v19899_v13, %v19889_v62  ;;  %v12001_v50 = vor.u32 %v17493_v40, %v12000_v37  ;;  %v11968_v53 = vld [vmem:[%s19447_s22 + $0x148] sm:$0xf]  ;;  %v12769_v56 = vor.u32 %v17685_v48, %v12768_v47 }
 0x1ef   : > { %v15162_v52 = vld [vmem:[%s19447_s22 + $0x1a60] sm:$0xf0]  ;;  %v12480_v62 = vld [vmem:[%s19447_s22 + $0x548] sm:$0xf] }
 0x1f0   : > { %v18080_v54 = vld [vmem:[%s19447_s22 + $0x1404] sm:$0xf]  ;;  %v15165_v1 = vor.u32 %v18280_v51, %v15162_v52  ;;  %6184 = vmatpush.bf16.msra.mxu2 %v14909_v57  ;;  %v12257_v51 = vor.u32 %v17557_v44, %v12256_v42  ;;  %v12513_v52 = vor.u32 %v17621_v46, %v12512_v45  ;;  %v17549_v57 = vld [vmem:[%s19447_s22 + $0x364] sm:$0xf0] }
 0x1f1   : > { %v14362_v55 = vld [vmem:[%s19447_s22 + $0x1420] sm:$0xf0]  ;;  %v17613_v13 = vld [vmem:[%s19447_s22 + $0x564] sm:$0xf0] }
 0x1f2   : > { %v18144_v59 = vld [vmem:[%s19447_s22 + $0x1604] sm:$0xf]  ;;  %v14365_v11 = vor.u32 %v18080_v54, %v14362_v55  ;;  %6197 = vmatpush.bf16.msra.mxu3 %v15165_v1  ;;  %v17485_v54 = vld [vmem:[%s19447_s22 + $0x164] sm:$0xf0] }
 0x1f3   : > { %v14618_v60 = vld [vmem:[%s19447_s22 + $0x1620] sm:$0xf0]  ;;  %v12224_v55 = vld [vmem:[%s19447_s22 + $0x348] sm:$0xf]  ;;  %v11969_v63 = vor.u32 %v17485_v54, %v11968_v53 }
 0x1f4   : > { %v18208_v61 = vld [vmem:[%s19447_s22 + $0x1804] sm:$0xf]  ;;  %v14621_v22 = vor.u32 %v18144_v59, %v14618_v60  ;;  %6159 = vmatpush.bf16.msra.mxu0 %v14365_v11  ;;  %v12736_v59 = vld [vmem:[%s19447_s22 + $0x748] sm:$0xf]  ;;  %v12225_v1 = vor.u32 %v17549_v57, %v12224_v55  ;;  %v20034_v11 = vpop.f32.mrf.mxu0  ;;  %v20058_v55 = vpop.f32.mrf.mxu3 }
 0x1f5   : > { %v14874_v3 = vld [vmem:[%s19447_s22 + $0x1820] sm:$0xf0]  ;;  %v17677_v60 = vld [vmem:[%s19447_s22 + $0x764] sm:$0xf0] }
 0x1f6   : > { %v18272_v4 = vld [vmem:[%s19447_s22 + $0x1a04] sm:$0xf]  ;;  %v14877_v26 = vor.u32 %v18208_v61, %v14874_v3  ;;  %6172 = vmatpush.bf16.msra.mxu1 %v14621_v22  ;;  %v5876_v61 = vadd.f32 %v19901_v14, %v5863_v49  ;;  %v12481_v3 = vor.u32 %v17613_v13, %v12480_v62  ;;  %v12737_v7 = vor.u32 %v17677_v60, %v12736_v59  ;;  %v12448_v14 = vld [vmem:[%s19447_s22 + $0x508] sm:$0xf] }
 0x1f7   : > { %v15130_v5 = vld [vmem:[%s19447_s22 + $0x1a20] sm:$0xf0]  ;;  %6160 = vmatmul.bf16.vlgmr.msra.gmra.mxu0 %v19711_v24  ;;  %v17605_v9 = vld [vmem:[%s19447_s22 + $0x524] sm:$0xf0] }
 0x1f8   : > { %v15133_v30 = vor.u32 %v18272_v4, %v15130_v5  ;;  %6185 = vmatpush.bf16.msra.mxu2 %v14877_v26  ;;  %6204 = vmatpush.bf16.msrb.mxu0 %v12033_v32  ;;  %v11936_v4 = vld [vmem:[%s19447_s22 + $0x108] sm:$0xf]  ;;  %v5889_v21 = vadd.f32 %v19911_v34, %v5876_v61  ;;  %v20039_v26 = vpop.f32.mrf.mxu1  ;;  %v12449_v29 = vor.u32 %v17605_v9, %v12448_v14 }
 0x1f9   : > { %6173 = vmatmul.bf16.vlgmr.msra.gmra.mxu1 %v19717_v28  ;;  %v17477_v5 = vld [vmem:[%s19447_s22 + $0x124] sm:$0xf0] }
 0x1fa   : > { %6198 = vmatpush.bf16.msra.mxu3 %v15133_v30  ;;  %6217 = vmatpush.bf16.msrb.mxu1 %v12289_v33  ;;  %v12704_v15 = vld [vmem:[%s19447_s22 + $0x708] sm:$0xf]  ;;  %v11937_v22 = vor.u32 %v17477_v5, %v11936_v4  ;;  %v5902_v44 = vadd.f32 %v19957_v58, %v5889_v21 }
 0x1fb   : > { %6186 = vmatmul.bf16.vlgmr.msra.gmra.mxu2 %v19784_v12  ;;  %v17669_v19 = vld [vmem:[%s19447_s22 + $0x724] sm:$0xf0] }
 0x1fc   : > { %6230 = vmatpush.bf16.msrb.mxu2 %v12545_v36  ;;  %6205 = vmatpush.bf16.msrb.mxu0 %v12001_v50  ;;  %v11904_v30 = vld [vmem:[%s19447_s22 + $0xc8] sm:$0xf]  ;;  %v12705_v36 = vor.u32 %v17669_v19, %v12704_v15  ;;  %v5955_v62 = vpop.f32.mrf.mxu0  ;;  %v5915_v13 = vadd.f32 %v19962_v2, %v5902_v44  ;;  %v5994_v44 = vpop.f32.mrf.mxu3 }
 0x1fd   : > { %6199 = vmatmul.bf16.vlgmr.msra.gmra.mxu3 %v19789_v16  ;;  %v17469_v32 = vld [vmem:[%s19447_s22 + $0xe4] sm:$0xf0] }
 0x1fe   : > { %6243 = vmatpush.bf16.msrb.mxu3 %v12801_v43  ;;  %6218 = vmatpush.bf16.msrb.mxu1 %v12257_v51  ;;  %v12160_v33 = vld [vmem:[%s19447_s22 + $0x2c8] sm:$0xf]  ;;  %v11905_v45 = vor.u32 %v17469_v32, %v11904_v30  ;;  %v5928_v9 = vadd.f32 %v19972_v23, %v5915_v13 }
 0x1ff   : > { %v17533_v37 = vld [vmem:[%s19447_s22 + $0x2e4] sm:$0xf0] }
 0x200   : > { %6231 = vmatpush.bf16.msrb.mxu2 %v12513_v52  ;;  %6206 = vmatpush.bf16.msrb.mxu0 %v11969_v63  ;;  %v12416_v34 = vld [vmem:[%s19447_s22 + $0x4c8] sm:$0xf]  ;;  %v12161_v46 = vor.u32 %v17533_v37, %v12160_v33  ;;  %v20053_v52 = vpop.f32.mrf.mxu2  ;;  %v5968_v60 = vpop.f32.mrf.mxu1 }
 0x201   : > { %v17597_v40 = vld [vmem:[%s19447_s22 + $0x4e4] sm:$0xf0] }
 0x202   : > { %6244 = vmatpush.bf16.msrb.mxu3 %v12769_v56  ;;  %6219 = vmatpush.bf16.msrb.mxu1 %v12225_v1  ;;  %v12672_v42 = vld [vmem:[%s19447_s22 + $0x6c8] sm:$0xf]  ;;  %v12417_v47 = vor.u32 %v17597_v40, %v12416_v34 }
 0x203   : > { %v17661_v43 = vld [vmem:[%s19447_s22 + $0x6e4] sm:$0xf0] }
 0x204   : > { %6232 = vmatpush.bf16.msrb.mxu2 %v12481_v3  ;;  %6207 = vmatpush.bf16.msrb.mxu0 %v11937_v22  ;;  %v11872_v48 = vld [vmem:[%s19447_s22 + $0x88] sm:$0xf]  ;;  %v12673_v51 = vor.u32 %v17661_v43, %v12672_v42  ;;  %v6005_v44 = vpop.f32.mrf.mxu0 }
 0x205   : > { %v17461_v49 = vld [vmem:[%s19447_s22 + $0xa4] sm:$0xf0] }
 0x206   : > { %6245 = vmatpush.bf16.msrb.mxu3 %v12737_v7  ;;  %6220 = vmatpush.bf16.msrb.mxu1 %v12193_v27  ;;  %v12128_v50 = vld [vmem:[%s19447_s22 + $0x288] sm:$0xf]  ;;  %v11873_v59 = vor.u32 %v17461_v49, %v11872_v48 }
 0x207   : > { %v17525_v53 = vld [vmem:[%s19447_s22 + $0x2a4] sm:$0xf0] }
 0x208   : > { %6233 = vmatpush.bf16.msrb.mxu2 %v12449_v29  ;;  %v12384_v54 = vld [vmem:[%s19447_s22 + $0x488] sm:$0xf]  ;;  %6208 = vmatpush.bf16.msrb.mxu0 %v11905_v45  ;;  %v12129_v61 = vor.u32 %v17525_v53, %v12128_v50  ;;  %v5981_v34 = vpop.f32.mrf.mxu2  ;;  %v5941_v45 = vadd.f32 %v19977_v31, %v5928_v9 }
 0x209   : > { %v17589_v58 = vld [vmem:[%s19447_s22 + $0x4a4] sm:$0xf0] }
 0x20a   : > { %6246 = vmatpush.bf16.msrb.mxu3 %v12705_v36  ;;  %v12640_v56 = vld [vmem:[%s19447_s22 + $0x688] sm:$0xf]  ;;  %6221 = vmatpush.bf16.msrb.mxu1 %v12161_v46  ;;  %v12385_v63 = vor.u32 %v17589_v58, %v12384_v54  ;;  %v5954_v58 = vadd.f32 %v20034_v11, %v5941_v45 }
 0x20b   : > { %v17653_v57 = vld [vmem:[%s19447_s22 + $0x6a4] sm:$0xf0] }
 0x20c   : > { %6234 = vmatpush.bf16.msrb.mxu2 %v12417_v47  ;;  %v11840_v1 = vld [vmem:[%s19447_s22 + $0x48] sm:$0xf]  ;;  %v12641_v5 = vor.u32 %v17653_v57, %v12640_v56  ;;  %6209 = vmatpush.bf16.msrb.mxu0 %v11873_v59 }
 0x20d   : > { %v17453_v3 = vld [vmem:[%s19447_s22 + $0x64] sm:$0xf0] }
 0x20e   : > { %v12096_v4 = vld [vmem:[%s19447_s22 + $0x248] sm:$0xf]  ;;  %6247 = vmatpush.bf16.msrb.mxu3 %v12673_v51  ;;  %v11841_v15 = vor.u32 %v17453_v3, %v11840_v1  ;;  %6222 = vmatpush.bf16.msrb.mxu1 %v12129_v61 }
 0x20f   : > { %v17517_v6 = vld [vmem:[%s19447_s22 + $0x264] sm:$0xf0] }
 0x210   : > { %v12352_v2 = vld [vmem:[%s19447_s22 + $0x448] sm:$0xf]  ;;  %6235 = vmatpush.bf16.msrb.mxu2 %v12385_v63  ;;  %v12097_v22 = vor.u32 %v17517_v6, %v12096_v4  ;;  %6210 = vmatpush.bf16.msrb.mxu0 %v11841_v15 }
 0x211   : > { %v17581_v7 = vld [vmem:[%s19447_s22 + $0x464] sm:$0xf0] }
 0x212   : > { %v12608_v8 = vld [vmem:[%s19447_s22 + $0x648] sm:$0xf]  ;;  %v12353_v27 = vor.u32 %v17581_v7, %v12352_v2  ;;  %6248 = vmatpush.bf16.msrb.mxu3 %v12641_v5  ;;  %6223 = vmatpush.bf16.msrb.mxu1 %v12097_v22  ;;  %v5967_v5 = vadd.f32 %v20039_v26, %v5954_v58 }
 0x213   : > { %v17645_v14 = vld [vmem:[%s19447_s22 + $0x664] sm:$0xf0] }
 0x214   : > { %v11808_v19 = vld [vmem:[%s19447_s22 + $0x8] sm:$0xf]  ;;  %v12609_v23 = vor.u32 %v17645_v14, %v12608_v8  ;;  %6236 = vmatpush.bf16.msrb.mxu2 %v12353_v27  ;;  %v5980_v15 = vadd.f32 %v20053_v52, %v5967_v5 }
 0x215   : > { %v17445_v21 = vld [vmem:[%s19447_s22 + $0x24] sm:$0xf0] }
 0x216   : > { %v12064_v29 = vld [vmem:[%s19447_s22 + $0x208] sm:$0xf]  ;;  %v11809_v46 = vor.u32 %v17445_v21, %v11808_v19  ;;  %6249 = vmatpush.bf16.msrb.mxu3 %v12609_v23 }
 0x217   : > { %v17509_v30 = vld [vmem:[%s19447_s22 + $0x224] sm:$0xf0] }
 0x218   : > { %v12320_v32 = vld [vmem:[%s19447_s22 + $0x408] sm:$0xf]  ;;  %v12065_v50 = vor.u32 %v17509_v30, %v12064_v29  ;;  %6211 = vmatpush.bf16.msrb.mxu0 %v11809_v46 }
 0x219   : > { %v17573_v33 = vld [vmem:[%s19447_s22 + $0x424] sm:$0xf0] }
 0x21a   : > { %v12576_v36 = vld [vmem:[%s19447_s22 + $0x608] sm:$0xf]  ;;  %v12321_v51 = vor.u32 %v17573_v33, %v12320_v32  ;;  %6224 = vmatpush.bf16.msrb.mxu1 %v12065_v50 }
 0x21b   : > { %v17637_v37 = vld [vmem:[%s19447_s22 + $0x624] sm:$0xf0]  ;;  %6212 = vmatmul.bf16.vlgmr.msrb.gmra.mxu0 %v19563_v10 }
 0x21c   : > { %v13056_v40 = vld [vmem:[%s19447_s22 + $0x9c8] sm:$0xf]  ;;  %v12577_v31 = vor.u32 %v17637_v37, %v12576_v36  ;;  %6237 = vmatpush.bf16.msrb.mxu2 %v12321_v51  ;;  %v5993_v37 = vadd.f32 %v20058_v55, %v5980_v15  ;;  %v6018_v55 = vpop.f32.mrf.mxu1 }
 0x21d   : > { %v17757_v42 = vld [vmem:[%s19447_s22 + $0x9e4] sm:$0xf0]  ;;  %6225 = vmatmul.bf16.vlgmr.msrb.gmra.mxu1 %v19572_v18 }
 0x21e   : > { %v13312_v43 = vld [vmem:[%s19447_s22 + $0xbc8] sm:$0xf]  ;;  %v13057_v56 = vor.u32 %v17757_v42, %v13056_v40  ;;  %6250 = vmatpush.bf16.msrb.mxu3 %v12577_v31 }
 0x21f   : > { %v17821_v47 = vld [vmem:[%s19447_s22 + $0xbe4] sm:$0xf0]  ;;  %6238 = vmatmul.bf16.vlgmr.msrb.gmra.mxu2 %v19554_v0 }
 0x220   : > { %v13568_v48 = vld [vmem:[%s19447_s22 + $0xdc8] sm:$0xf]  ;;  %v13313_v57 = vor.u32 %v17821_v47, %v13312_v43  ;;  %6256 = vmatpush.bf16.msra.mxu0 %v13057_v56  ;;  %v6006_v47 = vadd.f32 %v6005_v44, %v5993_v37 }
 0x221   : > { %v17885_v49 = vld [vmem:[%s19447_s22 + $0xde4] sm:$0xf0]  ;;  %6251 = vmatmul.bf16.vlgmr.msrb.gmra.mxu3 %v19570_v17 }
 0x222   : > { %v13824_v53 = vld [vmem:[%s19447_s22 + $0xfc8] sm:$0xf]  ;;  %v13569_v62 = vor.u32 %v17885_v49, %v13568_v48  ;;  %6269 = vmatpush.bf16.msra.mxu1 %v13313_v57  ;;  %v428_v49 = vld [vmem:[#allocation2 + $0x30] sm:$0xff]  ;;  %v6019_v56 = vadd.f32 %v6018_v55, %v6006_v47 }
 0x223   : > { %v17949_v54 = vld [vmem:[%s19447_s22 + $0xfe4] sm:$0xf0] }
 0x224   : > { %v13024_v13 = vld [vmem:[%s19447_s22 + $0x988] sm:$0xf]  ;;  %v13825_v61 = vor.u32 %v17949_v54, %v13824_v53  ;;  %6282 = vmatpush.bf16.msra.mxu2 %v13569_v62 }
 0x225   : > { %v17749_v59 = vld [vmem:[%s19447_s22 + $0x9a4] sm:$0xf0] }
 0x226   : > { %v13280_v60 = vld [vmem:[%s19447_s22 + $0xb88] sm:$0xf]  ;;  %v13025_v6 = vor.u32 %v17749_v59, %v13024_v13  ;;  %6295 = vmatpush.bf16.msra.mxu3 %v13825_v61  ;;  %v7296_v61 = vadd.f32 %v6019_v56, %v428_v49 }
 0x227   : > { %v17813_v63 = vld [vmem:[%s19447_s22 + $0xba4] sm:$0xf0] }
 0x228   : > { %v13536_v1 = vld [vmem:[%s19447_s22 + $0xd88] sm:$0xf]  ;;  %v13281_v2 = vor.u32 %v17813_v63, %v13280_v60  ;;  %6257 = vmatpush.bf16.msra.mxu0 %v13025_v6  ;;  %7304 = vst [vmem:[#allocation2 + $0x30] sm:$0xff] %v7296_v61 }
 0x229   : > { %v17877_v3 = vld [vmem:[%s19447_s22 + $0xda4] sm:$0xf0] }
 0x22a   : > { %v13792_v11 = vld [vmem:[%s19447_s22 + $0xf88] sm:$0xf]  ;;  %v13537_v7 = vor.u32 %v17877_v3, %v13536_v1  ;;  %6270 = vmatpush.bf16.msra.mxu1 %v13281_v2 }
 0x22b   : > { %v17941_v4 = vld [vmem:[%s19447_s22 + $0xfa4] sm:$0xf0] }
 0x22c   : > { %v12992_v8 = vld [vmem:[%s19447_s22 + $0x948] sm:$0xf]  ;;  %v13793_v19 = vor.u32 %v17941_v4, %v13792_v11  ;;  %6283 = vmatpush.bf16.msra.mxu2 %v13537_v7 }
 0x22d   : > { %v17741_v14 = vld [vmem:[%s19447_s22 + $0x964] sm:$0xf0] }
 0x22e   : > { %v13248_v9 = vld [vmem:[%s19447_s22 + $0xb48] sm:$0xf]  ;;  %v12993_v52 = vor.u32 %v17741_v14, %v12992_v8  ;;  %6296 = vmatpush.bf16.msra.mxu3 %v13793_v19  ;;  %v6031_v14 = vpop.f32.mrf.mxu2  ;;  %v6044_v19 = vpop.f32.mrf.mxu3 }
 0x22f   : > { %v17805_v21 = vld [vmem:[%s19447_s22 + $0xb64] sm:$0xf0] }
 0x230   : > { %v13504_v26 = vld [vmem:[%s19447_s22 + $0xd48] sm:$0xf]  ;;  %v13249_v30 = vor.u32 %v17805_v21, %v13248_v9  ;;  %6258 = vmatpush.bf16.msra.mxu0 %v12993_v52  ;;  %v6007_v21 = vpop.f32.mrf.mxu0 }
 0x231   : > { %v17869_v22 = vld [vmem:[%s19447_s22 + $0xd64] sm:$0xf0] }
 0x232   : > { %v13760_v27 = vld [vmem:[%s19447_s22 + $0xf48] sm:$0xf]  ;;  %v13505_v32 = vor.u32 %v17869_v22, %v13504_v26  ;;  %6271 = vmatpush.bf16.msra.mxu1 %v13249_v30  ;;  %v20137_v22 = vadd.f32 %v6044_v19, %v6031_v14 }
 0x233   : > { %v17933_v29 = vld [vmem:[%s19447_s22 + $0xf64] sm:$0xf0] }
 0x234   : > { %v12960_v23 = vld [vmem:[%s19447_s22 + $0x908] sm:$0xf]  ;;  %v13761_v34 = vor.u32 %v17933_v29, %v13760_v27  ;;  %6284 = vmatpush.bf16.msra.mxu2 %v13505_v32  ;;  %v6020_v27 = vpop.f32.mrf.mxu1 }
 0x235   : > { %v17733_v33 = vld [vmem:[%s19447_s22 + $0x924] sm:$0xf0] }
 0x236   : > { %v13216_v36 = vld [vmem:[%s19447_s22 + $0xb08] sm:$0xf]  ;;  %v12961_v48 = vor.u32 %v17733_v33, %v12960_v23  ;;  %6297 = vmatpush.bf16.msra.mxu3 %v13761_v34 }
 0x237   : > { %v17797_v40 = vld [vmem:[%s19447_s22 + $0xb24] sm:$0xf0] }
 0x238   : > { %v13472_v42 = vld [vmem:[%s19447_s22 + $0xd08] sm:$0xf]  ;;  %v13217_v50 = vor.u32 %v17797_v40, %v13216_v36  ;;  %6259 = vmatpush.bf16.msra.mxu0 %v12961_v48 }
 0x239   : > { %v17861_v43 = vld [vmem:[%s19447_s22 + $0xd24] sm:$0xf0] }
 0x23a   : > { %v13728_v45 = vld [vmem:[%s19447_s22 + $0xf08] sm:$0xf]  ;;  %v13473_v51 = vor.u32 %v17861_v43, %v13472_v42  ;;  %6272 = vmatpush.bf16.msra.mxu1 %v13217_v50 }
 0x23b   : > { %v17925_v46 = vld [vmem:[%s19447_s22 + $0xf24] sm:$0xf0] }
 0x23c   : > { %v12928_v53 = vld [vmem:[%s19447_s22 + $0x8c8] sm:$0xf]  ;;  %v13729_v31 = vor.u32 %v17925_v46, %v13728_v45  ;;  %6285 = vmatpush.bf16.msra.mxu2 %v13473_v51 }
 0x23d   : > { %v17725_v54 = vld [vmem:[%s19447_s22 + $0x8e4] sm:$0xf0] }
 0x23e   : > { %v13184_v58 = vld [vmem:[%s19447_s22 + $0xac8] sm:$0xf]  ;;  %v12929_v63 = vor.u32 %v17725_v54, %v12928_v53  ;;  %6298 = vmatpush.bf16.msra.mxu3 %v13729_v31 }
 0x23f   : > { %v17789_v57 = vld [vmem:[%s19447_s22 + $0xae4] sm:$0xf0] }
 0x240   : > { %v13440_v62 = vld [vmem:[%s19447_s22 + $0xcc8] sm:$0xf]  ;;  %v13185_v3 = vor.u32 %v17789_v57, %v13184_v58  ;;  %6260 = vmatpush.bf16.msra.mxu0 %v12929_v63  ;;  %v6033_v58 = vpop.f32.mrf.mxu2 }
 0x241   : > { %v17853_v13 = vld [vmem:[%s19447_s22 + $0xce4] sm:$0xf0] }
 0x242   : > { %v13696_v59 = vld [vmem:[%s19447_s22 + $0xec8] sm:$0xf]  ;;  %v13441_v11 = vor.u32 %v17853_v13, %v13440_v62  ;;  %6273 = vmatpush.bf16.msra.mxu1 %v13185_v3  ;;  %v6046_v62 = vpop.f32.mrf.mxu3 }
 0x243   : > { %v17917_v60 = vld [vmem:[%s19447_s22 + $0xee4] sm:$0xf0] }
 0x244   : > { %v12896_v1 = vld [vmem:[%s19447_s22 + $0x888] sm:$0xf]  ;;  %v13697_v2 = vor.u32 %v17917_v60, %v13696_v59  ;;  %6286 = vmatpush.bf16.msra.mxu2 %v13441_v11 }
 0x245   : > { %v17717_v4 = vld [vmem:[%s19447_s22 + $0x8a4] sm:$0xf0] }
 0x246   : > { %v13152_v5 = vld [vmem:[%s19447_s22 + $0xa88] sm:$0xf]  ;;  %v12897_v26 = vor.u32 %v17717_v4, %v12896_v1  ;;  %6299 = vmatpush.bf16.msra.mxu3 %v13697_v2 }
 0x247   : > { %v17781_v6 = vld [vmem:[%s19447_s22 + $0xaa4] sm:$0xf0] }
 0x248   : > { %v13408_v7 = vld [vmem:[%s19447_s22 + $0xc88] sm:$0xf]  ;;  %v13153_v29 = vor.u32 %v17781_v6, %v13152_v5  ;;  %6261 = vmatpush.bf16.msra.mxu0 %v12897_v26 }
 0x249   : > { %v17845_v8 = vld [vmem:[%s19447_s22 + $0xca4] sm:$0xf0] }
 0x24a   : > { %v13664_v9 = vld [vmem:[%s19447_s22 + $0xe88] sm:$0xf]  ;;  %v13409_v52 = vor.u32 %v17845_v8, %v13408_v7  ;;  %6274 = vmatpush.bf16.msra.mxu1 %v13153_v29 }
 0x24b   : > { %v17909_v15 = vld [vmem:[%s19447_s22 + $0xea4] sm:$0xf0] }
 0x24c   : > { %v12864_v30 = vld [vmem:[%s19447_s22 + $0x848] sm:$0xf]  ;;  %v13665_v33 = vor.u32 %v17909_v15, %v13664_v9  ;;  %6287 = vmatpush.bf16.msra.mxu2 %v13409_v52 }
 0x24d   : > { %v17709_v32 = vld [vmem:[%s19447_s22 + $0x864] sm:$0xf0] }
 0x24e   : > { %v13120_v23 = vld [vmem:[%s19447_s22 + $0xa48] sm:$0xf]  ;;  %v12865_v43 = vor.u32 %v17709_v32, %v12864_v30  ;;  %6300 = vmatpush.bf16.msra.mxu3 %v13665_v33 }
 0x24f   : > { %v17773_v36 = vld [vmem:[%s19447_s22 + $0xa64] sm:$0xf0] }
 0x250   : > { %v13376_v37 = vld [vmem:[%s19447_s22 + $0xc48] sm:$0xf]  ;;  %v13121_v46 = vor.u32 %v17773_v36, %v13120_v23  ;;  %6262 = vmatpush.bf16.msra.mxu0 %v12865_v43 }
 0x251   : > { %v17837_v34 = vld [vmem:[%s19447_s22 + $0xc64] sm:$0xf0] }
 0x252   : > { %v13632_v40 = vld [vmem:[%s19447_s22 + $0xe48] sm:$0xf]  ;;  %v13377_v47 = vor.u32 %v17837_v34, %v13376_v37  ;;  %6275 = vmatpush.bf16.msra.mxu1 %v13121_v46 }
 0x253   : > { %v17901_v42 = vld [vmem:[%s19447_s22 + $0xe64] sm:$0xf0] }
 0x254   : > { %v12832_v44 = vld [vmem:[%s19447_s22 + $0x808] sm:$0xf]  ;;  %v13633_v50 = vor.u32 %v17901_v42, %v13632_v40  ;;  %6288 = vmatpush.bf16.msra.mxu2 %v13377_v47 }
 0x255   : > { %v17701_v45 = vld [vmem:[%s19447_s22 + $0x824] sm:$0xf0] }
 0x256   : > { %v13088_v48 = vld [vmem:[%s19447_s22 + $0xa08] sm:$0xf]  ;;  %v12833_v13 = vor.u32 %v17701_v45, %v12832_v44  ;;  %6301 = vmatpush.bf16.msra.mxu3 %v13633_v50 }
 0x257   : > { %v17765_v49 = vld [vmem:[%s19447_s22 + $0xa24] sm:$0xf0] }
 0x258   : > { %v13344_v55 = vld [vmem:[%s19447_s22 + $0xc08] sm:$0xf]  ;;  %v13089_v63 = vor.u32 %v17765_v49, %v13088_v48  ;;  %6263 = vmatpush.bf16.msra.mxu0 %v12833_v13 }
 0x259   : > { %v17829_v51 = vld [vmem:[%s19447_s22 + $0xc24] sm:$0xf0] }
 0x25a   : > { %v13600_v53 = vld [vmem:[%s19447_s22 + $0xe08] sm:$0xf]  ;;  %v13345_v1 = vor.u32 %v17829_v51, %v13344_v55  ;;  %6276 = vmatpush.bf16.msra.mxu1 %v13089_v63 }
 0x25b   : > { %v17893_v54 = vld [vmem:[%s19447_s22 + $0xe24] sm:$0xf0]  ;;  %6264 = vmatmul.bf16.vlgmr.msra.gmra.mxu0 %v19633_v38 }
 0x25c   : > { %v14080_v31 = vld [vmem:[%s19447_s22 + $0x11c8] sm:$0xf]  ;;  %v13601_v4 = vor.u32 %v17893_v54, %v13600_v53  ;;  %6289 = vmatpush.bf16.msra.mxu2 %v13345_v1 }
 0x25d   : > { %v18013_v56 = vld [vmem:[%s19447_s22 + $0x11e4] sm:$0xf0]  ;;  %6277 = vmatmul.bf16.vlgmr.msra.gmra.mxu1 %v19637_v41 }
 0x25e   : > { %v14336_v57 = vld [vmem:[%s19447_s22 + $0x13c8] sm:$0xf]  ;;  %v14081_v5 = vor.u32 %v18013_v56, %v14080_v31  ;;  %6302 = vmatpush.bf16.msra.mxu3 %v13601_v4  ;;  %v20191_v56 = vpop.f32.mrf.mxu0 }
 0x25f   : > { %v18077_v59 = vld [vmem:[%s19447_s22 + $0x13e4] sm:$0xf0]  ;;  %6290 = vmatmul.bf16.vlgmr.msra.gmra.mxu2 %v19629_v35 }
 0x260   : > { %v14592_v60 = vld [vmem:[%s19447_s22 + $0x15c8] sm:$0xf]  ;;  %v14337_v6 = vor.u32 %v18077_v59, %v14336_v57  ;;  %6308 = vmatpush.bf16.msrb.mxu0 %v14081_v5 }
 0x261   : > { %v18141_v61 = vld [vmem:[%s19447_s22 + $0x15e4] sm:$0xf0]  ;;  %6303 = vmatmul.bf16.vlgmr.msra.gmra.mxu3 %v19635_v39 }
 0x262   : > { %v14848_v3 = vld [vmem:[%s19447_s22 + $0x17c8] sm:$0xf]  ;;  %v14593_v2 = vor.u32 %v18141_v61, %v14592_v60  ;;  %6321 = vmatpush.bf16.msrb.mxu1 %v14337_v6  ;;  %v20196_v61 = vpop.f32.mrf.mxu1 }
 0x263   : > { %v18205_v11 = vld [vmem:[%s19447_s22 + $0x17e4] sm:$0xf0] }
 0x264   : > { %v14048_v7 = vld [vmem:[%s19447_s22 + $0x1188] sm:$0xf]  ;;  %v14849_v9 = vor.u32 %v18205_v11, %v14848_v3  ;;  %6334 = vmatpush.bf16.msrb.mxu2 %v14593_v2 }
 0x265   : > { %v18005_v8 = vld [vmem:[%s19447_s22 + $0x11a4] sm:$0xf0] }
 0x266   : > { %v14304_v14 = vld [vmem:[%s19447_s22 + $0x1388] sm:$0xf]  ;;  %v14049_v29 = vor.u32 %v18005_v8, %v14048_v7  ;;  %6347 = vmatpush.bf16.msrb.mxu3 %v14849_v9 }
 0x267   : > { %v18069_v15 = vld [vmem:[%s19447_s22 + $0x13a4] sm:$0xf0] }
 0x268   : > { %v14560_v19 = vld [vmem:[%s19447_s22 + $0x1588] sm:$0xf]  ;;  %v14305_v52 = vor.u32 %v18069_v15, %v14304_v14  ;;  %6309 = vmatpush.bf16.msrb.mxu0 %v14049_v29  ;;  %v20206_v15 = vpop.f32.mrf.mxu2  ;;  %v20211_v29 = vpop.f32.mrf.mxu3 }
 0x269   : > { %v18133_v21 = vld [vmem:[%s19447_s22 + $0x15a4] sm:$0xf0] }
 0x26a   : > { %v14816_v26 = vld [vmem:[%s19447_s22 + $0x1788] sm:$0xf]  ;;  %v14561_v30 = vor.u32 %v18133_v21, %v14560_v19  ;;  %6322 = vmatpush.bf16.msrb.mxu1 %v14305_v52 }
 0x26b   : > { %v18197_v27 = vld [vmem:[%s19447_s22 + $0x17a4] sm:$0xf0] }
 0x26c   : > { %v14016_v32 = vld [vmem:[%s19447_s22 + $0x1148] sm:$0xf]  ;;  %v14817_v36 = vor.u32 %v18197_v27, %v14816_v26  ;;  %6335 = vmatpush.bf16.msrb.mxu2 %v14561_v30 }
 0x26d   : > { %v17997_v23 = vld [vmem:[%s19447_s22 + $0x1164] sm:$0xf0] }
 0x26e   : > { %v14272_v33 = vld [vmem:[%s19447_s22 + $0x1348] sm:$0xf]  ;;  %v14017_v44 = vor.u32 %v17997_v23, %v14016_v32  ;;  %6348 = vmatpush.bf16.msrb.mxu3 %v14817_v36  ;;  %v6059_v23 = vpop.f32.mrf.mxu0 }
 0x26f   : > { %v18061_v37 = vld [vmem:[%s19447_s22 + $0x1364] sm:$0xf0] }
 0x270   : > { %v14528_v34 = vld [vmem:[%s19447_s22 + $0x1548] sm:$0xf]  ;;  %v14273_v45 = vor.u32 %v18061_v37, %v14272_v33  ;;  %6310 = vmatpush.bf16.msrb.mxu0 %v14017_v44 }
 0x271   : > { %v18125_v40 = vld [vmem:[%s19447_s22 + $0x1564] sm:$0xf0] }
 0x272   : > { %v14784_v42 = vld [vmem:[%s19447_s22 + $0x1748] sm:$0xf]  ;;  %v14529_v46 = vor.u32 %v18125_v40, %v14528_v34  ;;  %6323 = vmatpush.bf16.msrb.mxu1 %v14273_v45 }
 0x273   : > { %v18189_v43 = vld [vmem:[%s19447_s22 + $0x1764] sm:$0xf0] }
 0x274   : > { %v13984_v47 = vld [vmem:[%s19447_s22 + $0x1108] sm:$0xf]  ;;  %v14785_v55 = vor.u32 %v18189_v43, %v14784_v42  ;;  %6336 = vmatpush.bf16.msrb.mxu2 %v14529_v46  ;;  %v6072_v42 = vpop.f32.mrf.mxu1 }
 0x275   : > { %v17989_v48 = vld [vmem:[%s19447_s22 + $0x1124] sm:$0xf0] }
 0x276   : > { %v14240_v49 = vld [vmem:[%s19447_s22 + $0x1308] sm:$0xf]  ;;  %v13985_v31 = vor.u32 %v17989_v48, %v13984_v47  ;;  %6349 = vmatpush.bf16.msrb.mxu3 %v14785_v55 }
 0x277   : > { %v18053_v50 = vld [vmem:[%s19447_s22 + $0x1324] sm:$0xf0] }
 0x278   : > { %v14496_v51 = vld [vmem:[%s19447_s22 + $0x1508] sm:$0xf]  ;;  %v14241_v57 = vor.u32 %v18053_v50, %v14240_v49  ;;  %6311 = vmatpush.bf16.msrb.mxu0 %v13985_v31 }
 0x279   : > { %v18117_v53 = vld [vmem:[%s19447_s22 + $0x1524] sm:$0xf0] }
 0x27a   : > { %v14752_v54 = vld [vmem:[%s19447_s22 + $0x1708] sm:$0xf]  ;;  %v14497_v62 = vor.u32 %v18117_v53, %v14496_v51  ;;  %6324 = vmatpush.bf16.msrb.mxu1 %v14241_v57  ;;  %v6085_v57 = vpop.f32.mrf.mxu2 }
 0x27b   : > { %v18181_v58 = vld [vmem:[%s19447_s22 + $0x1724] sm:$0xf0] }
 0x27c   : > { %v13952_v13 = vld [vmem:[%s19447_s22 + $0x10c8] sm:$0xf]  ;;  %v14753_v63 = vor.u32 %v18181_v58, %v14752_v54  ;;  %6337 = vmatpush.bf16.msrb.mxu2 %v14497_v62 }
 0x27d   : > { %v17981_v59 = vld [vmem:[%s19447_s22 + $0x10e4] sm:$0xf0] }
 0x27e   : > { %v14208_v60 = vld [vmem:[%s19447_s22 + $0x12c8] sm:$0xf]  ;;  %v13953_v6 = vor.u32 %v17981_v59, %v13952_v13  ;;  %6350 = vmatpush.bf16.msrb.mxu3 %v14753_v63  ;;  %v6098_v63 = vpop.f32.mrf.mxu3 }
 0x27f   : > { %v18045_v1 = vld [vmem:[%s19447_s22 + $0x12e4] sm:$0xf0]  ;;  %v17473_v63 = vld [vmem:[%s19447_s22 + $0x10c] sm:$0xf] }
 0x280   : > { %v14464_v3 = vld [vmem:[%s19447_s22 + $0x14c8] sm:$0xf]  ;;  %v14209_v2 = vor.u32 %v18045_v1, %v14208_v60  ;;  %6312 = vmatpush.bf16.msrb.mxu0 %v13953_v6  ;;  %v17497_v6 = vld [vmem:[%s19447_s22 + $0x1cc] sm:$0xf] }
 0x281   : > { %v18109_v11 = vld [vmem:[%s19447_s22 + $0x14e4] sm:$0xf0] }
 0x282   : > { %v14720_v4 = vld [vmem:[%s19447_s22 + $0x16c8] sm:$0xf]  ;;  %v14465_v7 = vor.u32 %v18109_v11, %v14464_v3  ;;  %6325 = vmatpush.bf16.msrb.mxu1 %v14209_v2  ;;  %v12034_v2 = vld [vmem:[%s19447_s22 + $0x1e8] sm:$0xf0] }
 0x283   : > { %v18173_v5 = vld [vmem:[%s19447_s22 + $0x16e4] sm:$0xf0] }
 0x284   : > { %v13920_v8 = vld [vmem:[%s19447_s22 + $0x1088] sm:$0xf]  ;;  %v14721_v19 = vor.u32 %v18173_v5, %v14720_v4  ;;  %6338 = vmatpush.bf16.msrb.mxu2 %v14465_v7 }
 0x285   : > { %v17973_v14 = vld [vmem:[%s19447_s22 + $0x10a4] sm:$0xf0] }
 0x286   : > { %v14176_v9 = vld [vmem:[%s19447_s22 + $0x1288] sm:$0xf]  ;;  %v13921_v32 = vor.u32 %v17973_v14, %v13920_v8  ;;  %6351 = vmatpush.bf16.msrb.mxu3 %v14721_v19  ;;  %v17561_v14 = vld [vmem:[%s19447_s22 + $0x3cc] sm:$0xf] }
 0x287   : > { %v18037_v21 = vld [vmem:[%s19447_s22 + $0x12a4] sm:$0xf0] }
 0x288   : > { %v14432_v26 = vld [vmem:[%s19447_s22 + $0x1488] sm:$0xf]  ;;  %v14177_v33 = vor.u32 %v18037_v21, %v14176_v9  ;;  %6313 = vmatpush.bf16.msrb.mxu0 %v13921_v32  ;;  %v12290_v9 = vld [vmem:[%s19447_s22 + $0x3e8] sm:$0xf0] }
 0x289   : > { %v18101_v27 = vld [vmem:[%s19447_s22 + $0x14a4] sm:$0xf0]  ;;  %v12293_v23 = vor.u32 %v17561_v14, %v12290_v9 }
 0x28a   : > { %v14688_v52 = vld [vmem:[%s19447_s22 + $0x1688] sm:$0xf]  ;;  %v14433_v36 = vor.u32 %v18101_v27, %v14432_v26  ;;  %6326 = vmatpush.bf16.msrb.mxu1 %v14177_v33  ;;  %v12037_v27 = vor.u32 %v17497_v6, %v12034_v2  ;;  %v20269_v6 = vpop.f32.mrf.mxu1 }
 0x28b   : > { %v18165_v30 = vld [vmem:[%s19447_s22 + $0x16a4] sm:$0xf0] }
 0x28c   : > { %v13888_v37 = vld [vmem:[%s19447_s22 + $0x1048] sm:$0xf]  ;;  %v14689_v43 = vor.u32 %v18165_v30, %v14688_v52  ;;  %6339 = vmatpush.bf16.msrb.mxu2 %v14433_v36  ;;  %v17489_v36 = vld [vmem:[%s19447_s22 + $0x18c] sm:$0xf] }
 0x28d   : > { %v17965_v34 = vld [vmem:[%s19447_s22 + $0x1064] sm:$0xf0] }
 0x28e   : > { %v14144_v40 = vld [vmem:[%s19447_s22 + $0x1248] sm:$0xf]  ;;  %v13889_v49 = vor.u32 %v17965_v34, %v13888_v37  ;;  %6352 = vmatpush.bf16.msrb.mxu3 %v14689_v43  ;;  %v12002_v37 = vld [vmem:[%s19447_s22 + $0x1a8] sm:$0xf0] }
 0x28f   : > { %v18029_v44 = vld [vmem:[%s19447_s22 + $0x1264] sm:$0xf0]  ;;  %v17553_v34 = vld [vmem:[%s19447_s22 + $0x38c] sm:$0xf] }
 0x290   : > { %v14400_v45 = vld [vmem:[%s19447_s22 + $0x1448] sm:$0xf]  ;;  %v14145_v51 = vor.u32 %v18029_v44, %v14144_v40  ;;  %6314 = vmatpush.bf16.msrb.mxu0 %v13889_v49  ;;  %v12258_v40 = vld [vmem:[%s19447_s22 + $0x3a8] sm:$0xf0]  ;;  %v12005_v44 = vor.u32 %v17489_v36, %v12002_v37 }
 0x291   : > { %v18093_v46 = vld [vmem:[%s19447_s22 + $0x1464] sm:$0xf0] }
 0x292   : > { %v14656_v47 = vld [vmem:[%s19447_s22 + $0x1648] sm:$0xf]  ;;  %v14401_v53 = vor.u32 %v18093_v46, %v14400_v45  ;;  %6327 = vmatpush.bf16.msrb.mxu1 %v14145_v51  ;;  %v17545_v51 = vld [vmem:[%s19447_s22 + $0x34c] sm:$0xf] }
 0x293   : > { %v18157_v48 = vld [vmem:[%s19447_s22 + $0x1664] sm:$0xf0] }
 0x294   : > { %v13856_v55 = vld [vmem:[%s19447_s22 + $0x1008] sm:$0xf]  ;;  %v14657_v62 = vor.u32 %v18157_v48, %v14656_v47  ;;  %6340 = vmatpush.bf16.msrb.mxu2 %v14401_v53  ;;  %v12261_v48 = vor.u32 %v17553_v34, %v12258_v40  ;;  %v12226_v53 = vld [vmem:[%s19447_s22 + $0x368] sm:$0xf0] }
 0x295   : > { %v17957_v50 = vld [vmem:[%s19447_s22 + $0x1024] sm:$0xf0] }
 0x296   : > { %v14112_v54 = vld [vmem:[%s19447_s22 + $0x1208] sm:$0xf]  ;;  %v13857_v4 = vor.u32 %v17957_v50, %v13856_v55  ;;  %6353 = vmatpush.bf16.msrb.mxu3 %v14657_v62  ;;  %v17481_v55 = vld [vmem:[%s19447_s22 + $0x14c] sm:$0xf] }
 0x297   : > { %v18021_v58 = vld [vmem:[%s19447_s22 + $0x1224] sm:$0xf0]  ;;  %v11970_v50 = vld [vmem:[%s19447_s22 + $0x168] sm:$0xf0] }
 0x298   : > { %v14368_v31 = vld [vmem:[%s19447_s22 + $0x1408] sm:$0xf]  ;;  %v14113_v7 = vor.u32 %v18021_v58, %v14112_v54  ;;  %6315 = vmatpush.bf16.msrb.mxu0 %v13857_v4  ;;  %v12194_v4 = vld [vmem:[%s19447_s22 + $0x328] sm:$0xf0] }
 0x299   : > { %v18085_v13 = vld [vmem:[%s19447_s22 + $0x1424] sm:$0xf0] }
 0x29a   : > { %v14624_v59 = vld [vmem:[%s19447_s22 + $0x1608] sm:$0xf]  ;;  %v14369_v8 = vor.u32 %v18085_v13, %v14368_v31  ;;  %6328 = vmatpush.bf16.msrb.mxu1 %v14113_v7  ;;  %v11973_v31 = vor.u32 %v17481_v55, %v11970_v50  ;;  %v6124_v55 = vpop.f32.mrf.mxu1 }
 0x29b   : > { %v18149_v60 = vld [vmem:[%s19447_s22 + $0x1624] sm:$0xf0]  ;;  %6316 = vmatmul.bf16.vlgmr.msrb.gmra.mxu0 %v19706_v20  ;;  %v17617_v55 = vld [vmem:[%s19447_s22 + $0x58c] sm:$0xf] }
 0x29c   : > { %v15104_v1 = vld [vmem:[%s19447_s22 + $0x19c8] sm:$0xf]  ;;  %v14625_v19 = vor.u32 %v18149_v60, %v14624_v59  ;;  %6341 = vmatpush.bf16.msrb.mxu2 %v14369_v8  ;;  %v12229_v59 = vor.u32 %v17545_v51, %v12226_v53 }
 0x29d   : > { %v18269_v3 = vld [vmem:[%s19447_s22 + $0x19e4] sm:$0xf0]  ;;  %6329 = vmatmul.bf16.vlgmr.msrb.gmra.mxu1 %v19713_v25 }
 0x29e   : > { %v15360_v11 = vld [vmem:[%s19447_s22 + $0x1bc8] sm:$0xf]  ;;  %v15105_v21 = vor.u32 %v18269_v3, %v15104_v1  ;;  %6354 = vmatpush.bf16.msrb.mxu3 %v14625_v19  ;;  %v11938_v1 = vld [vmem:[%s19447_s22 + $0x128] sm:$0xf0]  ;;  %v20265_v3 = vpop.f32.mrf.mxu0 }
 0x29f   : > { %v18333_v5 = vld [vmem:[%s19447_s22 + $0x1be4] sm:$0xf0]  ;;  %6342 = vmatmul.bf16.vlgmr.msrb.gmra.mxu2 %v19711_v24  ;;  %v11941_v7 = vor.u32 %v17473_v63, %v11938_v1 }
 0x2a0   : > { %v15361_v26 = vor.u32 %v18333_v5, %v15360_v11  ;;  %v15072_v52 = vld [vmem:[%s19447_s22 + $0x1988] sm:$0xf]  ;;  %6360 = vmatpush.bf16.msra.mxu0 %v15105_v21  ;;  %6386 = vmatpush.bf16.msra.mxu2 %v12037_v27  ;;  %v17537_v11 = vld [vmem:[%s19447_s22 + $0x30c] sm:$0xf] }
 0x2a1   : > { %v18261_v30 = vld [vmem:[%s19447_s22 + $0x19a4] sm:$0xf0]  ;;  %6355 = vmatmul.bf16.vlgmr.msrb.gmra.mxu3 %v19717_v28  ;;  %v12197_v19 = vor.u32 %v17537_v11, %v12194_v4  ;;  %v11906_v27 = vld [vmem:[%s19447_s22 + $0xe8] sm:$0xf0] }
 0x2a2   : > { %v15328_v32 = vld [vmem:[%s19447_s22 + $0x1b88] sm:$0xf]  ;;  %v15073_v42 = vor.u32 %v18261_v30, %v15072_v52  ;;  %6373 = vmatpush.bf16.msra.mxu1 %v15361_v26  ;;  %6399 = vmatpush.bf16.msra.mxu3 %v12293_v23  ;;  %v17465_v26 = vld [vmem:[%s19447_s22 + $0xcc] sm:$0xf]  ;;  %v6058_v23 = vadd.f32 %v20191_v56, %v20137_v22 }
 0x2a3   : > { %v18325_v33 = vld [vmem:[%s19447_s22 + $0x1ba4] sm:$0xf0]  ;;  %v17529_v52 = vld [vmem:[%s19447_s22 + $0x2cc] sm:$0xf]  ;;  %v11909_v36 = vor.u32 %v17465_v26, %v11906_v27 }
 0x2a4   : > { %v15329_v43 = vor.u32 %v18325_v33, %v15328_v32  ;;  %v15040_v45 = vld [vmem:[%s19447_s22 + $0x1948] sm:$0xf]  ;;  %6361 = vmatpush.bf16.msra.mxu0 %v15073_v42  ;;  %6387 = vmatpush.bf16.msra.mxu2 %v12005_v44  ;;  %v12162_v30 = vld [vmem:[%s19447_s22 + $0x2e8] sm:$0xf0]  ;;  %v6071_v50 = vadd.f32 %v20196_v61, %v6058_v23 }
 0x2a5   : > { %v18253_v46 = vld [vmem:[%s19447_s22 + $0x1964] sm:$0xf0]  ;;  %v12165_v42 = vor.u32 %v17529_v52, %v12162_v30  ;;  %v17521_v22 = vld [vmem:[%s19447_s22 + $0x28c] sm:$0xf] }
 0x2a6   : > { %v15296_v47 = vld [vmem:[%s19447_s22 + $0x1b48] sm:$0xf]  ;;  %v15041_v54 = vor.u32 %v18253_v46, %v15040_v45  ;;  %6374 = vmatpush.bf16.msra.mxu1 %v15329_v43  ;;  %6400 = vmatpush.bf16.msra.mxu3 %v12261_v48  ;;  %v20284_v43 = vpop.f32.mrf.mxu2  ;;  %v17457_v45 = vld [vmem:[%s19447_s22 + $0x8c] sm:$0xf]  ;;  %v6111_v48 = vpop.f32.mrf.mxu0  ;;  %v6084_v4 = vadd.f32 %v20206_v15, %v6071_v50 }
 0x2a7   : > { %v18317_v49 = vld [vmem:[%s19447_s22 + $0x1b64] sm:$0xf0]  ;;  %v11874_v46 = vld [vmem:[%s19447_s22 + $0xa8] sm:$0xf0] }
 0x2a8   : > { %v15297_v58 = vor.u32 %v18317_v49, %v15296_v47  ;;  %v15008_v57 = vld [vmem:[%s19447_s22 + $0x1908] sm:$0xf]  ;;  %6362 = vmatpush.bf16.msra.mxu0 %v15041_v54  ;;  %6388 = vmatpush.bf16.msra.mxu2 %v11973_v31  ;;  %v20289_v47 = vpop.f32.mrf.mxu3  ;;  %v12130_v56 = vld [vmem:[%s19447_s22 + $0x2a8] sm:$0xf0]  ;;  %v11877_v53 = vor.u32 %v17457_v45, %v11874_v46 }
 0x2a9   : > { %v18245_v62 = vld [vmem:[%s19447_s22 + $0x1924] sm:$0xf0]  ;;  %v12098_v61 = vld [vmem:[%s19447_s22 + $0x268] sm:$0xf0] }
 0x2aa   : > { %v15264_v13 = vld [vmem:[%s19447_s22 + $0x1b08] sm:$0xf]  ;;  %v15009_v5 = vor.u32 %v18245_v62, %v15008_v57  ;;  %6375 = vmatpush.bf16.msra.mxu1 %v15297_v58  ;;  %6401 = vmatpush.bf16.msra.mxu3 %v12229_v59  ;;  %v12133_v57 = vor.u32 %v17521_v22, %v12130_v56  ;;  %v11842_v59 = vld [vmem:[%s19447_s22 + $0x68] sm:$0xf0] }
 0x2ab   : > { %v18309_v60 = vld [vmem:[%s19447_s22 + $0x1b24] sm:$0xf0]  ;;  %v12066_v26 = vld [vmem:[%s19447_s22 + $0x228] sm:$0xf0] }
 0x2ac   : > { %v15265_v2 = vor.u32 %v18309_v60, %v15264_v13  ;;  %v14976_v8 = vld [vmem:[%s19447_s22 + $0x18c8] sm:$0xf]  ;;  %6363 = vmatpush.bf16.msra.mxu0 %v15009_v5  ;;  %6389 = vmatpush.bf16.msra.mxu2 %v11941_v7  ;;  %v17449_v13 = vld [vmem:[%s19447_s22 + $0x4c] sm:$0xf] }
 0x2ad   : > { %v18237_v14 = vld [vmem:[%s19447_s22 + $0x18e4] sm:$0xf0]  ;;  %v17513_v60 = vld [vmem:[%s19447_s22 + $0x24c] sm:$0xf] }
 0x2ae   : > { %v15232_v9 = vld [vmem:[%s19447_s22 + $0x1ac8] sm:$0xf]  ;;  %v14977_v32 = vor.u32 %v18237_v14, %v14976_v8  ;;  %6376 = vmatpush.bf16.msra.mxu1 %v15265_v2  ;;  %6402 = vmatpush.bf16.msra.mxu3 %v12197_v19  ;;  %v11845_v2 = vor.u32 %v17449_v13, %v11842_v59  ;;  %v17441_v14 = vld [vmem:[%s19447_s22 + $0xc] sm:$0xf]  ;;  %v6137_v27 = vpop.f32.mrf.mxu2 }
 0x2af   : > { %v18301_v21 = vld [vmem:[%s19447_s22 + $0x1ae4] sm:$0xf0]  ;;  %v11810_v19 = vld [vmem:[%s19447_s22 + $0x28] sm:$0xf0] }
 0x2b0   : > { %v15233_v33 = vor.u32 %v18301_v21, %v15232_v9  ;;  %v14944_v37 = vld [vmem:[%s19447_s22 + $0x1888] sm:$0xf]  ;;  %6364 = vmatpush.bf16.msra.mxu0 %v14977_v32  ;;  %6390 = vmatpush.bf16.msra.mxu2 %v11909_v36  ;;  %v12101_v9 = vor.u32 %v17513_v60, %v12098_v61  ;;  %v17505_v21 = vld [vmem:[%s19447_s22 + $0x20c] sm:$0xf]  ;;  %v6150_v32 = vpop.f32.mrf.mxu3 }
 0x2b1   : > { %v18229_v34 = vld [vmem:[%s19447_s22 + $0x18a4] sm:$0xf0]  ;;  %v17625_v15 = vld [vmem:[%s19447_s22 + $0x5cc] sm:$0xf]  ;;  %v12069_v46 = vor.u32 %v17505_v21, %v12066_v26  ;;  %v6161_v32 = vpop.f32.mrf.mxu0 }
 0x2b2   : > { %v15200_v40 = vld [vmem:[%s19447_s22 + $0x1a88] sm:$0xf]  ;;  %v14945_v49 = vor.u32 %v18229_v34, %v14944_v37  ;;  %6377 = vmatpush.bf16.msra.mxu1 %v15233_v33  ;;  %6403 = vmatpush.bf16.msra.mxu3 %v12165_v42  ;;  %v12546_v52 = vld [vmem:[%s19447_s22 + $0x5e8] sm:$0xf0]  ;;  %v6097_v34 = vadd.f32 %v20211_v29, %v6084_v4  ;;  %v11813_v42 = vor.u32 %v17441_v14, %v11810_v19 }
 0x2b3   : > { %v18293_v44 = vld [vmem:[%s19447_s22 + $0x1aa4] sm:$0xf0]  ;;  %v17689_v30 = vld [vmem:[%s19447_s22 + $0x7cc] sm:$0xf]  ;;  %v12549_v22 = vor.u32 %v17625_v15, %v12546_v52 }
 0x2b4   : > { %v15201_v51 = vor.u32 %v18293_v44, %v15200_v40  ;;  %v14912_v54 = vld [vmem:[%s19447_s22 + $0x1848] sm:$0xf]  ;;  %6365 = vmatpush.bf16.msra.mxu0 %v14945_v49  ;;  %6391 = vmatpush.bf16.msra.mxu2 %v11877_v53  ;;  %v12802_v33 = vld [vmem:[%s19447_s22 + $0x7e8] sm:$0xf0]  ;;  %v6110_v56 = vadd.f32 %v20265_v3, %v6097_v34 }
 0x2b5   : > { %v18221_v58 = vld [vmem:[%s19447_s22 + $0x1864] sm:$0xf0]  ;;  %v17753_v36 = vld [vmem:[%s19447_s22 + $0x9cc] sm:$0xf]  ;;  %v12805_v48 = vor.u32 %v17689_v30, %v12802_v33 }
 0x2b6   : > { %v15168_v31 = vld [vmem:[%s19447_s22 + $0x1a48] sm:$0xf]  ;;  %v14913_v63 = vor.u32 %v18221_v58, %v14912_v54  ;;  %6378 = vmatpush.bf16.msra.mxu1 %v15201_v51  ;;  %6404 = vmatpush.bf16.msra.mxu3 %v12133_v57  ;;  %v13058_v37 = vld [vmem:[%s19447_s22 + $0x9e8] sm:$0xf0] }
 0x2b7   : > { %v18285_v62 = vld [vmem:[%s19447_s22 + $0x1a64] sm:$0xf0]  ;;  %v17817_v44 = vld [vmem:[%s19447_s22 + $0xbcc] sm:$0xf]  ;;  %v13061_v49 = vor.u32 %v17753_v36, %v13058_v37  ;;  %v6174_v37 = vpop.f32.mrf.mxu1 }
 0x2b8   : > { %v14880_v1 = vld [vmem:[%s19447_s22 + $0x1808] sm:$0xf]  ;;  %v15169_v5 = vor.u32 %v18285_v62, %v15168_v31  ;;  %6366 = vmatpush.bf16.msra.mxu0 %v14913_v63  ;;  %6392 = vmatpush.bf16.msra.mxu2 %v11845_v2  ;;  %v13314_v45 = vld [vmem:[%s19447_s22 + $0xbe8] sm:$0xf0]  ;;  %v6123_v62 = vadd.f32 %v20269_v6, %v6110_v56 }
 0x2b9   : > { %v18213_v11 = vld [vmem:[%s19447_s22 + $0x1824] sm:$0xf0]  ;;  %v12514_v29 = vld [vmem:[%s19447_s22 + $0x5a8] sm:$0xf0]  ;;  %v13317_v51 = vor.u32 %v17817_v44, %v13314_v45 }
 0x2ba   : > { %v15136_v7 = vld [vmem:[%s19447_s22 + $0x1a08] sm:$0xf]  ;;  %v14881_v23 = vor.u32 %v18213_v11, %v14880_v1  ;;  %6379 = vmatpush.bf16.msra.mxu1 %v15169_v5  ;;  %6405 = vmatpush.bf16.msra.mxu3 %v12101_v9  ;;  %v17681_v50 = vld [vmem:[%s19447_s22 + $0x78c] sm:$0xf]  ;;  %v12517_v3 = vor.u32 %v17617_v55, %v12514_v29  ;;  %v6136_v6 = vadd.f32 %v20284_v43, %v6123_v62 }
 0x2bb   : > { %v18277_v8 = vld [vmem:[%s19447_s22 + $0x1a24] sm:$0xf0]  ;;  %v12770_v53 = vld [vmem:[%s19447_s22 + $0x7a8] sm:$0xf0] }
 0x2bc   : > { %v15137_v40 = vor.u32 %v18277_v8, %v15136_v7  ;;  %6367 = vmatpush.bf16.msra.mxu0 %v14881_v23  ;;  %v17745_v54 = vld [vmem:[%s19447_s22 + $0x98c] sm:$0xf]  ;;  %6393 = vmatpush.bf16.msra.mxu2 %v11813_v42  ;;  %v12773_v13 = vor.u32 %v17681_v50, %v12770_v53  ;;  %v6149_v30 = vadd.f32 %v20289_v47, %v6136_v6 }
 0x2bd   : > { %v13026_v58 = vld [vmem:[%s19447_s22 + $0x9a8] sm:$0xf0] }
 0x2be   : > { %6380 = vmatpush.bf16.msra.mxu1 %v15137_v40  ;;  %v17809_v31 = vld [vmem:[%s19447_s22 + $0xb8c] sm:$0xf]  ;;  %6406 = vmatpush.bf16.msra.mxu3 %v12069_v46  ;;  %v13029_v59 = vor.u32 %v17745_v54, %v13026_v58  ;;  %v6162_v34 = vadd.f32 %v6161_v32, %v6149_v30 }
 0x2bf   : > { %v13282_v57 = vld [vmem:[%s19447_s22 + $0xba8] sm:$0xf0]  ;;  %6368 = vmatmul.bf16.vlgmr.msra.gmra.mxu0 %v19784_v12  ;;  %6394 = vmatmul.bf16.vlgmr.msra.gmra.mxu2 %v19563_v10  ;;  %v6176_v6 = vpop.f32.mrf.mxu1 }
 0x2c0   : > { %6412 = vmatpush.bf16.msrb.mxu0 %v12549_v22  ;;  %6438 = vmatpush.bf16.msrb.mxu2 %v13061_v49  ;;  %v17609_v60 = vld [vmem:[%s19447_s22 + $0x54c] sm:$0xf]  ;;  %v13285_v1 = vor.u32 %v17809_v31, %v13282_v57  ;;  %v6175_v50 = vadd.f32 %v6174_v37, %v6162_v34 }
 0x2c1   : > { %v12482_v61 = vld [vmem:[%s19447_s22 + $0x568] sm:$0xf0]  ;;  %6381 = vmatmul.bf16.vlgmr.msra.gmra.mxu1 %v19789_v16  ;;  %6407 = vmatmul.bf16.vlgmr.msra.gmra.mxu3 %v19572_v18 }
 0x2c2   : > { %6425 = vmatpush.bf16.msrb.mxu1 %v12805_v48  ;;  %v17673_v63 = vld [vmem:[%s19447_s22 + $0x74c] sm:$0xf]  ;;  %6451 = vmatpush.bf16.msrb.mxu3 %v13317_v51  ;;  %v12485_v8 = vor.u32 %v17609_v60, %v12482_v61  ;;  %v6200_v61 = vpop.f32.mrf.mxu3 }
 0x2c3   : > { %v12738_v11 = vld [vmem:[%s19447_s22 + $0x768] sm:$0xf0] }
 0x2c4   : > { %v17737_v4 = vld [vmem:[%s19447_s22 + $0x94c] sm:$0xf]  ;;  %6413 = vmatpush.bf16.msrb.mxu0 %v12517_v3  ;;  %6439 = vmatpush.bf16.msrb.mxu2 %v13029_v59  ;;  %v12741_v14 = vor.u32 %v17673_v63, %v12738_v11  ;;  %v6187_v3 = vpop.f32.mrf.mxu2  ;;  %v6163_v11 = vpop.f32.mrf.mxu0 }
 0x2c5   : > { %v12994_v5 = vld [vmem:[%s19447_s22 + $0x968] sm:$0xf0]  ;;  %v6188_v60 = vadd.f32 %v6187_v3, %v6175_v50 }
 0x2c6   : > { %v17801_v2 = vld [vmem:[%s19447_s22 + $0xb4c] sm:$0xf]  ;;  %6426 = vmatpush.bf16.msrb.mxu1 %v12773_v13  ;;  %v12997_v9 = vor.u32 %v17737_v4, %v12994_v5  ;;  %6452 = vmatpush.bf16.msrb.mxu3 %v13285_v1  ;;  %v429_v4 = vld [vmem:[#allocation2] sm:$0xff] }
 0x2c7   : > { %v13250_v7 = vld [vmem:[%s19447_s22 + $0xb68] sm:$0xf0] }
 0x2c8   : > { %v17601_v43 = vld [vmem:[%s19447_s22 + $0x50c] sm:$0xf]  ;;  %v13253_v26 = vor.u32 %v17801_v2, %v13250_v7  ;;  %6414 = vmatpush.bf16.msrb.mxu0 %v12485_v8  ;;  %6440 = vmatpush.bf16.msrb.mxu2 %v12997_v9  ;;  %v6201_v2 = vadd.f32 %v6200_v61, %v6188_v60 }
 0x2c9   : > { %v12450_v19 = vld [vmem:[%s19447_s22 + $0x528] sm:$0xf0] }
 0x2ca   : > { %v17665_v21 = vld [vmem:[%s19447_s22 + $0x70c] sm:$0xf]  ;;  %v12453_v36 = vor.u32 %v17601_v43, %v12450_v19  ;;  %6427 = vmatpush.bf16.msrb.mxu1 %v12741_v14  ;;  %6453 = vmatpush.bf16.msrb.mxu3 %v13253_v26 }
 0x2cb   : > { %v12706_v27 = vld [vmem:[%s19447_s22 + $0x728] sm:$0xf0] }
 0x2cc   : > { %v17729_v15 = vld [vmem:[%s19447_s22 + $0x90c] sm:$0xf]  ;;  %v12709_v40 = vor.u32 %v17665_v21, %v12706_v27  ;;  %6415 = vmatpush.bf16.msrb.mxu0 %v12453_v36 }
 0x2cd   : > { %v12962_v52 = vld [vmem:[%s19447_s22 + $0x928] sm:$0xf0] }
 0x2ce   : > { %v17793_v23 = vld [vmem:[%s19447_s22 + $0xb0c] sm:$0xf]  ;;  %v12965_v42 = vor.u32 %v17729_v15, %v12962_v52  ;;  %6428 = vmatpush.bf16.msrb.mxu1 %v12709_v40  ;;  %v7297_v15 = vadd.f32 %v6201_v2, %v429_v4 }
 0x2cf   : > { %v13218_v33 = vld [vmem:[%s19447_s22 + $0xb28] sm:$0xf0] }
 0x2d0   : > { %v17593_v44 = vld [vmem:[%s19447_s22 + $0x4cc] sm:$0xf]  ;;  %v13221_v46 = vor.u32 %v17793_v23, %v13218_v33  ;;  %6441 = vmatpush.bf16.msrb.mxu2 %v12965_v42  ;;  %7305 = vst [vmem:[#allocation2] sm:$0xff] %v7297_v15 }
 0x2d1   : > { %v12418_v45 = vld [vmem:[%s19447_s22 + $0x4e8] sm:$0xf0] }
 0x2d2   : > { %v17657_v47 = vld [vmem:[%s19447_s22 + $0x6cc] sm:$0xf]  ;;  %v12421_v29 = vor.u32 %v17593_v44, %v12418_v45  ;;  %6454 = vmatpush.bf16.msrb.mxu3 %v13221_v46 }
 0x2d3   : > { %v12674_v22 = vld [vmem:[%s19447_s22 + $0x6e8] sm:$0xf0] }
 0x2d4   : > { %v17721_v56 = vld [vmem:[%s19447_s22 + $0x8cc] sm:$0xf]  ;;  %v12677_v51 = vor.u32 %v17657_v47, %v12674_v22  ;;  %6416 = vmatpush.bf16.msrb.mxu0 %v12421_v29  ;;  %v6189_v22 = vpop.f32.mrf.mxu2 }
 0x2d5   : > { %v12930_v48 = vld [vmem:[%s19447_s22 + $0x8e8] sm:$0xf0] }
 0x2d6   : > { %v17785_v49 = vld [vmem:[%s19447_s22 + $0xacc] sm:$0xf]  ;;  %v12933_v53 = vor.u32 %v17721_v56, %v12930_v48  ;;  %6429 = vmatpush.bf16.msrb.mxu1 %v12677_v51 }
 0x2d7   : > { %v13186_v55 = vld [vmem:[%s19447_s22 + $0xae8] sm:$0xf0] }
 0x2d8   : > { %v17585_v54 = vld [vmem:[%s19447_s22 + $0x48c] sm:$0xf]  ;;  %v13189_v57 = vor.u32 %v17785_v49, %v13186_v55  ;;  %6442 = vmatpush.bf16.msrb.mxu2 %v12933_v53  ;;  %v6202_v55 = vpop.f32.mrf.mxu3 }
 0x2d9   : > { %v12386_v58 = vld [vmem:[%s19447_s22 + $0x4a8] sm:$0xf0] }
 0x2da   : > { %v17649_v31 = vld [vmem:[%s19447_s22 + $0x68c] sm:$0xf]  ;;  %v12389_v5 = vor.u32 %v17585_v54, %v12386_v58  ;;  %6455 = vmatpush.bf16.msrb.mxu3 %v13189_v57 }
 0x2db   : > { %v12642_v62 = vld [vmem:[%s19447_s22 + $0x6a8] sm:$0xf0] }
 0x2dc   : > { %v17713_v13 = vld [vmem:[%s19447_s22 + $0x88c] sm:$0xf]  ;;  %v12645_v7 = vor.u32 %v17649_v31, %v12642_v62  ;;  %6417 = vmatpush.bf16.msrb.mxu0 %v12389_v5 }
 0x2dd   : > { %v12898_v59 = vld [vmem:[%s19447_s22 + $0x8a8] sm:$0xf0] }
 0x2de   : > { %v17777_v63 = vld [vmem:[%s19447_s22 + $0xa8c] sm:$0xf]  ;;  %v12901_v8 = vor.u32 %v17713_v13, %v12898_v59  ;;  %6430 = vmatpush.bf16.msrb.mxu1 %v12645_v7 }
 0x2df   : > { %v13154_v1 = vld [vmem:[%s19447_s22 + $0xaa8] sm:$0xf0] }
 0x2e0   : > { %v17577_v14 = vld [vmem:[%s19447_s22 + $0x44c] sm:$0xf]  ;;  %v13157_v19 = vor.u32 %v17777_v63, %v13154_v1  ;;  %6443 = vmatpush.bf16.msrb.mxu2 %v12901_v8 }
 0x2e1   : > { %v12354_v9 = vld [vmem:[%s19447_s22 + $0x468] sm:$0xf0] }
 0x2e2   : > { %v17641_v43 = vld [vmem:[%s19447_s22 + $0x64c] sm:$0xf]  ;;  %v12357_v32 = vor.u32 %v17577_v14, %v12354_v9  ;;  %6456 = vmatpush.bf16.msrb.mxu3 %v13157_v19 }
 0x2e3   : > { %v12610_v21 = vld [vmem:[%s19447_s22 + $0x668] sm:$0xf0] }
 0x2e4   : > { %v17705_v26 = vld [vmem:[%s19447_s22 + $0x84c] sm:$0xf]  ;;  %v12613_v37 = vor.u32 %v17641_v43, %v12610_v21  ;;  %6418 = vmatpush.bf16.msrb.mxu0 %v12357_v32 }
 0x2e5   : > { %v12866_v27 = vld [vmem:[%s19447_s22 + $0x868] sm:$0xf0] }
 0x2e6   : > { %v17769_v52 = vld [vmem:[%s19447_s22 + $0xa4c] sm:$0xf]  ;;  %v12869_v34 = vor.u32 %v17705_v26, %v12866_v27  ;;  %6431 = vmatpush.bf16.msrb.mxu1 %v12613_v37 }
 0x2e7   : > { %v13122_v30 = vld [vmem:[%s19447_s22 + $0xa68] sm:$0xf0] }
 0x2e8   : > { %v17569_v23 = vld [vmem:[%s19447_s22 + $0x40c] sm:$0xf]  ;;  %v13125_v44 = vor.u32 %v17769_v52, %v13122_v30  ;;  %6444 = vmatpush.bf16.msrb.mxu2 %v12869_v34 }
 0x2e9   : > { %v12322_v33 = vld [vmem:[%s19447_s22 + $0x428] sm:$0xf0] }
 0x2ea   : > { %v17633_v36 = vld [vmem:[%s19447_s22 + $0x60c] sm:$0xf]  ;;  %v12325_v29 = vor.u32 %v17569_v23, %v12322_v33  ;;  %6457 = vmatpush.bf16.msrb.mxu3 %v13125_v44 }
 0x2eb   : > { %v12578_v40 = vld [vmem:[%s19447_s22 + $0x628] sm:$0xf0] }
 0x2ec   : > { %v17697_v42 = vld [vmem:[%s19447_s22 + $0x80c] sm:$0xf]  ;;  %v12581_v54 = vor.u32 %v17633_v36, %v12578_v40  ;;  %6419 = vmatpush.bf16.msrb.mxu0 %v12325_v29 }
 0x2ed   : > { %v12834_v45 = vld [vmem:[%s19447_s22 + $0x828] sm:$0xf0] }
 0x2ee   : > { %v17761_v47 = vld [vmem:[%s19447_s22 + $0xa0c] sm:$0xf]  ;;  %v12837_v58 = vor.u32 %v17697_v42, %v12834_v45  ;;  %6432 = vmatpush.bf16.msrb.mxu1 %v12581_v54 }
 0x2ef   : > { %v13090_v46 = vld [vmem:[%s19447_s22 + $0xa28] sm:$0xf0]  ;;  %6420 = vmatmul.bf16.vlgmr.msrb.gmra.mxu0 %v19554_v0 }
 0x2f0   : > { %v17881_v56 = vld [vmem:[%s19447_s22 + $0xdcc] sm:$0xf]  ;;  %v13093_v3 = vor.u32 %v17761_v47, %v13090_v46  ;;  %6445 = vmatpush.bf16.msrb.mxu2 %v12837_v58 }
 0x2f1   : > { %v13570_v48 = vld [vmem:[%s19447_s22 + $0xde8] sm:$0xf0]  ;;  %6433 = vmatmul.bf16.vlgmr.msrb.gmra.mxu1 %v19570_v17 }
 0x2f2   : > { %v17945_v49 = vld [vmem:[%s19447_s22 + $0xfcc] sm:$0xf]  ;;  %v13573_v62 = vor.u32 %v17881_v56, %v13570_v48  ;;  %6458 = vmatpush.bf16.msrb.mxu3 %v13093_v3  ;;  %v6213_v56 = vpop.f32.mrf.mxu0 }
 0x2f3   : > { %v13826_v50 = vld [vmem:[%s19447_s22 + $0xfe8] sm:$0xf0]  ;;  %6446 = vmatmul.bf16.vlgmr.msrb.gmra.mxu2 %v19633_v38 }
 0x2f4   : > { %v18009_v51 = vld [vmem:[%s19447_s22 + $0x11cc] sm:$0xf]  ;;  %v13829_v13 = vor.u32 %v17945_v49, %v13826_v50  ;;  %6464 = vmatpush.bf16.msra.mxu0 %v13573_v62 }
 0x2f5   : > { %v14082_v53 = vld [vmem:[%s19447_s22 + $0x11e8] sm:$0xf0]  ;;  %6459 = vmatmul.bf16.vlgmr.msrb.gmra.mxu3 %v19637_v41 }
 0x2f6   : > { %v18073_v31 = vld [vmem:[%s19447_s22 + $0x13cc] sm:$0xf]  ;;  %v14085_v59 = vor.u32 %v18009_v51, %v14082_v53  ;;  %6477 = vmatpush.bf16.msra.mxu1 %v13829_v13  ;;  %v6226_v51 = vpop.f32.mrf.mxu1 }
 0x2f7   : > { %v14338_v57 = vld [vmem:[%s19447_s22 + $0x13e8] sm:$0xf0] }
 0x2f8   : > { %v17873_v60 = vld [vmem:[%s19447_s22 + $0xd8c] sm:$0xf]  ;;  %v14341_v1 = vor.u32 %v18073_v31, %v14338_v57  ;;  %6490 = vmatpush.bf16.msra.mxu2 %v14085_v59  ;;  %v6227_v57 = vadd.f32 %v6226_v51, %v6213_v56 }
 0x2f9   : > { %v13538_v61 = vld [vmem:[%s19447_s22 + $0xda8] sm:$0xf0] }
 0x2fa   : > { %v17937_v63 = vld [vmem:[%s19447_s22 + $0xf8c] sm:$0xf]  ;;  %v13541_v7 = vor.u32 %v17873_v60, %v13538_v61  ;;  %6503 = vmatpush.bf16.msra.mxu3 %v14341_v1 }
 0x2fb   : > { %v13794_v11 = vld [vmem:[%s19447_s22 + $0xfa8] sm:$0xf0] }
 0x2fc   : > { %v18001_v4 = vld [vmem:[%s19447_s22 + $0x118c] sm:$0xf]  ;;  %v13797_v8 = vor.u32 %v17937_v63, %v13794_v11  ;;  %6465 = vmatpush.bf16.msra.mxu0 %v13541_v7  ;;  %v6239_v11 = vpop.f32.mrf.mxu2 }
 0x2fd   : > { %v14050_v5 = vld [vmem:[%s19447_s22 + $0x11a8] sm:$0xf0]  ;;  %v6240_v7 = vadd.f32 %v6239_v11, %v6227_v57 }
 0x2fe   : > { %v18065_v6 = vld [vmem:[%s19447_s22 + $0x138c] sm:$0xf]  ;;  %v14053_v14 = vor.u32 %v18001_v4, %v14050_v5  ;;  %6478 = vmatpush.bf16.msra.mxu1 %v13797_v8  ;;  %v6252_v8 = vpop.f32.mrf.mxu3 }
 0x2ff   : > { %v14306_v2 = vld [vmem:[%s19447_s22 + $0x13a8] sm:$0xf0] }
 0x300   : > { %v17865_v9 = vld [vmem:[%s19447_s22 + $0xd4c] sm:$0xf]  ;;  %v14309_v21 = vor.u32 %v18065_v6, %v14306_v2  ;;  %6491 = vmatpush.bf16.msra.mxu2 %v14053_v14 }
 0x301   : > { %v13506_v43 = vld [vmem:[%s19447_s22 + $0xd68] sm:$0xf0] }
 0x302   : > { %v17929_v19 = vld [vmem:[%s19447_s22 + $0xf4c] sm:$0xf]  ;;  %v13509_v32 = vor.u32 %v17865_v9, %v13506_v43  ;;  %6504 = vmatpush.bf16.msra.mxu3 %v14309_v21  ;;  %v6215_v21 = vpop.f32.mrf.mxu0 }
 0x303   : > { %v13762_v26 = vld [vmem:[%s19447_s22 + $0xf68] sm:$0xf0] }
 0x304   : > { %v17993_v27 = vld [vmem:[%s19447_s22 + $0x114c] sm:$0xf]  ;;  %v13765_v23 = vor.u32 %v17929_v19, %v13762_v26  ;;  %6466 = vmatpush.bf16.msra.mxu0 %v13509_v32  ;;  %v20436_v19 = vadd.f32 %v6252_v8, %v6240_v7  ;;  %v6228_v32 = vpop.f32.mrf.mxu1 }
 0x305   : > { %v14018_v15 = vld [vmem:[%s19447_s22 + $0x1168] sm:$0xf0] }
 0x306   : > { %v18057_v52 = vld [vmem:[%s19447_s22 + $0x134c] sm:$0xf]  ;;  %v14021_v33 = vor.u32 %v17993_v27, %v14018_v15  ;;  %6479 = vmatpush.bf16.msra.mxu1 %v13765_v23 }
 0x307   : > { %v14274_v30 = vld [vmem:[%s19447_s22 + $0x1368] sm:$0xf0] }
 0x308   : > { %v17857_v36 = vld [vmem:[%s19447_s22 + $0xd0c] sm:$0xf]  ;;  %v14277_v40 = vor.u32 %v18057_v52, %v14274_v30  ;;  %6492 = vmatpush.bf16.msra.mxu2 %v14021_v33 }
 0x309   : > { %v13474_v37 = vld [vmem:[%s19447_s22 + $0xd28] sm:$0xf0] }
 0x30a   : > { %v17921_v34 = vld [vmem:[%s19447_s22 + $0xf0c] sm:$0xf]  ;;  %v13477_v22 = vor.u32 %v17857_v36, %v13474_v37  ;;  %6505 = vmatpush.bf16.msra.mxu3 %v14277_v40 }
 0x30b   : > { %v13730_v42 = vld [vmem:[%s19447_s22 + $0xf28] sm:$0xf0] }
 0x30c   : > { %v17985_v44 = vld [vmem:[%s19447_s22 + $0x110c] sm:$0xf]  ;;  %v13733_v48 = vor.u32 %v17921_v34, %v13730_v42  ;;  %6467 = vmatpush.bf16.msra.mxu0 %v13477_v22 }
 0x30d   : > { %v13986_v45 = vld [vmem:[%s19447_s22 + $0x1128] sm:$0xf0] }
 0x30e   : > { %v18049_v47 = vld [vmem:[%s19447_s22 + $0x130c] sm:$0xf]  ;;  %v13989_v49 = vor.u32 %v17985_v44, %v13986_v45  ;;  %6480 = vmatpush.bf16.msra.mxu1 %v13733_v48 }
 0x30f   : > { %v14242_v46 = vld [vmem:[%s19447_s22 + $0x1328] sm:$0xf0] }
 0x310   : > { %v17849_v55 = vld [vmem:[%s19447_s22 + $0xccc] sm:$0xf]  ;;  %v14245_v53 = vor.u32 %v18049_v47, %v14242_v46  ;;  %6493 = vmatpush.bf16.msra.mxu2 %v13989_v49  ;;  %v6241_v49 = vpop.f32.mrf.mxu2 }
 0x311   : > { %v13442_v29 = vld [vmem:[%s19447_s22 + $0xce8] sm:$0xf0] }
 0x312   : > { %v17913_v50 = vld [vmem:[%s19447_s22 + $0xecc] sm:$0xf]  ;;  %v13445_v13 = vor.u32 %v17849_v55, %v13442_v29  ;;  %6506 = vmatpush.bf16.msra.mxu3 %v14245_v53  ;;  %v6254_v53 = vpop.f32.mrf.mxu3 }
 0x313   : > { %v13698_v54 = vld [vmem:[%s19447_s22 + $0xee8] sm:$0xf0] }
 0x314   : > { %v17977_v58 = vld [vmem:[%s19447_s22 + $0x10cc] sm:$0xf]  ;;  %v13701_v59 = vor.u32 %v17913_v50, %v13698_v54  ;;  %6468 = vmatpush.bf16.msra.mxu0 %v13445_v13 }
 0x315   : > { %v13954_v31 = vld [vmem:[%s19447_s22 + $0x10e8] sm:$0xf0] }
 0x316   : > { %v18041_v3 = vld [vmem:[%s19447_s22 + $0x12cc] sm:$0xf]  ;;  %v13957_v60 = vor.u32 %v17977_v58, %v13954_v31  ;;  %6481 = vmatpush.bf16.msra.mxu1 %v13701_v59 }
 0x317   : > { %v14210_v62 = vld [vmem:[%s19447_s22 + $0x12e8] sm:$0xf0] }
 0x318   : > { %v17841_v61 = vld [vmem:[%s19447_s22 + $0xc8c] sm:$0xf]  ;;  %v14213_v4 = vor.u32 %v18041_v3, %v14210_v62  ;;  %6494 = vmatpush.bf16.msra.mxu2 %v13957_v60 }
 0x319   : > { %v13410_v63 = vld [vmem:[%s19447_s22 + $0xca8] sm:$0xf0] }
 0x31a   : > { %v17905_v1 = vld [vmem:[%s19447_s22 + $0xe8c] sm:$0xf]  ;;  %v13413_v43 = vor.u32 %v17841_v61, %v13410_v63  ;;  %6507 = vmatpush.bf16.msra.mxu3 %v14213_v4 }
 0x31b   : > { %v13666_v5 = vld [vmem:[%s19447_s22 + $0xea8] sm:$0xf0] }
 0x31c   : > { %v17969_v6 = vld [vmem:[%s19447_s22 + $0x108c] sm:$0xf]  ;;  %v13669_v26 = vor.u32 %v17905_v1, %v13666_v5  ;;  %6469 = vmatpush.bf16.msra.mxu0 %v13413_v43 }
 0x31d   : > { %v13922_v2 = vld [vmem:[%s19447_s22 + $0x10a8] sm:$0xf0] }
 0x31e   : > { %v18033_v14 = vld [vmem:[%s19447_s22 + $0x128c] sm:$0xf]  ;;  %v13925_v27 = vor.u32 %v17969_v6, %v13922_v2  ;;  %6482 = vmatpush.bf16.msra.mxu1 %v13669_v26 }
 0x31f   : > { %v14178_v9 = vld [vmem:[%s19447_s22 + $0x12a8] sm:$0xf0] }
 0x320   : > { %v17833_v15 = vld [vmem:[%s19447_s22 + $0xc4c] sm:$0xf]  ;;  %v14181_v23 = vor.u32 %v18033_v14, %v14178_v9  ;;  %6495 = vmatpush.bf16.msra.mxu2 %v13925_v27 }
 0x321   : > { %v13378_v52 = vld [vmem:[%s19447_s22 + $0xc68] sm:$0xf0] }
 0x322   : > { %v17897_v30 = vld [vmem:[%s19447_s22 + $0xe4c] sm:$0xf]  ;;  %v13381_v42 = vor.u32 %v17833_v15, %v13378_v52  ;;  %6508 = vmatpush.bf16.msra.mxu3 %v14181_v23 }
 0x323   : > { %v13634_v33 = vld [vmem:[%s19447_s22 + $0xe68] sm:$0xf0] }
 0x324   : > { %v17961_v36 = vld [vmem:[%s19447_s22 + $0x104c] sm:$0xf]  ;;  %v13637_v47 = vor.u32 %v17897_v30, %v13634_v33  ;;  %6470 = vmatpush.bf16.msra.mxu0 %v13381_v42 }
 0x325   : > { %v13890_v37 = vld [vmem:[%s19447_s22 + $0x1068] sm:$0xf0] }
 0x326   : > { %v18025_v34 = vld [vmem:[%s19447_s22 + $0x124c] sm:$0xf]  ;;  %v13893_v46 = vor.u32 %v17961_v36, %v13890_v37  ;;  %6483 = vmatpush.bf16.msra.mxu1 %v13637_v47 }
 0x327   : > { %v14146_v40 = vld [vmem:[%s19447_s22 + $0x1268] sm:$0xf0] }
 0x328   : > { %v17825_v44 = vld [vmem:[%s19447_s22 + $0xc0c] sm:$0xf]  ;;  %v14149_v55 = vor.u32 %v18025_v34, %v14146_v40  ;;  %6496 = vmatpush.bf16.msra.mxu2 %v13893_v46 }
 0x329   : > { %v13346_v45 = vld [vmem:[%s19447_s22 + $0xc28] sm:$0xf0] }
 0x32a   : > { %v17889_v22 = vld [vmem:[%s19447_s22 + $0xe0c] sm:$0xf]  ;;  %v13349_v57 = vor.u32 %v17825_v44, %v13346_v45  ;;  %6509 = vmatpush.bf16.msra.mxu3 %v14149_v55 }
 0x32b   : > { %v13602_v56 = vld [vmem:[%s19447_s22 + $0xe28] sm:$0xf0] }
 0x32c   : > { %v17953_v48 = vld [vmem:[%s19447_s22 + $0x100c] sm:$0xf]  ;;  %v13605_v59 = vor.u32 %v17889_v22, %v13602_v56  ;;  %6471 = vmatpush.bf16.msra.mxu0 %v13349_v57 }
 0x32d   : > { %v13858_v29 = vld [vmem:[%s19447_s22 + $0x1028] sm:$0xf0] }
 0x32e   : > { %v18017_v50 = vld [vmem:[%s19447_s22 + $0x120c] sm:$0xf]  ;;  %v13861_v60 = vor.u32 %v17953_v48, %v13858_v29  ;;  %6484 = vmatpush.bf16.msra.mxu1 %v13605_v59 }
 0x32f   : > { %v14114_v51 = vld [vmem:[%s19447_s22 + $0x1228] sm:$0xf0]  ;;  %6472 = vmatmul.bf16.vlgmr.msra.gmra.mxu0 %v19629_v35 }
 0x330   : > { %v18137_v54 = vld [vmem:[%s19447_s22 + $0x15cc] sm:$0xf]  ;;  %v14117_v1 = vor.u32 %v18017_v50, %v14114_v51  ;;  %6497 = vmatpush.bf16.msra.mxu2 %v13861_v60 }
 0x331   : > { %v14594_v58 = vld [vmem:[%s19447_s22 + $0x15e8] sm:$0xf0]  ;;  %6485 = vmatmul.bf16.vlgmr.msra.gmra.mxu1 %v19635_v39 }
 0x332   : > { %v18201_v31 = vld [vmem:[%s19447_s22 + $0x17cc] sm:$0xf]  ;;  %v14597_v11 = vor.u32 %v18137_v54, %v14594_v58  ;;  %6510 = vmatpush.bf16.msra.mxu3 %v14117_v1  ;;  %v20490_v54 = vpop.f32.mrf.mxu0 }
 0x333   : > { %v14850_v3 = vld [vmem:[%s19447_s22 + $0x17e8] sm:$0xf0]  ;;  %6498 = vmatmul.bf16.vlgmr.msra.gmra.mxu2 %v19706_v20 }
 0x334   : > { %v18265_v62 = vld [vmem:[%s19447_s22 + $0x19cc] sm:$0xf]  ;;  %v14853_v4 = vor.u32 %v18201_v31, %v14850_v3  ;;  %6516 = vmatpush.bf16.msrb.mxu0 %v14597_v11 }
 0x335   : > { %v15106_v13 = vld [vmem:[%s19447_s22 + $0x19e8] sm:$0xf0]  ;;  %6511 = vmatmul.bf16.vlgmr.msra.gmra.mxu3 %v19713_v25 }
 0x336   : > { %v18329_v61 = vld [vmem:[%s19447_s22 + $0x1bcc] sm:$0xf]  ;;  %v15109_v5 = vor.u32 %v18265_v62, %v15106_v13  ;;  %6529 = vmatpush.bf16.msrb.mxu1 %v14853_v4  ;;  %v20495_v13 = vpop.f32.mrf.mxu1 }
 0x337   : > { %v15362_v63 = vld [vmem:[%s19447_s22 + $0x1be8] sm:$0xf0] }
 0x338   : > { %v18129_v6 = vld [vmem:[%s19447_s22 + $0x158c] sm:$0xf]  ;;  %v15365_v8 = vor.u32 %v18329_v61, %v15362_v63  ;;  %6542 = vmatpush.bf16.msrb.mxu2 %v15109_v5 }
 0x339   : > { %v14562_v2 = vld [vmem:[%s19447_s22 + $0x15a8] sm:$0xf0] }
 0x33a   : > { %v18193_v7 = vld [vmem:[%s19447_s22 + $0x178c] sm:$0xf]  ;;  %v14565_v27 = vor.u32 %v18129_v6, %v14562_v2  ;;  %6555 = vmatpush.bf16.msrb.mxu3 %v15365_v8 }
 0x33b   : > { %v14818_v14 = vld [vmem:[%s19447_s22 + $0x17a8] sm:$0xf0] }
 0x33c   : > { %v18257_v9 = vld [vmem:[%s19447_s22 + $0x198c] sm:$0xf]  ;;  %v14821_v15 = vor.u32 %v18193_v7, %v14818_v14  ;;  %6517 = vmatpush.bf16.msrb.mxu0 %v14565_v27  ;;  %v20505_v14 = vpop.f32.mrf.mxu2  ;;  %v20510_v27 = vpop.f32.mrf.mxu3 }
 0x33d   : > { %v15074_v43 = vld [vmem:[%s19447_s22 + $0x19a8] sm:$0xf0] }
 0x33e   : > { %v18321_v21 = vld [vmem:[%s19447_s22 + $0x1b8c] sm:$0xf]  ;;  %v15077_v52 = vor.u32 %v18257_v9, %v15074_v43  ;;  %6530 = vmatpush.bf16.msrb.mxu1 %v14821_v15 }
 0x33f   : > { %v15330_v26 = vld [vmem:[%s19447_s22 + $0x1ba8] sm:$0xf0] }
 0x340   : > { %v18121_v30 = vld [vmem:[%s19447_s22 + $0x154c] sm:$0xf]  ;;  %v15333_v33 = vor.u32 %v18321_v21, %v15330_v26  ;;  %6543 = vmatpush.bf16.msrb.mxu2 %v15077_v52 }
 0x341   : > { %v14530_v32 = vld [vmem:[%s19447_s22 + $0x1568] sm:$0xf0] }
 0x342   : > { %v18185_v23 = vld [vmem:[%s19447_s22 + $0x174c] sm:$0xf]  ;;  %v14533_v44 = vor.u32 %v18121_v30, %v14530_v32  ;;  %6556 = vmatpush.bf16.msrb.mxu3 %v15333_v33  ;;  %v6267_v32 = vpop.f32.mrf.mxu0 }
 0x343   : > { %v14786_v36 = vld [vmem:[%s19447_s22 + $0x1768] sm:$0xf0] }
 0x344   : > { %v18249_v37 = vld [vmem:[%s19447_s22 + $0x194c] sm:$0xf]  ;;  %v14789_v45 = vor.u32 %v18185_v23, %v14786_v36  ;;  %6518 = vmatpush.bf16.msrb.mxu0 %v14533_v44 }
 0x345   : > { %v15042_v34 = vld [vmem:[%s19447_s22 + $0x1968] sm:$0xf0] }
 0x346   : > { %v18313_v40 = vld [vmem:[%s19447_s22 + $0x1b4c] sm:$0xf]  ;;  %v15045_v47 = vor.u32 %v18249_v37, %v15042_v34  ;;  %6531 = vmatpush.bf16.msrb.mxu1 %v14789_v45 }
 0x347   : > { %v15298_v42 = vld [vmem:[%s19447_s22 + $0x1b68] sm:$0xf0] }
 0x348   : > { %v18113_v46 = vld [vmem:[%s19447_s22 + $0x150c] sm:$0xf]  ;;  %v15301_v48 = vor.u32 %v18313_v40, %v15298_v42  ;;  %6544 = vmatpush.bf16.msrb.mxu2 %v15045_v47  ;;  %v6280_v40 = vpop.f32.mrf.mxu1 }
 0x349   : > { %v14498_v22 = vld [vmem:[%s19447_s22 + $0x1528] sm:$0xf0] }
 0x34a   : > { %v18177_v56 = vld [vmem:[%s19447_s22 + $0x170c] sm:$0xf]  ;;  %v14501_v53 = vor.u32 %v18113_v46, %v14498_v22  ;;  %6557 = vmatpush.bf16.msrb.mxu3 %v15301_v48 }
 0x34b   : > { %v14754_v49 = vld [vmem:[%s19447_s22 + $0x1728] sm:$0xf0] }
 0x34c   : > { %v18241_v55 = vld [vmem:[%s19447_s22 + $0x190c] sm:$0xf]  ;;  %v14757_v58 = vor.u32 %v18177_v56, %v14754_v49  ;;  %6519 = vmatpush.bf16.msrb.mxu0 %v14501_v53 }
 0x34d   : > { %v15010_v29 = vld [vmem:[%s19447_s22 + $0x1928] sm:$0xf0] }
 0x34e   : > { %v18305_v50 = vld [vmem:[%s19447_s22 + $0x1b0c] sm:$0xf]  ;;  %v15013_v31 = vor.u32 %v18241_v55, %v15010_v29  ;;  %6532 = vmatpush.bf16.msrb.mxu1 %v14757_v58  ;;  %v6293_v58 = vpop.f32.mrf.mxu2 }
 0x34f   : > { %v15266_v51 = vld [vmem:[%s19447_s22 + $0x1b28] sm:$0xf0]  ;;  %v11944_v58 = vld [vmem:[%s19447_s22 + $0x110] sm:$0xf] }
 0x350   : > { %v18105_v57 = vld [vmem:[%s19447_s22 + $0x14cc] sm:$0xf]  ;;  %v15269_v59 = vor.u32 %v18305_v50, %v15266_v51  ;;  %6545 = vmatpush.bf16.msrb.mxu2 %v15013_v31 }
 0x351   : > { %v14466_v3 = vld [vmem:[%s19447_s22 + $0x14e8] sm:$0xf0] }
 0x352   : > { %v18169_v62 = vld [vmem:[%s19447_s22 + $0x16cc] sm:$0xf]  ;;  %v14469_v4 = vor.u32 %v18105_v57, %v14466_v3  ;;  %6558 = vmatpush.bf16.msrb.mxu3 %v15269_v59  ;;  %v6306_v59 = vpop.f32.mrf.mxu3 }
 0x353   : > { %v14722_v60 = vld [vmem:[%s19447_s22 + $0x16e8] sm:$0xf0]  ;;  %v12456_v59 = vld [vmem:[%s19447_s22 + $0x510] sm:$0xf] }
 0x354   : > { %v18233_v61 = vld [vmem:[%s19447_s22 + $0x18cc] sm:$0xf]  ;;  %v14725_v5 = vor.u32 %v18169_v62, %v14722_v60  ;;  %6520 = vmatpush.bf16.msrb.mxu0 %v14469_v4  ;;  %v12040_v60 = vld [vmem:[%s19447_s22 + $0x1d0] sm:$0xf] }
 0x355   : > { %v14978_v63 = vld [vmem:[%s19447_s22 + $0x18e8] sm:$0xf0]  ;;  %v12552_v4 = vld [vmem:[%s19447_s22 + $0x5d0] sm:$0xf] }
 0x356   : > { %v18297_v1 = vld [vmem:[%s19447_s22 + $0x1acc] sm:$0xf]  ;;  %v14981_v6 = vor.u32 %v18233_v61, %v14978_v63  ;;  %6533 = vmatpush.bf16.msrb.mxu1 %v14725_v5  ;;  %v17502_v61 = vld [vmem:[%s19447_s22 + $0x1ec] sm:$0xf0] }
 0x357   : > { %v15234_v11 = vld [vmem:[%s19447_s22 + $0x1ae8] sm:$0xf0]  ;;  %v12296_v63 = vld [vmem:[%s19447_s22 + $0x3d0] sm:$0xf] }
 0x358   : > { %v18097_v2 = vld [vmem:[%s19447_s22 + $0x148c] sm:$0xf]  ;;  %v15237_v9 = vor.u32 %v18297_v1, %v15234_v11  ;;  %6546 = vmatpush.bf16.msrb.mxu2 %v14981_v6  ;;  %v17566_v11 = vld [vmem:[%s19447_s22 + $0x3ec] sm:$0xf0] }
 0x359   : > { %v14434_v7 = vld [vmem:[%s19447_s22 + $0x14a8] sm:$0xf0]  ;;  %v17630_v5 = vld [vmem:[%s19447_s22 + $0x5ec] sm:$0xf0] }
 0x35a   : > { %v18161_v8 = vld [vmem:[%s19447_s22 + $0x168c] sm:$0xf]  ;;  %v14437_v30 = vor.u32 %v18097_v2, %v14434_v7  ;;  %6559 = vmatpush.bf16.msrb.mxu3 %v15237_v9  ;;  %v12808_v7 = vld [vmem:[%s19447_s22 + $0x7d0] sm:$0xf] }
 0x35b   : > { %v14690_v43 = vld [vmem:[%s19447_s22 + $0x16a8] sm:$0xf0] }
 0x35c   : > { %v18225_v21 = vld [vmem:[%s19447_s22 + $0x188c] sm:$0xf]  ;;  %v14693_v23 = vor.u32 %v18161_v8, %v14690_v43  ;;  %6521 = vmatpush.bf16.msrb.mxu0 %v14437_v30  ;;  %v17694_v8 = vld [vmem:[%s19447_s22 + $0x7ec] sm:$0xf0]  ;;  %v12041_v43 = vor.u32 %v17502_v61, %v12040_v60  ;;  %v20564_v61 = vpop.f32.mrf.mxu0 }
 0x35d   : > { %v14946_v26 = vld [vmem:[%s19447_s22 + $0x18a8] sm:$0xf0]  ;;  %v12264_v30 = vld [vmem:[%s19447_s22 + $0x390] sm:$0xf]  ;;  %v12809_v32 = vor.u32 %v17694_v8, %v12808_v7 }
 0x35e   : > { %v18289_v15 = vld [vmem:[%s19447_s22 + $0x1a8c] sm:$0xf]  ;;  %v14949_v33 = vor.u32 %v18225_v21, %v14946_v26  ;;  %6534 = vmatpush.bf16.msrb.mxu1 %v14693_v23  ;;  %v12297_v21 = vor.u32 %v17566_v11, %v12296_v63  ;;  %v12553_v26 = vor.u32 %v17630_v5, %v12552_v4  ;;  %v17558_v23 = vld [vmem:[%s19447_s22 + $0x3ac] sm:$0xf0]  ;;  %v20568_v4 = vpop.f32.mrf.mxu1 }
 0x35f   : > { %v15202_v52 = vld [vmem:[%s19447_s22 + $0x1aa8] sm:$0xf0]  ;;  %v17606_v60 = vld [vmem:[%s19447_s22 + $0x52c] sm:$0xf0] }
 0x360   : > { %v18089_v36 = vld [vmem:[%s19447_s22 + $0x144c] sm:$0xf]  ;;  %v15205_v42 = vor.u32 %v18289_v15, %v15202_v52  ;;  %6547 = vmatpush.bf16.msrb.mxu2 %v14949_v33  ;;  %v12008_v15 = vld [vmem:[%s19447_s22 + $0x190] sm:$0xf] }
 0x361   : > { %v14402_v37 = vld [vmem:[%s19447_s22 + $0x1468] sm:$0xf0]  ;;  %v17494_v52 = vld [vmem:[%s19447_s22 + $0x1ac] sm:$0xf0] }
 0x362   : > { %v18153_v34 = vld [vmem:[%s19447_s22 + $0x164c] sm:$0xf]  ;;  %v14405_v56 = vor.u32 %v18089_v36, %v14402_v37  ;;  %6560 = vmatpush.bf16.msrb.mxu3 %v15205_v42  ;;  %v12520_v33 = vld [vmem:[%s19447_s22 + $0x590] sm:$0xf]  ;;  %v12009_v40 = vor.u32 %v17494_v52, %v12008_v15  ;;  %v12265_v42 = vor.u32 %v17558_v23, %v12264_v30  ;;  %v6266_v30 = vadd.f32 %v20490_v54, %v20436_v19  ;;  %v20588_v54 = vpop.f32.mrf.mxu3 }
 0x363   : > { %v14658_v44 = vld [vmem:[%s19447_s22 + $0x1668] sm:$0xf0]  ;;  %v17622_v36 = vld [vmem:[%s19447_s22 + $0x5ac] sm:$0xf0] }
 0x364   : > { %v18217_v45 = vld [vmem:[%s19447_s22 + $0x184c] sm:$0xf]  ;;  %v14661_v55 = vor.u32 %v18153_v34, %v14658_v44  ;;  %6522 = vmatpush.bf16.msrb.mxu0 %v14405_v56  ;;  %v12776_v37 = vld [vmem:[%s19447_s22 + $0x790] sm:$0xf]  ;;  %v12521_v44 = vor.u32 %v17622_v36, %v12520_v33 }
 0x365   : > { %v14914_v47 = vld [vmem:[%s19447_s22 + $0x1868] sm:$0xf0]  ;;  %v17686_v34 = vld [vmem:[%s19447_s22 + $0x7ac] sm:$0xf0] }
 0x366   : > { %v18281_v46 = vld [vmem:[%s19447_s22 + $0x1a4c] sm:$0xf]  ;;  %v14917_v29 = vor.u32 %v18217_v45, %v14914_v47  ;;  %6535 = vmatpush.bf16.msrb.mxu1 %v14661_v55  ;;  %v11976_v45 = vld [vmem:[%s19447_s22 + $0x150] sm:$0xf] }
 0x367   : > { %v15170_v22 = vld [vmem:[%s19447_s22 + $0x1a68] sm:$0xf0]  ;;  %v17486_v47 = vld [vmem:[%s19447_s22 + $0x16c] sm:$0xf0] }
 0x368   : > { %v18081_v48 = vld [vmem:[%s19447_s22 + $0x140c] sm:$0xf]  ;;  %v15173_v31 = vor.u32 %v18281_v46, %v15170_v22  ;;  %6548 = vmatpush.bf16.msrb.mxu2 %v14917_v29  ;;  %v12232_v46 = vld [vmem:[%s19447_s22 + $0x350] sm:$0xf]  ;;  %v12777_v22 = vor.u32 %v17686_v34, %v12776_v37 }
 0x369   : > { %v14370_v49 = vld [vmem:[%s19447_s22 + $0x1428] sm:$0xf0]  ;;  %v17550_v56 = vld [vmem:[%s19447_s22 + $0x36c] sm:$0xf0] }
 0x36a   : > { %v18145_v50 = vld [vmem:[%s19447_s22 + $0x160c] sm:$0xf]  ;;  %v14373_v1 = vor.u32 %v18081_v48, %v14370_v49  ;;  %6561 = vmatpush.bf16.msrb.mxu3 %v15173_v31  ;;  %v12488_v48 = vld [vmem:[%s19447_s22 + $0x550] sm:$0xf] }
 0x36b   : > { %v14626_v51 = vld [vmem:[%s19447_s22 + $0x1628] sm:$0xf0]  ;;  %v17614_v49 = vld [vmem:[%s19447_s22 + $0x56c] sm:$0xf0] }
 0x36c   : > { %v18209_v53 = vld [vmem:[%s19447_s22 + $0x180c] sm:$0xf]  ;;  %v14629_v6 = vor.u32 %v18145_v50, %v14626_v51  ;;  %6523 = vmatpush.bf16.msrb.mxu0 %v14373_v1  ;;  %v12744_v55 = vld [vmem:[%s19447_s22 + $0x750] sm:$0xf]  ;;  %v11977_v50 = vor.u32 %v17486_v47, %v11976_v45  ;;  %v12233_v51 = vor.u32 %v17550_v56, %v12232_v46  ;;  %v6279_v56 = vadd.f32 %v20495_v13, %v6266_v30  ;;  %v6358_v30 = vpop.f32.mrf.mxu3 }
 0x36d   : > { %v14882_v57 = vld [vmem:[%s19447_s22 + $0x1828] sm:$0xf0]  ;;  %v17678_v29 = vld [vmem:[%s19447_s22 + $0x76c] sm:$0xf0] }
 0x36e   : > { %v18273_v3 = vld [vmem:[%s19447_s22 + $0x1a0c] sm:$0xf]  ;;  %v14885_v2 = vor.u32 %v18209_v53, %v14882_v57  ;;  %6536 = vmatpush.bf16.msrb.mxu1 %v14629_v6  ;;  %v12489_v53 = vor.u32 %v17614_v49, %v12488_v48  ;;  %v17478_v31 = vld [vmem:[%s19447_s22 + $0x12c] sm:$0xf0]  ;;  %v12457_v6 = vor.u32 %v17606_v60, %v12456_v59  ;;  %v6332_v49 = vpop.f32.mrf.mxu1  ;;  %v6292_v59 = vadd.f32 %v20505_v14, %v6279_v56 }
 0x36f   : > { %v15138_v62 = vld [vmem:[%s19447_s22 + $0x1a28] sm:$0xf0]  ;;  %6524 = vmatmul.bf16.vlgmr.msrb.gmra.mxu0 %v19711_v24  ;;  %v12200_v57 = vld [vmem:[%s19447_s22 + $0x310] sm:$0xf]  ;;  %v11945_v11 = vor.u32 %v17478_v31, %v11944_v58 }
 0x370   : > { %v15141_v9 = vor.u32 %v18273_v3, %v15138_v62  ;;  %6549 = vmatpush.bf16.msrb.mxu2 %v14885_v2  ;;  %6568 = vmatpush.bf16.msra.mxu0 %v12041_v43  ;;  %v12745_v3 = vor.u32 %v17678_v29, %v12744_v55  ;;  %v17542_v62 = vld [vmem:[%s19447_s22 + $0x32c] sm:$0xf0] }
 0x371   : > { %6537 = vmatmul.bf16.vlgmr.msrb.gmra.mxu1 %v19717_v28  ;;  %v12712_v63 = vld [vmem:[%s19447_s22 + $0x710] sm:$0xf]  ;;  %v12201_v5 = vor.u32 %v17542_v62, %v12200_v57 }
 0x372   : > { %6562 = vmatpush.bf16.msrb.mxu3 %v15141_v9  ;;  %6581 = vmatpush.bf16.msra.mxu1 %v12297_v21  ;;  %v17670_v1 = vld [vmem:[%s19447_s22 + $0x72c] sm:$0xf0] }
 0x373   : > { %6550 = vmatmul.bf16.vlgmr.msrb.gmra.mxu2 %v19784_v12  ;;  %v11912_v2 = vld [vmem:[%s19447_s22 + $0xd0] sm:$0xf]  ;;  %v12713_v9 = vor.u32 %v17670_v1, %v12712_v63 }
 0x374   : > { %6594 = vmatpush.bf16.msra.mxu2 %v12553_v26  ;;  %6569 = vmatpush.bf16.msra.mxu0 %v12009_v40  ;;  %v17470_v7 = vld [vmem:[%s19447_s22 + $0xec] sm:$0xf0] }
 0x375   : > { %6563 = vmatmul.bf16.vlgmr.msrb.gmra.mxu3 %v19789_v16  ;;  %v12168_v8 = vld [vmem:[%s19447_s22 + $0x2d0] sm:$0xf] }
 0x376   : > { %6607 = vmatpush.bf16.msra.mxu3 %v12809_v32  ;;  %6582 = vmatpush.bf16.msra.mxu1 %v12265_v42  ;;  %v17534_v43 = vld [vmem:[%s19447_s22 + $0x2ec] sm:$0xf0]  ;;  %v11913_v32 = vor.u32 %v17470_v7, %v11912_v2  ;;  %v20583_v42 = vpop.f32.mrf.mxu2 }
 0x377   : > { %v12424_v21 = vld [vmem:[%s19447_s22 + $0x4d0] sm:$0xf]  ;;  %v12169_v23 = vor.u32 %v17534_v43, %v12168_v8 }
 0x378   : > { %6595 = vmatpush.bf16.msra.mxu2 %v12521_v44  ;;  %6570 = vmatpush.bf16.msra.mxu0 %v11977_v50  ;;  %v17598_v26 = vld [vmem:[%s19447_s22 + $0x4ec] sm:$0xf0] }
 0x379   : > { %v12680_v15 = vld [vmem:[%s19447_s22 + $0x6d0] sm:$0xf]  ;;  %v12425_v33 = vor.u32 %v17598_v26, %v12424_v21 }
 0x37a   : > { %6608 = vmatpush.bf16.msra.mxu3 %v12777_v22  ;;  %6583 = vmatpush.bf16.msra.mxu1 %v12233_v51  ;;  %v17662_v52 = vld [vmem:[%s19447_s22 + $0x6ec] sm:$0xf0]  ;;  %v6319_v22 = vpop.f32.mrf.mxu0 }
 0x37b   : > { %v11880_v36 = vld [vmem:[%s19447_s22 + $0x90] sm:$0xf]  ;;  %v12681_v40 = vor.u32 %v17662_v52, %v12680_v15 }
 0x37c   : > { %6596 = vmatpush.bf16.msra.mxu2 %v12489_v53  ;;  %6571 = vmatpush.bf16.msra.mxu0 %v11945_v11  ;;  %v17462_v37 = vld [vmem:[%s19447_s22 + $0xac] sm:$0xf0] }
 0x37d   : > { %v12136_v34 = vld [vmem:[%s19447_s22 + $0x290] sm:$0xf]  ;;  %v11881_v48 = vor.u32 %v17462_v37, %v11880_v36 }
 0x37e   : > { %6609 = vmatpush.bf16.msra.mxu3 %v12745_v3  ;;  %6584 = vmatpush.bf16.msra.mxu1 %v12201_v5  ;;  %v17526_v44 = vld [vmem:[%s19447_s22 + $0x2ac] sm:$0xf0]  ;;  %v6345_v21 = vpop.f32.mrf.mxu2 }
 0x37f   : > { %v12392_v45 = vld [vmem:[%s19447_s22 + $0x490] sm:$0xf]  ;;  %v12137_v55 = vor.u32 %v17526_v44, %v12136_v34 }
 0x380   : > { %6597 = vmatpush.bf16.msra.mxu2 %v12457_v6  ;;  %v17590_v19 = vld [vmem:[%s19447_s22 + $0x4ac] sm:$0xf0]  ;;  %6572 = vmatpush.bf16.msra.mxu0 %v11913_v32  ;;  %v6305_v32 = vadd.f32 %v20510_v27, %v6292_v59 }
 0x381   : > { %v12648_v47 = vld [vmem:[%s19447_s22 + $0x690] sm:$0xf]  ;;  %v12393_v29 = vor.u32 %v17590_v19, %v12392_v45 }
 0x382   : > { %6610 = vmatpush.bf16.msra.mxu3 %v12713_v9  ;;  %v17654_v46 = vld [vmem:[%s19447_s22 + $0x6ac] sm:$0xf0]  ;;  %6585 = vmatpush.bf16.msra.mxu1 %v12169_v23  ;;  %v6318_v19 = vadd.f32 %v20564_v61, %v6305_v32  ;;  %v6369_v30 = vpop.f32.mrf.mxu0 }
 0x383   : > { %v11848_v50 = vld [vmem:[%s19447_s22 + $0x50] sm:$0xf]  ;;  %v12649_v58 = vor.u32 %v17654_v46, %v12648_v47 }
 0x384   : > { %6598 = vmatpush.bf16.msra.mxu2 %v12425_v33  ;;  %v17454_v51 = vld [vmem:[%s19447_s22 + $0x6c] sm:$0xf0]  ;;  %6573 = vmatpush.bf16.msra.mxu0 %v11881_v48 }
 0x385   : > { %v12104_v53 = vld [vmem:[%s19447_s22 + $0x250] sm:$0xf]  ;;  %v11849_v60 = vor.u32 %v17454_v51, %v11848_v50 }
 0x386   : > { %6611 = vmatpush.bf16.msra.mxu3 %v12681_v40  ;;  %v17518_v31 = vld [vmem:[%s19447_s22 + $0x26c] sm:$0xf0]  ;;  %6586 = vmatpush.bf16.msra.mxu1 %v12137_v55 }
 0x387   : > { %v12360_v13 = vld [vmem:[%s19447_s22 + $0x450] sm:$0xf]  ;;  %v12105_v11 = vor.u32 %v17518_v31, %v12104_v53 }
 0x388   : > { %v17582_v57 = vld [vmem:[%s19447_s22 + $0x46c] sm:$0xf0]  ;;  %6599 = vmatpush.bf16.msra.mxu2 %v12393_v29  ;;  %6574 = vmatpush.bf16.msra.mxu0 %v11849_v60 }
 0x389   : > { %v12616_v3 = vld [vmem:[%s19447_s22 + $0x650] sm:$0xf]  ;;  %v12361_v5 = vor.u32 %v17582_v57, %v12360_v13 }
 0x38a   : > { %v17646_v62 = vld [vmem:[%s19447_s22 + $0x66c] sm:$0xf0]  ;;  %6612 = vmatpush.bf16.msra.mxu3 %v12649_v58  ;;  %6587 = vmatpush.bf16.msra.mxu1 %v12105_v11  ;;  %v6331_v58 = vadd.f32 %v20568_v4, %v6318_v19 }
 0x38b   : > { %v11816_v63 = vld [vmem:[%s19447_s22 + $0x10] sm:$0xf]  ;;  %v12617_v14 = vor.u32 %v17646_v62, %v12616_v3 }
 0x38c   : > { %v17446_v1 = vld [vmem:[%s19447_s22 + $0x2c] sm:$0xf0]  ;;  %6600 = vmatpush.bf16.msra.mxu2 %v12361_v5  ;;  %v6344_v60 = vadd.f32 %v20583_v42, %v6331_v58 }
 0x38d   : > { %v12072_v6 = vld [vmem:[%s19447_s22 + $0x210] sm:$0xf]  ;;  %v11817_v23 = vor.u32 %v17446_v1, %v11816_v63 }
 0x38e   : > { %v17510_v2 = vld [vmem:[%s19447_s22 + $0x22c] sm:$0xf0]  ;;  %6613 = vmatpush.bf16.msra.mxu3 %v12617_v14 }
 0x38f   : > { %v12328_v7 = vld [vmem:[%s19447_s22 + $0x410] sm:$0xf]  ;;  %v12073_v34 = vor.u32 %v17510_v2, %v12072_v6  ;;  %6575 = vmatpush.bf16.msra.mxu0 %v11817_v23 }
 0x390   : > { %v17574_v8 = vld [vmem:[%s19447_s22 + $0x42c] sm:$0xf0] }
 0x391   : > { %v12584_v9 = vld [vmem:[%s19447_s22 + $0x610] sm:$0xf]  ;;  %v12329_v40 = vor.u32 %v17574_v8, %v12328_v7  ;;  %6588 = vmatpush.bf16.msra.mxu1 %v12073_v34 }
 0x392   : > { %v17638_v43 = vld [vmem:[%s19447_s22 + $0x62c] sm:$0xf0]  ;;  %6576 = vmatmul.bf16.vlgmr.msra.gmra.mxu0 %v19563_v10 }
 0x393   : > { %v13064_v26 = vld [vmem:[%s19447_s22 + $0x9d0] sm:$0xf]  ;;  %v12585_v27 = vor.u32 %v17638_v43, %v12584_v9  ;;  %6601 = vmatpush.bf16.msra.mxu2 %v12329_v40  ;;  %v6357_v43 = vadd.f32 %v20588_v54, %v6344_v60  ;;  %v6382_v54 = vpop.f32.mrf.mxu1 }
 0x394   : > { %v17758_v15 = vld [vmem:[%s19447_s22 + $0x9ec] sm:$0xf0]  ;;  %6589 = vmatmul.bf16.vlgmr.msra.gmra.mxu1 %v19572_v18 }
 0x395   : > { %v13320_v52 = vld [vmem:[%s19447_s22 + $0xbd0] sm:$0xf]  ;;  %v13065_v47 = vor.u32 %v17758_v15, %v13064_v26  ;;  %6614 = vmatpush.bf16.msra.mxu3 %v12585_v27 }
 0x396   : > { %v17822_v33 = vld [vmem:[%s19447_s22 + $0xbec] sm:$0xf0]  ;;  %6602 = vmatmul.bf16.vlgmr.msra.gmra.mxu2 %v19554_v0 }
 0x397   : > { %v13576_v36 = vld [vmem:[%s19447_s22 + $0xdd0] sm:$0xf]  ;;  %v13321_v46 = vor.u32 %v17822_v33, %v13320_v52  ;;  %6620 = vmatpush.bf16.msrb.mxu0 %v13065_v47  ;;  %v6370_v33 = vadd.f32 %v6369_v30, %v6357_v43 }
 0x398   : > { %v17886_v37 = vld [vmem:[%s19447_s22 + $0xdec] sm:$0xf0]  ;;  %6615 = vmatmul.bf16.vlgmr.msra.gmra.mxu3 %v19570_v17 }
 0x399   : > { %v13832_v44 = vld [vmem:[%s19447_s22 + $0xfd0] sm:$0xf]  ;;  %v13577_v22 = vor.u32 %v17886_v37, %v13576_v36  ;;  %6633 = vmatpush.bf16.msrb.mxu1 %v13321_v46  ;;  %v430_v37 = vld [vmem:[#allocation2 + $0x18] sm:$0xff]  ;;  %v6383_v47 = vadd.f32 %v6382_v54, %v6370_v33 }
 0x39a   : > { %v17950_v45 = vld [vmem:[%s19447_s22 + $0xfec] sm:$0xf0] }
 0x39b   : > { %v13032_v56 = vld [vmem:[%s19447_s22 + $0x990] sm:$0xf]  ;;  %v13833_v55 = vor.u32 %v17950_v45, %v13832_v44  ;;  %6646 = vmatpush.bf16.msrb.mxu2 %v13577_v22 }
 0x39c   : > { %v17750_v48 = vld [vmem:[%s19447_s22 + $0x9ac] sm:$0xf0] }
 0x39d   : > { %v13288_v49 = vld [vmem:[%s19447_s22 + $0xb90] sm:$0xf]  ;;  %v13033_v31 = vor.u32 %v17750_v48, %v13032_v56  ;;  %6659 = vmatpush.bf16.msrb.mxu3 %v13833_v55  ;;  %v7298_v55 = vadd.f32 %v6383_v47, %v430_v37 }
 0x39e   : > { %v17814_v29 = vld [vmem:[%s19447_s22 + $0xbac] sm:$0xf0] }
 0x39f   : > { %v13544_v50 = vld [vmem:[%s19447_s22 + $0xd90] sm:$0xf]  ;;  %v13289_v13 = vor.u32 %v17814_v29, %v13288_v49  ;;  %6621 = vmatpush.bf16.msrb.mxu0 %v13033_v31  ;;  %7306 = vst [vmem:[#allocation2 + $0x18] sm:$0xff] %v7298_v55 }
 0x3a0   : > { %v17878_v51 = vld [vmem:[%s19447_s22 + $0xdac] sm:$0xf0] }
 0x3a1   : > { %v13800_v61 = vld [vmem:[%s19447_s22 + $0xf90] sm:$0xf]  ;;  %v13545_v57 = vor.u32 %v17878_v51, %v13544_v50  ;;  %6634 = vmatpush.bf16.msrb.mxu1 %v13289_v13 }
 0x3a2   : > { %v17942_v53 = vld [vmem:[%s19447_s22 + $0xfac] sm:$0xf0] }
 0x3a3   : > { %v13000_v3 = vld [vmem:[%s19447_s22 + $0x950] sm:$0xf]  ;;  %v13801_v63 = vor.u32 %v17942_v53, %v13800_v61  ;;  %6647 = vmatpush.bf16.msrb.mxu2 %v13545_v57 }
 0x3a4   : > { %v17742_v62 = vld [vmem:[%s19447_s22 + $0x96c] sm:$0xf0] }
 0x3a5   : > { %v13256_v59 = vld [vmem:[%s19447_s22 + $0xb50] sm:$0xf]  ;;  %v13001_v42 = vor.u32 %v17742_v62, %v13000_v3  ;;  %6660 = vmatpush.bf16.msrb.mxu3 %v13801_v63  ;;  %v6395_v62 = vpop.f32.mrf.mxu2  ;;  %v6408_v63 = vpop.f32.mrf.mxu3 }
 0x3a6   : > { %v17806_v1 = vld [vmem:[%s19447_s22 + $0xb6c] sm:$0xf0] }
 0x3a7   : > { %v13512_v4 = vld [vmem:[%s19447_s22 + $0xd50] sm:$0xf]  ;;  %v13257_v2 = vor.u32 %v17806_v1, %v13256_v59  ;;  %6622 = vmatpush.bf16.msrb.mxu0 %v13001_v42  ;;  %v6371_v1 = vpop.f32.mrf.mxu0 }
 0x3a8   : > { %v17870_v11 = vld [vmem:[%s19447_s22 + $0xd6c] sm:$0xf0] }
 0x3a9   : > { %v13768_v5 = vld [vmem:[%s19447_s22 + $0xf50] sm:$0xf]  ;;  %v13513_v7 = vor.u32 %v17870_v11, %v13512_v4  ;;  %6635 = vmatpush.bf16.msrb.mxu1 %v13257_v2  ;;  %v20667_v11 = vadd.f32 %v6408_v63, %v6395_v62 }
 0x3aa   : > { %v17934_v6 = vld [vmem:[%s19447_s22 + $0xf6c] sm:$0xf0] }
 0x3ab   : > { %v12968_v14 = vld [vmem:[%s19447_s22 + $0x910] sm:$0xf]  ;;  %v13769_v21 = vor.u32 %v17934_v6, %v13768_v5  ;;  %6648 = vmatpush.bf16.msrb.mxu2 %v13513_v7  ;;  %v6384_v5 = vpop.f32.mrf.mxu1 }
 0x3ac   : > { %v17734_v8 = vld [vmem:[%s19447_s22 + $0x92c] sm:$0xf0] }
 0x3ad   : > { %v13224_v9 = vld [vmem:[%s19447_s22 + $0xb10] sm:$0xf]  ;;  %v12969_v36 = vor.u32 %v17734_v8, %v12968_v14  ;;  %6661 = vmatpush.bf16.msrb.mxu3 %v13769_v21 }
 0x3ae   : > { %v17798_v26 = vld [vmem:[%s19447_s22 + $0xb2c] sm:$0xf0] }
 0x3af   : > { %v13480_v15 = vld [vmem:[%s19447_s22 + $0xd10] sm:$0xf]  ;;  %v13225_v34 = vor.u32 %v17798_v26, %v13224_v9  ;;  %6623 = vmatpush.bf16.msrb.mxu0 %v12969_v36 }
 0x3b0   : > { %v17862_v52 = vld [vmem:[%s19447_s22 + $0xd2c] sm:$0xf0] }
 0x3b1   : > { %v13736_v32 = vld [vmem:[%s19447_s22 + $0xf10] sm:$0xf]  ;;  %v13481_v40 = vor.u32 %v17862_v52, %v13480_v15  ;;  %6636 = vmatpush.bf16.msrb.mxu1 %v13225_v34 }
 0x3b2   : > { %v17926_v23 = vld [vmem:[%s19447_s22 + $0xf2c] sm:$0xf0] }
 0x3b3   : > { %v12936_v44 = vld [vmem:[%s19447_s22 + $0x8d0] sm:$0xf]  ;;  %v13737_v27 = vor.u32 %v17926_v23, %v13736_v32  ;;  %6649 = vmatpush.bf16.msrb.mxu2 %v13481_v40 }
 0x3b4   : > { %v17726_v45 = vld [vmem:[%s19447_s22 + $0x8ec] sm:$0xf0] }
 0x3b5   : > { %v13192_v19 = vld [vmem:[%s19447_s22 + $0xad0] sm:$0xf]  ;;  %v12937_v29 = vor.u32 %v17726_v45, %v12936_v44  ;;  %6662 = vmatpush.bf16.msrb.mxu3 %v13737_v27 }
 0x3b6   : > { %v17790_v46 = vld [vmem:[%s19447_s22 + $0xaec] sm:$0xf0] }
 0x3b7   : > { %v13448_v22 = vld [vmem:[%s19447_s22 + $0xcd0] sm:$0xf]  ;;  %v13193_v51 = vor.u32 %v17790_v46, %v13192_v19  ;;  %6624 = vmatpush.bf16.msrb.mxu0 %v12937_v29  ;;  %v6397_v19 = vpop.f32.mrf.mxu2 }
 0x3b8   : > { %v17854_v56 = vld [vmem:[%s19447_s22 + $0xcec] sm:$0xf0] }
 0x3b9   : > { %v13704_v48 = vld [vmem:[%s19447_s22 + $0xed0] sm:$0xf]  ;;  %v13449_v61 = vor.u32 %v17854_v56, %v13448_v22  ;;  %6637 = vmatpush.bf16.msrb.mxu1 %v13193_v51  ;;  %v6410_v22 = vpop.f32.mrf.mxu3 }
 0x3ba   : > { %v17918_v49 = vld [vmem:[%s19447_s22 + $0xeec] sm:$0xf0] }
 0x3bb   : > { %v12904_v50 = vld [vmem:[%s19447_s22 + $0x890] sm:$0xf]  ;;  %v13705_v13 = vor.u32 %v17918_v49, %v13704_v48  ;;  %6650 = vmatpush.bf16.msrb.mxu2 %v13449_v61 }
 0x3bc   : > { %v17718_v53 = vld [vmem:[%s19447_s22 + $0x8ac] sm:$0xf0] }
 0x3bd   : > { %v13160_v58 = vld [vmem:[%s19447_s22 + $0xa90] sm:$0xf]  ;;  %v12905_v4 = vor.u32 %v17718_v53, %v12904_v50  ;;  %6663 = vmatpush.bf16.msrb.mxu3 %v13705_v13 }
 0x3be   : > { %v17782_v31 = vld [vmem:[%s19447_s22 + $0xaac] sm:$0xf0] }
 0x3bf   : > { %v13416_v57 = vld [vmem:[%s19447_s22 + $0xc90] sm:$0xf]  ;;  %v13161_v6 = vor.u32 %v17782_v31, %v13160_v58  ;;  %6625 = vmatpush.bf16.msrb.mxu0 %v12905_v4 }
 0x3c0   : > { %v17846_v3 = vld [vmem:[%s19447_s22 + $0xcac] sm:$0xf0] }
 0x3c1   : > { %v13672_v59 = vld [vmem:[%s19447_s22 + $0xe90] sm:$0xf]  ;;  %v13417_v42 = vor.u32 %v17846_v3, %v13416_v57  ;;  %6638 = vmatpush.bf16.msrb.mxu1 %v13161_v6 }
 0x3c2   : > { %v17910_v60 = vld [vmem:[%s19447_s22 + $0xeac] sm:$0xf0] }
 0x3c3   : > { %v12872_v2 = vld [vmem:[%s19447_s22 + $0x850] sm:$0xf]  ;;  %v13673_v8 = vor.u32 %v17910_v60, %v13672_v59  ;;  %6651 = vmatpush.bf16.msrb.mxu2 %v13417_v42 }
 0x3c4   : > { %v17710_v7 = vld [vmem:[%s19447_s22 + $0x86c] sm:$0xf0] }
 0x3c5   : > { %v13128_v14 = vld [vmem:[%s19447_s22 + $0xa50] sm:$0xf]  ;;  %v12873_v52 = vor.u32 %v17710_v7, %v12872_v2  ;;  %6664 = vmatpush.bf16.msrb.mxu3 %v13673_v8 }
 0x3c6   : > { %v17774_v9 = vld [vmem:[%s19447_s22 + $0xa6c] sm:$0xf0] }
 0x3c7   : > { %v13384_v43 = vld [vmem:[%s19447_s22 + $0xc50] sm:$0xf]  ;;  %v13129_v23 = vor.u32 %v17774_v9, %v13128_v14  ;;  %6626 = vmatpush.bf16.msrb.mxu0 %v12873_v52 }
 0x3c8   : > { %v17838_v21 = vld [vmem:[%s19447_s22 + $0xc6c] sm:$0xf0] }
 0x3c9   : > { %v13640_v26 = vld [vmem:[%s19447_s22 + $0xe50] sm:$0xf]  ;;  %v13385_v33 = vor.u32 %v17838_v21, %v13384_v43  ;;  %6639 = vmatpush.bf16.msrb.mxu1 %v13129_v23 }
 0x3ca   : > { %v17902_v15 = vld [vmem:[%s19447_s22 + $0xe6c] sm:$0xf0] }
 0x3cb   : > { %v12840_v30 = vld [vmem:[%s19447_s22 + $0x810] sm:$0xf]  ;;  %v13641_v34 = vor.u32 %v17902_v15, %v13640_v26  ;;  %6652 = vmatpush.bf16.msrb.mxu2 %v13385_v33 }
 0x3cc   : > { %v17702_v32 = vld [vmem:[%s19447_s22 + $0x82c] sm:$0xf0] }
 0x3cd   : > { %v13096_v36 = vld [vmem:[%s19447_s22 + $0xa10] sm:$0xf]  ;;  %v12841_v56 = vor.u32 %v17702_v32, %v12840_v30  ;;  %6665 = vmatpush.bf16.msrb.mxu3 %v13641_v34 }
 0x3ce   : > { %v17766_v37 = vld [vmem:[%s19447_s22 + $0xa2c] sm:$0xf0] }
 0x3cf   : > { %v13352_v54 = vld [vmem:[%s19447_s22 + $0xc10] sm:$0xf]  ;;  %v13097_v29 = vor.u32 %v17766_v37, %v13096_v36  ;;  %6627 = vmatpush.bf16.msrb.mxu0 %v12841_v56 }
 0x3d0   : > { %v17830_v40 = vld [vmem:[%s19447_s22 + $0xc2c] sm:$0xf0] }
 0x3d1   : > { %v13608_v44 = vld [vmem:[%s19447_s22 + $0xe10] sm:$0xf]  ;;  %v13353_v50 = vor.u32 %v17830_v40, %v13352_v54  ;;  %6640 = vmatpush.bf16.msrb.mxu1 %v13097_v29 }
 0x3d2   : > { %v17894_v45 = vld [vmem:[%s19447_s22 + $0xe2c] sm:$0xf0]  ;;  %6628 = vmatmul.bf16.vlgmr.msrb.gmra.mxu0 %v19633_v38 }
 0x3d3   : > { %v14088_v27 = vld [vmem:[%s19447_s22 + $0x11d0] sm:$0xf]  ;;  %v13609_v53 = vor.u32 %v17894_v45, %v13608_v44  ;;  %6653 = vmatpush.bf16.msrb.mxu2 %v13353_v50 }
 0x3d4   : > { %v18014_v47 = vld [vmem:[%s19447_s22 + $0x11ec] sm:$0xf0]  ;;  %6641 = vmatmul.bf16.vlgmr.msrb.gmra.mxu1 %v19637_v41 }
 0x3d5   : > { %v14344_v46 = vld [vmem:[%s19447_s22 + $0x13d0] sm:$0xf]  ;;  %v14089_v58 = vor.u32 %v18014_v47, %v14088_v27  ;;  %6666 = vmatpush.bf16.msrb.mxu3 %v13609_v53  ;;  %v20721_v47 = vpop.f32.mrf.mxu0 }
 0x3d6   : > { %v18078_v48 = vld [vmem:[%s19447_s22 + $0x13ec] sm:$0xf0]  ;;  %6654 = vmatmul.bf16.vlgmr.msrb.gmra.mxu2 %v19629_v35 }
 0x3d7   : > { %v14600_v49 = vld [vmem:[%s19447_s22 + $0x15d0] sm:$0xf]  ;;  %v14345_v31 = vor.u32 %v18078_v48, %v14344_v46  ;;  %6672 = vmatpush.bf16.msra.mxu0 %v14089_v58 }
 0x3d8   : > { %v18142_v55 = vld [vmem:[%s19447_s22 + $0x15ec] sm:$0xf0]  ;;  %6667 = vmatmul.bf16.vlgmr.msrb.gmra.mxu3 %v19635_v39 }
 0x3d9   : > { %v14856_v51 = vld [vmem:[%s19447_s22 + $0x17d0] sm:$0xf]  ;;  %v14601_v13 = vor.u32 %v18142_v55, %v14600_v49  ;;  %6685 = vmatpush.bf16.msra.mxu1 %v14345_v31  ;;  %v20726_v55 = vpop.f32.mrf.mxu1 }
 0x3da   : > { %v18206_v61 = vld [vmem:[%s19447_s22 + $0x17ec] sm:$0xf0] }
 0x3db   : > { %v14056_v57 = vld [vmem:[%s19447_s22 + $0x1190] sm:$0xf]  ;;  %v14857_v59 = vor.u32 %v18206_v61, %v14856_v51  ;;  %6698 = vmatpush.bf16.msra.mxu2 %v14601_v13 }
 0x3dc   : > { %v18006_v3 = vld [vmem:[%s19447_s22 + $0x11ac] sm:$0xf0] }
 0x3dd   : > { %v14312_v62 = vld [vmem:[%s19447_s22 + $0x1390] sm:$0xf]  ;;  %v14057_v6 = vor.u32 %v18006_v3, %v14056_v57  ;;  %6711 = vmatpush.bf16.msra.mxu3 %v14857_v59 }
 0x3de   : > { %v18070_v60 = vld [vmem:[%s19447_s22 + $0x13ac] sm:$0xf0] }
 0x3df   : > { %v14568_v63 = vld [vmem:[%s19447_s22 + $0x1590] sm:$0xf]  ;;  %v14313_v42 = vor.u32 %v18070_v60, %v14312_v62  ;;  %6673 = vmatpush.bf16.msra.mxu0 %v14057_v6  ;;  %v20736_v60 = vpop.f32.mrf.mxu2  ;;  %v20741_v6 = vpop.f32.mrf.mxu3 }
 0x3e0   : > { %v18134_v1 = vld [vmem:[%s19447_s22 + $0x15ac] sm:$0xf0] }
 0x3e1   : > { %v14824_v4 = vld [vmem:[%s19447_s22 + $0x1790] sm:$0xf]  ;;  %v14569_v2 = vor.u32 %v18134_v1, %v14568_v63  ;;  %6686 = vmatpush.bf16.msra.mxu1 %v14313_v42 }
 0x3e2   : > { %v18198_v5 = vld [vmem:[%s19447_s22 + $0x17ac] sm:$0xf0] }
 0x3e3   : > { %v14024_v7 = vld [vmem:[%s19447_s22 + $0x1150] sm:$0xf]  ;;  %v14825_v9 = vor.u32 %v18198_v5, %v14824_v4  ;;  %6699 = vmatpush.bf16.msra.mxu2 %v14569_v2 }
 0x3e4   : > { %v17998_v14 = vld [vmem:[%s19447_s22 + $0x116c] sm:$0xf0] }
 0x3e5   : > { %v14280_v8 = vld [vmem:[%s19447_s22 + $0x1350] sm:$0xf]  ;;  %v14025_v30 = vor.u32 %v17998_v14, %v14024_v7  ;;  %6712 = vmatpush.bf16.msra.mxu3 %v14825_v9  ;;  %v6423_v14 = vpop.f32.mrf.mxu0 }
 0x3e6   : > { %v18062_v43 = vld [vmem:[%s19447_s22 + $0x136c] sm:$0xf0] }
 0x3e7   : > { %v14536_v21 = vld [vmem:[%s19447_s22 + $0x1550] sm:$0xf]  ;;  %v14281_v32 = vor.u32 %v18062_v43, %v14280_v8  ;;  %6674 = vmatpush.bf16.msra.mxu0 %v14025_v30 }
 0x3e8   : > { %v18126_v26 = vld [vmem:[%s19447_s22 + $0x156c] sm:$0xf0] }
 0x3e9   : > { %v14792_v15 = vld [vmem:[%s19447_s22 + $0x1750] sm:$0xf]  ;;  %v14537_v23 = vor.u32 %v18126_v26, %v14536_v21  ;;  %6687 = vmatpush.bf16.msra.mxu1 %v14281_v32 }
 0x3ea   : > { %v18190_v52 = vld [vmem:[%s19447_s22 + $0x176c] sm:$0xf0] }
 0x3eb   : > { %v13992_v33 = vld [vmem:[%s19447_s22 + $0x1110] sm:$0xf]  ;;  %v14793_v54 = vor.u32 %v18190_v52, %v14792_v15  ;;  %6700 = vmatpush.bf16.msra.mxu2 %v14537_v23  ;;  %v6436_v15 = vpop.f32.mrf.mxu1 }
 0x3ec   : > { %v17990_v36 = vld [vmem:[%s19447_s22 + $0x112c] sm:$0xf0] }
 0x3ed   : > { %v14248_v37 = vld [vmem:[%s19447_s22 + $0x1310] sm:$0xf]  ;;  %v13993_v27 = vor.u32 %v17990_v36, %v13992_v33  ;;  %6713 = vmatpush.bf16.msra.mxu3 %v14793_v54 }
 0x3ee   : > { %v18054_v34 = vld [vmem:[%s19447_s22 + $0x132c] sm:$0xf0] }
 0x3ef   : > { %v14504_v40 = vld [vmem:[%s19447_s22 + $0x1510] sm:$0xf]  ;;  %v14249_v46 = vor.u32 %v18054_v34, %v14248_v37  ;;  %6675 = vmatpush.bf16.msra.mxu0 %v13993_v27 }
 0x3f0   : > { %v18118_v44 = vld [vmem:[%s19447_s22 + $0x152c] sm:$0xf0] }
 0x3f1   : > { %v14760_v45 = vld [vmem:[%s19447_s22 + $0x1710] sm:$0xf]  ;;  %v14505_v22 = vor.u32 %v18118_v44, %v14504_v40  ;;  %6688 = vmatpush.bf16.msra.mxu1 %v14249_v46  ;;  %v6449_v46 = vpop.f32.mrf.mxu2 }
 0x3f2   : > { %v18182_v19 = vld [vmem:[%s19447_s22 + $0x172c] sm:$0xf0] }
 0x3f3   : > { %v13960_v56 = vld [vmem:[%s19447_s22 + $0x10d0] sm:$0xf]  ;;  %v14761_v29 = vor.u32 %v18182_v19, %v14760_v45  ;;  %6701 = vmatpush.bf16.msra.mxu2 %v14505_v22 }
 0x3f4   : > { %v17982_v48 = vld [vmem:[%s19447_s22 + $0x10ec] sm:$0xf0] }
 0x3f5   : > { %v14216_v49 = vld [vmem:[%s19447_s22 + $0x12d0] sm:$0xf]  ;;  %v13961_v31 = vor.u32 %v17982_v48, %v13960_v56  ;;  %6714 = vmatpush.bf16.msra.mxu3 %v14761_v29  ;;  %v6462_v29 = vpop.f32.mrf.mxu3 }
 0x3f6   : > { %v18046_v50 = vld [vmem:[%s19447_s22 + $0x12ec] sm:$0xf0]  ;;  %v17474_v29 = vld [vmem:[%s19447_s22 + $0x114] sm:$0xf] }
 0x3f7   : > { %v14472_v51 = vld [vmem:[%s19447_s22 + $0x14d0] sm:$0xf]  ;;  %v14217_v13 = vor.u32 %v18046_v50, %v14216_v49  ;;  %6676 = vmatpush.bf16.msra.mxu0 %v13961_v31  ;;  %v17498_v31 = vld [vmem:[%s19447_s22 + $0x1d4] sm:$0xf] }
 0x3f8   : > { %v18110_v61 = vld [vmem:[%s19447_s22 + $0x14ec] sm:$0xf0] }
 0x3f9   : > { %v14728_v53 = vld [vmem:[%s19447_s22 + $0x16d0] sm:$0xf]  ;;  %v14473_v57 = vor.u32 %v18110_v61, %v14472_v51  ;;  %6689 = vmatpush.bf16.msra.mxu1 %v14217_v13  ;;  %v12042_v13 = vld [vmem:[%s19447_s22 + $0x1f0] sm:$0xf0] }
 0x3fa   : > { %v18174_v58 = vld [vmem:[%s19447_s22 + $0x16ec] sm:$0xf0] }
 0x3fb   : > { %v13928_v3 = vld [vmem:[%s19447_s22 + $0x1090] sm:$0xf]  ;;  %v14729_v63 = vor.u32 %v18174_v58, %v14728_v53  ;;  %6702 = vmatpush.bf16.msra.mxu2 %v14473_v57 }
 0x3fc   : > { %v17974_v62 = vld [vmem:[%s19447_s22 + $0x10ac] sm:$0xf0] }
 0x3fd   : > { %v14184_v59 = vld [vmem:[%s19447_s22 + $0x1290] sm:$0xf]  ;;  %v13929_v7 = vor.u32 %v17974_v62, %v13928_v3  ;;  %6715 = vmatpush.bf16.msra.mxu3 %v14729_v63  ;;  %v17562_v62 = vld [vmem:[%s19447_s22 + $0x3d4] sm:$0xf] }
 0x3fe   : > { %v18038_v1 = vld [vmem:[%s19447_s22 + $0x12ac] sm:$0xf0] }
 0x3ff   : > { %v14440_v4 = vld [vmem:[%s19447_s22 + $0x1490] sm:$0xf]  ;;  %v14185_v8 = vor.u32 %v18038_v1, %v14184_v59  ;;  %6677 = vmatpush.bf16.msra.mxu0 %v13929_v7  ;;  %v12298_v59 = vld [vmem:[%s19447_s22 + $0x3f0] sm:$0xf0] }
 0x400   : > { %v18102_v5 = vld [vmem:[%s19447_s22 + $0x14ac] sm:$0xf0]  ;;  %v12301_v14 = vor.u32 %v17562_v62, %v12298_v59 }
 0x401   : > { %v14696_v42 = vld [vmem:[%s19447_s22 + $0x1690] sm:$0xf]  ;;  %v14441_v9 = vor.u32 %v18102_v5, %v14440_v4  ;;  %6690 = vmatpush.bf16.msra.mxu1 %v14185_v8  ;;  %v12045_v5 = vor.u32 %v17498_v31, %v12042_v13  ;;  %v20799_v31 = vpop.f32.mrf.mxu1 }
 0x402   : > { %v18166_v2 = vld [vmem:[%s19447_s22 + $0x16ac] sm:$0xf0] }
 0x403   : > { %v13896_v43 = vld [vmem:[%s19447_s22 + $0x1050] sm:$0xf]  ;;  %v14697_v52 = vor.u32 %v18166_v2, %v14696_v42  ;;  %6703 = vmatpush.bf16.msra.mxu2 %v14441_v9  ;;  %v17490_v9 = vld [vmem:[%s19447_s22 + $0x194] sm:$0xf] }
 0x404   : > { %v17966_v21 = vld [vmem:[%s19447_s22 + $0x106c] sm:$0xf0] }
 0x405   : > { %v14152_v26 = vld [vmem:[%s19447_s22 + $0x1250] sm:$0xf]  ;;  %v13897_v37 = vor.u32 %v17966_v21, %v13896_v43  ;;  %6716 = vmatpush.bf16.msra.mxu3 %v14697_v52  ;;  %v12010_v43 = vld [vmem:[%s19447_s22 + $0x1b0] sm:$0xf0] }
 0x406   : > { %v18030_v30 = vld [vmem:[%s19447_s22 + $0x126c] sm:$0xf0]  ;;  %v17554_v21 = vld [vmem:[%s19447_s22 + $0x394] sm:$0xf] }
 0x407   : > { %v14408_v32 = vld [vmem:[%s19447_s22 + $0x1450] sm:$0xf]  ;;  %v14153_v40 = vor.u32 %v18030_v30, %v14152_v26  ;;  %6678 = vmatpush.bf16.msra.mxu0 %v13897_v37  ;;  %v12266_v26 = vld [vmem:[%s19447_s22 + $0x3b0] sm:$0xf0]  ;;  %v12013_v30 = vor.u32 %v17490_v9, %v12010_v43 }
 0x408   : > { %v18094_v23 = vld [vmem:[%s19447_s22 + $0x146c] sm:$0xf0] }
 0x409   : > { %v14664_v33 = vld [vmem:[%s19447_s22 + $0x1650] sm:$0xf]  ;;  %v14409_v44 = vor.u32 %v18094_v23, %v14408_v32  ;;  %6691 = vmatpush.bf16.msra.mxu1 %v14153_v40  ;;  %v17546_v40 = vld [vmem:[%s19447_s22 + $0x354] sm:$0xf] }
 0x40a   : > { %v18158_v36 = vld [vmem:[%s19447_s22 + $0x166c] sm:$0xf0] }
 0x40b   : > { %v13864_v54 = vld [vmem:[%s19447_s22 + $0x1010] sm:$0xf]  ;;  %v14665_v22 = vor.u32 %v18158_v36, %v14664_v33  ;;  %6704 = vmatpush.bf16.msra.mxu2 %v14409_v44  ;;  %v12269_v36 = vor.u32 %v17554_v21, %v12266_v26  ;;  %v12234_v44 = vld [vmem:[%s19447_s22 + $0x370] sm:$0xf0] }
 0x40c   : > { %v17958_v34 = vld [vmem:[%s19447_s22 + $0x102c] sm:$0xf0] }
 0x40d   : > { %v14120_v45 = vld [vmem:[%s19447_s22 + $0x1210] sm:$0xf]  ;;  %v13865_v53 = vor.u32 %v17958_v34, %v13864_v54  ;;  %6717 = vmatpush.bf16.msra.mxu3 %v14665_v22  ;;  %v17482_v54 = vld [vmem:[%s19447_s22 + $0x154] sm:$0xf] }
 0x40e   : > { %v18022_v19 = vld [vmem:[%s19447_s22 + $0x122c] sm:$0xf0]  ;;  %v11978_v34 = vld [vmem:[%s19447_s22 + $0x170] sm:$0xf0] }
 0x40f   : > { %v14376_v27 = vld [vmem:[%s19447_s22 + $0x1410] sm:$0xf]  ;;  %v14121_v57 = vor.u32 %v18022_v19, %v14120_v45  ;;  %6679 = vmatpush.bf16.msra.mxu0 %v13865_v53  ;;  %v12202_v53 = vld [vmem:[%s19447_s22 + $0x330] sm:$0xf0] }
 0x410   : > { %v18086_v56 = vld [vmem:[%s19447_s22 + $0x142c] sm:$0xf0] }
 0x411   : > { %v14632_v48 = vld [vmem:[%s19447_s22 + $0x1610] sm:$0xf]  ;;  %v14377_v3 = vor.u32 %v18086_v56, %v14376_v27  ;;  %6692 = vmatpush.bf16.msra.mxu1 %v14121_v57  ;;  %v11981_v27 = vor.u32 %v17482_v54, %v11978_v34  ;;  %v6488_v54 = vpop.f32.mrf.mxu1 }
 0x412   : > { %v18150_v49 = vld [vmem:[%s19447_s22 + $0x162c] sm:$0xf0]  ;;  %6680 = vmatmul.bf16.vlgmr.msra.gmra.mxu0 %v19706_v20  ;;  %v17618_v54 = vld [vmem:[%s19447_s22 + $0x594] sm:$0xf] }
 0x413   : > { %v15112_v50 = vld [vmem:[%s19447_s22 + $0x19d0] sm:$0xf]  ;;  %v14633_v63 = vor.u32 %v18150_v49, %v14632_v48  ;;  %6705 = vmatpush.bf16.msra.mxu2 %v14377_v3  ;;  %v12237_v48 = vor.u32 %v17546_v40, %v12234_v44 }
 0x414   : > { %v18270_v51 = vld [vmem:[%s19447_s22 + $0x19ec] sm:$0xf0]  ;;  %6693 = vmatmul.bf16.vlgmr.msra.gmra.mxu1 %v19713_v25 }
 0x415   : > { %v15368_v61 = vld [vmem:[%s19447_s22 + $0x1bd0] sm:$0xf]  ;;  %v15113_v1 = vor.u32 %v18270_v51, %v15112_v50  ;;  %6718 = vmatpush.bf16.msra.mxu3 %v14633_v63  ;;  %v11946_v50 = vld [vmem:[%s19447_s22 + $0x130] sm:$0xf0]  ;;  %v20795_v51 = vpop.f32.mrf.mxu0 }
 0x416   : > { %v18334_v58 = vld [vmem:[%s19447_s22 + $0x1bec] sm:$0xf0]  ;;  %6706 = vmatmul.bf16.vlgmr.msra.gmra.mxu2 %v19711_v24  ;;  %v11949_v57 = vor.u32 %v17474_v29, %v11946_v50 }
 0x417   : > { %v15369_v4 = vor.u32 %v18334_v58, %v15368_v61  ;;  %v15080_v42 = vld [vmem:[%s19447_s22 + $0x1990] sm:$0xf]  ;;  %6724 = vmatpush.bf16.msrb.mxu0 %v15113_v1  ;;  %6750 = vmatpush.bf16.msrb.mxu2 %v12045_v5  ;;  %v17538_v61 = vld [vmem:[%s19447_s22 + $0x314] sm:$0xf] }
 0x418   : > { %v18262_v2 = vld [vmem:[%s19447_s22 + $0x19ac] sm:$0xf0]  ;;  %6719 = vmatmul.bf16.vlgmr.msra.gmra.mxu3 %v19717_v28  ;;  %v12205_v63 = vor.u32 %v17538_v61, %v12202_v53  ;;  %v11914_v5 = vld [vmem:[%s19447_s22 + $0xf0] sm:$0xf0] }
 0x419   : > { %v15336_v7 = vld [vmem:[%s19447_s22 + $0x1b90] sm:$0xf]  ;;  %v15081_v15 = vor.u32 %v18262_v2, %v15080_v42  ;;  %6737 = vmatpush.bf16.msrb.mxu1 %v15369_v4  ;;  %6763 = vmatpush.bf16.msrb.mxu3 %v12301_v14  ;;  %v17466_v4 = vld [vmem:[%s19447_s22 + $0xd4] sm:$0xf]  ;;  %v6422_v14 = vadd.f32 %v20721_v47, %v20667_v11 }
 0x41a   : > { %v18326_v8 = vld [vmem:[%s19447_s22 + $0x1bac] sm:$0xf0]  ;;  %v17530_v42 = vld [vmem:[%s19447_s22 + $0x2d4] sm:$0xf]  ;;  %v11917_v9 = vor.u32 %v17466_v4, %v11914_v5 }
 0x41b   : > { %v15337_v52 = vor.u32 %v18326_v8, %v15336_v7  ;;  %v15048_v32 = vld [vmem:[%s19447_s22 + $0x1950] sm:$0xf]  ;;  %6725 = vmatpush.bf16.msrb.mxu0 %v15081_v15  ;;  %6751 = vmatpush.bf16.msrb.mxu2 %v12013_v30  ;;  %v12170_v2 = vld [vmem:[%s19447_s22 + $0x2f0] sm:$0xf0]  ;;  %v6435_v34 = vadd.f32 %v20726_v55, %v6422_v14 }
 0x41c   : > { %v18254_v23 = vld [vmem:[%s19447_s22 + $0x196c] sm:$0xf0]  ;;  %v12173_v15 = vor.u32 %v17530_v42, %v12170_v2  ;;  %v17522_v11 = vld [vmem:[%s19447_s22 + $0x294] sm:$0xf] }
 0x41d   : > { %v15304_v33 = vld [vmem:[%s19447_s22 + $0x1b50] sm:$0xf]  ;;  %v15049_v45 = vor.u32 %v18254_v23, %v15048_v32  ;;  %6738 = vmatpush.bf16.msrb.mxu1 %v15337_v52  ;;  %6764 = vmatpush.bf16.msrb.mxu3 %v12269_v36  ;;  %v20814_v52 = vpop.f32.mrf.mxu2  ;;  %v17458_v32 = vld [vmem:[%s19447_s22 + $0x94] sm:$0xf]  ;;  %v6475_v36 = vpop.f32.mrf.mxu0  ;;  %v6448_v53 = vadd.f32 %v20736_v60, %v6435_v34 }
 0x41e   : > { %v18318_v37 = vld [vmem:[%s19447_s22 + $0x1b6c] sm:$0xf0]  ;;  %v11882_v23 = vld [vmem:[%s19447_s22 + $0xb0] sm:$0xf0] }
 0x41f   : > { %v15305_v19 = vor.u32 %v18318_v37, %v15304_v33  ;;  %v15016_v46 = vld [vmem:[%s19447_s22 + $0x1910] sm:$0xf]  ;;  %6726 = vmatpush.bf16.msrb.mxu0 %v15049_v45  ;;  %6752 = vmatpush.bf16.msrb.mxu2 %v11981_v27  ;;  %v20819_v33 = vpop.f32.mrf.mxu3  ;;  %v12138_v47 = vld [vmem:[%s19447_s22 + $0x2b0] sm:$0xf0]  ;;  %v11885_v44 = vor.u32 %v17458_v32, %v11882_v23 }
 0x420   : > { %v18246_v22 = vld [vmem:[%s19447_s22 + $0x192c] sm:$0xf0]  ;;  %v12106_v55 = vld [vmem:[%s19447_s22 + $0x270] sm:$0xf0] }
 0x421   : > { %v15272_v56 = vld [vmem:[%s19447_s22 + $0x1b10] sm:$0xf]  ;;  %v15017_v58 = vor.u32 %v18246_v22, %v15016_v46  ;;  %6739 = vmatpush.bf16.msrb.mxu1 %v15305_v19  ;;  %6765 = vmatpush.bf16.msrb.mxu3 %v12237_v48  ;;  %v12141_v46 = vor.u32 %v17522_v11, %v12138_v47  ;;  %v11850_v48 = vld [vmem:[%s19447_s22 + $0x70] sm:$0xf0] }
 0x422   : > { %v18310_v49 = vld [vmem:[%s19447_s22 + $0x1b2c] sm:$0xf0]  ;;  %v12074_v4 = vld [vmem:[%s19447_s22 + $0x230] sm:$0xf0] }
 0x423   : > { %v15273_v13 = vor.u32 %v18310_v49, %v15272_v56  ;;  %v14984_v3 = vld [vmem:[%s19447_s22 + $0x18d0] sm:$0xf]  ;;  %6727 = vmatpush.bf16.msrb.mxu0 %v15017_v58  ;;  %6753 = vmatpush.bf16.msrb.mxu2 %v11949_v57  ;;  %v17450_v56 = vld [vmem:[%s19447_s22 + $0x54] sm:$0xf] }
 0x424   : > { %v18238_v62 = vld [vmem:[%s19447_s22 + $0x18ec] sm:$0xf0]  ;;  %v17514_v49 = vld [vmem:[%s19447_s22 + $0x254] sm:$0xf] }
 0x425   : > { %v15240_v59 = vld [vmem:[%s19447_s22 + $0x1ad0] sm:$0xf]  ;;  %v14985_v7 = vor.u32 %v18238_v62, %v14984_v3  ;;  %6740 = vmatpush.bf16.msrb.mxu1 %v15273_v13  ;;  %6766 = vmatpush.bf16.msrb.mxu3 %v12205_v63  ;;  %v11853_v13 = vor.u32 %v17450_v56, %v11850_v48  ;;  %v17442_v62 = vld [vmem:[%s19447_s22 + $0x14] sm:$0xf]  ;;  %v6501_v5 = vpop.f32.mrf.mxu2 }
 0x426   : > { %v18302_v1 = vld [vmem:[%s19447_s22 + $0x1aec] sm:$0xf0]  ;;  %v11818_v63 = vld [vmem:[%s19447_s22 + $0x30] sm:$0xf0] }
 0x427   : > { %v15241_v8 = vor.u32 %v18302_v1, %v15240_v59  ;;  %v14952_v43 = vld [vmem:[%s19447_s22 + $0x1890] sm:$0xf]  ;;  %6728 = vmatpush.bf16.msrb.mxu0 %v14985_v7  ;;  %6754 = vmatpush.bf16.msrb.mxu2 %v11917_v9  ;;  %v12109_v59 = vor.u32 %v17514_v49, %v12106_v55  ;;  %v17506_v1 = vld [vmem:[%s19447_s22 + $0x214] sm:$0xf]  ;;  %v6514_v7 = vpop.f32.mrf.mxu3 }
 0x428   : > { %v18230_v21 = vld [vmem:[%s19447_s22 + $0x18ac] sm:$0xf0]  ;;  %v17626_v60 = vld [vmem:[%s19447_s22 + $0x5d4] sm:$0xf]  ;;  %v12077_v23 = vor.u32 %v17506_v1, %v12074_v4  ;;  %v6525_v7 = vpop.f32.mrf.mxu0 }
 0x429   : > { %v15208_v26 = vld [vmem:[%s19447_s22 + $0x1a90] sm:$0xf]  ;;  %v14953_v37 = vor.u32 %v18230_v21, %v14952_v43  ;;  %6741 = vmatpush.bf16.msrb.mxu1 %v15241_v8  ;;  %6767 = vmatpush.bf16.msrb.mxu3 %v12173_v15  ;;  %v12554_v42 = vld [vmem:[%s19447_s22 + $0x5f0] sm:$0xf0]  ;;  %v6461_v21 = vadd.f32 %v20741_v6, %v6448_v53  ;;  %v11821_v15 = vor.u32 %v17442_v62, %v11818_v63 }
 0x42a   : > { %v18294_v30 = vld [vmem:[%s19447_s22 + $0x1aac] sm:$0xf0]  ;;  %v17690_v2 = vld [vmem:[%s19447_s22 + $0x7d4] sm:$0xf]  ;;  %v12557_v11 = vor.u32 %v17626_v60, %v12554_v42 }
 0x42b   : > { %v15209_v40 = vor.u32 %v18294_v30, %v15208_v26  ;;  %v14920_v45 = vld [vmem:[%s19447_s22 + $0x1850] sm:$0xf]  ;;  %6729 = vmatpush.bf16.msrb.mxu0 %v14953_v37  ;;  %6755 = vmatpush.bf16.msrb.mxu2 %v11885_v44  ;;  %v12810_v8 = vld [vmem:[%s19447_s22 + $0x7f0] sm:$0xf0]  ;;  %v6474_v47 = vadd.f32 %v20795_v51, %v6461_v21 }
 0x42c   : > { %v18222_v19 = vld [vmem:[%s19447_s22 + $0x186c] sm:$0xf0]  ;;  %v17754_v9 = vld [vmem:[%s19447_s22 + $0x9d4] sm:$0xf]  ;;  %v12813_v36 = vor.u32 %v17690_v2, %v12810_v8 }
 0x42d   : > { %v15176_v27 = vld [vmem:[%s19447_s22 + $0x1a50] sm:$0xf]  ;;  %v14921_v29 = vor.u32 %v18222_v19, %v14920_v45  ;;  %6742 = vmatpush.bf16.msrb.mxu1 %v15209_v40  ;;  %6768 = vmatpush.bf16.msrb.mxu3 %v12141_v46  ;;  %v13066_v43 = vld [vmem:[%s19447_s22 + $0x9f0] sm:$0xf0] }
 0x42e   : > { %v18286_v22 = vld [vmem:[%s19447_s22 + $0x1a6c] sm:$0xf0]  ;;  %v17818_v30 = vld [vmem:[%s19447_s22 + $0xbd4] sm:$0xf]  ;;  %v13069_v37 = vor.u32 %v17754_v9, %v13066_v43  ;;  %v6538_v43 = vpop.f32.mrf.mxu1 }
 0x42f   : > { %v14888_v50 = vld [vmem:[%s19447_s22 + $0x1810] sm:$0xf]  ;;  %v15177_v58 = vor.u32 %v18286_v22, %v15176_v27  ;;  %6730 = vmatpush.bf16.msrb.mxu0 %v14921_v29  ;;  %6756 = vmatpush.bf16.msrb.mxu2 %v11853_v13  ;;  %v13322_v32 = vld [vmem:[%s19447_s22 + $0xbf0] sm:$0xf0]  ;;  %v6487_v22 = vadd.f32 %v20799_v31, %v6474_v47 }
 0x430   : > { %v18214_v61 = vld [vmem:[%s19447_s22 + $0x182c] sm:$0xf0]  ;;  %v12522_v6 = vld [vmem:[%s19447_s22 + $0x5b0] sm:$0xf0]  ;;  %v13325_v40 = vor.u32 %v17818_v30, %v13322_v32 }
 0x431   : > { %v15144_v57 = vld [vmem:[%s19447_s22 + $0x1a10] sm:$0xf]  ;;  %v14889_v14 = vor.u32 %v18214_v61, %v14888_v50  ;;  %6743 = vmatpush.bf16.msrb.mxu1 %v15177_v58  ;;  %6769 = vmatpush.bf16.msrb.mxu3 %v12109_v59  ;;  %v17682_v34 = vld [vmem:[%s19447_s22 + $0x794] sm:$0xf]  ;;  %v12525_v51 = vor.u32 %v17618_v54, %v12522_v6  ;;  %v6500_v31 = vadd.f32 %v20814_v52, %v6487_v22 }
 0x432   : > { %v18278_v3 = vld [vmem:[%s19447_s22 + $0x1a2c] sm:$0xf0]  ;;  %v12778_v44 = vld [vmem:[%s19447_s22 + $0x7b0] sm:$0xf0] }
 0x433   : > { %v15145_v26 = vor.u32 %v18278_v3, %v15144_v57  ;;  %6731 = vmatpush.bf16.msrb.mxu0 %v14889_v14  ;;  %v17746_v45 = vld [vmem:[%s19447_s22 + $0x994] sm:$0xf]  ;;  %6757 = vmatpush.bf16.msrb.mxu2 %v11821_v15  ;;  %v12781_v56 = vor.u32 %v17682_v34, %v12778_v44  ;;  %v6513_v2 = vadd.f32 %v20819_v33, %v6500_v31 }
 0x434   : > { %v13034_v19 = vld [vmem:[%s19447_s22 + $0x9b0] sm:$0xf0] }
 0x435   : > { %6744 = vmatpush.bf16.msrb.mxu1 %v15145_v26  ;;  %v17810_v27 = vld [vmem:[%s19447_s22 + $0xb94] sm:$0xf]  ;;  %6770 = vmatpush.bf16.msrb.mxu3 %v12077_v23  ;;  %v13037_v48 = vor.u32 %v17746_v45, %v13034_v19  ;;  %v6526_v21 = vadd.f32 %v6525_v7, %v6513_v2 }
 0x436   : > { %v13290_v46 = vld [vmem:[%s19447_s22 + $0xbb0] sm:$0xf0]  ;;  %6732 = vmatmul.bf16.vlgmr.msrb.gmra.mxu0 %v19784_v12  ;;  %6758 = vmatmul.bf16.vlgmr.msrb.gmra.mxu2 %v19563_v10  ;;  %v6540_v31 = vpop.f32.mrf.mxu1 }
 0x437   : > { %6776 = vmatpush.bf16.msra.mxu0 %v12557_v11  ;;  %6802 = vmatpush.bf16.msra.mxu2 %v13069_v37  ;;  %v17610_v49 = vld [vmem:[%s19447_s22 + $0x554] sm:$0xf]  ;;  %v13293_v50 = vor.u32 %v17810_v27, %v13290_v46  ;;  %v6539_v34 = vadd.f32 %v6538_v43, %v6526_v21 }
 0x438   : > { %v12490_v55 = vld [vmem:[%s19447_s22 + $0x570] sm:$0xf0]  ;;  %6745 = vmatmul.bf16.vlgmr.msrb.gmra.mxu1 %v19789_v16  ;;  %6771 = vmatmul.bf16.vlgmr.msrb.gmra.mxu3 %v19572_v18 }
 0x439   : > { %6789 = vmatpush.bf16.msra.mxu1 %v12813_v36  ;;  %v17674_v29 = vld [vmem:[%s19447_s22 + $0x754] sm:$0xf]  ;;  %6815 = vmatpush.bf16.msra.mxu3 %v13325_v40  ;;  %v12493_v3 = vor.u32 %v17610_v49, %v12490_v55  ;;  %v6564_v55 = vpop.f32.mrf.mxu3 }
 0x43a   : > { %v12746_v61 = vld [vmem:[%s19447_s22 + $0x770] sm:$0xf0] }
 0x43b   : > { %v17738_v53 = vld [vmem:[%s19447_s22 + $0x954] sm:$0xf]  ;;  %6777 = vmatpush.bf16.msra.mxu0 %v12525_v51  ;;  %6803 = vmatpush.bf16.msra.mxu2 %v13037_v48  ;;  %v12749_v62 = vor.u32 %v17674_v29, %v12746_v61  ;;  %v6551_v51 = vpop.f32.mrf.mxu2  ;;  %v6527_v61 = vpop.f32.mrf.mxu0 }
 0x43c   : > { %v13002_v58 = vld [vmem:[%s19447_s22 + $0x970] sm:$0xf0]  ;;  %v6552_v49 = vadd.f32 %v6551_v51, %v6539_v34 }
 0x43d   : > { %v17802_v13 = vld [vmem:[%s19447_s22 + $0xb54] sm:$0xf]  ;;  %6790 = vmatpush.bf16.msra.mxu1 %v12781_v56  ;;  %v13005_v59 = vor.u32 %v17738_v53, %v13002_v58  ;;  %6816 = vmatpush.bf16.msra.mxu3 %v13293_v50 }
 0x43e   : > { %v13258_v57 = vld [vmem:[%s19447_s22 + $0xb70] sm:$0xf0] }
 0x43f   : > { %v17602_v52 = vld [vmem:[%s19447_s22 + $0x514] sm:$0xf]  ;;  %v13261_v4 = vor.u32 %v17802_v13, %v13258_v57  ;;  %6778 = vmatpush.bf16.msra.mxu0 %v12493_v3  ;;  %6804 = vmatpush.bf16.msra.mxu2 %v13005_v59  ;;  %v6565_v13 = vadd.f32 %v6564_v55, %v6552_v49 }
 0x440   : > { %v12458_v63 = vld [vmem:[%s19447_s22 + $0x530] sm:$0xf0] }
 0x441   : > { %v17666_v1 = vld [vmem:[%s19447_s22 + $0x714] sm:$0xf]  ;;  %v12461_v9 = vor.u32 %v17602_v52, %v12458_v63  ;;  %6791 = vmatpush.bf16.msra.mxu1 %v12749_v62  ;;  %6817 = vmatpush.bf16.msra.mxu3 %v13261_v4 }
 0x442   : > { %v12714_v5 = vld [vmem:[%s19447_s22 + $0x730] sm:$0xf0] }
 0x443   : > { %v17730_v60 = vld [vmem:[%s19447_s22 + $0x914] sm:$0xf]  ;;  %v12717_v26 = vor.u32 %v17666_v1, %v12714_v5  ;;  %6779 = vmatpush.bf16.msra.mxu0 %v12461_v9 }
 0x444   : > { %v12970_v42 = vld [vmem:[%s19447_s22 + $0x930] sm:$0xf0] }
 0x445   : > { %v17794_v14 = vld [vmem:[%s19447_s22 + $0xb14] sm:$0xf]  ;;  %v12973_v15 = vor.u32 %v17730_v60, %v12970_v42  ;;  %6792 = vmatpush.bf16.msra.mxu1 %v12717_v26 }
 0x446   : > { %v13226_v8 = vld [vmem:[%s19447_s22 + $0xb30] sm:$0xf0] }
 0x447   : > { %v17594_v30 = vld [vmem:[%s19447_s22 + $0x4d4] sm:$0xf]  ;;  %v13229_v23 = vor.u32 %v17794_v14, %v13226_v8  ;;  %6805 = vmatpush.bf16.msra.mxu2 %v12973_v15 }
 0x448   : > { %v12426_v32 = vld [vmem:[%s19447_s22 + $0x4f0] sm:$0xf0] }
 0x449   : > { %v17658_v33 = vld [vmem:[%s19447_s22 + $0x6d4] sm:$0xf]  ;;  %v12429_v6 = vor.u32 %v17594_v30, %v12426_v32  ;;  %6818 = vmatpush.bf16.msra.mxu3 %v13229_v23 }
 0x44a   : > { %v12682_v11 = vld [vmem:[%s19447_s22 + $0x6f0] sm:$0xf0] }
 0x44b   : > { %v17722_v47 = vld [vmem:[%s19447_s22 + $0x8d4] sm:$0xf]  ;;  %v12685_v40 = vor.u32 %v17658_v33, %v12682_v11  ;;  %6780 = vmatpush.bf16.msra.mxu0 %v12429_v6  ;;  %v6553_v11 = vpop.f32.mrf.mxu2 }
 0x44c   : > { %v12938_v36 = vld [vmem:[%s19447_s22 + $0x8f0] sm:$0xf0] }
 0x44d   : > { %v17786_v37 = vld [vmem:[%s19447_s22 + $0xad4] sm:$0xf]  ;;  %v12941_v44 = vor.u32 %v17722_v47, %v12938_v36  ;;  %6793 = vmatpush.bf16.msra.mxu1 %v12685_v40 }
 0x44e   : > { %v13194_v54 = vld [vmem:[%s19447_s22 + $0xaf0] sm:$0xf0] }
 0x44f   : > { %v17586_v45 = vld [vmem:[%s19447_s22 + $0x494] sm:$0xf]  ;;  %v13197_v46 = vor.u32 %v17786_v37, %v13194_v54  ;;  %6806 = vmatpush.bf16.msra.mxu2 %v12941_v44  ;;  %v6566_v54 = vpop.f32.mrf.mxu3 }
 0x450   : > { %v12394_v19 = vld [vmem:[%s19447_s22 + $0x4b0] sm:$0xf0] }
 0x451   : > { %v17650_v27 = vld [vmem:[%s19447_s22 + $0x694] sm:$0xf]  ;;  %v12397_v58 = vor.u32 %v17586_v45, %v12394_v19  ;;  %6819 = vmatpush.bf16.msra.mxu3 %v13197_v46 }
 0x452   : > { %v12650_v22 = vld [vmem:[%s19447_s22 + $0x6b0] sm:$0xf0] }
 0x453   : > { %v17714_v56 = vld [vmem:[%s19447_s22 + $0x894] sm:$0xf]  ;;  %v12653_v57 = vor.u32 %v17650_v27, %v12650_v22  ;;  %6781 = vmatpush.bf16.msra.mxu0 %v12397_v58 }
 0x454   : > { %v12906_v48 = vld [vmem:[%s19447_s22 + $0x8b0] sm:$0xf0] }
 0x455   : > { %v17778_v29 = vld [vmem:[%s19447_s22 + $0xa94] sm:$0xf]  ;;  %v12909_v3 = vor.u32 %v17714_v56, %v12906_v48  ;;  %6794 = vmatpush.bf16.msra.mxu1 %v12653_v57 }
 0x456   : > { %v13162_v50 = vld [vmem:[%s19447_s22 + $0xab0] sm:$0xf0] }
 0x457   : > { %v431_v53 = vld [vmem:[#allocation2 + $0x10] sm:$0xff]  ;;  %v13165_v63 = vor.u32 %v17778_v29, %v13162_v50  ;;  %6807 = vmatpush.bf16.msra.mxu2 %v12909_v3 }
 0x458   : > { %v17578_v62 = vld [vmem:[%s19447_s22 + $0x454] sm:$0xf]  ;;  %v7299_v60 = vadd.f32 %v6565_v13, %v431_v53 }
 0x459   : > { %v12362_v59 = vld [vmem:[%s19447_s22 + $0x470] sm:$0xf0]  ;;  %6820 = vmatpush.bf16.msra.mxu3 %v13165_v63 }
 0x45a   : > { %v17642_v52 = vld [vmem:[%s19447_s22 + $0x654] sm:$0xf]  ;;  %v12365_v7 = vor.u32 %v17578_v62, %v12362_v59  ;;  %7307 = vst [vmem:[#allocation2 + $0x10] sm:$0xff] %v7299_v60 }
 0x45b   : > { %v12618_v1 = vld [vmem:[%s19447_s22 + $0x670] sm:$0xf0] }
 0x45c   : > { %v17706_v4 = vld [vmem:[%s19447_s22 + $0x854] sm:$0xf]  ;;  %v12621_v43 = vor.u32 %v17642_v52, %v12618_v1  ;;  %6782 = vmatpush.bf16.msra.mxu0 %v12365_v7 }
 0x45d   : > { %v12874_v5 = vld [vmem:[%s19447_s22 + $0x870] sm:$0xf0] }
 0x45e   : > { %v17770_v42 = vld [vmem:[%s19447_s22 + $0xa54] sm:$0xf]  ;;  %v12877_v21 = vor.u32 %v17706_v4, %v12874_v5  ;;  %6795 = vmatpush.bf16.msra.mxu1 %v12621_v43 }
 0x45f   : > { %v13130_v2 = vld [vmem:[%s19447_s22 + $0xa70] sm:$0xf0] }
 0x460   : > { %v17570_v14 = vld [vmem:[%s19447_s22 + $0x414] sm:$0xf]  ;;  %v13133_v30 = vor.u32 %v17770_v42, %v13130_v2  ;;  %6808 = vmatpush.bf16.msra.mxu2 %v12877_v21 }
 0x461   : > { %v12330_v8 = vld [vmem:[%s19447_s22 + $0x430] sm:$0xf0] }
 0x462   : > { %v17634_v9 = vld [vmem:[%s19447_s22 + $0x614] sm:$0xf]  ;;  %v12333_v6 = vor.u32 %v17570_v14, %v12330_v8  ;;  %6821 = vmatpush.bf16.msra.mxu3 %v13133_v30 }
 0x463   : > { %v12586_v26 = vld [vmem:[%s19447_s22 + $0x630] sm:$0xf0] }
 0x464   : > { %v17698_v15 = vld [vmem:[%s19447_s22 + $0x814] sm:$0xf]  ;;  %v12589_v45 = vor.u32 %v17634_v9, %v12586_v26  ;;  %6783 = vmatpush.bf16.msra.mxu0 %v12333_v6 }
 0x465   : > { %v12842_v32 = vld [vmem:[%s19447_s22 + $0x830] sm:$0xf0] }
 0x466   : > { %v17762_v33 = vld [vmem:[%s19447_s22 + $0xa14] sm:$0xf]  ;;  %v12845_v19 = vor.u32 %v17698_v15, %v12842_v32  ;;  %6796 = vmatpush.bf16.msra.mxu1 %v12589_v45 }
 0x467   : > { %v13098_v23 = vld [vmem:[%s19447_s22 + $0xa30] sm:$0xf0]  ;;  %6784 = vmatmul.bf16.vlgmr.msra.gmra.mxu0 %v19554_v0 }
 0x468   : > { %v17882_v47 = vld [vmem:[%s19447_s22 + $0xdd4] sm:$0xf]  ;;  %v13101_v51 = vor.u32 %v17762_v33, %v13098_v23  ;;  %6809 = vmatpush.bf16.msra.mxu2 %v12845_v19 }
 0x469   : > { %v13578_v36 = vld [vmem:[%s19447_s22 + $0xdf0] sm:$0xf0]  ;;  %6797 = vmatmul.bf16.vlgmr.msra.gmra.mxu1 %v19570_v17 }
 0x46a   : > { %v17946_v37 = vld [vmem:[%s19447_s22 + $0xfd4] sm:$0xf]  ;;  %v13581_v22 = vor.u32 %v17882_v47, %v13578_v36  ;;  %6822 = vmatpush.bf16.msra.mxu3 %v13101_v51  ;;  %v6577_v47 = vpop.f32.mrf.mxu0 }
 0x46b   : > { %v13834_v34 = vld [vmem:[%s19447_s22 + $0xff0] sm:$0xf0]  ;;  %6810 = vmatmul.bf16.vlgmr.msra.gmra.mxu2 %v19633_v38 }
 0x46c   : > { %v18010_v40 = vld [vmem:[%s19447_s22 + $0x11d4] sm:$0xf]  ;;  %v13837_v56 = vor.u32 %v17946_v37, %v13834_v34  ;;  %6828 = vmatpush.bf16.msrb.mxu0 %v13581_v22 }
 0x46d   : > { %v14090_v44 = vld [vmem:[%s19447_s22 + $0x11f0] sm:$0xf0]  ;;  %6823 = vmatmul.bf16.vlgmr.msra.gmra.mxu3 %v19637_v41 }
 0x46e   : > { %v18074_v27 = vld [vmem:[%s19447_s22 + $0x13d4] sm:$0xf]  ;;  %v14093_v48 = vor.u32 %v18010_v40, %v14090_v44  ;;  %6841 = vmatpush.bf16.msrb.mxu1 %v13837_v56  ;;  %v6590_v40 = vpop.f32.mrf.mxu1 }
 0x46f   : > { %v14346_v46 = vld [vmem:[%s19447_s22 + $0x13f0] sm:$0xf0] }
 0x470   : > { %v17874_v49 = vld [vmem:[%s19447_s22 + $0xd94] sm:$0xf]  ;;  %v14349_v50 = vor.u32 %v18074_v27, %v14346_v46  ;;  %6854 = vmatpush.bf16.msrb.mxu2 %v14093_v48  ;;  %v6591_v46 = vadd.f32 %v6590_v40, %v6577_v47 }
 0x471   : > { %v13546_v55 = vld [vmem:[%s19447_s22 + $0xdb0] sm:$0xf0] }
 0x472   : > { %v17938_v29 = vld [vmem:[%s19447_s22 + $0xf94] sm:$0xf]  ;;  %v13549_v57 = vor.u32 %v17874_v49, %v13546_v55  ;;  %6867 = vmatpush.bf16.msrb.mxu3 %v14349_v50 }
 0x473   : > { %v13802_v61 = vld [vmem:[%s19447_s22 + $0xfb0] sm:$0xf0] }
 0x474   : > { %v18002_v53 = vld [vmem:[%s19447_s22 + $0x1194] sm:$0xf]  ;;  %v13805_v3 = vor.u32 %v17938_v29, %v13802_v61  ;;  %6829 = vmatpush.bf16.msrb.mxu0 %v13549_v57  ;;  %v6603_v61 = vpop.f32.mrf.mxu2 }
 0x475   : > { %v14058_v58 = vld [vmem:[%s19447_s22 + $0x11b0] sm:$0xf0]  ;;  %v6604_v57 = vadd.f32 %v6603_v61, %v6591_v46 }
 0x476   : > { %v18066_v31 = vld [vmem:[%s19447_s22 + $0x1394] sm:$0xf]  ;;  %v14061_v62 = vor.u32 %v18002_v53, %v14058_v58  ;;  %6842 = vmatpush.bf16.msrb.mxu1 %v13805_v3  ;;  %v6616_v3 = vpop.f32.mrf.mxu3 }
 0x477   : > { %v14314_v13 = vld [vmem:[%s19447_s22 + $0x13b0] sm:$0xf0] }
 0x478   : > { %v17866_v59 = vld [vmem:[%s19447_s22 + $0xd54] sm:$0xf]  ;;  %v14317_v1 = vor.u32 %v18066_v31, %v14314_v13  ;;  %6855 = vmatpush.bf16.msrb.mxu2 %v14061_v62 }
 0x479   : > { %v13514_v52 = vld [vmem:[%s19447_s22 + $0xd70] sm:$0xf0] }
 0x47a   : > { %v17930_v63 = vld [vmem:[%s19447_s22 + $0xf54] sm:$0xf]  ;;  %v13517_v7 = vor.u32 %v17866_v59, %v13514_v52  ;;  %6868 = vmatpush.bf16.msrb.mxu3 %v14317_v1  ;;  %v6579_v1 = vpop.f32.mrf.mxu0 }
 0x47b   : > { %v13770_v4 = vld [vmem:[%s19447_s22 + $0xf70] sm:$0xf0] }
 0x47c   : > { %v17994_v5 = vld [vmem:[%s19447_s22 + $0x1154] sm:$0xf]  ;;  %v13773_v14 = vor.u32 %v17930_v63, %v13770_v4  ;;  %6830 = vmatpush.bf16.msrb.mxu0 %v13517_v7  ;;  %v20966_v63 = vadd.f32 %v6616_v3, %v6604_v57  ;;  %v6592_v7 = vpop.f32.mrf.mxu1 }
 0x47d   : > { %v14026_v60 = vld [vmem:[%s19447_s22 + $0x1170] sm:$0xf0] }
 0x47e   : > { %v18058_v42 = vld [vmem:[%s19447_s22 + $0x1354] sm:$0xf]  ;;  %v14029_v8 = vor.u32 %v17994_v5, %v14026_v60  ;;  %6843 = vmatpush.bf16.msrb.mxu1 %v13773_v14 }
 0x47f   : > { %v14282_v2 = vld [vmem:[%s19447_s22 + $0x1370] sm:$0xf0] }
 0x480   : > { %v17858_v9 = vld [vmem:[%s19447_s22 + $0xd14] sm:$0xf]  ;;  %v14285_v26 = vor.u32 %v18058_v42, %v14282_v2  ;;  %6856 = vmatpush.bf16.msrb.mxu2 %v14029_v8 }
 0x481   : > { %v13482_v43 = vld [vmem:[%s19447_s22 + $0xd30] sm:$0xf0] }
 0x482   : > { %v17922_v21 = vld [vmem:[%s19447_s22 + $0xf14] sm:$0xf]  ;;  %v13485_v11 = vor.u32 %v17858_v9, %v13482_v43  ;;  %6869 = vmatpush.bf16.msrb.mxu3 %v14285_v26 }
 0x483   : > { %v13738_v15 = vld [vmem:[%s19447_s22 + $0xf30] sm:$0xf0] }
 0x484   : > { %v17986_v30 = vld [vmem:[%s19447_s22 + $0x1114] sm:$0xf]  ;;  %v13741_v36 = vor.u32 %v17922_v21, %v13738_v15  ;;  %6831 = vmatpush.bf16.msrb.mxu0 %v13485_v11 }
 0x485   : > { %v13994_v32 = vld [vmem:[%s19447_s22 + $0x1130] sm:$0xf0] }
 0x486   : > { %v18050_v33 = vld [vmem:[%s19447_s22 + $0x1314] sm:$0xf]  ;;  %v13997_v37 = vor.u32 %v17986_v30, %v13994_v32  ;;  %6844 = vmatpush.bf16.msrb.mxu1 %v13741_v36 }
 0x487   : > { %v14250_v23 = vld [vmem:[%s19447_s22 + $0x1330] sm:$0xf0] }
 0x488   : > { %v17850_v54 = vld [vmem:[%s19447_s22 + $0xcd4] sm:$0xf]  ;;  %v14253_v44 = vor.u32 %v18050_v33, %v14250_v23  ;;  %6857 = vmatpush.bf16.msrb.mxu2 %v13997_v37  ;;  %v6605_v37 = vpop.f32.mrf.mxu2 }
 0x489   : > { %v13450_v6 = vld [vmem:[%s19447_s22 + $0xcf0] sm:$0xf0] }
 0x48a   : > { %v17914_v34 = vld [vmem:[%s19447_s22 + $0xed4] sm:$0xf]  ;;  %v13453_v56 = vor.u32 %v17850_v54, %v13450_v6  ;;  %6870 = vmatpush.bf16.msrb.mxu3 %v14253_v44  ;;  %v6618_v44 = vpop.f32.mrf.mxu3 }
 0x48b   : > { %v13706_v45 = vld [vmem:[%s19447_s22 + $0xef0] sm:$0xf0] }
 0x48c   : > { %v17978_v19 = vld [vmem:[%s19447_s22 + $0x10d4] sm:$0xf]  ;;  %v13709_v48 = vor.u32 %v17914_v34, %v13706_v45  ;;  %6832 = vmatpush.bf16.msrb.mxu0 %v13453_v56 }
 0x48d   : > { %v13962_v27 = vld [vmem:[%s19447_s22 + $0x10f0] sm:$0xf0] }
 0x48e   : > { %v18042_v51 = vld [vmem:[%s19447_s22 + $0x12d4] sm:$0xf]  ;;  %v13965_v49 = vor.u32 %v17978_v19, %v13962_v27  ;;  %6845 = vmatpush.bf16.msrb.mxu1 %v13709_v48 }
 0x48f   : > { %v14218_v22 = vld [vmem:[%s19447_s22 + $0x12f0] sm:$0xf0] }
 0x490   : > { %v17842_v55 = vld [vmem:[%s19447_s22 + $0xc94] sm:$0xf]  ;;  %v14221_v53 = vor.u32 %v18042_v51, %v14218_v22  ;;  %6858 = vmatpush.bf16.msrb.mxu2 %v13965_v49 }
 0x491   : > { %v13418_v29 = vld [vmem:[%s19447_s22 + $0xcb0] sm:$0xf0] }
 0x492   : > { %v17906_v50 = vld [vmem:[%s19447_s22 + $0xe94] sm:$0xf]  ;;  %v13421_v52 = vor.u32 %v17842_v55, %v13418_v29  ;;  %6871 = vmatpush.bf16.msrb.mxu3 %v14221_v53 }
 0x493   : > { %v13674_v58 = vld [vmem:[%s19447_s22 + $0xeb0] sm:$0xf0] }
 0x494   : > { %v17970_v31 = vld [vmem:[%s19447_s22 + $0x1094] sm:$0xf]  ;;  %v13677_v4 = vor.u32 %v17906_v50, %v13674_v58  ;;  %6833 = vmatpush.bf16.msrb.mxu0 %v13421_v52 }
 0x495   : > { %v13930_v13 = vld [vmem:[%s19447_s22 + $0x10b0] sm:$0xf0] }
 0x496   : > { %v18034_v62 = vld [vmem:[%s19447_s22 + $0x1294] sm:$0xf]  ;;  %v13933_v5 = vor.u32 %v17970_v31, %v13930_v13  ;;  %6846 = vmatpush.bf16.msrb.mxu1 %v13677_v4 }
 0x497   : > { %v14186_v59 = vld [vmem:[%s19447_s22 + $0x12b0] sm:$0xf0] }
 0x498   : > { %v17834_v60 = vld [vmem:[%s19447_s22 + $0xc54] sm:$0xf]  ;;  %v14189_v14 = vor.u32 %v18034_v62, %v14186_v59  ;;  %6859 = vmatpush.bf16.msrb.mxu2 %v13933_v5 }
 0x499   : > { %v13386_v42 = vld [vmem:[%s19447_s22 + $0xc70] sm:$0xf0] }
 0x49a   : > { %v17898_v2 = vld [vmem:[%s19447_s22 + $0xe54] sm:$0xf]  ;;  %v13389_v15 = vor.u32 %v17834_v60, %v13386_v42  ;;  %6872 = vmatpush.bf16.msrb.mxu3 %v14189_v14 }
 0x49b   : > { %v13642_v8 = vld [vmem:[%s19447_s22 + $0xe70] sm:$0xf0] }
 0x49c   : > { %v17962_v9 = vld [vmem:[%s19447_s22 + $0x1054] sm:$0xf]  ;;  %v13645_v33 = vor.u32 %v17898_v2, %v13642_v8  ;;  %6834 = vmatpush.bf16.msrb.mxu0 %v13389_v15 }
 0x49d   : > { %v13898_v43 = vld [vmem:[%s19447_s22 + $0x1070] sm:$0xf0] }
 0x49e   : > { %v18026_v21 = vld [vmem:[%s19447_s22 + $0x1254] sm:$0xf]  ;;  %v13901_v23 = vor.u32 %v17962_v9, %v13898_v43  ;;  %6847 = vmatpush.bf16.msrb.mxu1 %v13645_v33 }
 0x49f   : > { %v14154_v26 = vld [vmem:[%s19447_s22 + $0x1270] sm:$0xf0] }
 0x4a0   : > { %v17826_v30 = vld [vmem:[%s19447_s22 + $0xc14] sm:$0xf]  ;;  %v14157_v54 = vor.u32 %v18026_v21, %v14154_v26  ;;  %6860 = vmatpush.bf16.msrb.mxu2 %v13901_v23 }
 0x4a1   : > { %v13354_v32 = vld [vmem:[%s19447_s22 + $0xc30] sm:$0xf0] }
 0x4a2   : > { %v17890_v11 = vld [vmem:[%s19447_s22 + $0xe14] sm:$0xf]  ;;  %v13357_v46 = vor.u32 %v17826_v30, %v13354_v32  ;;  %6873 = vmatpush.bf16.msrb.mxu3 %v14157_v54 }
 0x4a3   : > { %v13610_v47 = vld [vmem:[%s19447_s22 + $0xe30] sm:$0xf0] }
 0x4a4   : > { %v17954_v36 = vld [vmem:[%s19447_s22 + $0x1014] sm:$0xf]  ;;  %v13613_v48 = vor.u32 %v17890_v11, %v13610_v47  ;;  %6835 = vmatpush.bf16.msrb.mxu0 %v13357_v46 }
 0x4a5   : > { %v13866_v6 = vld [vmem:[%s19447_s22 + $0x1030] sm:$0xf0] }
 0x4a6   : > { %v18018_v34 = vld [vmem:[%s19447_s22 + $0x1214] sm:$0xf]  ;;  %v13869_v49 = vor.u32 %v17954_v36, %v13866_v6  ;;  %6848 = vmatpush.bf16.msrb.mxu1 %v13613_v48 }
 0x4a7   : > { %v14122_v40 = vld [vmem:[%s19447_s22 + $0x1230] sm:$0xf0]  ;;  %6836 = vmatmul.bf16.vlgmr.msrb.gmra.mxu0 %v19629_v35 }
 0x4a8   : > { %v18138_v45 = vld [vmem:[%s19447_s22 + $0x15d4] sm:$0xf]  ;;  %v14125_v50 = vor.u32 %v18018_v34, %v14122_v40  ;;  %6861 = vmatpush.bf16.msrb.mxu2 %v13869_v49 }
 0x4a9   : > { %v14602_v19 = vld [vmem:[%s19447_s22 + $0x15f0] sm:$0xf0]  ;;  %6849 = vmatmul.bf16.vlgmr.msrb.gmra.mxu1 %v19635_v39 }
 0x4aa   : > { %v18202_v27 = vld [vmem:[%s19447_s22 + $0x17d4] sm:$0xf]  ;;  %v14605_v61 = vor.u32 %v18138_v45, %v14602_v19  ;;  %6874 = vmatpush.bf16.msrb.mxu3 %v14125_v50  ;;  %v21020_v45 = vpop.f32.mrf.mxu0 }
 0x4ab   : > { %v14858_v51 = vld [vmem:[%s19447_s22 + $0x17f0] sm:$0xf0]  ;;  %6862 = vmatmul.bf16.vlgmr.msrb.gmra.mxu2 %v19706_v20 }
 0x4ac   : > { %v18266_v22 = vld [vmem:[%s19447_s22 + $0x19d4] sm:$0xf]  ;;  %v14861_v53 = vor.u32 %v18202_v27, %v14858_v51  ;;  %6880 = vmatpush.bf16.msra.mxu0 %v14605_v61 }
 0x4ad   : > { %v15114_v56 = vld [vmem:[%s19447_s22 + $0x19f0] sm:$0xf0]  ;;  %6875 = vmatmul.bf16.vlgmr.msrb.gmra.mxu3 %v19713_v25 }
 0x4ae   : > { %v18330_v55 = vld [vmem:[%s19447_s22 + $0x1bd4] sm:$0xf]  ;;  %v15117_v58 = vor.u32 %v18266_v22, %v15114_v56  ;;  %6893 = vmatpush.bf16.msra.mxu1 %v14861_v53  ;;  %v21025_v56 = vpop.f32.mrf.mxu1 }
 0x4af   : > { %v15370_v29 = vld [vmem:[%s19447_s22 + $0x1bf0] sm:$0xf0] }
 0x4b0   : > { %v18130_v31 = vld [vmem:[%s19447_s22 + $0x1594] sm:$0xf]  ;;  %v15373_v3 = vor.u32 %v18330_v55, %v15370_v29  ;;  %6906 = vmatpush.bf16.msra.mxu2 %v15117_v58 }
 0x4b1   : > { %v14570_v13 = vld [vmem:[%s19447_s22 + $0x15b0] sm:$0xf0] }
 0x4b2   : > { %v18194_v57 = vld [vmem:[%s19447_s22 + $0x1794] sm:$0xf]  ;;  %v14573_v5 = vor.u32 %v18130_v31, %v14570_v13  ;;  %6919 = vmatpush.bf16.msra.mxu3 %v15373_v3 }
 0x4b3   : > { %v14826_v62 = vld [vmem:[%s19447_s22 + $0x17b0] sm:$0xf0] }
 0x4b4   : > { %v18258_v59 = vld [vmem:[%s19447_s22 + $0x1994] sm:$0xf]  ;;  %v14829_v60 = vor.u32 %v18194_v57, %v14826_v62  ;;  %6881 = vmatpush.bf16.msra.mxu0 %v14573_v5  ;;  %v21035_v62 = vpop.f32.mrf.mxu2  ;;  %v21040_v5 = vpop.f32.mrf.mxu3 }
 0x4b5   : > { %v15082_v52 = vld [vmem:[%s19447_s22 + $0x19b0] sm:$0xf0] }
 0x4b6   : > { %v18322_v1 = vld [vmem:[%s19447_s22 + $0x1b94] sm:$0xf]  ;;  %v15085_v42 = vor.u32 %v18258_v59, %v15082_v52  ;;  %6894 = vmatpush.bf16.msra.mxu1 %v14829_v60 }
 0x4b7   : > { %v15338_v4 = vld [vmem:[%s19447_s22 + $0x1bb0] sm:$0xf0] }
 0x4b8   : > { %v18122_v2 = vld [vmem:[%s19447_s22 + $0x1554] sm:$0xf]  ;;  %v15341_v8 = vor.u32 %v18322_v1, %v15338_v4  ;;  %6907 = vmatpush.bf16.msra.mxu2 %v15085_v42 }
 0x4b9   : > { %v14538_v7 = vld [vmem:[%s19447_s22 + $0x1570] sm:$0xf0] }
 0x4ba   : > { %v18186_v14 = vld [vmem:[%s19447_s22 + $0x1754] sm:$0xf]  ;;  %v14541_v30 = vor.u32 %v18122_v2, %v14538_v7  ;;  %6920 = vmatpush.bf16.msra.mxu3 %v15341_v8  ;;  %v6631_v7 = vpop.f32.mrf.mxu0 }
 0x4bb   : > { %v14794_v9 = vld [vmem:[%s19447_s22 + $0x1770] sm:$0xf0] }
 0x4bc   : > { %v18250_v43 = vld [vmem:[%s19447_s22 + $0x1954] sm:$0xf]  ;;  %v14797_v32 = vor.u32 %v18186_v14, %v14794_v9  ;;  %6882 = vmatpush.bf16.msra.mxu0 %v14541_v30 }
 0x4bd   : > { %v15050_v21 = vld [vmem:[%s19447_s22 + $0x1970] sm:$0xf0] }
 0x4be   : > { %v18314_v26 = vld [vmem:[%s19447_s22 + $0x1b54] sm:$0xf]  ;;  %v15053_v33 = vor.u32 %v18250_v43, %v15050_v21  ;;  %6895 = vmatpush.bf16.msra.mxu1 %v14797_v32 }
 0x4bf   : > { %v15306_v15 = vld [vmem:[%s19447_s22 + $0x1b70] sm:$0xf0] }
 0x4c0   : > { %v18114_v23 = vld [vmem:[%s19447_s22 + $0x1514] sm:$0xf]  ;;  %v15309_v36 = vor.u32 %v18314_v26, %v15306_v15  ;;  %6908 = vmatpush.bf16.msra.mxu2 %v15053_v33  ;;  %v6644_v26 = vpop.f32.mrf.mxu1 }
 0x4c1   : > { %v14506_v11 = vld [vmem:[%s19447_s22 + $0x1530] sm:$0xf0] }
 0x4c2   : > { %v18178_v47 = vld [vmem:[%s19447_s22 + $0x1714] sm:$0xf]  ;;  %v14509_v44 = vor.u32 %v18114_v23, %v14506_v11  ;;  %6921 = vmatpush.bf16.msra.mxu3 %v15309_v36 }
 0x4c3   : > { %v14762_v37 = vld [vmem:[%s19447_s22 + $0x1730] sm:$0xf0] }
 0x4c4   : > { %v18242_v54 = vld [vmem:[%s19447_s22 + $0x1914] sm:$0xf]  ;;  %v14765_v19 = vor.u32 %v18178_v47, %v14762_v37  ;;  %6883 = vmatpush.bf16.msra.mxu0 %v14509_v44 }
 0x4c5   : > { %v15018_v6 = vld [vmem:[%s19447_s22 + $0x1930] sm:$0xf0] }
 0x4c6   : > { %v18306_v34 = vld [vmem:[%s19447_s22 + $0x1b14] sm:$0xf]  ;;  %v15021_v27 = vor.u32 %v18242_v54, %v15018_v6  ;;  %6896 = vmatpush.bf16.msra.mxu1 %v14765_v19  ;;  %v6657_v19 = vpop.f32.mrf.mxu2 }
 0x4c7   : > { %v15274_v40 = vld [vmem:[%s19447_s22 + $0x1b30] sm:$0xf0]  ;;  %v11952_v19 = vld [vmem:[%s19447_s22 + $0x118] sm:$0xf] }
 0x4c8   : > { %v18106_v46 = vld [vmem:[%s19447_s22 + $0x14d4] sm:$0xf]  ;;  %v15277_v48 = vor.u32 %v18306_v34, %v15274_v40  ;;  %6909 = vmatpush.bf16.msra.mxu2 %v15021_v27 }
 0x4c9   : > { %v14474_v51 = vld [vmem:[%s19447_s22 + $0x14f0] sm:$0xf0] }
 0x4ca   : > { %v18170_v22 = vld [vmem:[%s19447_s22 + $0x16d4] sm:$0xf]  ;;  %v14477_v53 = vor.u32 %v18106_v46, %v14474_v51  ;;  %6922 = vmatpush.bf16.msra.mxu3 %v15277_v48  ;;  %v6670_v48 = vpop.f32.mrf.mxu3 }
 0x4cb   : > { %v14730_v49 = vld [vmem:[%s19447_s22 + $0x16f0] sm:$0xf0]  ;;  %v12464_v48 = vld [vmem:[%s19447_s22 + $0x518] sm:$0xf] }
 0x4cc   : > { %v18234_v55 = vld [vmem:[%s19447_s22 + $0x18d4] sm:$0xf]  ;;  %v14733_v58 = vor.u32 %v18170_v22, %v14730_v49  ;;  %6884 = vmatpush.bf16.msra.mxu0 %v14477_v53  ;;  %v12048_v49 = vld [vmem:[%s19447_s22 + $0x1d8] sm:$0xf] }
 0x4cd   : > { %v14986_v29 = vld [vmem:[%s19447_s22 + $0x18f0] sm:$0xf0]  ;;  %v12560_v53 = vld [vmem:[%s19447_s22 + $0x5d8] sm:$0xf] }
 0x4ce   : > { %v18298_v50 = vld [vmem:[%s19447_s22 + $0x1ad4] sm:$0xf]  ;;  %v14989_v31 = vor.u32 %v18234_v55, %v14986_v29  ;;  %6897 = vmatpush.bf16.msra.mxu1 %v14733_v58  ;;  %v17503_v55 = vld [vmem:[%s19447_s22 + $0x1f4] sm:$0xf0] }
 0x4cf   : > { %v15242_v61 = vld [vmem:[%s19447_s22 + $0x1af0] sm:$0xf0]  ;;  %v12304_v29 = vld [vmem:[%s19447_s22 + $0x3d8] sm:$0xf] }
 0x4d0   : > { %v18098_v13 = vld [vmem:[%s19447_s22 + $0x1494] sm:$0xf]  ;;  %v15245_v59 = vor.u32 %v18298_v50, %v15242_v61  ;;  %6910 = vmatpush.bf16.msra.mxu2 %v14989_v31  ;;  %v17567_v61 = vld [vmem:[%s19447_s22 + $0x3f4] sm:$0xf0] }
 0x4d1   : > { %v14442_v57 = vld [vmem:[%s19447_s22 + $0x14b0] sm:$0xf0]  ;;  %v17631_v58 = vld [vmem:[%s19447_s22 + $0x5f4] sm:$0xf0] }
 0x4d2   : > { %v18162_v3 = vld [vmem:[%s19447_s22 + $0x1694] sm:$0xf]  ;;  %v14445_v2 = vor.u32 %v18098_v13, %v14442_v57  ;;  %6923 = vmatpush.bf16.msra.mxu3 %v15245_v59  ;;  %v12816_v57 = vld [vmem:[%s19447_s22 + $0x7d8] sm:$0xf] }
 0x4d3   : > { %v14698_v52 = vld [vmem:[%s19447_s22 + $0x16b0] sm:$0xf0] }
 0x4d4   : > { %v18226_v1 = vld [vmem:[%s19447_s22 + $0x1894] sm:$0xf]  ;;  %v14701_v14 = vor.u32 %v18162_v3, %v14698_v52  ;;  %6885 = vmatpush.bf16.msra.mxu0 %v14445_v2  ;;  %v17695_v3 = vld [vmem:[%s19447_s22 + $0x7f4] sm:$0xf0]  ;;  %v12049_v52 = vor.u32 %v17503_v55, %v12048_v49  ;;  %v21094_v55 = vpop.f32.mrf.mxu0 }
 0x4d5   : > { %v14954_v4 = vld [vmem:[%s19447_s22 + $0x18b0] sm:$0xf0]  ;;  %v12272_v2 = vld [vmem:[%s19447_s22 + $0x398] sm:$0xf]  ;;  %v12817_v7 = vor.u32 %v17695_v3, %v12816_v57 }
 0x4d6   : > { %v18290_v60 = vld [vmem:[%s19447_s22 + $0x1a94] sm:$0xf]  ;;  %v14957_v8 = vor.u32 %v18226_v1, %v14954_v4  ;;  %6898 = vmatpush.bf16.msra.mxu1 %v14701_v14  ;;  %v12305_v1 = vor.u32 %v17567_v61, %v12304_v29  ;;  %v12561_v4 = vor.u32 %v17631_v58, %v12560_v53  ;;  %v17559_v14 = vld [vmem:[%s19447_s22 + $0x3b4] sm:$0xf0]  ;;  %v21098_v53 = vpop.f32.mrf.mxu1 }
 0x4d7   : > { %v15210_v42 = vld [vmem:[%s19447_s22 + $0x1ab0] sm:$0xf0]  ;;  %v17607_v49 = vld [vmem:[%s19447_s22 + $0x534] sm:$0xf0] }
 0x4d8   : > { %v18090_v9 = vld [vmem:[%s19447_s22 + $0x1454] sm:$0xf]  ;;  %v15213_v15 = vor.u32 %v18290_v60, %v15210_v42  ;;  %6911 = vmatpush.bf16.msra.mxu2 %v14957_v8  ;;  %v12016_v60 = vld [vmem:[%s19447_s22 + $0x198] sm:$0xf] }
 0x4d9   : > { %v14410_v43 = vld [vmem:[%s19447_s22 + $0x1470] sm:$0xf0]  ;;  %v17495_v42 = vld [vmem:[%s19447_s22 + $0x1b4] sm:$0xf0] }
 0x4da   : > { %v18154_v21 = vld [vmem:[%s19447_s22 + $0x1654] sm:$0xf]  ;;  %v14413_v47 = vor.u32 %v18090_v9, %v14410_v43  ;;  %6924 = vmatpush.bf16.msra.mxu3 %v15213_v15  ;;  %v12528_v8 = vld [vmem:[%s19447_s22 + $0x598] sm:$0xf]  ;;  %v12017_v26 = vor.u32 %v17495_v42, %v12016_v60  ;;  %v12273_v15 = vor.u32 %v17559_v14, %v12272_v2  ;;  %v6630_v2 = vadd.f32 %v21020_v45, %v20966_v63  ;;  %v21118_v45 = vpop.f32.mrf.mxu3 }
 0x4db   : > { %v14666_v30 = vld [vmem:[%s19447_s22 + $0x1670] sm:$0xf0]  ;;  %v17623_v9 = vld [vmem:[%s19447_s22 + $0x5b4] sm:$0xf0] }
 0x4dc   : > { %v18218_v32 = vld [vmem:[%s19447_s22 + $0x1854] sm:$0xf]  ;;  %v14669_v54 = vor.u32 %v18154_v21, %v14666_v30  ;;  %6886 = vmatpush.bf16.msra.mxu0 %v14413_v47  ;;  %v12784_v43 = vld [vmem:[%s19447_s22 + $0x798] sm:$0xf]  ;;  %v12529_v30 = vor.u32 %v17623_v9, %v12528_v8 }
 0x4dd   : > { %v14922_v33 = vld [vmem:[%s19447_s22 + $0x1870] sm:$0xf0]  ;;  %v17687_v21 = vld [vmem:[%s19447_s22 + $0x7b4] sm:$0xf0] }
 0x4de   : > { %v18282_v23 = vld [vmem:[%s19447_s22 + $0x1a54] sm:$0xf]  ;;  %v14925_v6 = vor.u32 %v18218_v32, %v14922_v33  ;;  %6899 = vmatpush.bf16.msra.mxu1 %v14669_v54  ;;  %v11984_v32 = vld [vmem:[%s19447_s22 + $0x158] sm:$0xf] }
 0x4df   : > { %v15178_v11 = vld [vmem:[%s19447_s22 + $0x1a70] sm:$0xf0]  ;;  %v17487_v33 = vld [vmem:[%s19447_s22 + $0x174] sm:$0xf0] }
 0x4e0   : > { %v18082_v36 = vld [vmem:[%s19447_s22 + $0x1414] sm:$0xf]  ;;  %v15181_v27 = vor.u32 %v18282_v23, %v15178_v11  ;;  %6912 = vmatpush.bf16.msra.mxu2 %v14925_v6  ;;  %v12240_v23 = vld [vmem:[%s19447_s22 + $0x358] sm:$0xf]  ;;  %v12785_v11 = vor.u32 %v17687_v21, %v12784_v43 }
 0x4e1   : > { %v14378_v37 = vld [vmem:[%s19447_s22 + $0x1430] sm:$0xf0]  ;;  %v17551_v47 = vld [vmem:[%s19447_s22 + $0x374] sm:$0xf0] }
 0x4e2   : > { %v18146_v34 = vld [vmem:[%s19447_s22 + $0x1614] sm:$0xf]  ;;  %v14381_v50 = vor.u32 %v18082_v36, %v14378_v37  ;;  %6925 = vmatpush.bf16.msra.mxu3 %v15181_v27  ;;  %v12496_v36 = vld [vmem:[%s19447_s22 + $0x558] sm:$0xf] }
 0x4e3   : > { %v14634_v40 = vld [vmem:[%s19447_s22 + $0x1630] sm:$0xf0]  ;;  %v17615_v37 = vld [vmem:[%s19447_s22 + $0x574] sm:$0xf0] }
 0x4e4   : > { %v18210_v44 = vld [vmem:[%s19447_s22 + $0x1814] sm:$0xf]  ;;  %v14637_v31 = vor.u32 %v18146_v34, %v14634_v40  ;;  %6887 = vmatpush.bf16.msra.mxu0 %v14381_v50  ;;  %v12752_v54 = vld [vmem:[%s19447_s22 + $0x758] sm:$0xf]  ;;  %v11985_v34 = vor.u32 %v17487_v33, %v11984_v32  ;;  %v12241_v40 = vor.u32 %v17551_v47, %v12240_v23  ;;  %v6643_v47 = vadd.f32 %v21025_v56, %v6630_v2  ;;  %v6722_v2 = vpop.f32.mrf.mxu3 }
 0x4e5   : > { %v14890_v46 = vld [vmem:[%s19447_s22 + $0x1830] sm:$0xf0]  ;;  %v17679_v6 = vld [vmem:[%s19447_s22 + $0x774] sm:$0xf0] }
 0x4e6   : > { %v18274_v51 = vld [vmem:[%s19447_s22 + $0x1a14] sm:$0xf]  ;;  %v14893_v13 = vor.u32 %v18210_v44, %v14890_v46  ;;  %6900 = vmatpush.bf16.msra.mxu1 %v14637_v31  ;;  %v12497_v44 = vor.u32 %v17615_v37, %v12496_v36  ;;  %v17479_v27 = vld [vmem:[%s19447_s22 + $0x134] sm:$0xf0]  ;;  %v12465_v31 = vor.u32 %v17607_v49, %v12464_v48  ;;  %v6696_v37 = vpop.f32.mrf.mxu1  ;;  %v6656_v48 = vadd.f32 %v21035_v62, %v6643_v47 }
 0x4e7   : > { %v15146_v22 = vld [vmem:[%s19447_s22 + $0x1a30] sm:$0xf0]  ;;  %6888 = vmatmul.bf16.vlgmr.msra.gmra.mxu0 %v19711_v24  ;;  %v12208_v46 = vld [vmem:[%s19447_s22 + $0x318] sm:$0xf]  ;;  %v11953_v61 = vor.u32 %v17479_v27, %v11952_v19 }
 0x4e8   : > { %v15149_v59 = vor.u32 %v18274_v51, %v15146_v22  ;;  %6913 = vmatpush.bf16.msra.mxu2 %v14893_v13  ;;  %6932 = vmatpush.bf16.msrb.mxu0 %v12049_v52  ;;  %v12753_v51 = vor.u32 %v17679_v6, %v12752_v54  ;;  %v17543_v22 = vld [vmem:[%s19447_s22 + $0x334] sm:$0xf0] }
 0x4e9   : > { %6901 = vmatmul.bf16.vlgmr.msra.gmra.mxu1 %v19717_v28  ;;  %v12720_v29 = vld [vmem:[%s19447_s22 + $0x718] sm:$0xf]  ;;  %v12209_v58 = vor.u32 %v17543_v22, %v12208_v46 }
 0x4ea   : > { %6926 = vmatpush.bf16.msra.mxu3 %v15149_v59  ;;  %6945 = vmatpush.bf16.msrb.mxu1 %v12305_v1  ;;  %v17671_v50 = vld [vmem:[%s19447_s22 + $0x734] sm:$0xf0] }
 0x4eb   : > { %6914 = vmatmul.bf16.vlgmr.msra.gmra.mxu2 %v19784_v12  ;;  %v11920_v13 = vld [vmem:[%s19447_s22 + $0xd8] sm:$0xf]  ;;  %v12721_v59 = vor.u32 %v17671_v50, %v12720_v29 }
 0x4ec   : > { %6958 = vmatpush.bf16.msrb.mxu2 %v12561_v4  ;;  %6933 = vmatpush.bf16.msrb.mxu0 %v12017_v26  ;;  %v17471_v57 = vld [vmem:[%s19447_s22 + $0xf4] sm:$0xf0] }
 0x4ed   : > { %6927 = vmatmul.bf16.vlgmr.msra.gmra.mxu3 %v19789_v16  ;;  %v12176_v3 = vld [vmem:[%s19447_s22 + $0x2d8] sm:$0xf] }
 0x4ee   : > { %6971 = vmatpush.bf16.msrb.mxu3 %v12817_v7  ;;  %6946 = vmatpush.bf16.msrb.mxu1 %v12273_v15  ;;  %v17535_v52 = vld [vmem:[%s19447_s22 + $0x2f4] sm:$0xf0]  ;;  %v11921_v7 = vor.u32 %v17471_v57, %v11920_v13  ;;  %v21113_v15 = vpop.f32.mrf.mxu2 }
 0x4ef   : > { %v12432_v1 = vld [vmem:[%s19447_s22 + $0x4d8] sm:$0xf]  ;;  %v12177_v14 = vor.u32 %v17535_v52, %v12176_v3 }
 0x4f0   : > { %6959 = vmatpush.bf16.msrb.mxu2 %v12529_v30  ;;  %6934 = vmatpush.bf16.msrb.mxu0 %v11985_v34  ;;  %v17599_v4 = vld [vmem:[%s19447_s22 + $0x4f4] sm:$0xf0] }
 0x4f1   : > { %v12688_v60 = vld [vmem:[%s19447_s22 + $0x6d8] sm:$0xf]  ;;  %v12433_v8 = vor.u32 %v17599_v4, %v12432_v1 }
 0x4f2   : > { %6972 = vmatpush.bf16.msrb.mxu3 %v12785_v11  ;;  %6947 = vmatpush.bf16.msrb.mxu1 %v12241_v40  ;;  %v17663_v42 = vld [vmem:[%s19447_s22 + $0x6f4] sm:$0xf0]  ;;  %v6683_v11 = vpop.f32.mrf.mxu0 }
 0x4f3   : > { %v11888_v9 = vld [vmem:[%s19447_s22 + $0x98] sm:$0xf]  ;;  %v12689_v26 = vor.u32 %v17663_v42, %v12688_v60 }
 0x4f4   : > { %6960 = vmatpush.bf16.msrb.mxu2 %v12497_v44  ;;  %6935 = vmatpush.bf16.msrb.mxu0 %v11953_v61  ;;  %v17463_v43 = vld [vmem:[%s19447_s22 + $0xb4] sm:$0xf0] }
 0x4f5   : > { %v12144_v21 = vld [vmem:[%s19447_s22 + $0x298] sm:$0xf]  ;;  %v11889_v36 = vor.u32 %v17463_v43, %v11888_v9 }
 0x4f6   : > { %6973 = vmatpush.bf16.msrb.mxu3 %v12753_v51  ;;  %6948 = vmatpush.bf16.msrb.mxu1 %v12209_v58  ;;  %v17527_v30 = vld [vmem:[%s19447_s22 + $0x2b4] sm:$0xf0]  ;;  %v6709_v1 = vpop.f32.mrf.mxu2 }
 0x4f7   : > { %v12400_v32 = vld [vmem:[%s19447_s22 + $0x498] sm:$0xf]  ;;  %v12145_v54 = vor.u32 %v17527_v30, %v12144_v21 }
 0x4f8   : > { %6961 = vmatpush.bf16.msrb.mxu2 %v12465_v31  ;;  %v17591_v63 = vld [vmem:[%s19447_s22 + $0x4b4] sm:$0xf0]  ;;  %6936 = vmatpush.bf16.msrb.mxu0 %v11921_v7  ;;  %v6669_v7 = vadd.f32 %v21040_v5, %v6656_v48 }
 0x4f9   : > { %v12656_v33 = vld [vmem:[%s19447_s22 + $0x698] sm:$0xf]  ;;  %v12401_v6 = vor.u32 %v17591_v63, %v12400_v32 }
 0x4fa   : > { %6974 = vmatpush.bf16.msrb.mxu3 %v12721_v59  ;;  %v17655_v23 = vld [vmem:[%s19447_s22 + $0x6b4] sm:$0xf0]  ;;  %6949 = vmatpush.bf16.msrb.mxu1 %v12177_v14  ;;  %v6682_v63 = vadd.f32 %v21094_v55, %v6669_v7  ;;  %v6733_v2 = vpop.f32.mrf.mxu0 }
 0x4fb   : > { %v11856_v34 = vld [vmem:[%s19447_s22 + $0x58] sm:$0xf]  ;;  %v12657_v19 = vor.u32 %v17655_v23, %v12656_v33 }
 0x4fc   : > { %6962 = vmatpush.bf16.msrb.mxu2 %v12433_v8  ;;  %v17455_v40 = vld [vmem:[%s19447_s22 + $0x74] sm:$0xf0]  ;;  %6937 = vmatpush.bf16.msrb.mxu0 %v11889_v36 }
 0x4fd   : > { %v12112_v44 = vld [vmem:[%s19447_s22 + $0x258] sm:$0xf]  ;;  %v11857_v49 = vor.u32 %v17455_v40, %v11856_v34 }
 0x4fe   : > { %6975 = vmatpush.bf16.msrb.mxu3 %v12689_v26  ;;  %v17519_v27 = vld [vmem:[%s19447_s22 + $0x274] sm:$0xf0]  ;;  %6950 = vmatpush.bf16.msrb.mxu1 %v12145_v54 }
 0x4ff   : > { %v12368_v56 = vld [vmem:[%s19447_s22 + $0x458] sm:$0xf]  ;;  %v12113_v61 = vor.u32 %v17519_v27, %v12112_v44 }
 0x500   : > { %v17583_v46 = vld [vmem:[%s19447_s22 + $0x474] sm:$0xf0]  ;;  %6963 = vmatpush.bf16.msrb.mxu2 %v12401_v6  ;;  %6938 = vmatpush.bf16.msrb.mxu0 %v11857_v49 }
 0x501   : > { %v12624_v51 = vld [vmem:[%s19447_s22 + $0x658] sm:$0xf]  ;;  %v12369_v58 = vor.u32 %v17583_v46, %v12368_v56 }
 0x502   : > { %v17647_v22 = vld [vmem:[%s19447_s22 + $0x674] sm:$0xf0]  ;;  %6976 = vmatpush.bf16.msrb.mxu3 %v12657_v19  ;;  %6951 = vmatpush.bf16.msrb.mxu1 %v12113_v61  ;;  %v6695_v19 = vadd.f32 %v21098_v53, %v6682_v63 }
 0x503   : > { %v11824_v29 = vld [vmem:[%s19447_s22 + $0x18] sm:$0xf]  ;;  %v12625_v62 = vor.u32 %v17647_v22, %v12624_v51 }
 0x504   : > { %v17447_v50 = vld [vmem:[%s19447_s22 + $0x34] sm:$0xf0]  ;;  %6964 = vmatpush.bf16.msrb.mxu2 %v12369_v58  ;;  %v6708_v49 = vadd.f32 %v21113_v15, %v6695_v19 }
 0x505   : > { %v12080_v31 = vld [vmem:[%s19447_s22 + $0x218] sm:$0xf]  ;;  %v11825_v14 = vor.u32 %v17447_v50, %v11824_v29 }
 0x506   : > { %v17511_v13 = vld [vmem:[%s19447_s22 + $0x234] sm:$0xf0]  ;;  %6977 = vmatpush.bf16.msrb.mxu3 %v12625_v62 }
 0x507   : > { %v12336_v57 = vld [vmem:[%s19447_s22 + $0x418] sm:$0xf]  ;;  %v12081_v21 = vor.u32 %v17511_v13, %v12080_v31  ;;  %6939 = vmatpush.bf16.msrb.mxu0 %v11825_v14 }
 0x508   : > { %v17575_v3 = vld [vmem:[%s19447_s22 + $0x434] sm:$0xf0] }
 0x509   : > { %v12592_v59 = vld [vmem:[%s19447_s22 + $0x618] sm:$0xf]  ;;  %v12337_v26 = vor.u32 %v17575_v3, %v12336_v57  ;;  %6952 = vmatpush.bf16.msrb.mxu1 %v12081_v21 }
 0x50a   : > { %v17639_v52 = vld [vmem:[%s19447_s22 + $0x634] sm:$0xf0]  ;;  %6940 = vmatmul.bf16.vlgmr.msrb.gmra.mxu0 %v19563_v10 }
 0x50b   : > { %v13072_v4 = vld [vmem:[%s19447_s22 + $0x9d8] sm:$0xf]  ;;  %v12593_v5 = vor.u32 %v17639_v52, %v12592_v59  ;;  %6965 = vmatpush.bf16.msrb.mxu2 %v12337_v26  ;;  %v6721_v52 = vadd.f32 %v21118_v45, %v6708_v49  ;;  %v6746_v45 = vpop.f32.mrf.mxu1 }
 0x50c   : > { %v17759_v60 = vld [vmem:[%s19447_s22 + $0x9f4] sm:$0xf0]  ;;  %6953 = vmatmul.bf16.vlgmr.msrb.gmra.mxu1 %v19572_v18 }
 0x50d   : > { %v13328_v42 = vld [vmem:[%s19447_s22 + $0xbd8] sm:$0xf]  ;;  %v13073_v33 = vor.u32 %v17759_v60, %v13072_v4  ;;  %6978 = vmatpush.bf16.msrb.mxu3 %v12593_v5 }
 0x50e   : > { %v17823_v8 = vld [vmem:[%s19447_s22 + $0xbf4] sm:$0xf0]  ;;  %6966 = vmatmul.bf16.vlgmr.msrb.gmra.mxu2 %v19554_v0 }
 0x50f   : > { %v13584_v9 = vld [vmem:[%s19447_s22 + $0xdd8] sm:$0xf]  ;;  %v13329_v23 = vor.u32 %v17823_v8, %v13328_v42  ;;  %6984 = vmatpush.bf16.msra.mxu0 %v13073_v33  ;;  %v6734_v8 = vadd.f32 %v6733_v2, %v6721_v52 }
 0x510   : > { %v17887_v43 = vld [vmem:[%s19447_s22 + $0xdf4] sm:$0xf0]  ;;  %6979 = vmatmul.bf16.vlgmr.msrb.gmra.mxu3 %v19570_v17 }
 0x511   : > { %v13840_v30 = vld [vmem:[%s19447_s22 + $0xfd8] sm:$0xf]  ;;  %v13585_v11 = vor.u32 %v17887_v43, %v13584_v9  ;;  %6997 = vmatpush.bf16.msra.mxu1 %v13329_v23  ;;  %v432_v43 = vld [vmem:[#allocation2 + $0x8] sm:$0xff]  ;;  %v6747_v33 = vadd.f32 %v6746_v45, %v6734_v8 }
 0x512   : > { %v17951_v32 = vld [vmem:[%s19447_s22 + $0xff4] sm:$0xf0] }
 0x513   : > { %v13040_v47 = vld [vmem:[%s19447_s22 + $0x998] sm:$0xf]  ;;  %v13841_v54 = vor.u32 %v17951_v32, %v13840_v30  ;;  %7010 = vmatpush.bf16.msra.mxu2 %v13585_v11 }
 0x514   : > { %v17751_v36 = vld [vmem:[%s19447_s22 + $0x9b4] sm:$0xf0] }
 0x515   : > { %v13296_v37 = vld [vmem:[%s19447_s22 + $0xb98] sm:$0xf]  ;;  %v13041_v27 = vor.u32 %v17751_v36, %v13040_v47  ;;  %7023 = vmatpush.bf16.msra.mxu3 %v13841_v54  ;;  %v7300_v54 = vadd.f32 %v6747_v33, %v432_v43 }
 0x516   : > { %v17815_v6 = vld [vmem:[%s19447_s22 + $0xbb4] sm:$0xf0] }
 0x517   : > { %v13552_v34 = vld [vmem:[%s19447_s22 + $0xd98] sm:$0xf]  ;;  %v13297_v56 = vor.u32 %v17815_v6, %v13296_v37  ;;  %6985 = vmatpush.bf16.msra.mxu0 %v13041_v27  ;;  %7308 = vst [vmem:[#allocation2 + $0x8] sm:$0xff] %v7300_v54 }
 0x518   : > { %v17879_v40 = vld [vmem:[%s19447_s22 + $0xdb4] sm:$0xf0] }
 0x519   : > { %v13808_v55 = vld [vmem:[%s19447_s22 + $0xf98] sm:$0xf]  ;;  %v13553_v46 = vor.u32 %v17879_v40, %v13552_v34  ;;  %6998 = vmatpush.bf16.msra.mxu1 %v13297_v56 }
 0x51a   : > { %v17943_v44 = vld [vmem:[%s19447_s22 + $0xfb4] sm:$0xf0] }
 0x51b   : > { %v13008_v51 = vld [vmem:[%s19447_s22 + $0x958] sm:$0xf]  ;;  %v13809_v29 = vor.u32 %v17943_v44, %v13808_v55  ;;  %7011 = vmatpush.bf16.msra.mxu2 %v13553_v46 }
 0x51c   : > { %v17743_v22 = vld [vmem:[%s19447_s22 + $0x974] sm:$0xf0] }
 0x51d   : > { %v13264_v48 = vld [vmem:[%s19447_s22 + $0xb58] sm:$0xf]  ;;  %v13009_v15 = vor.u32 %v17743_v22, %v13008_v51  ;;  %7024 = vmatpush.bf16.msra.mxu3 %v13809_v29  ;;  %v6759_v22 = vpop.f32.mrf.mxu2  ;;  %v6772_v29 = vpop.f32.mrf.mxu3 }
 0x51e   : > { %v17807_v50 = vld [vmem:[%s19447_s22 + $0xb74] sm:$0xf0] }
 0x51f   : > { %v13520_v53 = vld [vmem:[%s19447_s22 + $0xd58] sm:$0xf]  ;;  %v13265_v13 = vor.u32 %v17807_v50, %v13264_v48  ;;  %6986 = vmatpush.bf16.msra.mxu0 %v13009_v15  ;;  %v6735_v50 = vpop.f32.mrf.mxu0 }
 0x520   : > { %v17871_v61 = vld [vmem:[%s19447_s22 + $0xd74] sm:$0xf0] }
 0x521   : > { %v13776_v58 = vld [vmem:[%s19447_s22 + $0xf58] sm:$0xf]  ;;  %v13521_v57 = vor.u32 %v17871_v61, %v13520_v53  ;;  %6999 = vmatpush.bf16.msra.mxu1 %v13265_v13  ;;  %v21197_v61 = vadd.f32 %v6772_v29, %v6759_v22 }
 0x522   : > { %v17935_v31 = vld [vmem:[%s19447_s22 + $0xf74] sm:$0xf0] }
 0x523   : > { %v12976_v62 = vld [vmem:[%s19447_s22 + $0x918] sm:$0xf]  ;;  %v13777_v1 = vor.u32 %v17935_v31, %v13776_v58  ;;  %7012 = vmatpush.bf16.msra.mxu2 %v13521_v57  ;;  %v6748_v58 = vpop.f32.mrf.mxu1 }
 0x524   : > { %v17735_v3 = vld [vmem:[%s19447_s22 + $0x934] sm:$0xf0] }
 0x525   : > { %v13232_v59 = vld [vmem:[%s19447_s22 + $0xb18] sm:$0xf]  ;;  %v12977_v9 = vor.u32 %v17735_v3, %v12976_v62  ;;  %7025 = vmatpush.bf16.msra.mxu3 %v13777_v1 }
 0x526   : > { %v17799_v4 = vld [vmem:[%s19447_s22 + $0xb34] sm:$0xf0] }
 0x527   : > { %v13488_v60 = vld [vmem:[%s19447_s22 + $0xd18] sm:$0xf]  ;;  %v13233_v21 = vor.u32 %v17799_v4, %v13232_v59  ;;  %6987 = vmatpush.bf16.msra.mxu0 %v12977_v9 }
 0x528   : > { %v17863_v42 = vld [vmem:[%s19447_s22 + $0xd34] sm:$0xf0] }
 0x529   : > { %v13744_v7 = vld [vmem:[%s19447_s22 + $0xf18] sm:$0xf]  ;;  %v13489_v26 = vor.u32 %v17863_v42, %v13488_v60  ;;  %7000 = vmatpush.bf16.msra.mxu1 %v13233_v21 }
 0x52a   : > { %v17927_v14 = vld [vmem:[%s19447_s22 + $0xf34] sm:$0xf0] }
 0x52b   : > { %v12944_v30 = vld [vmem:[%s19447_s22 + $0x8d8] sm:$0xf]  ;;  %v13745_v5 = vor.u32 %v17927_v14, %v13744_v7  ;;  %7013 = vmatpush.bf16.msra.mxu2 %v13489_v26 }
 0x52c   : > { %v17727_v32 = vld [vmem:[%s19447_s22 + $0x8f4] sm:$0xf0] }
 0x52d   : > { %v13200_v63 = vld [vmem:[%s19447_s22 + $0xad8] sm:$0xf]  ;;  %v12945_v6 = vor.u32 %v17727_v32, %v12944_v30  ;;  %7026 = vmatpush.bf16.msra.mxu3 %v13745_v5 }
 0x52e   : > { %v17791_v23 = vld [vmem:[%s19447_s22 + $0xaf4] sm:$0xf0] }
 0x52f   : > { %v13456_v11 = vld [vmem:[%s19447_s22 + $0xcd8] sm:$0xf]  ;;  %v13201_v40 = vor.u32 %v17791_v23, %v13200_v63  ;;  %6988 = vmatpush.bf16.msra.mxu0 %v12945_v6  ;;  %v6761_v63 = vpop.f32.mrf.mxu2 }
 0x530   : > { %v17855_v47 = vld [vmem:[%s19447_s22 + $0xcf4] sm:$0xf0] }
 0x531   : > { %v13712_v36 = vld [vmem:[%s19447_s22 + $0xed8] sm:$0xf]  ;;  %v13457_v55 = vor.u32 %v17855_v47, %v13456_v11  ;;  %7001 = vmatpush.bf16.msra.mxu1 %v13201_v40  ;;  %v6774_v11 = vpop.f32.mrf.mxu3 }
 0x532   : > { %v17919_v37 = vld [vmem:[%s19447_s22 + $0xef4] sm:$0xf0] }
 0x533   : > { %v12912_v34 = vld [vmem:[%s19447_s22 + $0x898] sm:$0xf]  ;;  %v13713_v56 = vor.u32 %v17919_v37, %v13712_v36  ;;  %7014 = vmatpush.bf16.msra.mxu2 %v13457_v55 }
 0x534   : > { %v17719_v44 = vld [vmem:[%s19447_s22 + $0x8b4] sm:$0xf0] }
 0x535   : > { %v13168_v19 = vld [vmem:[%s19447_s22 + $0xa98] sm:$0xf]  ;;  %v12913_v53 = vor.u32 %v17719_v44, %v12912_v34  ;;  %7027 = vmatpush.bf16.msra.mxu3 %v13713_v56 }
 0x536   : > { %v17783_v27 = vld [vmem:[%s19447_s22 + $0xab4] sm:$0xf0] }
 0x537   : > { %v13424_v46 = vld [vmem:[%s19447_s22 + $0xc98] sm:$0xf]  ;;  %v13169_v31 = vor.u32 %v17783_v27, %v13168_v19  ;;  %6989 = vmatpush.bf16.msra.mxu0 %v12913_v53 }
 0x538   : > { %v17847_v51 = vld [vmem:[%s19447_s22 + $0xcb4] sm:$0xf0] }
 0x539   : > { %v13680_v48 = vld [vmem:[%s19447_s22 + $0xe98] sm:$0xf]  ;;  %v13425_v15 = vor.u32 %v17847_v51, %v13424_v46  ;;  %7002 = vmatpush.bf16.msra.mxu1 %v13169_v31 }
 0x53a   : > { %v17911_v49 = vld [vmem:[%s19447_s22 + $0xeb4] sm:$0xf0] }
 0x53b   : > { %v12880_v13 = vld [vmem:[%s19447_s22 + $0x858] sm:$0xf]  ;;  %v13681_v3 = vor.u32 %v17911_v49, %v13680_v48  ;;  %7015 = vmatpush.bf16.msra.mxu2 %v13425_v15 }
 0x53c   : > { %v17711_v57 = vld [vmem:[%s19447_s22 + $0x874] sm:$0xf0] }
 0x53d   : > { %v13136_v62 = vld [vmem:[%s19447_s22 + $0xa58] sm:$0xf]  ;;  %v12881_v42 = vor.u32 %v17711_v57, %v12880_v13  ;;  %7028 = vmatpush.bf16.msra.mxu3 %v13681_v3 }
 0x53e   : > { %v17775_v59 = vld [vmem:[%s19447_s22 + $0xa74] sm:$0xf0] }
 0x53f   : > { %v13392_v52 = vld [vmem:[%s19447_s22 + $0xc58] sm:$0xf]  ;;  %v13137_v14 = vor.u32 %v17775_v59, %v13136_v62  ;;  %6990 = vmatpush.bf16.msra.mxu0 %v12881_v42 }
 0x540   : > { %v17839_v1 = vld [vmem:[%s19447_s22 + $0xc74] sm:$0xf0] }
 0x541   : > { %v13648_v4 = vld [vmem:[%s19447_s22 + $0xe58] sm:$0xf]  ;;  %v13393_v8 = vor.u32 %v17839_v1, %v13392_v52  ;;  %7003 = vmatpush.bf16.msra.mxu1 %v13137_v14 }
 0x542   : > { %v17903_v60 = vld [vmem:[%s19447_s22 + $0xe74] sm:$0xf0] }
 0x543   : > { %v12848_v2 = vld [vmem:[%s19447_s22 + $0x818] sm:$0xf]  ;;  %v13649_v21 = vor.u32 %v17903_v60, %v13648_v4  ;;  %7016 = vmatpush.bf16.msra.mxu2 %v13393_v8 }
 0x544   : > { %v17703_v7 = vld [vmem:[%s19447_s22 + $0x834] sm:$0xf0] }
 0x545   : > { %v13104_v9 = vld [vmem:[%s19447_s22 + $0xa18] sm:$0xf]  ;;  %v12849_v47 = vor.u32 %v17703_v7, %v12848_v2  ;;  %7029 = vmatpush.bf16.msra.mxu3 %v13649_v21 }
 0x546   : > { %v17767_v43 = vld [vmem:[%s19447_s22 + $0xa34] sm:$0xf0] }
 0x547   : > { %v13360_v45 = vld [vmem:[%s19447_s22 + $0xc18] sm:$0xf]  ;;  %v13105_v6 = vor.u32 %v17767_v43, %v13104_v9  ;;  %6991 = vmatpush.bf16.msra.mxu0 %v12849_v47 }
 0x548   : > { %v17831_v26 = vld [vmem:[%s19447_s22 + $0xc34] sm:$0xf0] }
 0x549   : > { %v13616_v30 = vld [vmem:[%s19447_s22 + $0xe18] sm:$0xf]  ;;  %v13361_v34 = vor.u32 %v17831_v26, %v13360_v45  ;;  %7004 = vmatpush.bf16.msra.mxu1 %v13105_v6 }
 0x54a   : > { %v17895_v32 = vld [vmem:[%s19447_s22 + $0xe34] sm:$0xf0]  ;;  %6992 = vmatmul.bf16.vlgmr.msra.gmra.mxu0 %v19633_v38 }
 0x54b   : > { %v14096_v5 = vld [vmem:[%s19447_s22 + $0x11d8] sm:$0xf]  ;;  %v13617_v44 = vor.u32 %v17895_v32, %v13616_v30  ;;  %7017 = vmatpush.bf16.msra.mxu2 %v13361_v34 }
 0x54c   : > { %v18015_v33 = vld [vmem:[%s19447_s22 + $0x11f4] sm:$0xf0]  ;;  %7005 = vmatmul.bf16.vlgmr.msra.gmra.mxu1 %v19637_v41 }
 0x54d   : > { %v14352_v23 = vld [vmem:[%s19447_s22 + $0x13d8] sm:$0xf]  ;;  %v14097_v19 = vor.u32 %v18015_v33, %v14096_v5  ;;  %7030 = vmatpush.bf16.msra.mxu3 %v13617_v44  ;;  %v21251_v33 = vpop.f32.mrf.mxu0 }
 0x54e   : > { %v18079_v36 = vld [vmem:[%s19447_s22 + $0x13f4] sm:$0xf0]  ;;  %7018 = vmatmul.bf16.vlgmr.msra.gmra.mxu2 %v19629_v35 }
 0x54f   : > { %v14608_v37 = vld [vmem:[%s19447_s22 + $0x15d8] sm:$0xf]  ;;  %v14353_v27 = vor.u32 %v18079_v36, %v14352_v23  ;;  %7036 = vmatpush.bf16.msrb.mxu0 %v14097_v19 }
 0x550   : > { %v18143_v54 = vld [vmem:[%s19447_s22 + $0x15f4] sm:$0xf0]  ;;  %7031 = vmatmul.bf16.vlgmr.msra.gmra.mxu3 %v19635_v39 }
 0x551   : > { %v14864_v40 = vld [vmem:[%s19447_s22 + $0x17d8] sm:$0xf]  ;;  %v14609_v56 = vor.u32 %v18143_v54, %v14608_v37  ;;  %7049 = vmatpush.bf16.msrb.mxu1 %v14353_v27  ;;  %v21256_v54 = vpop.f32.mrf.mxu1 }
 0x552   : > { %v18207_v55 = vld [vmem:[%s19447_s22 + $0x17f4] sm:$0xf0] }
 0x553   : > { %v14064_v46 = vld [vmem:[%s19447_s22 + $0x1198] sm:$0xf]  ;;  %v14865_v48 = vor.u32 %v18207_v55, %v14864_v40  ;;  %7062 = vmatpush.bf16.msrb.mxu2 %v14609_v56 }
 0x554   : > { %v18007_v51 = vld [vmem:[%s19447_s22 + $0x11b4] sm:$0xf0] }
 0x555   : > { %v14320_v22 = vld [vmem:[%s19447_s22 + $0x1398] sm:$0xf]  ;;  %v14065_v31 = vor.u32 %v18007_v51, %v14064_v46  ;;  %7075 = vmatpush.bf16.msrb.mxu3 %v14865_v48 }
 0x556   : > { %v18071_v49 = vld [vmem:[%s19447_s22 + $0x13b4] sm:$0xf0] }
 0x557   : > { %v14576_v29 = vld [vmem:[%s19447_s22 + $0x1598] sm:$0xf]  ;;  %v14321_v15 = vor.u32 %v18071_v49, %v14320_v22  ;;  %7037 = vmatpush.bf16.msrb.mxu0 %v14065_v31  ;;  %v21266_v49 = vpop.f32.mrf.mxu2  ;;  %v21271_v31 = vpop.f32.mrf.mxu3 }
 0x558   : > { %v18135_v50 = vld [vmem:[%s19447_s22 + $0x15b4] sm:$0xf0] }
 0x559   : > { %v14832_v53 = vld [vmem:[%s19447_s22 + $0x1798] sm:$0xf]  ;;  %v14577_v13 = vor.u32 %v18135_v50, %v14576_v29  ;;  %7050 = vmatpush.bf16.msrb.mxu1 %v14321_v15 }
 0x55a   : > { %v18199_v58 = vld [vmem:[%s19447_s22 + $0x17b4] sm:$0xf0] }
 0x55b   : > { %v14032_v57 = vld [vmem:[%s19447_s22 + $0x1158] sm:$0xf]  ;;  %v14833_v59 = vor.u32 %v18199_v58, %v14832_v53  ;;  %7063 = vmatpush.bf16.msrb.mxu2 %v14577_v13 }
 0x55c   : > { %v17999_v62 = vld [vmem:[%s19447_s22 + $0x1174] sm:$0xf0] }
 0x55d   : > { %v14288_v3 = vld [vmem:[%s19447_s22 + $0x1358] sm:$0xf]  ;;  %v14033_v2 = vor.u32 %v17999_v62, %v14032_v57  ;;  %7076 = vmatpush.bf16.msrb.mxu3 %v14833_v59  ;;  %v6787_v62 = vpop.f32.mrf.mxu0 }
 0x55e   : > { %v18063_v52 = vld [vmem:[%s19447_s22 + $0x1374] sm:$0xf0] }
 0x55f   : > { %v14544_v1 = vld [vmem:[%s19447_s22 + $0x1558] sm:$0xf]  ;;  %v14289_v7 = vor.u32 %v18063_v52, %v14288_v3  ;;  %7038 = vmatpush.bf16.msrb.mxu0 %v14033_v2 }
 0x560   : > { %v18127_v4 = vld [vmem:[%s19447_s22 + $0x1574] sm:$0xf0] }
 0x561   : > { %v14800_v60 = vld [vmem:[%s19447_s22 + $0x1758] sm:$0xf]  ;;  %v14545_v14 = vor.u32 %v18127_v4, %v14544_v1  ;;  %7051 = vmatpush.bf16.msrb.mxu1 %v14289_v7 }
 0x562   : > { %v18191_v42 = vld [vmem:[%s19447_s22 + $0x1774] sm:$0xf0] }
 0x563   : > { %v14000_v8 = vld [vmem:[%s19447_s22 + $0x1118] sm:$0xf]  ;;  %v14801_v45 = vor.u32 %v18191_v42, %v14800_v60  ;;  %7064 = vmatpush.bf16.msrb.mxu2 %v14545_v14  ;;  %v6800_v60 = vpop.f32.mrf.mxu1 }
 0x564   : > { %v17991_v9 = vld [vmem:[%s19447_s22 + $0x1134] sm:$0xf0] }
 0x565   : > { %v14256_v43 = vld [vmem:[%s19447_s22 + $0x1318] sm:$0xf]  ;;  %v14001_v5 = vor.u32 %v17991_v9, %v14000_v8  ;;  %7077 = vmatpush.bf16.msrb.mxu3 %v14801_v45 }
 0x566   : > { %v18055_v21 = vld [vmem:[%s19447_s22 + $0x1334] sm:$0xf0] }
 0x567   : > { %v14512_v26 = vld [vmem:[%s19447_s22 + $0x1518] sm:$0xf]  ;;  %v14257_v23 = vor.u32 %v18055_v21, %v14256_v43  ;;  %7039 = vmatpush.bf16.msrb.mxu0 %v14001_v5 }
 0x568   : > { %v18119_v30 = vld [vmem:[%s19447_s22 + $0x1534] sm:$0xf0] }
 0x569   : > { %v14768_v32 = vld [vmem:[%s19447_s22 + $0x1718] sm:$0xf]  ;;  %v14513_v11 = vor.u32 %v18119_v30, %v14512_v26  ;;  %7052 = vmatpush.bf16.msrb.mxu1 %v14257_v23  ;;  %v6813_v23 = vpop.f32.mrf.mxu2 }
 0x56a   : > { %v18183_v63 = vld [vmem:[%s19447_s22 + $0x1734] sm:$0xf0] }
 0x56b   : > { %v13968_v47 = vld [vmem:[%s19447_s22 + $0x10d8] sm:$0xf]  ;;  %v14769_v6 = vor.u32 %v18183_v63, %v14768_v32  ;;  %7065 = vmatpush.bf16.msrb.mxu2 %v14513_v11 }
 0x56c   : > { %v17983_v36 = vld [vmem:[%s19447_s22 + $0x10f4] sm:$0xf0] }
 0x56d   : > { %v14224_v37 = vld [vmem:[%s19447_s22 + $0x12d8] sm:$0xf]  ;;  %v13969_v27 = vor.u32 %v17983_v36, %v13968_v47  ;;  %7078 = vmatpush.bf16.msrb.mxu3 %v14769_v6  ;;  %v6826_v6 = vpop.f32.mrf.mxu3 }
 0x56e   : > { %v18047_v34 = vld [vmem:[%s19447_s22 + $0x12f4] sm:$0xf0]  ;;  %v17475_v6 = vld [vmem:[%s19447_s22 + $0x11c] sm:$0xf] }
 0x56f   : > { %v14480_v40 = vld [vmem:[%s19447_s22 + $0x14d8] sm:$0xf]  ;;  %v14225_v56 = vor.u32 %v18047_v34, %v14224_v37  ;;  %7040 = vmatpush.bf16.msrb.mxu0 %v13969_v27  ;;  %v17499_v27 = vld [vmem:[%s19447_s22 + $0x1dc] sm:$0xf] }
 0x570   : > { %v18111_v55 = vld [vmem:[%s19447_s22 + $0x14f4] sm:$0xf0] }
 0x571   : > { %v14736_v44 = vld [vmem:[%s19447_s22 + $0x16d8] sm:$0xf]  ;;  %v14481_v46 = vor.u32 %v18111_v55, %v14480_v40  ;;  %7053 = vmatpush.bf16.msrb.mxu1 %v14225_v56  ;;  %v12050_v56 = vld [vmem:[%s19447_s22 + $0x1f8] sm:$0xf0] }
 0x572   : > { %v18175_v19 = vld [vmem:[%s19447_s22 + $0x16f4] sm:$0xf0] }
 0x573   : > { %v13936_v51 = vld [vmem:[%s19447_s22 + $0x1098] sm:$0xf]  ;;  %v14737_v29 = vor.u32 %v18175_v19, %v14736_v44  ;;  %7066 = vmatpush.bf16.msrb.mxu2 %v14481_v46 }
 0x574   : > { %v17975_v22 = vld [vmem:[%s19447_s22 + $0x10b4] sm:$0xf0] }
 0x575   : > { %v14192_v48 = vld [vmem:[%s19447_s22 + $0x1298] sm:$0xf]  ;;  %v13937_v57 = vor.u32 %v17975_v22, %v13936_v51  ;;  %7079 = vmatpush.bf16.msrb.mxu3 %v14737_v29  ;;  %v17563_v22 = vld [vmem:[%s19447_s22 + $0x3dc] sm:$0xf] }
 0x576   : > { %v18039_v50 = vld [vmem:[%s19447_s22 + $0x12b4] sm:$0xf0] }
 0x577   : > { %v14448_v53 = vld [vmem:[%s19447_s22 + $0x1498] sm:$0xf]  ;;  %v14193_v3 = vor.u32 %v18039_v50, %v14192_v48  ;;  %7041 = vmatpush.bf16.msrb.mxu0 %v13937_v57  ;;  %v12306_v48 = vld [vmem:[%s19447_s22 + $0x3f8] sm:$0xf0] }
 0x578   : > { %v18103_v58 = vld [vmem:[%s19447_s22 + $0x14b4] sm:$0xf0]  ;;  %v12309_v62 = vor.u32 %v17563_v22, %v12306_v48 }
 0x579   : > { %v14704_v15 = vld [vmem:[%s19447_s22 + $0x1698] sm:$0xf]  ;;  %v14449_v59 = vor.u32 %v18103_v58, %v14448_v53  ;;  %7054 = vmatpush.bf16.msrb.mxu1 %v14193_v3  ;;  %v12053_v58 = vor.u32 %v17499_v27, %v12050_v56  ;;  %v21329_v27 = vpop.f32.mrf.mxu1 }
 0x57a   : > { %v18167_v13 = vld [vmem:[%s19447_s22 + $0x16b4] sm:$0xf0] }
 0x57b   : > { %v13904_v52 = vld [vmem:[%s19447_s22 + $0x1058] sm:$0xf]  ;;  %v14705_v42 = vor.u32 %v18167_v13, %v14704_v15  ;;  %7067 = vmatpush.bf16.msrb.mxu2 %v14449_v59  ;;  %v17491_v59 = vld [vmem:[%s19447_s22 + $0x19c] sm:$0xf] }
 0x57c   : > { %v17967_v1 = vld [vmem:[%s19447_s22 + $0x1074] sm:$0xf0] }
 0x57d   : > { %v14160_v4 = vld [vmem:[%s19447_s22 + $0x1258] sm:$0xf]  ;;  %v13905_v43 = vor.u32 %v17967_v1, %v13904_v52  ;;  %7080 = vmatpush.bf16.msrb.mxu3 %v14705_v42  ;;  %v12018_v52 = vld [vmem:[%s19447_s22 + $0x1b8] sm:$0xf0] }
 0x57e   : > { %v18031_v2 = vld [vmem:[%s19447_s22 + $0x1274] sm:$0xf0]  ;;  %v17555_v1 = vld [vmem:[%s19447_s22 + $0x39c] sm:$0xf] }
 0x57f   : > { %v14416_v7 = vld [vmem:[%s19447_s22 + $0x1458] sm:$0xf]  ;;  %v14161_v26 = vor.u32 %v18031_v2, %v14160_v4  ;;  %7042 = vmatpush.bf16.msrb.mxu0 %v13905_v43  ;;  %v12274_v4 = vld [vmem:[%s19447_s22 + $0x3b8] sm:$0xf0]  ;;  %v12021_v2 = vor.u32 %v17491_v59, %v12018_v52 }
 0x580   : > { %v18095_v14 = vld [vmem:[%s19447_s22 + $0x1474] sm:$0xf0] }
 0x581   : > { %v14672_v8 = vld [vmem:[%s19447_s22 + $0x1658] sm:$0xf]  ;;  %v14417_v30 = vor.u32 %v18095_v14, %v14416_v7  ;;  %7055 = vmatpush.bf16.msrb.mxu1 %v14161_v26  ;;  %v17547_v26 = vld [vmem:[%s19447_s22 + $0x35c] sm:$0xf] }
 0x582   : > { %v18159_v9 = vld [vmem:[%s19447_s22 + $0x1674] sm:$0xf0] }
 0x583   : > { %v13872_v45 = vld [vmem:[%s19447_s22 + $0x1018] sm:$0xf]  ;;  %v14673_v11 = vor.u32 %v18159_v9, %v14672_v8  ;;  %7068 = vmatpush.bf16.msrb.mxu2 %v14417_v30  ;;  %v12277_v9 = vor.u32 %v17555_v1, %v12274_v4  ;;  %v12242_v30 = vld [vmem:[%s19447_s22 + $0x378] sm:$0xf0] }
 0x584   : > { %v17959_v21 = vld [vmem:[%s19447_s22 + $0x1034] sm:$0xf0] }
 0x585   : > { %v14128_v32 = vld [vmem:[%s19447_s22 + $0x1218] sm:$0xf]  ;;  %v13873_v44 = vor.u32 %v17959_v21, %v13872_v45  ;;  %7081 = vmatpush.bf16.msrb.mxu3 %v14673_v11  ;;  %v17483_v45 = vld [vmem:[%s19447_s22 + $0x15c] sm:$0xf] }
 0x586   : > { %v18023_v63 = vld [vmem:[%s19447_s22 + $0x1234] sm:$0xf0]  ;;  %v11986_v21 = vld [vmem:[%s19447_s22 + $0x178] sm:$0xf0] }
 0x587   : > { %v14384_v5 = vld [vmem:[%s19447_s22 + $0x1418] sm:$0xf]  ;;  %v14129_v46 = vor.u32 %v18023_v63, %v14128_v32  ;;  %7043 = vmatpush.bf16.msrb.mxu0 %v13873_v44  ;;  %v12210_v44 = vld [vmem:[%s19447_s22 + $0x338] sm:$0xf0] }
 0x588   : > { %v18087_v47 = vld [vmem:[%s19447_s22 + $0x1434] sm:$0xf0] }
 0x589   : > { %v14640_v36 = vld [vmem:[%s19447_s22 + $0x1618] sm:$0xf]  ;;  %v14385_v51 = vor.u32 %v18087_v47, %v14384_v5  ;;  %7056 = vmatpush.bf16.msrb.mxu1 %v14129_v46  ;;  %v11989_v5 = vor.u32 %v17483_v45, %v11986_v21  ;;  %v6852_v45 = vpop.f32.mrf.mxu1 }
 0x58a   : > { %v18151_v37 = vld [vmem:[%s19447_s22 + $0x1634] sm:$0xf0]  ;;  %7044 = vmatmul.bf16.vlgmr.msrb.gmra.mxu0 %v19706_v20  ;;  %v17619_v45 = vld [vmem:[%s19447_s22 + $0x59c] sm:$0xf] }
 0x58b   : > { %v15120_v34 = vld [vmem:[%s19447_s22 + $0x19d8] sm:$0xf]  ;;  %v14641_v29 = vor.u32 %v18151_v37, %v14640_v36  ;;  %7069 = vmatpush.bf16.msrb.mxu2 %v14385_v51  ;;  %v12245_v36 = vor.u32 %v17547_v26, %v12242_v30 }
 0x58c   : > { %v18271_v40 = vld [vmem:[%s19447_s22 + $0x19f4] sm:$0xf0]  ;;  %7057 = vmatmul.bf16.vlgmr.msrb.gmra.mxu1 %v19713_v25 }
 0x58d   : > { %v15376_v55 = vld [vmem:[%s19447_s22 + $0x1bd8] sm:$0xf]  ;;  %v15121_v50 = vor.u32 %v18271_v40, %v15120_v34  ;;  %7082 = vmatpush.bf16.msrb.mxu3 %v14641_v29  ;;  %v11954_v34 = vld [vmem:[%s19447_s22 + $0x138] sm:$0xf0]  ;;  %v21325_v40 = vpop.f32.mrf.mxu0 }
 0x58e   : > { %v18335_v19 = vld [vmem:[%s19447_s22 + $0x1bf4] sm:$0xf0]  ;;  %7070 = vmatmul.bf16.vlgmr.msrb.gmra.mxu2 %v19711_v24  ;;  %v11957_v46 = vor.u32 %v17475_v6, %v11954_v34 }
 0x58f   : > { %v15377_v53 = vor.u32 %v18335_v19, %v15376_v55  ;;  %v15088_v15 = vld [vmem:[%s19447_s22 + $0x1998] sm:$0xf]  ;;  %7088 = vmatpush.bf16.msra.mxu0 %v15121_v50  ;;  %7114 = vmatpush.bf16.msra.mxu2 %v12053_v58  ;;  %v17539_v55 = vld [vmem:[%s19447_s22 + $0x31c] sm:$0xf] }
 0x590   : > { %v18263_v13 = vld [vmem:[%s19447_s22 + $0x19b4] sm:$0xf0]  ;;  %7083 = vmatmul.bf16.vlgmr.msrb.gmra.mxu3 %v19717_v28  ;;  %v12213_v29 = vor.u32 %v17539_v55, %v12210_v44  ;;  %v11922_v58 = vld [vmem:[%s19447_s22 + $0xf8] sm:$0xf0] }
 0x591   : > { %v15344_v57 = vld [vmem:[%s19447_s22 + $0x1b98] sm:$0xf]  ;;  %v15089_v60 = vor.u32 %v18263_v13, %v15088_v15  ;;  %7101 = vmatpush.bf16.msra.mxu1 %v15377_v53  ;;  %7127 = vmatpush.bf16.msra.mxu3 %v12309_v62  ;;  %v17467_v53 = vld [vmem:[%s19447_s22 + $0xdc] sm:$0xf]  ;;  %v6786_v62 = vadd.f32 %v21251_v33, %v21197_v61 }
 0x592   : > { %v18327_v3 = vld [vmem:[%s19447_s22 + $0x1bb4] sm:$0xf0]  ;;  %v17531_v15 = vld [vmem:[%s19447_s22 + $0x2dc] sm:$0xf]  ;;  %v11925_v59 = vor.u32 %v17467_v53, %v11922_v58 }
 0x593   : > { %v15345_v42 = vor.u32 %v18327_v3, %v15344_v57  ;;  %v15056_v7 = vld [vmem:[%s19447_s22 + $0x1958] sm:$0xf]  ;;  %7089 = vmatpush.bf16.msra.mxu0 %v15089_v60  ;;  %7115 = vmatpush.bf16.msra.mxu2 %v12021_v2  ;;  %v12178_v13 = vld [vmem:[%s19447_s22 + $0x2f8] sm:$0xf0]  ;;  %v6799_v21 = vadd.f32 %v21256_v54, %v6786_v62 }
 0x594   : > { %v18255_v14 = vld [vmem:[%s19447_s22 + $0x1974] sm:$0xf0]  ;;  %v12181_v60 = vor.u32 %v17531_v15, %v12178_v13  ;;  %v17523_v61 = vld [vmem:[%s19447_s22 + $0x29c] sm:$0xf] }
 0x595   : > { %v15312_v8 = vld [vmem:[%s19447_s22 + $0x1b58] sm:$0xf]  ;;  %v15057_v32 = vor.u32 %v18255_v14, %v15056_v7  ;;  %7102 = vmatpush.bf16.msra.mxu1 %v15345_v42  ;;  %7128 = vmatpush.bf16.msra.mxu3 %v12277_v9  ;;  %v21344_v42 = vpop.f32.mrf.mxu2  ;;  %v17459_v7 = vld [vmem:[%s19447_s22 + $0x9c] sm:$0xf]  ;;  %v6839_v9 = vpop.f32.mrf.mxu0  ;;  %v6812_v44 = vadd.f32 %v21266_v49, %v6799_v21 }
 0x596   : > { %v18319_v43 = vld [vmem:[%s19447_s22 + $0x1b74] sm:$0xf0]  ;;  %v11890_v14 = vld [vmem:[%s19447_s22 + $0xb8] sm:$0xf0] }
 0x597   : > { %v15313_v63 = vor.u32 %v18319_v43, %v15312_v8  ;;  %v15024_v23 = vld [vmem:[%s19447_s22 + $0x1918] sm:$0xf]  ;;  %7090 = vmatpush.bf16.msra.mxu0 %v15057_v32  ;;  %7116 = vmatpush.bf16.msra.mxu2 %v11989_v5  ;;  %v21349_v8 = vpop.f32.mrf.mxu3  ;;  %v12146_v33 = vld [vmem:[%s19447_s22 + $0x2b8] sm:$0xf0]  ;;  %v11893_v30 = vor.u32 %v17459_v7, %v11890_v14 }
 0x598   : > { %v18247_v11 = vld [vmem:[%s19447_s22 + $0x1934] sm:$0xf0]  ;;  %v12114_v54 = vld [vmem:[%s19447_s22 + $0x278] sm:$0xf0] }
 0x599   : > { %v15280_v47 = vld [vmem:[%s19447_s22 + $0x1b18] sm:$0xf]  ;;  %v15025_v19 = vor.u32 %v18247_v11, %v15024_v23  ;;  %7103 = vmatpush.bf16.msra.mxu1 %v15313_v63  ;;  %7129 = vmatpush.bf16.msra.mxu3 %v12245_v36  ;;  %v12149_v23 = vor.u32 %v17523_v61, %v12146_v33  ;;  %v11858_v36 = vld [vmem:[%s19447_s22 + $0x78] sm:$0xf0] }
 0x59a   : > { %v18311_v37 = vld [vmem:[%s19447_s22 + $0x1b34] sm:$0xf0]  ;;  %v12082_v53 = vld [vmem:[%s19447_s22 + $0x238] sm:$0xf0] }
 0x59b   : > { %v15281_v56 = vor.u32 %v18311_v37, %v15280_v47  ;;  %v14992_v51 = vld [vmem:[%s19447_s22 + $0x18d8] sm:$0xf]  ;;  %7091 = vmatpush.bf16.msra.mxu0 %v15025_v19  ;;  %7117 = vmatpush.bf16.msra.mxu2 %v11957_v46  ;;  %v17451_v47 = vld [vmem:[%s19447_s22 + $0x5c] sm:$0xf] }
 0x59c   : > { %v18239_v22 = vld [vmem:[%s19447_s22 + $0x18f4] sm:$0xf0]  ;;  %v17515_v37 = vld [vmem:[%s19447_s22 + $0x25c] sm:$0xf] }
 0x59d   : > { %v15248_v48 = vld [vmem:[%s19447_s22 + $0x1ad8] sm:$0xf]  ;;  %v14993_v57 = vor.u32 %v18239_v22, %v14992_v51  ;;  %7104 = vmatpush.bf16.msra.mxu1 %v15281_v56  ;;  %7130 = vmatpush.bf16.msra.mxu3 %v12213_v29  ;;  %v11861_v56 = vor.u32 %v17451_v47, %v11858_v36  ;;  %v17443_v22 = vld [vmem:[%s19447_s22 + $0x1c] sm:$0xf]  ;;  %v6865_v58 = vpop.f32.mrf.mxu2 }
 0x59e   : > { %v18303_v50 = vld [vmem:[%s19447_s22 + $0x1af4] sm:$0xf0]  ;;  %v11826_v29 = vld [vmem:[%s19447_s22 + $0x38] sm:$0xf0] }
 0x59f   : > { %v15249_v3 = vor.u32 %v18303_v50, %v15248_v48  ;;  %v14960_v52 = vld [vmem:[%s19447_s22 + $0x1898] sm:$0xf]  ;;  %7092 = vmatpush.bf16.msra.mxu0 %v14993_v57  ;;  %7118 = vmatpush.bf16.msra.mxu2 %v11925_v59  ;;  %v12117_v48 = vor.u32 %v17515_v37, %v12114_v54  ;;  %v17507_v50 = vld [vmem:[%s19447_s22 + $0x21c] sm:$0xf]  ;;  %v6878_v57 = vpop.f32.mrf.mxu3 }
 0x5a0   : > { %v18231_v1 = vld [vmem:[%s19447_s22 + $0x18b4] sm:$0xf0]  ;;  %v17627_v49 = vld [vmem:[%s19447_s22 + $0x5dc] sm:$0xf]  ;;  %v12085_v14 = vor.u32 %v17507_v50, %v12082_v53 }
 0x5a1   : > { %v15216_v4 = vld [vmem:[%s19447_s22 + $0x1a98] sm:$0xf]  ;;  %v14961_v43 = vor.u32 %v18231_v1, %v14960_v52  ;;  %7105 = vmatpush.bf16.msra.mxu1 %v15249_v3  ;;  %7131 = vmatpush.bf16.msra.mxu3 %v12181_v60  ;;  %v12562_v15 = vld [vmem:[%s19447_s22 + $0x5f8] sm:$0xf0]  ;;  %v6825_v1 = vadd.f32 %v21271_v31, %v6812_v44  ;;  %v11829_v60 = vor.u32 %v17443_v22, %v11826_v29 }
 0x5a2   : > { %v18295_v2 = vld [vmem:[%s19447_s22 + $0x1ab4] sm:$0xf0]  ;;  %v17691_v13 = vld [vmem:[%s19447_s22 + $0x7dc] sm:$0xf]  ;;  %v12565_v61 = vor.u32 %v17627_v49, %v12562_v15 }
 0x5a3   : > { %v15217_v26 = vor.u32 %v18295_v2, %v15216_v4  ;;  %v14928_v32 = vld [vmem:[%s19447_s22 + $0x1858] sm:$0xf]  ;;  %7093 = vmatpush.bf16.msra.mxu0 %v14961_v43  ;;  %7119 = vmatpush.bf16.msra.mxu2 %v11893_v30  ;;  %v12818_v3 = vld [vmem:[%s19447_s22 + $0x7f8] sm:$0xf0]  ;;  %v6838_v33 = vadd.f32 %v21325_v40, %v6825_v1 }
 0x5a4   : > { %v18223_v63 = vld [vmem:[%s19447_s22 + $0x1874] sm:$0xf0]  ;;  %v17755_v59 = vld [vmem:[%s19447_s22 + $0x9dc] sm:$0xf]  ;;  %v12821_v9 = vor.u32 %v17691_v13, %v12818_v3  ;;  %v6889_v13 = vpop.f32.mrf.mxu0  ;;  %v6902_v3 = vpop.f32.mrf.mxu1 }
 0x5a5   : > { %v15184_v5 = vld [vmem:[%s19447_s22 + $0x1a58] sm:$0xf]  ;;  %v14929_v6 = vor.u32 %v18223_v63, %v14928_v32  ;;  %7106 = vmatpush.bf16.msra.mxu1 %v15217_v26  ;;  %7132 = vmatpush.bf16.msra.mxu3 %v12149_v23  ;;  %v13074_v52 = vld [vmem:[%s19447_s22 + $0x9f8] sm:$0xf0] }
 0x5a6   : > { %v18287_v11 = vld [vmem:[%s19447_s22 + $0x1a74] sm:$0xf0]  ;;  %v17819_v2 = vld [vmem:[%s19447_s22 + $0xbdc] sm:$0xf]  ;;  %v13077_v43 = vor.u32 %v17755_v59, %v13074_v52 }
 0x5a7   : > { %v14896_v34 = vld [vmem:[%s19447_s22 + $0x1818] sm:$0xf]  ;;  %v15185_v19 = vor.u32 %v18287_v11, %v15184_v5  ;;  %7094 = vmatpush.bf16.msra.mxu0 %v14929_v6  ;;  %7120 = vmatpush.bf16.msra.mxu2 %v11861_v56  ;;  %v13330_v7 = vld [vmem:[%s19447_s22 + $0xbf8] sm:$0xf0]  ;;  %v6851_v11 = vadd.f32 %v21329_v27, %v6838_v33 }
 0x5a8   : > { %v18215_v55 = vld [vmem:[%s19447_s22 + $0x1834] sm:$0xf0]  ;;  %v12530_v31 = vld [vmem:[%s19447_s22 + $0x5b8] sm:$0xf0]  ;;  %v13333_v26 = vor.u32 %v17819_v2, %v13330_v7 }
 0x5a9   : > { %v15152_v46 = vld [vmem:[%s19447_s22 + $0x1a18] sm:$0xf]  ;;  %v14897_v62 = vor.u32 %v18215_v55, %v14896_v34  ;;  %7107 = vmatpush.bf16.msra.mxu1 %v15185_v19  ;;  %7133 = vmatpush.bf16.msra.mxu3 %v12117_v48  ;;  %v17683_v21 = vld [vmem:[%s19447_s22 + $0x79c] sm:$0xf]  ;;  %v12533_v40 = vor.u32 %v17619_v45, %v12530_v31  ;;  %v6864_v27 = vadd.f32 %v21344_v42, %v6851_v11 }
 0x5aa   : > { %v18279_v51 = vld [vmem:[%s19447_s22 + $0x1a34] sm:$0xf0]  ;;  %v12786_v30 = vld [vmem:[%s19447_s22 + $0x7b8] sm:$0xf0] }
 0x5ab   : > { %v15153_v4 = vor.u32 %v18279_v51, %v15152_v46  ;;  %7095 = vmatpush.bf16.msra.mxu0 %v14897_v62  ;;  %v17747_v32 = vld [vmem:[%s19447_s22 + $0x99c] sm:$0xf]  ;;  %7121 = vmatpush.bf16.msra.mxu2 %v11829_v60  ;;  %v12789_v47 = vor.u32 %v17683_v21, %v12786_v30  ;;  %v6877_v15 = vadd.f32 %v21349_v8, %v6864_v27 }
 0x5ac   : > { %v13042_v63 = vld [vmem:[%s19447_s22 + $0x9b8] sm:$0xf0] }
 0x5ad   : > { %7108 = vmatpush.bf16.msra.mxu1 %v15153_v4  ;;  %v17811_v5 = vld [vmem:[%s19447_s22 + $0xb9c] sm:$0xf]  ;;  %7134 = vmatpush.bf16.msra.mxu3 %v12085_v14  ;;  %v13045_v36 = vor.u32 %v17747_v32, %v13042_v63  ;;  %v6890_v59 = vadd.f32 %v6889_v13, %v6877_v15 }
 0x5ae   : > { %v13298_v23 = vld [vmem:[%s19447_s22 + $0xbb8] sm:$0xf0]  ;;  %7096 = vmatmul.bf16.vlgmr.msra.gmra.mxu0 %v19784_v12  ;;  %7122 = vmatmul.bf16.vlgmr.msra.gmra.mxu2 %v19563_v10 }
 0x5af   : > { %7140 = vmatpush.bf16.msrb.mxu0 %v12565_v61  ;;  %7166 = vmatpush.bf16.msrb.mxu2 %v13077_v43  ;;  %v17611_v37 = vld [vmem:[%s19447_s22 + $0x55c] sm:$0xf]  ;;  %v13301_v34 = vor.u32 %v17811_v5, %v13298_v23  ;;  %v6903_v45 = vadd.f32 %v6902_v3, %v6890_v59  ;;  %v6915_v5 = vpop.f32.mrf.mxu2 }
 0x5b0   : > { %v12498_v54 = vld [vmem:[%s19447_s22 + $0x578] sm:$0xf0]  ;;  %7109 = vmatmul.bf16.vlgmr.msra.gmra.mxu1 %v19789_v16  ;;  %7135 = vmatmul.bf16.vlgmr.msra.gmra.mxu3 %v19572_v18 }
 0x5b1   : > { %7153 = vmatpush.bf16.msrb.mxu1 %v12821_v9  ;;  %v17675_v6 = vld [vmem:[%s19447_s22 + $0x75c] sm:$0xf]  ;;  %7179 = vmatpush.bf16.msrb.mxu3 %v13333_v26  ;;  %v12501_v51 = vor.u32 %v17611_v37, %v12498_v54 }
 0x5b2   : > { %v12754_v55 = vld [vmem:[%s19447_s22 + $0x778] sm:$0xf0] }
 0x5b3   : > { %v17739_v44 = vld [vmem:[%s19447_s22 + $0x95c] sm:$0xf]  ;;  %7141 = vmatpush.bf16.msrb.mxu0 %v12533_v40  ;;  %7167 = vmatpush.bf16.msrb.mxu2 %v13045_v36  ;;  %v12757_v22 = vor.u32 %v17675_v6, %v12754_v55  ;;  %v6928_v36 = vpop.f32.mrf.mxu3  ;;  %v6891_v6 = vpop.f32.mrf.mxu0 }
 0x5b4   : > { %v13010_v19 = vld [vmem:[%s19447_s22 + $0x978] sm:$0xf0] }
 0x5b5   : > { %v17803_v56 = vld [vmem:[%s19447_s22 + $0xb5c] sm:$0xf]  ;;  %7154 = vmatpush.bf16.msrb.mxu1 %v12789_v47  ;;  %v13013_v48 = vor.u32 %v17739_v44, %v13010_v19  ;;  %7180 = vmatpush.bf16.msrb.mxu3 %v13301_v34  ;;  %v6916_v47 = vadd.f32 %v6915_v5, %v6903_v45  ;;  %v433_v34 = vld [vmem:[#allocation2 + $0x20] sm:$0xff]  ;;  %v6904_v44 = vpop.f32.mrf.mxu1 }
 0x5b6   : > { %v13266_v46 = vld [vmem:[%s19447_s22 + $0xb78] sm:$0xf0] }
 0x5b7   : > { %v17603_v42 = vld [vmem:[%s19447_s22 + $0x51c] sm:$0xf]  ;;  %v13269_v53 = vor.u32 %v17803_v56, %v13266_v46  ;;  %7142 = vmatpush.bf16.msrb.mxu0 %v12501_v51  ;;  %7168 = vmatpush.bf16.msrb.mxu2 %v13013_v48  ;;  %v6929_v19 = vadd.f32 %v6928_v36, %v6916_v47 }
 0x5b8   : > { %v12466_v29 = vld [vmem:[%s19447_s22 + $0x538] sm:$0xf0] }
 0x5b9   : > { %v17667_v50 = vld [vmem:[%s19447_s22 + $0x71c] sm:$0xf]  ;;  %v12469_v62 = vor.u32 %v17603_v42, %v12466_v29  ;;  %7155 = vmatpush.bf16.msrb.mxu1 %v12757_v22  ;;  %7181 = vmatpush.bf16.msrb.mxu3 %v13269_v53  ;;  %v7301_v53 = vadd.f32 %v6929_v19, %v433_v34 }
 0x5ba   : > { %v12722_v58 = vld [vmem:[%s19447_s22 + $0x738] sm:$0xf0] }
 0x5bb   : > { %v17731_v49 = vld [vmem:[%s19447_s22 + $0x91c] sm:$0xf]  ;;  %v12725_v52 = vor.u32 %v17667_v50, %v12722_v58  ;;  %7143 = vmatpush.bf16.msrb.mxu0 %v12469_v62  ;;  %7309 = vst [vmem:[#allocation2 + $0x20] sm:$0xff] %v7301_v53 }
 0x5bc   : > { %v12978_v10 = vld [vmem:[%s19447_s22 + $0x938] sm:$0xf0] }
 0x5bd   : > { %v17795_v18 = vld [vmem:[%s19447_s22 + $0xb1c] sm:$0xf]  ;;  %v12981_v1 = vor.u32 %v17731_v49, %v12978_v10  ;;  %7156 = vmatpush.bf16.msrb.mxu1 %v12725_v52 }
 0x5be   : > { %v13234_v57 = vld [vmem:[%s19447_s22 + $0xb38] sm:$0xf0] }
 0x5bf   : > { %v17595_v4 = vld [vmem:[%s19447_s22 + $0x4dc] sm:$0xf]  ;;  %v13237_v2 = vor.u32 %v17795_v18, %v13234_v57  ;;  %7169 = vmatpush.bf16.msrb.mxu2 %v12981_v1 }
 0x5c0   : > { %v12434_v60 = vld [vmem:[%s19447_s22 + $0x4f8] sm:$0xf0] }
 0x5c1   : > { %v17659_v8 = vld [vmem:[%s19447_s22 + $0x6dc] sm:$0xf]  ;;  %v12437_v43 = vor.u32 %v17595_v4, %v12434_v60  ;;  %7182 = vmatpush.bf16.msrb.mxu3 %v13237_v2 }
 0x5c2   : > { %v12690_v7 = vld [vmem:[%s19447_s22 + $0x6f8] sm:$0xf0] }
 0x5c3   : > { %v17723_v14 = vld [vmem:[%s19447_s22 + $0x8dc] sm:$0xf]  ;;  %v12693_v31 = vor.u32 %v17659_v8, %v12690_v7  ;;  %7144 = vmatpush.bf16.msrb.mxu0 %v12437_v43  ;;  %v6917_v8 = vpop.f32.mrf.mxu2 }
 0x5c4   : > { %v12946_v61 = vld [vmem:[%s19447_s22 + $0x8f8] sm:$0xf0] }
 0x5c5   : > { %v17787_v33 = vld [vmem:[%s19447_s22 + $0xadc] sm:$0xf]  ;;  %v12949_v21 = vor.u32 %v17723_v14, %v12946_v61  ;;  %7157 = vmatpush.bf16.msrb.mxu1 %v12693_v31  ;;  %v6930_v61 = vpop.f32.mrf.mxu3 }
 0x5c6   : > { %v13202_v9 = vld [vmem:[%s19447_s22 + $0xaf8] sm:$0xf0] }
 0x5c7   : > { %v17587_v26 = vld [vmem:[%s19447_s22 + $0x49c] sm:$0xf]  ;;  %v13205_v63 = vor.u32 %v17787_v33, %v13202_v9  ;;  %7170 = vmatpush.bf16.msrb.mxu2 %v12949_v21 }
 0x5c8   : > { %v12402_v30 = vld [vmem:[%s19447_s22 + $0x4b8] sm:$0xf0] }
 0x5c9   : > { %v17651_v32 = vld [vmem:[%s19447_s22 + $0x69c] sm:$0xf]  ;;  %v12405_v55 = vor.u32 %v17587_v26, %v12402_v30  ;;  %7183 = vmatpush.bf16.msrb.mxu3 %v13205_v63 }
 0x5ca   : > { %v12658_v23 = vld [vmem:[%s19447_s22 + $0x6b8] sm:$0xf0] }
 0x5cb   : > { %v17715_v40 = vld [vmem:[%s19447_s22 + $0x89c] sm:$0xf]  ;;  %v12661_v27 = vor.u32 %v17651_v32, %v12658_v23  ;;  %7145 = vmatpush.bf16.msrb.mxu0 %v12405_v55 }
 0x5cc   : > { %v12914_v11 = vld [vmem:[%s19447_s22 + $0x8b8] sm:$0xf0] }
 0x5cd   : > { %v17779_v37 = vld [vmem:[%s19447_s22 + $0xa9c] sm:$0xf]  ;;  %v12917_v56 = vor.u32 %v17715_v40, %v12914_v11  ;;  %7158 = vmatpush.bf16.msrb.mxu1 %v12661_v27 }
 0x5ce   : > { %v13170_v54 = vld [vmem:[%s19447_s22 + $0xab8] sm:$0xf0] }
 0x5cf   : > { %v17579_v46 = vld [vmem:[%s19447_s22 + $0x45c] sm:$0xf]  ;;  %v13173_v48 = vor.u32 %v17779_v37, %v13170_v54  ;;  %7171 = vmatpush.bf16.msrb.mxu2 %v12917_v56 }
 0x5d0   : > { %v12370_v51 = vld [vmem:[%s19447_s22 + $0x478] sm:$0xf0] }
 0x5d1   : > { %v17643_v22 = vld [vmem:[%s19447_s22 + $0x65c] sm:$0xf]  ;;  %v12373_v10 = vor.u32 %v17579_v46, %v12370_v51  ;;  %7184 = vmatpush.bf16.msrb.mxu3 %v13173_v48 }
 0x5d2   : > { %v12626_v42 = vld [vmem:[%s19447_s22 + $0x678] sm:$0xf0] }
 0x5d3   : > { %v17707_v29 = vld [vmem:[%s19447_s22 + $0x85c] sm:$0xf]  ;;  %v12629_v57 = vor.u32 %v17643_v22, %v12626_v42  ;;  %7146 = vmatpush.bf16.msrb.mxu0 %v12373_v10 }
 0x5d4   : > { %v12882_v50 = vld [vmem:[%s19447_s22 + $0x878] sm:$0xf0] }
 0x5d5   : > { %v17771_v58 = vld [vmem:[%s19447_s22 + $0xa5c] sm:$0xf]  ;;  %v12885_v62 = vor.u32 %v17707_v29, %v12882_v50  ;;  %7159 = vmatpush.bf16.msrb.mxu1 %v12629_v57 }
 0x5d6   : > { %v13138_v49 = vld [vmem:[%s19447_s22 + $0xa78] sm:$0xf0] }
 0x5d7   : > { %v17571_v15 = vld [vmem:[%s19447_s22 + $0x41c] sm:$0xf]  ;;  %v13141_v52 = vor.u32 %v17771_v58, %v13138_v49  ;;  %7172 = vmatpush.bf16.msrb.mxu2 %v12885_v62 }
 0x5d8   : > { %v12338_v13 = vld [vmem:[%s19447_s22 + $0x438] sm:$0xf0] }
 0x5d9   : > { %v17635_v18 = vld [vmem:[%s19447_s22 + $0x61c] sm:$0xf]  ;;  %v12341_v33 = vor.u32 %v17571_v15, %v12338_v13  ;;  %7185 = vmatpush.bf16.msrb.mxu3 %v13141_v52 }
 0x5da   : > { %v12594_v3 = vld [vmem:[%s19447_s22 + $0x638] sm:$0xf0] }
 0x5db   : > { %v17699_v59 = vld [vmem:[%s19447_s22 + $0x81c] sm:$0xf]  ;;  %v12597_v31 = vor.u32 %v17635_v18, %v12594_v3  ;;  %7147 = vmatpush.bf16.msrb.mxu0 %v12341_v33 }
 0x5dc   : > { %v12850_v1 = vld [vmem:[%s19447_s22 + $0x838] sm:$0xf0] }
 0x5dd   : > { %v17763_v4 = vld [vmem:[%s19447_s22 + $0xa1c] sm:$0xf]  ;;  %v12853_v21 = vor.u32 %v17699_v59, %v12850_v1  ;;  %7160 = vmatpush.bf16.msrb.mxu1 %v12597_v31  ;;  %v6941_v59 = vpop.f32.mrf.mxu0 }
 0x5de   : > { %v13106_v60 = vld [vmem:[%s19447_s22 + $0xa38] sm:$0xf0]  ;;  %7148 = vmatmul.bf16.vlgmr.msrb.gmra.mxu0 %v19554_v0 }
 0x5df   : > { %v17883_v2 = vld [vmem:[%s19447_s22 + $0xddc] sm:$0xf]  ;;  %v13109_v32 = vor.u32 %v17763_v4, %v13106_v60  ;;  %7173 = vmatpush.bf16.msrb.mxu2 %v12853_v21 }
 0x5e0   : > { %v13586_v7 = vld [vmem:[%s19447_s22 + $0xdf8] sm:$0xf0]  ;;  %7161 = vmatmul.bf16.vlgmr.msrb.gmra.mxu1 %v19570_v17 }
 0x5e1   : > { %v17947_v14 = vld [vmem:[%s19447_s22 + $0xfdc] sm:$0xf]  ;;  %v13589_v63 = vor.u32 %v17883_v2, %v13586_v7  ;;  %7186 = vmatpush.bf16.msrb.mxu3 %v13109_v32  ;;  %v6954_v2 = vpop.f32.mrf.mxu1 }
 0x5e2   : > { %v13842_v9 = vld [vmem:[%s19447_s22 + $0xff8] sm:$0xf0]  ;;  %7174 = vmatmul.bf16.vlgmr.msrb.gmra.mxu2 %v19633_v38 }
 0x5e3   : > { %v18011_v43 = vld [vmem:[%s19447_s22 + $0x11dc] sm:$0xf]  ;;  %v13845_v5 = vor.u32 %v17947_v14, %v13842_v9  ;;  %7192 = vmatpush.bf16.msra.mxu0 %v13589_v63  ;;  %v6955_v9 = vadd.f32 %v6954_v2, %v6941_v59 }
 0x5e4   : > { %v14098_v45 = vld [vmem:[%s19447_s22 + $0x11f8] sm:$0xf0]  ;;  %7187 = vmatmul.bf16.vlgmr.msrb.gmra.mxu3 %v19637_v41 }
 0x5e5   : > { %v18075_v26 = vld [vmem:[%s19447_s22 + $0x13dc] sm:$0xf]  ;;  %v14101_v23 = vor.u32 %v18011_v43, %v14098_v45  ;;  %7205 = vmatpush.bf16.msra.mxu1 %v13845_v5  ;;  %v6967_v5 = vpop.f32.mrf.mxu2 }
 0x5e6   : > { %v14354_v30 = vld [vmem:[%s19447_s22 + $0x13f8] sm:$0xf0] }
 0x5e7   : > { %v17875_v40 = vld [vmem:[%s19447_s22 + $0xd9c] sm:$0xf]  ;;  %v14357_v36 = vor.u32 %v18075_v26, %v14354_v30  ;;  %7218 = vmatpush.bf16.msra.mxu2 %v14101_v23 }
 0x5e8   : > { %v13554_v11 = vld [vmem:[%s19447_s22 + $0xdb8] sm:$0xf0] }
 0x5e9   : > { %v17939_v47 = vld [vmem:[%s19447_s22 + $0xf9c] sm:$0xf]  ;;  %v13557_v44 = vor.u32 %v17875_v40, %v13554_v11  ;;  %7231 = vmatpush.bf16.msra.mxu3 %v14357_v36  ;;  %v6968_v36 = vadd.f32 %v6967_v5, %v6955_v9 }
 0x5ea   : > { %v13810_v37 = vld [vmem:[%s19447_s22 + $0xfb8] sm:$0xf0] }
 0x5eb   : > { %v18003_v54 = vld [vmem:[%s19447_s22 + $0x119c] sm:$0xf]  ;;  %v13813_v19 = vor.u32 %v17939_v47, %v13810_v37  ;;  %7193 = vmatpush.bf16.msra.mxu0 %v13557_v44  ;;  %v6980_v37 = vpop.f32.mrf.mxu3  ;;  %v6943_v44 = vpop.f32.mrf.mxu0 }
 0x5ec   : > { %v14066_v6 = vld [vmem:[%s19447_s22 + $0x11b8] sm:$0xf0] }
 0x5ed   : > { %v18067_v34 = vld [vmem:[%s19447_s22 + $0x139c] sm:$0xf]  ;;  %v14069_v27 = vor.u32 %v18003_v54, %v14066_v6  ;;  %7206 = vmatpush.bf16.msra.mxu1 %v13813_v19 }
 0x5ee   : > { %v14322_v55 = vld [vmem:[%s19447_s22 + $0x13b8] sm:$0xf0] }
 0x5ef   : > { %v17867_v56 = vld [vmem:[%s19447_s22 + $0xd5c] sm:$0xf]  ;;  %v14325_v22 = vor.u32 %v18067_v34, %v14322_v55  ;;  %7219 = vmatpush.bf16.msra.mxu2 %v14069_v27  ;;  %v21496_v55 = vadd.f32 %v6980_v37, %v6968_v36 }
 0x5f0   : > { %v13522_v46 = vld [vmem:[%s19447_s22 + $0xd78] sm:$0xf0] }
 0x5f1   : > { %v17931_v51 = vld [vmem:[%s19447_s22 + $0xf5c] sm:$0xf]  ;;  %v13525_v58 = vor.u32 %v17867_v56, %v13522_v46  ;;  %7232 = vmatpush.bf16.msra.mxu3 %v14325_v22  ;;  %v6956_v22 = vpop.f32.mrf.mxu1 }
 0x5f2   : > { %v13778_v48 = vld [vmem:[%s19447_s22 + $0xf78] sm:$0xf0] }
 0x5f3   : > { %v17995_v42 = vld [vmem:[%s19447_s22 + $0x115c] sm:$0xf]  ;;  %v13781_v38 = vor.u32 %v17931_v51, %v13778_v48  ;;  %7194 = vmatpush.bf16.msra.mxu0 %v13525_v58 }
 0x5f4   : > { %v14034_v29 = vld [vmem:[%s19447_s22 + $0x1178] sm:$0xf0] }
 0x5f5   : > { %v18059_v50 = vld [vmem:[%s19447_s22 + $0x135c] sm:$0xf]  ;;  %v14037_v49 = vor.u32 %v17995_v42, %v14034_v29  ;;  %7207 = vmatpush.bf16.msra.mxu1 %v13781_v38 }
 0x5f6   : > { %v14290_v53 = vld [vmem:[%s19447_s22 + $0x1378] sm:$0xf0] }
 0x5f7   : > { %v17859_v10 = vld [vmem:[%s19447_s22 + $0xd1c] sm:$0xf]  ;;  %v14293_v41 = vor.u32 %v18059_v50, %v14290_v53  ;;  %7220 = vmatpush.bf16.msra.mxu2 %v14037_v49 }
 0x5f8   : > { %v13490_v15 = vld [vmem:[%s19447_s22 + $0xd38] sm:$0xf0] }
 0x5f9   : > { %v17923_v0 = vld [vmem:[%s19447_s22 + $0xf1c] sm:$0xf]  ;;  %v13493_v17 = vor.u32 %v17859_v10, %v13490_v15  ;;  %7233 = vmatpush.bf16.msra.mxu3 %v14293_v41 }
 0x5fa   : > { %v13746_v13 = vld [vmem:[%s19447_s22 + $0xf38] sm:$0xf0] }
 0x5fb   : > { %v17987_v18 = vld [vmem:[%s19447_s22 + $0x111c] sm:$0xf]  ;;  %v13749_v52 = vor.u32 %v17923_v0, %v13746_v13  ;;  %7195 = vmatpush.bf16.msra.mxu0 %v13493_v17 }
 0x5fc   : > { %v14002_v57 = vld [vmem:[%s19447_s22 + $0x1138] sm:$0xf0] }
 0x5fd   : > { %v18051_v62 = vld [vmem:[%s19447_s22 + $0x131c] sm:$0xf]  ;;  %v14005_v1 = vor.u32 %v17987_v18, %v14002_v57  ;;  %7208 = vmatpush.bf16.msra.mxu1 %v13749_v52  ;;  %v6969_v57 = vpop.f32.mrf.mxu2  ;;  %v6982_v52 = vpop.f32.mrf.mxu3 }
 0x5fe   : > { %v14258_v3 = vld [vmem:[%s19447_s22 + $0x1338] sm:$0xf0] }
 0x5ff   : > { %v17851_v4 = vld [vmem:[%s19447_s22 + $0xcdc] sm:$0xf]  ;;  %v14261_v7 = vor.u32 %v18051_v62, %v14258_v3  ;;  %7221 = vmatpush.bf16.msra.mxu2 %v14005_v1 }
 0x600   : > { %v13458_v60 = vld [vmem:[%s19447_s22 + $0xcf8] sm:$0xf0] }
 0x601   : > { %v17915_v8 = vld [vmem:[%s19447_s22 + $0xedc] sm:$0xf]  ;;  %v13461_v31 = vor.u32 %v17851_v4, %v13458_v60  ;;  %7234 = vmatpush.bf16.msra.mxu3 %v14261_v7 }
 0x602   : > { %v13714_v14 = vld [vmem:[%s19447_s22 + $0xef8] sm:$0xf0] }
 0x603   : > { %v17979_v61 = vld [vmem:[%s19447_s22 + $0x10dc] sm:$0xf]  ;;  %v13717_v21 = vor.u32 %v17915_v8, %v13714_v14  ;;  %7196 = vmatpush.bf16.msra.mxu0 %v13461_v31 }
 0x604   : > { %v13970_v33 = vld [vmem:[%s19447_s22 + $0x10f8] sm:$0xf0] }
 0x605   : > { %v18043_v43 = vld [vmem:[%s19447_s22 + $0x12dc] sm:$0xf]  ;;  %v13973_v26 = vor.u32 %v17979_v61, %v13970_v33  ;;  %7209 = vmatpush.bf16.msra.mxu1 %v13717_v21 }
 0x606   : > { %v14226_v45 = vld [vmem:[%s19447_s22 + $0x12f8] sm:$0xf0] }
 0x607   : > { %v17843_v30 = vld [vmem:[%s19447_s22 + $0xc9c] sm:$0xf]  ;;  %v14229_v23 = vor.u32 %v18043_v43, %v14226_v45  ;;  %7222 = vmatpush.bf16.msra.mxu2 %v13973_v26 }
 0x608   : > { %v13426_v32 = vld [vmem:[%s19447_s22 + $0xcb8] sm:$0xf0] }
 0x609   : > { %v17907_v63 = vld [vmem:[%s19447_s22 + $0xe9c] sm:$0xf]  ;;  %v13429_v34 = vor.u32 %v17843_v30, %v13426_v32  ;;  %7235 = vmatpush.bf16.msra.mxu3 %v14229_v23 }
 0x60a   : > { %v13682_v40 = vld [vmem:[%s19447_s22 + $0xeb8] sm:$0xf0] }
 0x60b   : > { %v17971_v11 = vld [vmem:[%s19447_s22 + $0x109c] sm:$0xf]  ;;  %v13685_v19 = vor.u32 %v17907_v63, %v13682_v40  ;;  %7197 = vmatpush.bf16.msra.mxu0 %v13429_v34 }
 0x60c   : > { %v13938_v47 = vld [vmem:[%s19447_s22 + $0x10b8] sm:$0xf0] }
 0x60d   : > { %v18035_v54 = vld [vmem:[%s19447_s22 + $0x129c] sm:$0xf]  ;;  %v13941_v27 = vor.u32 %v17971_v11, %v13938_v47  ;;  %7210 = vmatpush.bf16.msra.mxu1 %v13685_v19 }
 0x60e   : > { %v14194_v6 = vld [vmem:[%s19447_s22 + $0x12b8] sm:$0xf0] }
 0x60f   : > { %v17835_v56 = vld [vmem:[%s19447_s22 + $0xc5c] sm:$0xf]  ;;  %v14197_v48 = vor.u32 %v18035_v54, %v14194_v6  ;;  %7223 = vmatpush.bf16.msra.mxu2 %v13941_v27 }
 0x610   : > { %v13394_v46 = vld [vmem:[%s19447_s22 + $0xc78] sm:$0xf0] }
 0x611   : > { %v17899_v51 = vld [vmem:[%s19447_s22 + $0xe5c] sm:$0xf]  ;;  %v13397_v38 = vor.u32 %v17835_v56, %v13394_v46  ;;  %7236 = vmatpush.bf16.msra.mxu3 %v14197_v48 }
 0x612   : > { %v13650_v42 = vld [vmem:[%s19447_s22 + $0xe78] sm:$0xf0] }
 0x613   : > { %v17963_v29 = vld [vmem:[%s19447_s22 + $0x105c] sm:$0xf]  ;;  %v13653_v15 = vor.u32 %v17899_v51, %v13650_v42  ;;  %7198 = vmatpush.bf16.msra.mxu0 %v13397_v38 }
 0x614   : > { %v13906_v50 = vld [vmem:[%s19447_s22 + $0x1078] sm:$0xf0] }
 0x615   : > { %v18027_v53 = vld [vmem:[%s19447_s22 + $0x125c] sm:$0xf]  ;;  %v13909_v0 = vor.u32 %v17963_v29, %v13906_v50  ;;  %7211 = vmatpush.bf16.msra.mxu1 %v13653_v15 }
 0x616   : > { %v14162_v58 = vld [vmem:[%s19447_s22 + $0x1278] sm:$0xf0] }
 0x617   : > { %v17827_v49 = vld [vmem:[%s19447_s22 + $0xc1c] sm:$0xf]  ;;  %v14165_v62 = vor.u32 %v18027_v53, %v14162_v58  ;;  %7224 = vmatpush.bf16.msra.mxu2 %v13909_v0  ;;  %v21550_v0 = vpop.f32.mrf.mxu0 }
 0x618   : > { %v13362_v10 = vld [vmem:[%s19447_s22 + $0xc38] sm:$0xf0] }
 0x619   : > { %v17891_v41 = vld [vmem:[%s19447_s22 + $0xe1c] sm:$0xf]  ;;  %v13365_v8 = vor.u32 %v17827_v49, %v13362_v10  ;;  %7237 = vmatpush.bf16.msra.mxu3 %v14165_v62 }
 0x61a   : > { %v13618_v13 = vld [vmem:[%s19447_s22 + $0xe38] sm:$0xf0] }
 0x61b   : > { %v17955_v18 = vld [vmem:[%s19447_s22 + $0x101c] sm:$0xf]  ;;  %v13621_v61 = vor.u32 %v17891_v41, %v13618_v13  ;;  %7199 = vmatpush.bf16.msra.mxu0 %v13365_v8 }
 0x61c   : > { %v13874_v3 = vld [vmem:[%s19447_s22 + $0x1038] sm:$0xf0] }
 0x61d   : > { %v18019_v17 = vld [vmem:[%s19447_s22 + $0x121c] sm:$0xf]  ;;  %v13877_v33 = vor.u32 %v17955_v18, %v13874_v3  ;;  %7212 = vmatpush.bf16.msra.mxu1 %v13621_v61  ;;  %v21555_v3 = vpop.f32.mrf.mxu1 }
 0x61e   : > { %v14130_v59 = vld [vmem:[%s19447_s22 + $0x1238] sm:$0xf0]  ;;  %7200 = vmatmul.bf16.vlgmr.msra.gmra.mxu0 %v19629_v35 }
 0x61f   : > { %v18139_v1 = vld [vmem:[%s19447_s22 + $0x15dc] sm:$0xf]  ;;  %v14133_v45 = vor.u32 %v18019_v17, %v14130_v59  ;;  %7225 = vmatpush.bf16.msra.mxu2 %v13877_v33 }
 0x620   : > { %v14610_v4 = vld [vmem:[%s19447_s22 + $0x15f8] sm:$0xf0]  ;;  %7213 = vmatmul.bf16.vlgmr.msra.gmra.mxu1 %v19635_v39 }
 0x621   : > { %v18203_v60 = vld [vmem:[%s19447_s22 + $0x17dc] sm:$0xf]  ;;  %v14613_v31 = vor.u32 %v18139_v1, %v14610_v4  ;;  %7238 = vmatpush.bf16.msra.mxu3 %v14133_v45 }
 0x622   : > { %v14866_v2 = vld [vmem:[%s19447_s22 + $0x17f8] sm:$0xf0]  ;;  %7226 = vmatmul.bf16.vlgmr.msra.gmra.mxu2 %v19706_v20 }
 0x623   : > { %v18267_v7 = vld [vmem:[%s19447_s22 + $0x19dc] sm:$0xf]  ;;  %v14869_v21 = vor.u32 %v18203_v60, %v14866_v2  ;;  %7244 = vmatpush.bf16.msrb.mxu0 %v14613_v31 }
 0x624   : > { %v15122_v14 = vld [vmem:[%s19447_s22 + $0x19f8] sm:$0xf0]  ;;  %7239 = vmatmul.bf16.vlgmr.msra.gmra.mxu3 %v19713_v25 }
 0x625   : > { %v18331_v9 = vld [vmem:[%s19447_s22 + $0x1bdc] sm:$0xf]  ;;  %v15125_v26 = vor.u32 %v18267_v7, %v15122_v14  ;;  %7257 = vmatpush.bf16.msrb.mxu1 %v14869_v21 }
 0x626   : > { %v15378_v43 = vld [vmem:[%s19447_s22 + $0x1bf8] sm:$0xf0] }
 0x627   : > { %v18131_v30 = vld [vmem:[%s19447_s22 + $0x159c] sm:$0xf]  ;;  %v15381_v5 = vor.u32 %v18331_v9, %v15378_v43  ;;  %7270 = vmatpush.bf16.msrb.mxu2 %v15125_v26  ;;  %v21565_v9 = vpop.f32.mrf.mxu2  ;;  %v21570_v26 = vpop.f32.mrf.mxu3 }
 0x628   : > { %v14578_v32 = vld [vmem:[%s19447_s22 + $0x15b8] sm:$0xf0] }
 0x629   : > { %v18195_v63 = vld [vmem:[%s19447_s22 + $0x179c] sm:$0xf]  ;;  %v14581_v37 = vor.u32 %v18131_v30, %v14578_v32  ;;  %7283 = vmatpush.bf16.msrb.mxu3 %v15381_v5  ;;  %v6995_v5 = vpop.f32.mrf.mxu0 }
 0x62a   : > { %v14834_v23 = vld [vmem:[%s19447_s22 + $0x17b8] sm:$0xf0] }
 0x62b   : > { %v18259_v40 = vld [vmem:[%s19447_s22 + $0x199c] sm:$0xf]  ;;  %v14837_v54 = vor.u32 %v18195_v63, %v14834_v23  ;;  %7245 = vmatpush.bf16.msrb.mxu0 %v14581_v37  ;;  %v7008_v37 = vpop.f32.mrf.mxu1 }
 0x62c   : > { %v15090_v11 = vld [vmem:[%s19447_s22 + $0x19b8] sm:$0xf0] }
 0x62d   : > { %v18323_v47 = vld [vmem:[%s19447_s22 + $0x1b9c] sm:$0xf]  ;;  %v15093_v6 = vor.u32 %v18259_v40, %v15090_v11  ;;  %7258 = vmatpush.bf16.msrb.mxu1 %v14837_v54 }
 0x62e   : > { %v15346_v36 = vld [vmem:[%s19447_s22 + $0x1bb8] sm:$0xf0] }
 0x62f   : > { %v18123_v34 = vld [vmem:[%s19447_s22 + $0x155c] sm:$0xf]  ;;  %v15349_v27 = vor.u32 %v18323_v47, %v15346_v36  ;;  %7271 = vmatpush.bf16.msrb.mxu2 %v15093_v6 }
 0x630   : > { %v14546_v44 = vld [vmem:[%s19447_s22 + $0x1578] sm:$0xf0] }
 0x631   : > { %v18187_v19 = vld [vmem:[%s19447_s22 + $0x175c] sm:$0xf]  ;;  %v14549_v35 = vor.u32 %v18123_v34, %v14546_v44  ;;  %7284 = vmatpush.bf16.msrb.mxu3 %v15349_v27 }
 0x632   : > { %v14802_v56 = vld [vmem:[%s19447_s22 + $0x1778] sm:$0xf0] }
 0x633   : > { %v18251_v46 = vld [vmem:[%s19447_s22 + $0x195c] sm:$0xf]  ;;  %v14805_v42 = vor.u32 %v18187_v19, %v14802_v56  ;;  %7246 = vmatpush.bf16.msrb.mxu0 %v14549_v35 }
 0x634   : > { %v15058_v51 = vld [vmem:[%s19447_s22 + $0x1978] sm:$0xf0] }
 0x635   : > { %v18315_v22 = vld [vmem:[%s19447_s22 + $0x1b5c] sm:$0xf]  ;;  %v15061_v29 = vor.u32 %v18251_v46, %v15058_v51  ;;  %7259 = vmatpush.bf16.msrb.mxu1 %v14805_v42  ;;  %v7021_v42 = vpop.f32.mrf.mxu2 }
 0x636   : > { %v15314_v48 = vld [vmem:[%s19447_s22 + $0x1b78] sm:$0xf0] }
 0x637   : > { %v18115_v50 = vld [vmem:[%s19447_s22 + $0x151c] sm:$0xf]  ;;  %v15317_v39 = vor.u32 %v18315_v22, %v15314_v48  ;;  %7272 = vmatpush.bf16.msrb.mxu2 %v15061_v29 }
 0x638   : > { %v14514_v53 = vld [vmem:[%s19447_s22 + $0x1538] sm:$0xf0] }
 0x639   : > { %v18179_v20 = vld [vmem:[%s19447_s22 + $0x171c] sm:$0xf]  ;;  %v14517_v15 = vor.u32 %v18115_v50, %v14514_v53  ;;  %7285 = vmatpush.bf16.msrb.mxu3 %v15317_v39  ;;  %v7034_v39 = vpop.f32.mrf.mxu3 }
 0x63a   : > { %v14770_v58 = vld [vmem:[%s19447_s22 + $0x1738] sm:$0xf0] }
 0x63b   : > { %v18243_v38 = vld [vmem:[%s19447_s22 + $0x191c] sm:$0xf]  ;;  %v14773_v41 = vor.u32 %v18179_v20, %v14770_v58  ;;  %7247 = vmatpush.bf16.msrb.mxu0 %v14517_v15 }
 0x63c   : > { %v15026_v49 = vld [vmem:[%s19447_s22 + $0x1938] sm:$0xf0] }
 0x63d   : > { %v18307_v25 = vld [vmem:[%s19447_s22 + $0x1b1c] sm:$0xf]  ;;  %v15029_v13 = vor.u32 %v18243_v38, %v15026_v49  ;;  %7260 = vmatpush.bf16.msrb.mxu1 %v14773_v41  ;;  %v7045_v41 = vpop.f32.mrf.mxu0 }
 0x63e   : > { %v15282_v10 = vld [vmem:[%s19447_s22 + $0x1b38] sm:$0xf0] }
 0x63f   : > { %v18107_v18 = vld [vmem:[%s19447_s22 + $0x14dc] sm:$0xf]  ;;  %v15285_v17 = vor.u32 %v18307_v25, %v15282_v10  ;;  %7273 = vmatpush.bf16.msrb.mxu2 %v15029_v13  ;;  %v7058_v13 = vpop.f32.mrf.mxu1 }
 0x640   : > { %v14482_v57 = vld [vmem:[%s19447_s22 + $0x14f8] sm:$0xf0] }
 0x641   : > { %v18171_v62 = vld [vmem:[%s19447_s22 + $0x16dc] sm:$0xf]  ;;  %v14485_v8 = vor.u32 %v18107_v18, %v14482_v57  ;;  %7286 = vmatpush.bf16.msrb.mxu3 %v15285_v17  ;;  %v6994_v18 = vadd.f32 %v21550_v0, %v21496_v55  ;;  %v7071_v57 = vpop.f32.mrf.mxu2  ;;  %v434_v55 = vld [vmem:[#allocation2 + $0x28] sm:$0xff] }
 0x642   : > { %v14738_v59 = vld [vmem:[%s19447_s22 + $0x16f8] sm:$0xf0] }
 0x643   : > { %v18235_v52 = vld [vmem:[%s19447_s22 + $0x18dc] sm:$0xf]  ;;  %v14741_v2 = vor.u32 %v18171_v62, %v14738_v59  ;;  %7248 = vmatpush.bf16.msrb.mxu0 %v14485_v8  ;;  %v7084_v62 = vpop.f32.mrf.mxu3  ;;  %v7007_v59 = vadd.f32 %v21555_v3, %v6994_v18 }
 0x644   : > { %v14994_v1 = vld [vmem:[%s19447_s22 + $0x18f8] sm:$0xf0] }
 0x645   : > { %v18299_v4 = vld [vmem:[%s19447_s22 + $0x1adc] sm:$0xf]  ;;  %v14997_v7 = vor.u32 %v18235_v52, %v14994_v1  ;;  %7261 = vmatpush.bf16.msrb.mxu1 %v14741_v2  ;;  %v7047_v17 = vpop.f32.mrf.mxu0  ;;  %v7020_v1 = vadd.f32 %v21565_v9, %v7007_v59 }
 0x646   : > { %v15250_v60 = vld [vmem:[%s19447_s22 + $0x1af8] sm:$0xf0] }
 0x647   : > { %v18099_v14 = vld [vmem:[%s19447_s22 + $0x149c] sm:$0xf]  ;;  %v15253_v43 = vor.u32 %v18299_v4, %v15250_v60  ;;  %7274 = vmatpush.bf16.msrb.mxu2 %v14997_v7  ;;  %v7060_v52 = vpop.f32.mrf.mxu1 }
 0x648   : > { %v14450_v61 = vld [vmem:[%s19447_s22 + $0x14b8] sm:$0xf0] }
 0x649   : > { %v18163_v33 = vld [vmem:[%s19447_s22 + $0x169c] sm:$0xf]  ;;  %v14453_v63 = vor.u32 %v18099_v14, %v14450_v61  ;;  %7287 = vmatpush.bf16.msrb.mxu3 %v15253_v43 }
 0x64a   : > { %v14706_v45 = vld [vmem:[%s19447_s22 + $0x16b8] sm:$0xf0] }
 0x64b   : > { %v18227_v31 = vld [vmem:[%s19447_s22 + $0x189c] sm:$0xf]  ;;  %v14709_v23 = vor.u32 %v18163_v33, %v14706_v45  ;;  %7249 = vmatpush.bf16.msrb.mxu0 %v14453_v63  ;;  %v7086_v4 = vpop.f32.mrf.mxu3 }
 0x64c   : > { %v14962_v21 = vld [vmem:[%s19447_s22 + $0x18b8] sm:$0xf0] }
 0x64d   : > { %v18291_v30 = vld [vmem:[%s19447_s22 + $0x1a9c] sm:$0xf]  ;;  %v14965_v40 = vor.u32 %v18227_v31, %v14962_v21  ;;  %7262 = vmatpush.bf16.msrb.mxu1 %v14709_v23  ;;  %v7097_v2 = vpop.f32.mrf.mxu0 }
 0x64e   : > { %v15218_v32 = vld [vmem:[%s19447_s22 + $0x1ab8] sm:$0xf0] }
 0x64f   : > { %v18091_v11 = vld [vmem:[%s19447_s22 + $0x145c] sm:$0xf]  ;;  %v15221_v54 = vor.u32 %v18291_v30, %v15218_v32  ;;  %7275 = vmatpush.bf16.msrb.mxu2 %v14965_v40  ;;  %v7110_v14 = vpop.f32.mrf.mxu1 }
 0x650   : > { %v14418_v47 = vld [vmem:[%s19447_s22 + $0x1478] sm:$0xf0] }
 0x651   : > { %v18155_v36 = vld [vmem:[%s19447_s22 + $0x165c] sm:$0xf]  ;;  %v14421_v56 = vor.u32 %v18091_v11, %v14418_v47  ;;  %7288 = vmatpush.bf16.msrb.mxu3 %v15221_v54 }
 0x652   : > { %v14674_v6 = vld [vmem:[%s19447_s22 + $0x1678] sm:$0xf0] }
 0x653   : > { %v18219_v34 = vld [vmem:[%s19447_s22 + $0x185c] sm:$0xf]  ;;  %v14677_v46 = vor.u32 %v18155_v36, %v14674_v6  ;;  %7250 = vmatpush.bf16.msrb.mxu0 %v14421_v56  ;;  %v7136_v3 = vpop.f32.mrf.mxu3 }
 0x654   : > { %v14930_v44 = vld [vmem:[%s19447_s22 + $0x1878] sm:$0xf0] }
 0x655   : > { %v18283_v19 = vld [vmem:[%s19447_s22 + $0x1a5c] sm:$0xf]  ;;  %v14933_v51 = vor.u32 %v18219_v34, %v14930_v44  ;;  %7263 = vmatpush.bf16.msrb.mxu1 %v14677_v46  ;;  %v7099_v43 = vpop.f32.mrf.mxu0 }
 0x656   : > { %v15186_v27 = vld [vmem:[%s19447_s22 + $0x1a78] sm:$0xf0] }
 0x657   : > { %v18083_v22 = vld [vmem:[%s19447_s22 + $0x141c] sm:$0xf]  ;;  %v15189_v29 = vor.u32 %v18283_v19, %v15186_v27  ;;  %7276 = vmatpush.bf16.msrb.mxu2 %v14933_v51  ;;  %v7112_v9 = vpop.f32.mrf.mxu1 }
 0x658   : > { %v14386_v48 = vld [vmem:[%s19447_s22 + $0x1438] sm:$0xf0] }
 0x659   : > { %v18147_v35 = vld [vmem:[%s19447_s22 + $0x161c] sm:$0xf]  ;;  %v14389_v49 = vor.u32 %v18083_v22, %v14386_v48  ;;  %7289 = vmatpush.bf16.msrb.mxu3 %v15189_v29 }
 0x65a   : > { %v14642_v50 = vld [vmem:[%s19447_s22 + $0x1638] sm:$0xf0] }
 0x65b   : > { %v18211_v53 = vld [vmem:[%s19447_s22 + $0x181c] sm:$0xf]  ;;  %v14645_v25 = vor.u32 %v18147_v35, %v14642_v50  ;;  %7251 = vmatpush.bf16.msrb.mxu0 %v14389_v49  ;;  %v7138_v21 = vpop.f32.mrf.mxu3 }
 0x65c   : > { %v14898_v20 = vld [vmem:[%s19447_s22 + $0x1838] sm:$0xf0] }
 0x65d   : > { %v18275_v58 = vld [vmem:[%s19447_s22 + $0x1a1c] sm:$0xf]  ;;  %v14901_v10 = vor.u32 %v18211_v53, %v14898_v20  ;;  %7264 = vmatpush.bf16.msrb.mxu1 %v14645_v25  ;;  %v7149_v30 = vpop.f32.mrf.mxu0 }
 0x65e   : > { %v15154_v38 = vld [vmem:[%s19447_s22 + $0x1a38] sm:$0xf0]  ;;  %7252 = vmatmul.bf16.vlgmr.msrb.gmra.mxu0 %v19711_v24  ;;  %v7073_v24 = vpop.f32.mrf.mxu2 }
 0x65f   : > { %v15157_v15 = vor.u32 %v18275_v58, %v15154_v38  ;;  %7277 = vmatpush.bf16.msrb.mxu2 %v14901_v10  ;;  %v435_v25 = vld [vmem:[#allocation2 + $0x38] sm:$0xff] }
 0x660   : > { %7265 = vmatmul.bf16.vlgmr.msrb.gmra.mxu1 %v19717_v28  ;;  %v7033_v28 = vadd.f32 %v21570_v26, %v7020_v1  ;;  %v7162_v26 = vpop.f32.mrf.mxu1 }
 0x661   : > { %7290 = vmatpush.bf16.msrb.mxu3 %v15157_v15 }
 0x662   : > { %7278 = vmatmul.bf16.vlgmr.msrb.gmra.mxu2 %v19784_v12  ;;  %v7046_v12 = vadd.f32 %v7045_v41, %v7033_v28 }
 0x664   : > { %7291 = vmatmul.bf16.vlgmr.msrb.gmra.mxu3 %v19789_v16  ;;  %v7059_v60 = vadd.f32 %v7058_v13, %v7046_v12 }
 0x665   : > { %v7151_v5 = vpop.f32.mrf.mxu0 }
 0x666   : > { %v7072_v16 = vadd.f32 %v7071_v57, %v7059_v60  ;;  %v7123_v33 = vpop.f32.mrf.mxu2 }
 0x667   : > { %v7137_v45 = vadd.f32 %v7136_v3, %v7123_v33  ;;  %v7188_v63 = vpop.f32.mrf.mxu3 }
 0x668   : > { %v7085_v8 = vadd.f32 %v7084_v62, %v7072_v16  ;;  %v7164_v23 = vpop.f32.mrf.mxu1 }
 0x669   : > { %v7150_v37 = vadd.f32 %v7149_v30, %v7137_v45 }
 0x66a   : > { %v7098_v7 = vadd.f32 %v7097_v2, %v7085_v8 }
 0x66b   : > { %v7163_v44 = vadd.f32 %v7162_v26, %v7150_v37 }
 0x66c   : > { %v7111_v0 = vadd.f32 %v7110_v14, %v7098_v7 }
 0x66e   : > { %v7302_v61 = vadd.f32 %v7111_v0, %v434_v55  ;;  %v7125_v31 = vpop.f32.mrf.mxu2 }
 0x66f   : > { %v7190_v11 = vpop.f32.mrf.mxu3 }
 0x670   : > { %7310 = vst [vmem:[#allocation2 + $0x28] sm:$0xff] %v7302_v61 }
 0x676   : > { %v7175_v32 = vpop.f32.mrf.mxu2 }
 0x677   : > { %v7176_v27 = vadd.f32 %v7175_v32, %v7163_v44 }
 0x679   : > { %v7189_v51 = vadd.f32 %v7188_v63, %v7176_v27 }
 0x67e   : > { %v7177_v40 = vpop.f32.mrf.mxu2 }
 0x69b   : > { %v7201_v47 = vpop.f32.mrf.mxu0 }
 0x69c   : > { %v7202_v22 = vadd.f32 %v7201_v47, %v7189_v51 }
 0x69d   : > { %v7214_v36 = vpop.f32.mrf.mxu1 }
 0x69e   : > { %v7215_v48 = vadd.f32 %v7214_v36, %v7202_v22 }
 0x6a3   : > { %v7203_v34 = vpop.f32.mrf.mxu0 }
 0x6a5   : > { %v7227_v54 = vpop.f32.mrf.mxu2  ;;  %v7216_v19 = vpop.f32.mrf.mxu1 }
 0x6a6   : > { %v7228_v35 = vadd.f32 %v7227_v54, %v7215_v48 }
 0x6a7   : > { %v7240_v6 = vpop.f32.mrf.mxu3 }
 0x6a8   : > { %v7241_v42 = vadd.f32 %v7240_v6, %v7228_v35 }
 0x6ad   : > { %v7229_v56 = vpop.f32.mrf.mxu2 }
 0x6af   : > { %v7242_v46 = vpop.f32.mrf.mxu3 }
 0x6db   : > { %v7253_v29 = vpop.f32.mrf.mxu0 }
 0x6dc   : > { %v7254_v53 = vadd.f32 %v7253_v29, %v7241_v42 }
 0x6dd   : > { %v7266_v50 = vpop.f32.mrf.mxu1 }
 0x6de   : > { %v7267_v20 = vadd.f32 %v7266_v50, %v7254_v53 }
 0x6e3   : > { %v7255_v49 = vpop.f32.mrf.mxu0 }
 0x6e5   : > { %v7279_v39 = vpop.f32.mrf.mxu2  ;;  %v7268_v10 = vpop.f32.mrf.mxu1 }
 0x6e6   : > { %v7280_v58 = vadd.f32 %v7279_v39, %v7267_v20 }
 0x6e7   : > { %v7292_v38 = vpop.f32.mrf.mxu3 }
 0x6e8   : > { %v7293_v15 = vadd.f32 %v7292_v38, %v7280_v58 }
 0x6ea   : > { %v7303_v41 = vadd.f32 %v7293_v15, %v435_v25 }
 0x6eb   : > { %7315 = sbr.rel (%p15382_p1) target bundleno = 3101 (0xc1d), region = 80 }
 0x6ec   : > { %7311 = vst [vmem:[#allocation2 + $0x38] sm:$0xff] %v7303_v41 }
 0x6ed   : > { %v7281_v13 = vpop.f32.mrf.mxu2 }
 0x6ef   : > { %v7294_v18 = vpop.f32.mrf.mxu3 }
 0x6f0   : > { %v15609_v57 = vld [vmem:[#allocation9 + $0x1c0] sm:$0xf]  ;;  %vm11616_vm0 = vcmask 52224   ;;  %vm11626_vm1 = vcmask 56324   ;;  %vm11588_vm2 = vcmask 56320   ;;  %vm11636_vm5 = vcmask 50176  }
 0x6f1   : > { %v18396_v62 = vld [vmem:[#allocation9 + $0x1dc] sm:$0xf0] }
 0x6f2   : > { %v15865_v17 = vld [vmem:[#allocation9 + $0x3c0] sm:$0xf]  ;;  %v15610_v59 = vor.u32 %v18396_v62, %v15609_v57 }
 0x6f3   : > { %v18460_v52 = vld [vmem:[#allocation9 + $0x3dc] sm:$0xf0] }
 0x6f4   : > { %v16121_v1 = vld [vmem:[#allocation9 + $0x5c0] sm:$0xf]  ;;  %v15866_v4 = vor.u32 %v18460_v52, %v15865_v17  ;;  %10456 = vmatpush.bf16.msra.mxu0 %v15610_v59 }
 0x6f5   : > { %v18524_v24 = vld [vmem:[#allocation9 + $0x5dc] sm:$0xf0] }
 0x6f6   : > { %v16122_v28 = vor.u32 %v18524_v24, %v16121_v1  ;;  %v16377_v12 = vld [vmem:[#allocation9 + $0x7c0] sm:$0xf]  ;;  %10469 = vmatpush.bf16.msra.mxu1 %v15866_v4 }
 0x6f7   : > { %v18588_v60 = vld [vmem:[#allocation9 + $0x7dc] sm:$0xf0] }
 0x6f8   : > { %v15577_v16 = vld [vmem:[#allocation9 + $0x180] sm:$0xf]  ;;  %v16378_v8 = vor.u32 %v18588_v60, %v16377_v12  ;;  %10482 = vmatpush.bf16.msra.mxu2 %v16122_v28 }
 0x6f9   : > { %v18388_v2 = vld [vmem:[#allocation9 + $0x19c] sm:$0xf0] }
 0x6fa   : > { %v15833_v7 = vld [vmem:[#allocation9 + $0x380] sm:$0xf]  ;;  %v15578_v55 = vor.u32 %v18388_v2, %v15577_v16  ;;  %10495 = vmatpush.bf16.msra.mxu3 %v16378_v8 }
 0x6fb   : > { %v18452_v14 = vld [vmem:[#allocation9 + $0x39c] sm:$0xf0] }
 0x6fc   : > { %v15834_v0 = vor.u32 %v18452_v14, %v15833_v7  ;;  %v16089_v61 = vld [vmem:[#allocation9 + $0x580] sm:$0xf]  ;;  %10457 = vmatpush.bf16.msra.mxu0 %v15578_v55 }
 0x6fd   : > { %v18516_v33 = vld [vmem:[#allocation9 + $0x59c] sm:$0xf0] }
 0x6fe   : > { %v16345_v3 = vld [vmem:[#allocation9 + $0x780] sm:$0xf]  ;;  %v16090_v43 = vor.u32 %v18516_v33, %v16089_v61  ;;  %10470 = vmatpush.bf16.msra.mxu1 %v15834_v0 }
 0x6ff   : > { %v18580_v45 = vld [vmem:[#allocation9 + $0x79c] sm:$0xf0] }
 0x700   : > { %v15545_v9 = vld [vmem:[#allocation9 + $0x140] sm:$0xf]  ;;  %v16346_v21 = vor.u32 %v18580_v45, %v16345_v3  ;;  %10483 = vmatpush.bf16.msra.mxu2 %v16090_v43 }
 0x701   : > { %v18380_v31 = vld [vmem:[#allocation9 + $0x15c] sm:$0xf0] }
 0x702   : > { %v15801_v30 = vld [vmem:[#allocation9 + $0x340] sm:$0xf]  ;;  %v15546_v63 = vor.u32 %v18380_v31, %v15545_v9  ;;  %10496 = vmatpush.bf16.msra.mxu3 %v16346_v21 }
 0x703   : > { %v18444_v26 = vld [vmem:[#allocation9 + $0x35c] sm:$0xf0] }
 0x704   : > { %v16057_v32 = vld [vmem:[#allocation9 + $0x540] sm:$0xf]  ;;  %v15802_v11 = vor.u32 %v18444_v26, %v15801_v30  ;;  %10458 = vmatpush.bf16.msra.mxu0 %v15546_v63 }
 0x705   : > { %v18508_v5 = vld [vmem:[#allocation9 + $0x55c] sm:$0xf0] }
 0x706   : > { %v16313_v23 = vld [vmem:[#allocation9 + $0x740] sm:$0xf]  ;;  %v16058_v47 = vor.u32 %v18508_v5, %v16057_v32  ;;  %10471 = vmatpush.bf16.msra.mxu1 %v15802_v11 }
 0x707   : > { %v18572_v40 = vld [vmem:[#allocation9 + $0x75c] sm:$0xf0] }
 0x708   : > { %v15513_v36 = vld [vmem:[#allocation9 + $0x100] sm:$0xf]  ;;  %v16314_v6 = vor.u32 %v18572_v40, %v16313_v23  ;;  %10484 = vmatpush.bf16.msra.mxu2 %v16058_v47 }
 0x709   : > { %v18372_v37 = vld [vmem:[#allocation9 + $0x11c] sm:$0xf0] }
 0x70a   : > { %v15769_v54 = vld [vmem:[#allocation9 + $0x300] sm:$0xf]  ;;  %v15514_v46 = vor.u32 %v18372_v37, %v15513_v36  ;;  %10497 = vmatpush.bf16.msra.mxu3 %v16314_v6 }
 0x70b   : > { %v18436_v34 = vld [vmem:[#allocation9 + $0x31c] sm:$0xf0] }
 0x70c   : > { %v16025_v44 = vld [vmem:[#allocation9 + $0x500] sm:$0xf]  ;;  %v15770_v51 = vor.u32 %v18436_v34, %v15769_v54  ;;  %10459 = vmatpush.bf16.msra.mxu0 %v15514_v46 }
 0x70d   : > { %v18500_v19 = vld [vmem:[#allocation9 + $0x51c] sm:$0xf0] }
 0x70e   : > { %v16281_v27 = vld [vmem:[#allocation9 + $0x700] sm:$0xf]  ;;  %v16026_v22 = vor.u32 %v18500_v19, %v16025_v44  ;;  %10472 = vmatpush.bf16.msra.mxu1 %v15770_v51 }
 0x70f   : > { %v18564_v56 = vld [vmem:[#allocation9 + $0x71c] sm:$0xf0] }
 0x710   : > { %v15481_v48 = vld [vmem:[#allocation9 + $0xc0] sm:$0xf]  ;;  %v16282_v29 = vor.u32 %v18564_v56, %v16281_v27  ;;  %10485 = vmatpush.bf16.msra.mxu2 %v16026_v22 }
 0x711   : > { %v18364_v35 = vld [vmem:[#allocation9 + $0xdc] sm:$0xf0] }
 0x712   : > { %v15737_v42 = vld [vmem:[#allocation9 + $0x2c0] sm:$0xf]  ;;  %v15482_v38 = vor.u32 %v18364_v35, %v15481_v48  ;;  %10498 = vmatpush.bf16.msra.mxu3 %v16282_v29 }
 0x713   : > { %v18428_v50 = vld [vmem:[#allocation9 + $0x2dc] sm:$0xf0] }
 0x714   : > { %v15993_v53 = vld [vmem:[#allocation9 + $0x4c0] sm:$0xf]  ;;  %v15738_v49 = vor.u32 %v18428_v50, %v15737_v42  ;;  %10460 = vmatpush.bf16.msra.mxu0 %v15482_v38 }
 0x715   : > { %v18492_v20 = vld [vmem:[#allocation9 + $0x4dc] sm:$0xf0] }
 0x716   : > { %v16249_v39 = vld [vmem:[#allocation9 + $0x6c0] sm:$0xf]  ;;  %v15994_v25 = vor.u32 %v18492_v20, %v15993_v53  ;;  %10473 = vmatpush.bf16.msra.mxu1 %v15738_v49 }
 0x717   : > { %v18556_v58 = vld [vmem:[#allocation9 + $0x6dc] sm:$0xf0] }
 0x718   : > { %v15449_v10 = vld [vmem:[#allocation9 + $0x80] sm:$0xf]  ;;  %v16250_v13 = vor.u32 %v18556_v58, %v16249_v39  ;;  %10486 = vmatpush.bf16.msra.mxu2 %v15994_v25 }
 0x719   : > { %v18356_v15 = vld [vmem:[#allocation9 + $0x9c] sm:$0xf0] }
 0x71a   : > { %v15705_v41 = vld [vmem:[#allocation9 + $0x280] sm:$0xf]  ;;  %v15450_v52 = vor.u32 %v18356_v15, %v15449_v10  ;;  %10499 = vmatpush.bf16.msra.mxu3 %v16250_v13 }
 0x71b   : > { %v18420_v18 = vld [vmem:[#allocation9 + $0x29c] sm:$0xf0] }
 0x71c   : > { %v15961_v57 = vld [vmem:[#allocation9 + $0x480] sm:$0xf]  ;;  %v15706_v1 = vor.u32 %v18420_v18, %v15705_v41  ;;  %10461 = vmatpush.bf16.msra.mxu0 %v15450_v52 }
 0x71d   : > { %v18484_v62 = vld [vmem:[#allocation9 + $0x49c] sm:$0xf0] }
 0x71e   : > { %v16217_v17 = vld [vmem:[#allocation9 + $0x680] sm:$0xf]  ;;  %v15962_v24 = vor.u32 %v18484_v62, %v15961_v57  ;;  %10474 = vmatpush.bf16.msra.mxu1 %v15706_v1 }
 0x71f   : > { %v18548_v59 = vld [vmem:[#allocation9 + $0x69c] sm:$0xf0] }
 0x720   : > { %v15417_v4 = vld [vmem:[#allocation9 + $0x40] sm:$0xf]  ;;  %v16218_v60 = vor.u32 %v18548_v59, %v16217_v17  ;;  %10487 = vmatpush.bf16.msra.mxu2 %v15962_v24  ;;  %v7318_v24 = vld [vmem:[#allocation2 + $0x18] sm:$0xff] }
 0x721   : > { %v18348_v28 = vld [vmem:[#allocation9 + $0x5c] sm:$0xf0] }
 0x722   : > { %v15673_v12 = vld [vmem:[#allocation9 + $0x240] sm:$0xf]  ;;  %v15418_v55 = vor.u32 %v18348_v28, %v15417_v4  ;;  %10500 = vmatpush.bf16.msra.mxu3 %v16218_v60  ;;  %v21600_v4 = vld [vmem:[#allocation8] sm:$0xff]  ;;  %v7316_v60 = vld [vmem:[#allocation2 + $0x30] sm:$0xff] }
 0x723   : > { %v18412_v16 = vld [vmem:[#allocation9 + $0x25c] sm:$0xf0] }
 0x724   : > { %v15929_v8 = vld [vmem:[#allocation9 + $0x440] sm:$0xf]  ;;  %v15674_v33 = vor.u32 %v18412_v16, %v15673_v12  ;;  %10462 = vmatpush.bf16.msra.mxu0 %v15418_v55  ;;  %v7328_v12 = vperm.slane %v21600_v4, 2  ;;  %v7326_v16 = vperm.slane %v21600_v4, 0 }
 0x725   : > { %v18476_v2 = vld [vmem:[#allocation9 + $0x45c] sm:$0xf0] }
 0x726   : > { %v16185_v7 = vld [vmem:[#allocation9 + $0x640] sm:$0xf]  ;;  %v15930_v3 = vor.u32 %v18476_v2, %v15929_v8  ;;  %10475 = vmatpush.bf16.msra.mxu1 %v15674_v33  ;;  %v7319_v8 = vld [vmem:[#allocation2 + $0x10] sm:$0xff]  ;;  %v7329_v2 = vperm.slane %v21600_v4, 3  ;;  %v7344_v33 = vadd.f32 %v7328_v12, %v7318_v24 }
 0x727   : > { %v18540_v14 = vld [vmem:[#allocation9 + $0x65c] sm:$0xf0] }
 0x728   : > { %v15385_v0 = vld [vmem:[#allocation9] sm:$0xf]  ;;  %v16186_v31 = vor.u32 %v18540_v14, %v16185_v7  ;;  %10488 = vmatpush.bf16.msra.mxu2 %v15930_v3  ;;  %v7342_v3 = vadd.f32 %v7326_v16, %v7316_v60 }
 0x729   : > { %v18340_v61 = vld [vmem:[#allocation9 + $0x1c] sm:$0xf0] }
 0x72a   : > { %v15641_v43 = vld [vmem:[#allocation9 + $0x200] sm:$0xf]  ;;  %v15386_v23 = vor.u32 %v18340_v61, %v15385_v0  ;;  %10501 = vmatpush.bf16.msra.mxu3 %v16186_v31 }
 0x72b   : > { %v18404_v45 = vld [vmem:[#allocation9 + $0x21c] sm:$0xf0] }
 0x72c   : > { %v15897_v9 = vld [vmem:[#allocation9 + $0x400] sm:$0xf]  ;;  %v15642_v36 = vor.u32 %v18404_v45, %v15641_v43  ;;  %10463 = vmatpush.bf16.msra.mxu0 %v15386_v23  ;;  %v7345_v43 = vadd.f32 %v7329_v2, %v7319_v8  ;;  %v7317_v45 = vld [vmem:[#allocation2] sm:$0xff]  ;;  %v7350_v23 = vmax.f32 %v7342_v3, 0.0 }
 0x72d   : > { %v18468_v21 = vld [vmem:[#allocation9 + $0x41c] sm:$0xf0] }
 0x72e   : > { %v16153_v30 = vld [vmem:[#allocation9 + $0x600] sm:$0xf]  ;;  %v15898_v37 = vor.u32 %v18468_v21, %v15897_v9  ;;  %10476 = vmatpush.bf16.msra.mxu1 %v15642_v36 }
 0x72f   : > { %v18532_v26 = vld [vmem:[#allocation9 + $0x61c] sm:$0xf0] }
 0x730   : > { %v16633_v32 = vld [vmem:[#allocation9 + $0x9c0] sm:$0xf]  ;;  %v16154_v34 = vor.u32 %v18532_v26, %v16153_v30  ;;  %10489 = vmatpush.bf16.msra.mxu2 %v15898_v37  ;;  %v7327_v26 = vperm.slane %v21600_v4, 1 }
 0x731   : > { %v18652_v63 = vld [vmem:[#allocation9 + $0x9dc] sm:$0xf0] }
 0x732   : > { %v16889_v5 = vld [vmem:[#allocation9 + $0xbc0] sm:$0xf]  ;;  %v16634_v44 = vor.u32 %v18652_v63, %v16633_v32  ;;  %10502 = vmatpush.bf16.msra.mxu3 %v16154_v34 }
 0x733   : > { %v18716_v40 = vld [vmem:[#allocation9 + $0xbdc] sm:$0xf0] }
 0x734   : > { %v17145_v11 = vld [vmem:[#allocation9 + $0xdc0] sm:$0xf]  ;;  %v16890_v19 = vor.u32 %v18716_v40, %v16889_v5  ;;  %10508 = vmatpush.bf16.msrb.mxu0 %v16634_v44  ;;  %v7352_v5 = vmax.f32 %v7344_v33, 0.0  ;;  %v7353_v40 = vmax.f32 %v7345_v43, 0.0  ;;  %v7323_v43 = vld [vmem:[#allocation2 + $0x38] sm:$0xff] }
 0x735   : > { %v18780_v47 = vld [vmem:[#allocation9 + $0xddc] sm:$0xf0] }
 0x736   : > { %v17401_v54 = vld [vmem:[#allocation9 + $0xfc0] sm:$0xf]  ;;  %v17146_v27 = vor.u32 %v18780_v47, %v17145_v11  ;;  %10521 = vmatpush.bf16.msrb.mxu1 %v16890_v19  ;;  %v21606_v44 = vpack.c.bf16 %v7352_v5, %v7352_v5  ;;  %v21608_v19 = vpack.c.bf16 %v7350_v23, %v7350_v23  ;;  %v18456_v5 = vld [vmem:[#allocation9 + $0x3c4] sm:$0xf] }
 0x737   : > { %v18844_v6 = vld [vmem:[#allocation9 + $0xfdc] sm:$0xf0]  ;;  %v15867_v23 = vld [vmem:[#allocation9 + $0x3e0] sm:$0xf0] }
 0x738   : > { %v16601_v56 = vld [vmem:[#allocation9 + $0x980] sm:$0xf]  ;;  %v17402_v22 = vor.u32 %v18844_v6, %v17401_v54  ;;  %10534 = vmatpush.bf16.msrb.mxu2 %v17146_v27  ;;  %v7343_v54 = vadd.f32 %v7327_v26, %v7317_v45  ;;  %v21610_v27 = vpack.c.bf16 %v7353_v40, %v7353_v40  ;;  %10464 = vmatmul.bf16.vlgmr.msra.gmra.mxu0 %v21608_v19  ;;  %v7333_v45 = vperm.slane %v21600_v4, 7 }
 0x739   : > { %v18644_v46 = vld [vmem:[#allocation9 + $0x99c] sm:$0xf0]  ;;  %10490 = vmatmul.bf16.vlgmr.msra.gmra.mxu2 %v21606_v44 }
 0x73a   : > { %v16857_v51 = vld [vmem:[#allocation9 + $0xb80] sm:$0xf]  ;;  %v16602_v53 = vor.u32 %v18644_v46, %v16601_v56  ;;  %10547 = vmatpush.bf16.msrb.mxu3 %v17402_v22  ;;  %v7351_v46 = vmax.f32 %v7343_v54, 0.0  ;;  %v7349_v40 = vadd.f32 %v7333_v45, %v7323_v43  ;;  %v15771_v43 = vld [vmem:[#allocation9 + $0x320] sm:$0xf0] }
 0x73b   : > { %v18708_v48 = vld [vmem:[#allocation9 + $0xb9c] sm:$0xf0]  ;;  %10503 = vmatmul.bf16.vlgmr.msra.gmra.mxu3 %v21610_v27  ;;  %v18496_v45 = vld [vmem:[#allocation9 + $0x504] sm:$0xf] }
 0x73c   : > { %v17113_v35 = vld [vmem:[#allocation9 + $0xd80] sm:$0xf]  ;;  %v16858_v58 = vor.u32 %v18708_v48, %v16857_v51  ;;  %10509 = vmatpush.bf16.msrb.mxu0 %v16602_v53 }
 0x73d   : > { %v18772_v42 = vld [vmem:[#allocation9 + $0xd9c] sm:$0xf0] }
 0x73e   : > { %v17369_v29 = vld [vmem:[#allocation9 + $0xf80] sm:$0xf]  ;;  %v17114_v38 = vor.u32 %v18772_v42, %v17113_v35  ;;  %10522 = vmatpush.bf16.msrb.mxu1 %v16858_v58 }
 0x73f   : > { %v18836_v50 = vld [vmem:[#allocation9 + $0xf9c] sm:$0xf0] }
 0x740   : > { %v16569_v20 = vld [vmem:[#allocation9 + $0x940] sm:$0xf]  ;;  %v17370_v15 = vor.u32 %v18836_v50, %v17369_v29  ;;  %10535 = vmatpush.bf16.msrb.mxu2 %v17114_v38 }
 0x741   : > { %v18636_v39 = vld [vmem:[#allocation9 + $0x95c] sm:$0xf0] }
 0x742   : > { %v16825_v49 = vld [vmem:[#allocation9 + $0xb40] sm:$0xf]  ;;  %v16570_v59 = vor.u32 %v18636_v39, %v16569_v20  ;;  %10548 = vmatpush.bf16.msrb.mxu3 %v17370_v15  ;;  %v21613_v39 = vpack.c.bf16 %v7351_v46, %v7351_v46 }
 0x743   : > { %v18700_v25 = vld [vmem:[#allocation9 + $0xb5c] sm:$0xf0] }
 0x744   : > { %v17081_v10 = vld [vmem:[#allocation9 + $0xd40] sm:$0xf]  ;;  %v16826_v52 = vor.u32 %v18700_v25, %v16825_v49  ;;  %10510 = vmatpush.bf16.msrb.mxu0 %v16570_v59  ;;  %10477 = vmatmul.bf16.vlgmr.msra.gmra.mxu1 %v21613_v39 }
 0x745   : > { %v18764_v41 = vld [vmem:[#allocation9 + $0xd5c] sm:$0xf0] }
 0x746   : > { %v17337_v13 = vld [vmem:[#allocation9 + $0xf40] sm:$0xf]  ;;  %v17082_v28 = vor.u32 %v18764_v41, %v17081_v10  ;;  %10523 = vmatpush.bf16.msrb.mxu1 %v16826_v52  ;;  %v7332_v41 = vperm.slane %v21600_v4, 6 }
 0x747   : > { %v18828_v18 = vld [vmem:[#allocation9 + $0xf5c] sm:$0xf0] }
 0x748   : > { %v16537_v57 = vld [vmem:[#allocation9 + $0x900] sm:$0xf]  ;;  %v17338_v7 = vor.u32 %v18828_v18, %v17337_v13  ;;  %10536 = vmatpush.bf16.msrb.mxu2 %v17082_v28  ;;  %v7330_v28 = vperm.slane %v21600_v4, 4 }
 0x749   : > { %v18628_v62 = vld [vmem:[#allocation9 + $0x91c] sm:$0xf0] }
 0x74a   : > { %v16793_v17 = vld [vmem:[#allocation9 + $0xb00] sm:$0xf]  ;;  %v16538_v9 = vor.u32 %v18628_v62, %v16537_v57  ;;  %10549 = vmatpush.bf16.msrb.mxu3 %v17338_v7 }
 0x74b   : > { %v18692_v1 = vld [vmem:[#allocation9 + $0xb1c] sm:$0xf0] }
 0x74c   : > { %v17049_v14 = vld [vmem:[#allocation9 + $0xd00] sm:$0xf]  ;;  %v16794_v31 = vor.u32 %v18692_v1, %v16793_v17  ;;  %10511 = vmatpush.bf16.msrb.mxu0 %v16538_v9  ;;  %v7321_v9 = vld [vmem:[#allocation2 + $0x20] sm:$0xff] }
 0x74d   : > { %v18756_v55 = vld [vmem:[#allocation9 + $0xd1c] sm:$0xf0] }
 0x74e   : > { %v17305_v0 = vld [vmem:[#allocation9 + $0xf00] sm:$0xf]  ;;  %v17050_v32 = vor.u32 %v18756_v55, %v17049_v14  ;;  %10524 = vmatpush.bf16.msrb.mxu1 %v16794_v31  ;;  %v7331_v31 = vperm.slane %v21600_v4, 5  ;;  %v18584_v4 = vld [vmem:[#allocation9 + $0x7c4] sm:$0xf] }
 0x74f   : > { %v18820_v61 = vld [vmem:[#allocation9 + $0xf1c] sm:$0xf0] }
 0x750   : > { %v16505_v21 = vld [vmem:[#allocation9 + $0x8c0] sm:$0xf]  ;;  %v17306_v11 = vor.u32 %v18820_v61, %v17305_v0  ;;  %10537 = vmatpush.bf16.msrb.mxu2 %v17050_v32  ;;  %v18392_v32 = vld [vmem:[#allocation9 + $0x1c4] sm:$0xf] }
 0x751   : > { %v18620_v30 = vld [vmem:[#allocation9 + $0x8dc] sm:$0xf0] }
 0x752   : > { %v16761_v63 = vld [vmem:[#allocation9 + $0xac0] sm:$0xf]  ;;  %v16506_v56 = vor.u32 %v18620_v30, %v16505_v21  ;;  %10550 = vmatpush.bf16.msrb.mxu3 %v17306_v11  ;;  %v7347_v11 = vadd.f32 %v7331_v31, %v7321_v9  ;;  %v16027_v9 = vld [vmem:[#allocation9 + $0x520] sm:$0xf0] }
 0x753   : > { %v18684_v47 = vld [vmem:[#allocation9 + $0xadc] sm:$0xf0]  ;;  %v18560_v31 = vld [vmem:[#allocation9 + $0x704] sm:$0xf] }
 0x754   : > { %v17017_v36 = vld [vmem:[#allocation9 + $0xcc0] sm:$0xf]  ;;  %v16762_v51 = vor.u32 %v18684_v47, %v16761_v63  ;;  %10512 = vmatpush.bf16.msrb.mxu0 %v16506_v56  ;;  %v15611_v63 = vld [vmem:[#allocation9 + $0x1e0] sm:$0xf0] }
 0x755   : > { %v18748_v37 = vld [vmem:[#allocation9 + $0xcdc] sm:$0xf0]  ;;  %v16379_v56 = vld [vmem:[#allocation9 + $0x7e0] sm:$0xf0] }
 0x756   : > { %v17273_v6 = vld [vmem:[#allocation9 + $0xec0] sm:$0xf]  ;;  %v17018_v22 = vor.u32 %v18748_v37, %v17017_v36  ;;  %10525 = vmatpush.bf16.msrb.mxu1 %v16762_v51  ;;  %v18520_v36 = vld [vmem:[#allocation9 + $0x5c4] sm:$0xf]  ;;  %v7357_v51 = vmax.f32 %v7349_v40, 0.0 }
 0x757   : > { %v18812_v34 = vld [vmem:[#allocation9 + $0xedc] sm:$0xf0]  ;;  %v16123_v37 = vld [vmem:[#allocation9 + $0x5e0] sm:$0xf0] }
 0x758   : > { %v16473_v48 = vld [vmem:[#allocation9 + $0x880] sm:$0xf]  ;;  %v17274_v29 = vor.u32 %v18812_v34, %v17273_v6  ;;  %10538 = vmatpush.bf16.msrb.mxu2 %v17018_v22 }
 0x759   : > { %v18612_v35 = vld [vmem:[#allocation9 + $0x89c] sm:$0xf0] }
 0x75a   : > { %v16729_v42 = vld [vmem:[#allocation9 + $0xa80] sm:$0xf]  ;;  %v16474_v25 = vor.u32 %v18612_v35, %v16473_v48  ;;  %10551 = vmatpush.bf16.msrb.mxu3 %v17274_v29  ;;  %v15614_v48 = vor.u32 %v18392_v32, %v15611_v63  ;;  %v7355_v35 = vmax.f32 %v7347_v11, 0.0  ;;  %v16126_v29 = vor.u32 %v18520_v36, %v16123_v37  ;;  %v18360_v63 = vld [vmem:[#allocation9 + $0xc4] sm:$0xf] }
 0x75b   : > { %v18676_v50 = vld [vmem:[#allocation9 + $0xa9c] sm:$0xf0]  ;;  %v16030_v32 = vor.u32 %v18496_v45, %v16027_v9  ;;  %v15739_v11 = vld [vmem:[#allocation9 + $0x2e0] sm:$0xf0] }
 0x75c   : > { %v16985_v53 = vld [vmem:[#allocation9 + $0xc80] sm:$0xf]  ;;  %v16730_v13 = vor.u32 %v18676_v50, %v16729_v42  ;;  %10513 = vmatpush.bf16.msrb.mxu0 %v16474_v25  ;;  %v15870_v42 = vor.u32 %v18456_v5, %v15867_v23  ;;  %v18384_v50 = vld [vmem:[#allocation9 + $0x184] sm:$0xf] }
 0x75d   : > { %v18740_v20 = vld [vmem:[#allocation9 + $0xc9c] sm:$0xf0]  ;;  %v16091_v25 = vld [vmem:[#allocation9 + $0x5a0] sm:$0xf0] }
 0x75e   : > { %v17241_v58 = vld [vmem:[#allocation9 + $0xe80] sm:$0xf]  ;;  %v16986_v18 = vor.u32 %v18740_v20, %v16985_v53  ;;  %10526 = vmatpush.bf16.msrb.mxu1 %v16730_v13  ;;  %v15579_v53 = vld [vmem:[#allocation9 + $0x1a0] sm:$0xf0] }
 0x75f   : > { %v18804_v38 = vld [vmem:[#allocation9 + $0xe9c] sm:$0xf0]  ;;  %v18448_v20 = vld [vmem:[#allocation9 + $0x384] sm:$0xf] }
 0x760   : > { %v16441_v49 = vld [vmem:[#allocation9 + $0x840] sm:$0xf]  ;;  %v17242_v59 = vor.u32 %v18804_v38, %v17241_v58  ;;  %10539 = vmatpush.bf16.msrb.mxu2 %v16986_v18  ;;  %v16382_v58 = vor.u32 %v18584_v4, %v16379_v56  ;;  %v15835_v38 = vld [vmem:[#allocation9 + $0x3a0] sm:$0xf0]  ;;  %v21626_v18 = vpack.c.bf16 %v7357_v51, %v7357_v51 }
 0x761   : > { %v18604_v10 = vld [vmem:[#allocation9 + $0x85c] sm:$0xf0]  ;;  %v15483_v5 = vld [vmem:[#allocation9 + $0xe0] sm:$0xf0] }
 0x762   : > { %v16697_v15 = vld [vmem:[#allocation9 + $0xa40] sm:$0xf]  ;;  %v16442_v8 = vor.u32 %v18604_v10, %v16441_v49  ;;  %10552 = vmatpush.bf16.msrb.mxu3 %v17242_v59  ;;  %v18512_v49 = vld [vmem:[#allocation9 + $0x584] sm:$0xf] }
 0x763   : > { %v18668_v57 = vld [vmem:[#allocation9 + $0xa5c] sm:$0xf0]  ;;  %v16094_v59 = vor.u32 %v18512_v49, %v16091_v25  ;;  %v18424_v23 = vld [vmem:[#allocation9 + $0x2c4] sm:$0xf] }
 0x764   : > { %v16953_v62 = vld [vmem:[#allocation9 + $0xc40] sm:$0xf]  ;;  %v16698_v2 = vor.u32 %v18668_v57, %v16697_v15  ;;  %10514 = vmatpush.bf16.msrb.mxu0 %v16442_v8  ;;  %v18576_v15 = vld [vmem:[#allocation9 + $0x784] sm:$0xf]  ;;  %v15582_v57 = vor.u32 %v18384_v50, %v15579_v53 }
 0x765   : > { %v7322_v17 = vld [vmem:[#allocation2 + $0x28] sm:$0xff] }
 0x766   : > { %v18732_v52 = vld [vmem:[#allocation9 + $0xc5c] sm:$0xf0]  ;;  %v7348_v0 = vadd.f32 %v7332_v41, %v7322_v17  ;;  %10527 = vmatpush.bf16.msrb.mxu1 %v16698_v2  ;;  %v16347_v41 = vld [vmem:[#allocation9 + $0x7a0] sm:$0xf0]  ;;  %v15838_v17 = vor.u32 %v18448_v20, %v15835_v38 }
 0x767   : > { %v17209_v1 = vld [vmem:[#allocation9 + $0xe40] sm:$0xf]  ;;  %v16954_v61 = vor.u32 %v18732_v52, %v16953_v62  ;;  %v21628_v62 = vpack.c.bf16 %v7355_v35, %v7355_v35  ;;  %v18376_v52 = vld [vmem:[#allocation9 + $0x144] sm:$0xf] }
 0x768   : > { %v7320_v24 = vld [vmem:[#allocation2 + $0x8] sm:$0xff]  ;;  %v7356_v54 = vmax.f32 %v7348_v0, 0.0 }
 0x769   : > { %v18796_v12 = vld [vmem:[#allocation9 + $0xe5c] sm:$0xf0]  ;;  %v7346_v3 = vadd.f32 %v7330_v28, %v7320_v24  ;;  %10540 = vmatpush.bf16.msrb.mxu2 %v16954_v61  ;;  %v18440_v24 = vld [vmem:[#allocation9 + $0x344] sm:$0xf]  ;;  %v16350_v28 = vor.u32 %v18576_v15, %v16347_v41 }
 0x76a   : > { %v16409_v60 = vld [vmem:[#allocation9 + $0x800] sm:$0xf]  ;;  %v17210_v21 = vor.u32 %v18796_v12, %v17209_v1  ;;  %v21622_v10 = vpack.c.bf16 %v7356_v54, %v7356_v54  ;;  %v15547_v1 = vld [vmem:[#allocation9 + $0x160] sm:$0xf0] }
 0x76b   : > { %v18596_v16 = vld [vmem:[#allocation9 + $0x81c] sm:$0xf0]  ;;  %v7354_v46 = vmax.f32 %v7346_v3, 0.0  ;;  %v15803_v12 = vld [vmem:[#allocation9 + $0x360] sm:$0xf0] }
 0x76c   : > { %v16665_v7 = vld [vmem:[#allocation9 + $0xa00] sm:$0xf]  ;;  %v16410_v47 = vor.u32 %v18596_v16, %v16409_v60  ;;  %10553 = vmatpush.bf16.msrb.mxu3 %v17210_v21  ;;  %v18504_v60 = vld [vmem:[#allocation9 + $0x544] sm:$0xf] }
 0x76d   : > { %v18660_v14 = vld [vmem:[#allocation9 + $0xa1c] sm:$0xf0]  ;;  %v21624_v13 = vpack.c.bf16 %v7354_v46, %v7354_v46  ;;  %v16059_v16 = vld [vmem:[#allocation9 + $0x560] sm:$0xf0] }
 0x76e   : > { %v16921_v55 = vld [vmem:[#allocation9 + $0xc00] sm:$0xf]  ;;  %v16666_v6 = vor.u32 %v18660_v14, %v16665_v7  ;;  %10515 = vmatpush.bf16.msrb.mxu0 %v16410_v47  ;;  %v18568_v8 = vld [vmem:[#allocation9 + $0x744] sm:$0xf]  ;;  %v15550_v7 = vor.u32 %v18376_v52, %v15547_v1  ;;  %v15806_v14 = vor.u32 %v18440_v24, %v15803_v12 }
 0x76f   : > { %v18724_v33 = vld [vmem:[#allocation9 + $0xc1c] sm:$0xf0]  ;;  %v16315_v2 = vld [vmem:[#allocation9 + $0x760] sm:$0xf0] }
 0x770   : > { %v17177_v30 = vld [vmem:[#allocation9 + $0xe00] sm:$0xf]  ;;  %v16922_v34 = vor.u32 %v18724_v33, %v16921_v55  ;;  %10528 = vmatpush.bf16.msrb.mxu1 %v16666_v6  ;;  %v16062_v55 = vor.u32 %v18504_v60, %v16059_v16  ;;  %v18368_v0 = vld [vmem:[#allocation9 + $0x104] sm:$0xf]  ;;  %v16318_v3 = vor.u32 %v18568_v8, %v16315_v2  ;;  %v15486_v6 = vor.u32 %v18360_v63, %v15483_v5 }
 0x771   : > { %v18788_v26 = vld [vmem:[#allocation9 + $0xe1c] sm:$0xf0]  ;;  %10516 = vmatmul.bf16.vlgmr.msrb.gmra.mxu0 %v21624_v13  ;;  %v15515_v61 = vld [vmem:[#allocation9 + $0x120] sm:$0xf0] }
 0x772   : > { %v17178_v22 = vor.u32 %v18788_v26, %v17177_v30  ;;  %10541 = vmatpush.bf16.msrb.mxu2 %v16922_v34  ;;  %10560 = vmatpush.bf16.msra.mxu0 %v15614_v48  ;;  %v18432_v33 = vld [vmem:[#allocation9 + $0x304] sm:$0xf]  ;;  %v15518_v30 = vor.u32 %v18368_v0, %v15515_v61  ;;  %v15742_v34 = vor.u32 %v18424_v23, %v15739_v11 }
 0x773   : > { %10529 = vmatmul.bf16.vlgmr.msrb.gmra.mxu1 %v21628_v62  ;;  %v16283_v21 = vld [vmem:[#allocation9 + $0x720] sm:$0xf0]  ;;  %v15774_v26 = vor.u32 %v18432_v33, %v15771_v43 }
 0x774   : > { %10554 = vmatpush.bf16.msrb.mxu3 %v17178_v22  ;;  %10573 = vmatpush.bf16.msra.mxu1 %v15870_v42  ;;  %v16286_v40 = vor.u32 %v18560_v31, %v16283_v21  ;;  %v18488_v47 = vld [vmem:[#allocation9 + $0x4c4] sm:$0xf] }
 0x775   : > { %10542 = vmatmul.bf16.vlgmr.msrb.gmra.mxu2 %v21622_v10  ;;  %v15995_v36 = vld [vmem:[#allocation9 + $0x4e0] sm:$0xf0] }
 0x776   : > { %10586 = vmatpush.bf16.msra.mxu2 %v16126_v29  ;;  %10561 = vmatpush.bf16.msra.mxu0 %v15582_v57  ;;  %v18552_v37 = vld [vmem:[#allocation9 + $0x6c4] sm:$0xf]  ;;  %v15998_v4 = vor.u32 %v18488_v47, %v15995_v36 }
 0x777   : > { %10555 = vmatmul.bf16.vlgmr.msrb.gmra.mxu3 %v21626_v18  ;;  %v16251_v54 = vld [vmem:[#allocation9 + $0x6e0] sm:$0xf0] }
 0x778   : > { %10599 = vmatpush.bf16.msra.mxu3 %v16382_v58  ;;  %10574 = vmatpush.bf16.msra.mxu1 %v15838_v17  ;;  %v18352_v56 = vld [vmem:[#allocation9 + $0x84] sm:$0xf]  ;;  %v16254_v22 = vor.u32 %v18552_v37, %v16251_v54 }
 0x779   : > { %v15451_v46 = vld [vmem:[#allocation9 + $0xa0] sm:$0xf0] }
 0x77a   : > { %10587 = vmatpush.bf16.msra.mxu2 %v16094_v59  ;;  %10562 = vmatpush.bf16.msra.mxu0 %v15550_v7  ;;  %v18416_v51 = vld [vmem:[#allocation9 + $0x284] sm:$0xf]  ;;  %v15454_v53 = vor.u32 %v18352_v56, %v15451_v46 }
 0x77b   : > { %v15707_v48 = vld [vmem:[#allocation9 + $0x2a0] sm:$0xf0] }
 0x77c   : > { %10600 = vmatpush.bf16.msra.mxu3 %v16350_v28  ;;  %10575 = vmatpush.bf16.msra.mxu1 %v15806_v14  ;;  %v18480_v35 = vld [vmem:[#allocation9 + $0x484] sm:$0xf]  ;;  %v15710_v20 = vor.u32 %v18416_v51, %v15707_v48 }
 0x77d   : > { %v15963_v42 = vld [vmem:[#allocation9 + $0x4a0] sm:$0xf0] }
 0x77e   : > { %10588 = vmatpush.bf16.msra.mxu2 %v16062_v55  ;;  %10563 = vmatpush.bf16.msra.mxu0 %v15518_v30  ;;  %v18544_v29 = vld [vmem:[#allocation9 + $0x684] sm:$0xf]  ;;  %v15966_v58 = vor.u32 %v18480_v35, %v15963_v42 }
 0x77f   : > { %v16219_v50 = vld [vmem:[#allocation9 + $0x6a0] sm:$0xf0] }
 0x780   : > { %10601 = vmatpush.bf16.msra.mxu3 %v16318_v3  ;;  %10576 = vmatpush.bf16.msra.mxu1 %v15774_v26  ;;  %v18344_v38 = vld [vmem:[#allocation9 + $0x44] sm:$0xf]  ;;  %v16222_v15 = vor.u32 %v18544_v29, %v16219_v50 }
 0x781   : > { %v15419_v49 = vld [vmem:[#allocation9 + $0x60] sm:$0xf0] }
 0x782   : > { %10589 = vmatpush.bf16.msra.mxu2 %v16030_v32  ;;  %10564 = vmatpush.bf16.msra.mxu0 %v15486_v6  ;;  %v18408_v25 = vld [vmem:[#allocation9 + $0x244] sm:$0xf]  ;;  %v15422_v1 = vor.u32 %v18344_v38, %v15419_v49 }
 0x783   : > { %v15675_v41 = vld [vmem:[#allocation9 + $0x260] sm:$0xf0] }
 0x784   : > { %10602 = vmatpush.bf16.msra.mxu3 %v16286_v40  ;;  %10577 = vmatpush.bf16.msra.mxu1 %v15742_v34  ;;  %v18472_v57 = vld [vmem:[#allocation9 + $0x444] sm:$0xf]  ;;  %v15678_v12 = vor.u32 %v18408_v25, %v15675_v41 }
 0x785   : > { %v15931_v17 = vld [vmem:[#allocation9 + $0x460] sm:$0xf0] }
 0x786   : > { %10590 = vmatpush.bf16.msra.mxu2 %v15998_v4  ;;  %v18536_v59 = vld [vmem:[#allocation9 + $0x644] sm:$0xf]  ;;  %10565 = vmatpush.bf16.msra.mxu0 %v15454_v53  ;;  %v15934_v60 = vor.u32 %v18472_v57, %v15931_v17 }
 0x787   : > { %v16187_v52 = vld [vmem:[#allocation9 + $0x660] sm:$0xf0] }
 0x788   : > { %10603 = vmatpush.bf16.msra.mxu3 %v16254_v22  ;;  %v18336_v24 = vld [vmem:[#allocation9 + $0x4] sm:$0xf]  ;;  %10578 = vmatpush.bf16.msra.mxu1 %v15710_v20  ;;  %v16190_v7 = vor.u32 %v18536_v59, %v16187_v52 }
 0x789   : > { %v15387_v28 = vld [vmem:[#allocation9 + $0x20] sm:$0xf0] }
 0x78a   : > { %10591 = vmatpush.bf16.msra.mxu2 %v15966_v58  ;;  %v18400_v16 = vld [vmem:[#allocation9 + $0x204] sm:$0xf]  ;;  %10566 = vmatpush.bf16.msra.mxu0 %v15422_v1  ;;  %v15390_v43 = vor.u32 %v18336_v24, %v15387_v28 }
 0x78b   : > { %v15643_v8 = vld [vmem:[#allocation9 + $0x220] sm:$0xf0] }
 0x78c   : > { %v18464_v2 = vld [vmem:[#allocation9 + $0x404] sm:$0xf]  ;;  %10604 = vmatpush.bf16.msra.mxu3 %v16222_v15  ;;  %10579 = vmatpush.bf16.msra.mxu1 %v15678_v12  ;;  %v15646_v21 = vor.u32 %v18400_v16, %v15643_v8 }
 0x78d   : > { %v15899_v14 = vld [vmem:[#allocation9 + $0x420] sm:$0xf0] }
 0x78e   : > { %v18528_v55 = vld [vmem:[#allocation9 + $0x604] sm:$0xf]  ;;  %10592 = vmatpush.bf16.msra.mxu2 %v15934_v60  ;;  %v15902_v30 = vor.u32 %v18464_v2, %v15899_v14  ;;  %10567 = vmatpush.bf16.msra.mxu0 %v15390_v43 }
 0x78f   : > { %v16155_v0 = vld [vmem:[#allocation9 + $0x620] sm:$0xf0] }
 0x790   : > { %v18648_v61 = vld [vmem:[#allocation9 + $0x9c4] sm:$0xf]  ;;  %10605 = vmatpush.bf16.msra.mxu3 %v16190_v7  ;;  %v16158_v63 = vor.u32 %v18528_v55, %v16155_v0  ;;  %10580 = vmatpush.bf16.msra.mxu1 %v15646_v21 }
 0x791   : > { %v16635_v33 = vld [vmem:[#allocation9 + $0x9e0] sm:$0xf0]  ;;  %10568 = vmatmul.bf16.vlgmr.msra.gmra.mxu0 %v21608_v19 }
 0x792   : > { %v18712_v3 = vld [vmem:[#allocation9 + $0xbc4] sm:$0xf]  ;;  %v16638_v5 = vor.u32 %v18648_v61, %v16635_v33  ;;  %10593 = vmatpush.bf16.msra.mxu2 %v15902_v30 }
 0x793   : > { %v16891_v45 = vld [vmem:[#allocation9 + $0xbe0] sm:$0xf0]  ;;  %10581 = vmatmul.bf16.vlgmr.msra.gmra.mxu1 %v21613_v39 }
 0x794   : > { %v18776_v9 = vld [vmem:[#allocation9 + $0xdc4] sm:$0xf]  ;;  %v16894_v23 = vor.u32 %v18712_v3, %v16891_v45  ;;  %10606 = vmatpush.bf16.msra.mxu3 %v16158_v63  ;;  %10612 = vmatpush.bf16.msrb.mxu0 %v16638_v5 }
 0x795   : > { %v17147_v31 = vld [vmem:[#allocation9 + $0xde0] sm:$0xf0]  ;;  %10594 = vmatmul.bf16.vlgmr.msra.gmra.mxu2 %v21606_v44 }
 0x796   : > { %v18840_v26 = vld [vmem:[#allocation9 + $0xfc4] sm:$0xf]  ;;  %v17150_v40 = vor.u32 %v18776_v9, %v17147_v31  ;;  %10625 = vmatpush.bf16.msrb.mxu1 %v16894_v23 }
 0x797   : > { %v17403_v32 = vld [vmem:[#allocation9 + $0xfe0] sm:$0xf0]  ;;  %10607 = vmatmul.bf16.vlgmr.msra.gmra.mxu3 %v21610_v27 }
 0x798   : > { %v18640_v11 = vld [vmem:[#allocation9 + $0x984] sm:$0xf]  ;;  %v17406_v37 = vor.u32 %v18840_v26, %v17403_v32  ;;  %10638 = vmatpush.bf16.msrb.mxu2 %v17150_v40 }
 0x799   : > { %v16603_v47 = vld [vmem:[#allocation9 + $0x9a0] sm:$0xf0] }
 0x79a   : > { %v18704_v36 = vld [vmem:[#allocation9 + $0xb84] sm:$0xf]  ;;  %v16606_v46 = vor.u32 %v18640_v11, %v16603_v47  ;;  %10651 = vmatpush.bf16.msrb.mxu3 %v17406_v37 }
 0x79b   : > { %v16859_v54 = vld [vmem:[#allocation9 + $0xba0] sm:$0xf0] }
 0x79c   : > { %v18768_v6 = vld [vmem:[#allocation9 + $0xd84] sm:$0xf]  ;;  %v16862_v51 = vor.u32 %v18704_v36, %v16859_v54  ;;  %10613 = vmatpush.bf16.msrb.mxu0 %v16606_v46 }
 0x79d   : > { %v17115_v34 = vld [vmem:[#allocation9 + $0xda0] sm:$0xf0] }
 0x79e   : > { %v18832_v4 = vld [vmem:[#allocation9 + $0xf84] sm:$0xf]  ;;  %v17118_v22 = vor.u32 %v18768_v6, %v17115_v34  ;;  %10626 = vmatpush.bf16.msrb.mxu1 %v16862_v51 }
 0x79f   : > { %v17371_v56 = vld [vmem:[#allocation9 + $0xfa0] sm:$0xf0] }
 0x7a0   : > { %v18632_v48 = vld [vmem:[#allocation9 + $0x944] sm:$0xf]  ;;  %v17374_v29 = vor.u32 %v18832_v4, %v17371_v56  ;;  %10639 = vmatpush.bf16.msrb.mxu2 %v17118_v22 }
 0x7a1   : > { %v16571_v35 = vld [vmem:[#allocation9 + $0x960] sm:$0xf0] }
 0x7a2   : > { %v18696_v42 = vld [vmem:[#allocation9 + $0xb44] sm:$0xf]  ;;  %v16574_v49 = vor.u32 %v18632_v48, %v16571_v35  ;;  %10652 = vmatpush.bf16.msrb.mxu3 %v17374_v29 }
 0x7a3   : > { %v16827_v50 = vld [vmem:[#allocation9 + $0xb60] sm:$0xf0] }
 0x7a4   : > { %v18760_v53 = vld [vmem:[#allocation9 + $0xd44] sm:$0xf]  ;;  %v16830_v25 = vor.u32 %v18696_v42, %v16827_v50  ;;  %10614 = vmatpush.bf16.msrb.mxu0 %v16574_v49 }
 0x7a5   : > { %v17083_v20 = vld [vmem:[#allocation9 + $0xd60] sm:$0xf0] }
 0x7a6   : > { %v18824_v58 = vld [vmem:[#allocation9 + $0xf44] sm:$0xf]  ;;  %v17086_v15 = vor.u32 %v18760_v53, %v17083_v20  ;;  %10627 = vmatpush.bf16.msrb.mxu1 %v16830_v25 }
 0x7a7   : > { %v17339_v38 = vld [vmem:[#allocation9 + $0xf60] sm:$0xf0] }
 0x7a8   : > { %v18624_v41 = vld [vmem:[#allocation9 + $0x904] sm:$0xf]  ;;  %v17342_v59 = vor.u32 %v18824_v58, %v17339_v38  ;;  %10640 = vmatpush.bf16.msrb.mxu2 %v17086_v15 }
 0x7a9   : > { %v16539_v57 = vld [vmem:[#allocation9 + $0x920] sm:$0xf0] }
 0x7aa   : > { %v18688_v17 = vld [vmem:[#allocation9 + $0xb04] sm:$0xf]  ;;  %v16542_v60 = vor.u32 %v18624_v41, %v16539_v57  ;;  %10653 = vmatpush.bf16.msrb.mxu3 %v17342_v59  ;;  %v15617_v57 = vld [vmem:[#allocation9 + $0x1c8] sm:$0xf] }
 0x7ab   : > { %v16795_v52 = vld [vmem:[#allocation9 + $0xb20] sm:$0xf0]  ;;  %v15873_v59 = vld [vmem:[#allocation9 + $0x3c8] sm:$0xf] }
 0x7ac   : > { %v18752_v1 = vld [vmem:[#allocation9 + $0xd04] sm:$0xf]  ;;  %v16798_v16 = vor.u32 %v18688_v17, %v16795_v52  ;;  %10615 = vmatpush.bf16.msrb.mxu0 %v16542_v60  ;;  %v18397_v17 = vld [vmem:[#allocation9 + $0x1e4] sm:$0xf0] }
 0x7ad   : > { %v17051_v24 = vld [vmem:[#allocation9 + $0xd20] sm:$0xf0] }
 0x7ae   : > { %v18816_v28 = vld [vmem:[#allocation9 + $0xf04] sm:$0xf]  ;;  %v17054_v8 = vor.u32 %v18752_v1, %v17051_v24  ;;  %10628 = vmatpush.bf16.msrb.mxu1 %v16798_v16  ;;  %v18461_v1 = vld [vmem:[#allocation9 + $0x3e4] sm:$0xf0] }
 0x7af   : > { %v17307_v12 = vld [vmem:[#allocation9 + $0xf20] sm:$0xf0]  ;;  %v16129_v24 = vld [vmem:[#allocation9 + $0x5c8] sm:$0xf] }
 0x7b0   : > { %v18616_v2 = vld [vmem:[#allocation9 + $0x8c4] sm:$0xf]  ;;  %v17310_v55 = vor.u32 %v18816_v28, %v17307_v12  ;;  %10641 = vmatpush.bf16.msrb.mxu2 %v17054_v8  ;;  %v18525_v28 = vld [vmem:[#allocation9 + $0x5e4] sm:$0xf0] }
 0x7b1   : > { %v16507_v7 = vld [vmem:[#allocation9 + $0x8e0] sm:$0xf0]  ;;  %v16385_v16 = vld [vmem:[#allocation9 + $0x7c8] sm:$0xf] }
 0x7b2   : > { %v18680_v14 = vld [vmem:[#allocation9 + $0xac4] sm:$0xf]  ;;  %v16510_v45 = vor.u32 %v18616_v2, %v16507_v7  ;;  %10654 = vmatpush.bf16.msrb.mxu3 %v17310_v55  ;;  %v18589_v8 = vld [vmem:[#allocation9 + $0x7e4] sm:$0xf0]  ;;  %v15618_v7 = vor.u32 %v18397_v17, %v15617_v57  ;;  %v16130_v55 = vor.u32 %v18525_v28, %v16129_v24 }
 0x7b3   : > { %v16763_v0 = vld [vmem:[#allocation9 + $0xae0] sm:$0xf0]  ;;  %v16001_v57 = vld [vmem:[#allocation9 + $0x4c8] sm:$0xf] }
 0x7b4   : > { %v18744_v61 = vld [vmem:[#allocation9 + $0xcc4] sm:$0xf]  ;;  %v16766_v9 = vor.u32 %v18680_v14, %v16763_v0  ;;  %10616 = vmatpush.bf16.msrb.mxu0 %v16510_v45  ;;  %v15874_v14 = vor.u32 %v18461_v1, %v15873_v59  ;;  %v15585_v0 = vld [vmem:[#allocation9 + $0x188] sm:$0xf] }
 0x7b5   : > { %v17019_v33 = vld [vmem:[#allocation9 + $0xce0] sm:$0xf0]  ;;  %v16097_v45 = vld [vmem:[#allocation9 + $0x588] sm:$0xf] }
 0x7b6   : > { %v18808_v3 = vld [vmem:[#allocation9 + $0xec4] sm:$0xf]  ;;  %v17022_v31 = vor.u32 %v18744_v61, %v17019_v33  ;;  %10629 = vmatpush.bf16.msrb.mxu1 %v16766_v9  ;;  %v18389_v61 = vld [vmem:[#allocation9 + $0x1a4] sm:$0xf0] }
 0x7b7   : > { %v17275_v43 = vld [vmem:[#allocation9 + $0xee0] sm:$0xf0]  ;;  %v15841_v33 = vld [vmem:[#allocation9 + $0x388] sm:$0xf] }
 0x7b8   : > { %v18608_v21 = vld [vmem:[#allocation9 + $0x884] sm:$0xf]  ;;  %v17278_v32 = vor.u32 %v18808_v3, %v17275_v43  ;;  %10642 = vmatpush.bf16.msrb.mxu2 %v17022_v31  ;;  %v16386_v3 = vor.u32 %v18589_v8, %v16385_v16  ;;  %v18453_v43 = vld [vmem:[#allocation9 + $0x3a4] sm:$0xf0] }
 0x7b9   : > { %v16475_v30 = vld [vmem:[#allocation9 + $0x8a0] sm:$0xf0]  ;;  %v18517_v9 = vld [vmem:[#allocation9 + $0x5a4] sm:$0xf0] }
 0x7ba   : > { %v18672_v26 = vld [vmem:[#allocation9 + $0xa84] sm:$0xf]  ;;  %v16478_v47 = vor.u32 %v18608_v21, %v16475_v30  ;;  %10655 = vmatpush.bf16.msrb.mxu3 %v17278_v32  ;;  %v16353_v31 = vld [vmem:[#allocation9 + $0x788] sm:$0xf]  ;;  %v15586_v30 = vor.u32 %v18389_v61, %v15585_v0  ;;  %v16098_v32 = vor.u32 %v18517_v9, %v16097_v45 }
 0x7bb   : > { %v16731_v63 = vld [vmem:[#allocation9 + $0xaa0] sm:$0xf0]  ;;  %v18581_v21 = vld [vmem:[#allocation9 + $0x7a4] sm:$0xf0] }
 0x7bc   : > { %v18736_v5 = vld [vmem:[#allocation9 + $0xc84] sm:$0xf]  ;;  %v16734_v36 = vor.u32 %v18672_v26, %v16731_v63  ;;  %10617 = vmatpush.bf16.msrb.mxu0 %v16478_v47  ;;  %v15842_v26 = vor.u32 %v18453_v43, %v15841_v33  ;;  %v15553_v63 = vld [vmem:[#allocation9 + $0x148] sm:$0xf] }
 0x7bd   : > { %v16987_v23 = vld [vmem:[#allocation9 + $0xca0] sm:$0xf0]  ;;  %v16065_v47 = vld [vmem:[#allocation9 + $0x548] sm:$0xf] }
 0x7be   : > { %v18800_v40 = vld [vmem:[#allocation9 + $0xe84] sm:$0xf]  ;;  %v16990_v37 = vor.u32 %v18736_v5, %v16987_v23  ;;  %10630 = vmatpush.bf16.msrb.mxu1 %v16734_v36  ;;  %v18381_v5 = vld [vmem:[#allocation9 + $0x164] sm:$0xf0] }
 0x7bf   : > { %v17243_v11 = vld [vmem:[#allocation9 + $0xea0] sm:$0xf0]  ;;  %v15809_v23 = vld [vmem:[#allocation9 + $0x348] sm:$0xf] }
 0x7c0   : > { %v18600_v54 = vld [vmem:[#allocation9 + $0x844] sm:$0xf]  ;;  %v17246_v4 = vor.u32 %v18800_v40, %v17243_v11  ;;  %10643 = vmatpush.bf16.msrb.mxu2 %v16990_v37  ;;  %v16354_v40 = vor.u32 %v18581_v21, %v16353_v31  ;;  %v18445_v11 = vld [vmem:[#allocation9 + $0x364] sm:$0xf0] }
 0x7c1   : > { %v16443_v6 = vld [vmem:[#allocation9 + $0x860] sm:$0xf0]  ;;  %v18509_v36 = vld [vmem:[#allocation9 + $0x564] sm:$0xf0] }
 0x7c2   : > { %v18664_v34 = vld [vmem:[#allocation9 + $0xa44] sm:$0xf]  ;;  %v16446_v35 = vor.u32 %v18600_v54, %v16443_v6  ;;  %10656 = vmatpush.bf16.msrb.mxu3 %v17246_v4  ;;  %v16321_v37 = vld [vmem:[#allocation9 + $0x748] sm:$0xf]  ;;  %v15554_v6 = vor.u32 %v18381_v5, %v15553_v63  ;;  %v16066_v4 = vor.u32 %v18509_v36, %v16065_v47 }
 0x7c3   : > { %v16699_v56 = vld [vmem:[#allocation9 + $0xa60] sm:$0xf0]  ;;  %v18573_v54 = vld [vmem:[#allocation9 + $0x764] sm:$0xf0] }
 0x7c4   : > { %v18728_v46 = vld [vmem:[#allocation9 + $0xc44] sm:$0xf]  ;;  %v16702_v50 = vor.u32 %v18664_v34, %v16699_v56  ;;  %10618 = vmatpush.bf16.msrb.mxu0 %v16446_v35  ;;  %v15810_v34 = vor.u32 %v18445_v11, %v15809_v23  ;;  %v15521_v56 = vld [vmem:[#allocation9 + $0x108] sm:$0xf] }
 0x7c5   : > { %v16955_v51 = vld [vmem:[#allocation9 + $0xc60] sm:$0xf0]  ;;  %v16033_v35 = vld [vmem:[#allocation9 + $0x508] sm:$0xf] }
 0x7c6   : > { %v18792_v22 = vld [vmem:[#allocation9 + $0xe44] sm:$0xf]  ;;  %v16958_v53 = vor.u32 %v18728_v46, %v16955_v51  ;;  %10631 = vmatpush.bf16.msrb.mxu1 %v16702_v50  ;;  %v18373_v46 = vld [vmem:[#allocation9 + $0x124] sm:$0xf0] }
 0x7c7   : > { %v17211_v48 = vld [vmem:[#allocation9 + $0xe60] sm:$0xf0]  ;;  %v15777_v51 = vld [vmem:[#allocation9 + $0x308] sm:$0xf] }
 0x7c8   : > { %v18592_v42 = vld [vmem:[#allocation9 + $0x804] sm:$0xf]  ;;  %v17214_v49 = vor.u32 %v18792_v22, %v17211_v48  ;;  %10644 = vmatpush.bf16.msrb.mxu2 %v16958_v53  ;;  %v16322_v22 = vor.u32 %v18573_v54, %v16321_v37  ;;  %v18437_v48 = vld [vmem:[#allocation9 + $0x324] sm:$0xf0]  ;;  %v15522_v53 = vor.u32 %v18373_v46, %v15521_v56 }
 0x7c9   : > { %v16411_v29 = vld [vmem:[#allocation9 + $0x820] sm:$0xf0]  ;;  %v18565_v50 = vld [vmem:[#allocation9 + $0x724] sm:$0xf0] }
 0x7ca   : > { %v18656_v20 = vld [vmem:[#allocation9 + $0xa04] sm:$0xf]  ;;  %v16414_v52 = vor.u32 %v18592_v42, %v16411_v29  ;;  %10657 = vmatpush.bf16.msrb.mxu3 %v17214_v49  ;;  %v18501_v42 = vld [vmem:[#allocation9 + $0x524] sm:$0xf0] }
 0x7cb   : > { %v16667_v58 = vld [vmem:[#allocation9 + $0xa20] sm:$0xf0]  ;;  %v16289_v29 = vld [vmem:[#allocation9 + $0x708] sm:$0xf] }
 0x7cc   : > { %v18720_v38 = vld [vmem:[#allocation9 + $0xc04] sm:$0xf]  ;;  %v16670_v12 = vor.u32 %v18656_v20, %v16667_v58  ;;  %10619 = vmatpush.bf16.msrb.mxu0 %v16414_v52  ;;  %v15778_v20 = vor.u32 %v18437_v48, %v15777_v51  ;;  %v16034_v58 = vor.u32 %v18501_v42, %v16033_v35  ;;  %v18365_v49 = vld [vmem:[#allocation9 + $0xe4] sm:$0xf0] }
 0x7cd   : > { %v16923_v25 = vld [vmem:[#allocation9 + $0xc20] sm:$0xf0]  ;;  %v18493_v17 = vld [vmem:[#allocation9 + $0x4e4] sm:$0xf0] }
 0x7ce   : > { %v18784_v15 = vld [vmem:[#allocation9 + $0xe04] sm:$0xf]  ;;  %v16926_v60 = vor.u32 %v18720_v38, %v16923_v25  ;;  %10632 = vmatpush.bf16.msrb.mxu1 %v16670_v12  ;;  %v15489_v38 = vld [vmem:[#allocation9 + $0xc8] sm:$0xf]  ;;  %v16002_v28 = vor.u32 %v18493_v17, %v16001_v57 }
 0x7cf   : > { %v17179_v41 = vld [vmem:[#allocation9 + $0xe20] sm:$0xf0]  ;;  %10620 = vmatmul.bf16.vlgmr.msrb.gmra.mxu0 %v21624_v13  ;;  %v15745_v25 = vld [vmem:[#allocation9 + $0x2c8] sm:$0xf]  ;;  %v15490_v1 = vor.u32 %v18365_v49, %v15489_v38 }
 0x7d0   : > { %v17182_v2 = vor.u32 %v18784_v15, %v17179_v41  ;;  %10645 = vmatpush.bf16.msrb.mxu2 %v16926_v60  ;;  %10664 = vmatpush.bf16.msra.mxu0 %v15618_v7  ;;  %v16290_v15 = vor.u32 %v18565_v50, %v16289_v29  ;;  %v18429_v41 = vld [vmem:[#allocation9 + $0x2e4] sm:$0xf0] }
 0x7d1   : > { %10633 = vmatmul.bf16.vlgmr.msrb.gmra.mxu1 %v21628_v62  ;;  %v16257_v59 = vld [vmem:[#allocation9 + $0x6c8] sm:$0xf]  ;;  %v15746_v24 = vor.u32 %v18429_v41, %v15745_v25 }
 0x7d2   : > { %10658 = vmatpush.bf16.msrb.mxu3 %v17182_v2  ;;  %10677 = vmatpush.bf16.msra.mxu1 %v15874_v14  ;;  %v18557_v52 = vld [vmem:[#allocation9 + $0x6e4] sm:$0xf0] }
 0x7d3   : > { %10646 = vmatmul.bf16.vlgmr.msrb.gmra.mxu2 %v21622_v10  ;;  %v15457_v12 = vld [vmem:[#allocation9 + $0x88] sm:$0xf]  ;;  %v16258_v8 = vor.u32 %v18557_v52, %v16257_v59 }
 0x7d4   : > { %10690 = vmatpush.bf16.msra.mxu2 %v16130_v55  ;;  %10665 = vmatpush.bf16.msra.mxu0 %v15586_v30  ;;  %v18357_v60 = vld [vmem:[#allocation9 + $0xa4] sm:$0xf0] }
 0x7d5   : > { %10659 = vmatmul.bf16.vlgmr.msrb.gmra.mxu3 %v21626_v18  ;;  %v15713_v16 = vld [vmem:[#allocation9 + $0x288] sm:$0xf]  ;;  %v15458_v61 = vor.u32 %v18357_v60, %v15457_v12 }
 0x7d6   : > { %10703 = vmatpush.bf16.msra.mxu3 %v16386_v3  ;;  %10678 = vmatpush.bf16.msra.mxu1 %v15842_v26  ;;  %v18421_v2 = vld [vmem:[#allocation9 + $0x2a4] sm:$0xf0] }
 0x7d7   : > { %v15969_v7 = vld [vmem:[#allocation9 + $0x488] sm:$0xf]  ;;  %v15714_v33 = vor.u32 %v18421_v2, %v15713_v16 }
 0x7d8   : > { %10691 = vmatpush.bf16.msra.mxu2 %v16098_v32  ;;  %10666 = vmatpush.bf16.msra.mxu0 %v15554_v6  ;;  %v18485_v14 = vld [vmem:[#allocation9 + $0x4a4] sm:$0xf0] }
 0x7d9   : > { %v16225_v55 = vld [vmem:[#allocation9 + $0x688] sm:$0xf]  ;;  %v15970_v3 = vor.u32 %v18485_v14, %v15969_v7 }
 0x7da   : > { %10704 = vmatpush.bf16.msra.mxu3 %v16354_v40  ;;  %10679 = vmatpush.bf16.msra.mxu1 %v15810_v34  ;;  %v18549_v0 = vld [vmem:[#allocation9 + $0x6a4] sm:$0xf0] }
 0x7db   : > { %v15425_v43 = vld [vmem:[#allocation9 + $0x48] sm:$0xf]  ;;  %v16226_v31 = vor.u32 %v18549_v0, %v16225_v55 }
 0x7dc   : > { %10692 = vmatpush.bf16.msra.mxu2 %v16066_v4  ;;  %10667 = vmatpush.bf16.msra.mxu0 %v15522_v53  ;;  %v18349_v45 = vld [vmem:[#allocation9 + $0x64] sm:$0xf0] }
 0x7dd   : > { %v15681_v9 = vld [vmem:[#allocation9 + $0x248] sm:$0xf]  ;;  %v15426_v5 = vor.u32 %v18349_v45, %v15425_v43 }
 0x7de   : > { %10705 = vmatpush.bf16.msra.mxu3 %v16322_v22  ;;  %10680 = vmatpush.bf16.msra.mxu1 %v15778_v20  ;;  %v18413_v21 = vld [vmem:[#allocation9 + $0x264] sm:$0xf0] }
 0x7df   : > { %v15937_v30 = vld [vmem:[#allocation9 + $0x448] sm:$0xf]  ;;  %v15682_v11 = vor.u32 %v18413_v21, %v15681_v9 }
 0x7e0   : > { %10693 = vmatpush.bf16.msra.mxu2 %v16034_v58  ;;  %10668 = vmatpush.bf16.msra.mxu0 %v15490_v1  ;;  %v18477_v26 = vld [vmem:[#allocation9 + $0x464] sm:$0xf0] }
 0x7e1   : > { %v16193_v32 = vld [vmem:[#allocation9 + $0x648] sm:$0xf]  ;;  %v15938_v47 = vor.u32 %v18477_v26, %v15937_v30 }
 0x7e2   : > { %10706 = vmatpush.bf16.msra.mxu3 %v16290_v15  ;;  %10681 = vmatpush.bf16.msra.mxu1 %v15746_v24  ;;  %v18541_v63 = vld [vmem:[#allocation9 + $0x664] sm:$0xf0] }
 0x7e3   : > { %v15393_v23 = vld [vmem:[#allocation9 + $0x8] sm:$0xf]  ;;  %v16194_v6 = vor.u32 %v18541_v63, %v16193_v32 }
 0x7e4   : > { %10694 = vmatpush.bf16.msra.mxu2 %v16002_v28  ;;  %10669 = vmatpush.bf16.msra.mxu0 %v15458_v61  ;;  %v18341_v40 = vld [vmem:[#allocation9 + $0x24] sm:$0xf0] }
 0x7e5   : > { %v15649_v36 = vld [vmem:[#allocation9 + $0x208] sm:$0xf]  ;;  %v15394_v48 = vor.u32 %v18341_v40, %v15393_v23 }
 0x7e6   : > { %10707 = vmatpush.bf16.msra.mxu3 %v16258_v8  ;;  %10682 = vmatpush.bf16.msra.mxu1 %v15714_v33  ;;  %v18405_v37 = vld [vmem:[#allocation9 + $0x224] sm:$0xf0] }
 0x7e7   : > { %v15905_v54 = vld [vmem:[#allocation9 + $0x408] sm:$0xf]  ;;  %v15650_v50 = vor.u32 %v18405_v37, %v15649_v36 }
 0x7e8   : > { %10695 = vmatpush.bf16.msra.mxu2 %v15970_v3  ;;  %v18469_v34 = vld [vmem:[#allocation9 + $0x424] sm:$0xf0]  ;;  %10670 = vmatpush.bf16.msra.mxu0 %v15426_v5 }
 0x7e9   : > { %v16161_v4 = vld [vmem:[#allocation9 + $0x608] sm:$0xf]  ;;  %v15906_v53 = vor.u32 %v18469_v34, %v15905_v54 }
 0x7ea   : > { %10708 = vmatpush.bf16.msra.mxu3 %v16226_v31  ;;  %v18533_v56 = vld [vmem:[#allocation9 + $0x624] sm:$0xf0]  ;;  %10683 = vmatpush.bf16.msra.mxu1 %v15682_v11 }
 0x7eb   : > { %v16641_v46 = vld [vmem:[#allocation9 + $0x9c8] sm:$0xf]  ;;  %v16162_v38 = vor.u32 %v18533_v56, %v16161_v4 }
 0x7ec   : > { %v18653_v51 = vld [vmem:[#allocation9 + $0x9e4] sm:$0xf0]  ;;  %10696 = vmatpush.bf16.msra.mxu2 %v15938_v47  ;;  %10671 = vmatpush.bf16.msra.mxu0 %v15394_v48 }
 0x7ed   : > { %v16897_v22 = vld [vmem:[#allocation9 + $0xbc8] sm:$0xf]  ;;  %v16642_v49 = vor.u32 %v18653_v51, %v16641_v46 }
 0x7ee   : > { %v18717_v35 = vld [vmem:[#allocation9 + $0xbe4] sm:$0xf0]  ;;  %10709 = vmatpush.bf16.msra.mxu3 %v16194_v6  ;;  %10684 = vmatpush.bf16.msra.mxu1 %v15650_v50 }
 0x7ef   : > { %v17153_v42 = vld [vmem:[#allocation9 + $0xdc8] sm:$0xf]  ;;  %v16898_v25 = vor.u32 %v18717_v35, %v16897_v22  ;;  %10672 = vmatmul.bf16.vlgmr.msra.gmra.mxu0 %v21608_v19 }
 0x7f0   : > { %v18781_v29 = vld [vmem:[#allocation9 + $0xde4] sm:$0xf0]  ;;  %10697 = vmatpush.bf16.msra.mxu2 %v15906_v53  ;;  %10716 = vmatpush.bf16.msrb.mxu0 %v16642_v49 }
 0x7f1   : > { %v17409_v20 = vld [vmem:[#allocation9 + $0xfc8] sm:$0xf]  ;;  %v17154_v15 = vor.u32 %v18781_v29, %v17153_v42  ;;  %10685 = vmatmul.bf16.vlgmr.msra.gmra.mxu1 %v21613_v39 }
 0x7f2   : > { %v18845_v58 = vld [vmem:[#allocation9 + $0xfe4] sm:$0xf0]  ;;  %10710 = vmatpush.bf16.msra.mxu3 %v16162_v38  ;;  %10729 = vmatpush.bf16.msrb.mxu1 %v16898_v25 }
 0x7f3   : > { %v16609_v41 = vld [vmem:[#allocation9 + $0x988] sm:$0xf]  ;;  %v17410_v59 = vor.u32 %v18845_v58, %v17409_v20  ;;  %10698 = vmatmul.bf16.vlgmr.msra.gmra.mxu2 %v21606_v44 }
 0x7f4   : > { %v18645_v57 = vld [vmem:[#allocation9 + $0x9a4] sm:$0xf0]  ;;  %10742 = vmatpush.bf16.msrb.mxu2 %v17154_v15  ;;  %v21646_v15 = vld [vmem:[#allocation11] sm:$0xff] }
 0x7f5   : > { %v16865_v17 = vld [vmem:[#allocation9 + $0xb88] sm:$0xf]  ;;  %v16610_v60 = vor.u32 %v18645_v57, %v16609_v41  ;;  %10711 = vmatmul.bf16.vlgmr.msra.gmra.mxu3 %v21610_v27 }
 0x7f6   : > { %v18709_v52 = vld [vmem:[#allocation9 + $0xba4] sm:$0xf0]  ;;  %10755 = vmatpush.bf16.msrb.mxu3 %v17410_v59 }
 0x7f7   : > { %v17121_v1 = vld [vmem:[#allocation9 + $0xd88] sm:$0xf]  ;;  %v16866_v16 = vor.u32 %v18709_v52, %v16865_v17  ;;  %10717 = vmatpush.bf16.msrb.mxu0 %v16610_v60 }
 0x7f8   : > { %v18773_v24 = vld [vmem:[#allocation9 + $0xda4] sm:$0xf0] }
 0x7f9   : > { %v17377_v28 = vld [vmem:[#allocation9 + $0xf88] sm:$0xf]  ;;  %v17122_v8 = vor.u32 %v18773_v24, %v17121_v1  ;;  %10730 = vmatpush.bf16.msrb.mxu1 %v16866_v16 }
 0x7fa   : > { %v18837_v12 = vld [vmem:[#allocation9 + $0xfa4] sm:$0xf0] }
 0x7fb   : > { %v16577_v2 = vld [vmem:[#allocation9 + $0x948] sm:$0xf]  ;;  %v17378_v55 = vor.u32 %v18837_v12, %v17377_v28  ;;  %10743 = vmatpush.bf16.msrb.mxu2 %v17122_v8  ;;  %v7880_v12 = vperm.slane %v21646_v15, 0 }
 0x7fc   : > { %v18637_v7 = vld [vmem:[#allocation9 + $0x964] sm:$0xf0] }
 0x7fd   : > { %v16833_v14 = vld [vmem:[#allocation9 + $0xb48] sm:$0xf]  ;;  %v16578_v45 = vor.u32 %v18637_v7, %v16577_v2  ;;  %10756 = vmatpush.bf16.msrb.mxu3 %v17378_v55 }
 0x7fe   : > { %v18701_v0 = vld [vmem:[#allocation9 + $0xb64] sm:$0xf0] }
 0x7ff   : > { %v17089_v61 = vld [vmem:[#allocation9 + $0xd48] sm:$0xf]  ;;  %v16834_v9 = vor.u32 %v18701_v0, %v16833_v14  ;;  %10718 = vmatpush.bf16.msrb.mxu0 %v16578_v45 }
 0x800   : > { %v18765_v33 = vld [vmem:[#allocation9 + $0xd64] sm:$0xf0] }
 0x801   : > { %v17345_v3 = vld [vmem:[#allocation9 + $0xf48] sm:$0xf]  ;;  %v17090_v31 = vor.u32 %v18765_v33, %v17089_v61  ;;  %10731 = vmatpush.bf16.msrb.mxu1 %v16834_v9  ;;  %v10465_v33 = vpop.f32.mrf.mxu0 }
 0x802   : > { %v18829_v43 = vld [vmem:[#allocation9 + $0xf64] sm:$0xf0] }
 0x803   : > { %v16545_v21 = vld [vmem:[#allocation9 + $0x908] sm:$0xf]  ;;  %v17346_v32 = vor.u32 %v18829_v43, %v17345_v3  ;;  %10744 = vmatpush.bf16.msrb.mxu2 %v17090_v31 }
 0x804   : > { %v18629_v30 = vld [vmem:[#allocation9 + $0x924] sm:$0xf0] }
 0x805   : > { %v16801_v26 = vld [vmem:[#allocation9 + $0xb08] sm:$0xf]  ;;  %v16546_v47 = vor.u32 %v18629_v30, %v16545_v21  ;;  %10757 = vmatpush.bf16.msrb.mxu3 %v17346_v32  ;;  %v10466_v21 = vadd.f32 %v10465_v33, %v7880_v12  ;;  %v10478_v30 = vpop.f32.mrf.mxu1 }
 0x806   : > { %v18693_v63 = vld [vmem:[#allocation9 + $0xb24] sm:$0xf0] }
 0x807   : > { %v17057_v5 = vld [vmem:[#allocation9 + $0xd08] sm:$0xf]  ;;  %v16802_v36 = vor.u32 %v18693_v63, %v16801_v26  ;;  %10719 = vmatpush.bf16.msrb.mxu0 %v16546_v47  ;;  %v10479_v47 = vadd.f32 %v10478_v30, %v10466_v21  ;;  %v15523_v21 = vld [vmem:[#allocation9 + $0x128] sm:$0xf0] }
 0x808   : > { %v18757_v23 = vld [vmem:[#allocation9 + $0xd24] sm:$0xf0]  ;;  %v18433_v30 = vld [vmem:[#allocation9 + $0x30c] sm:$0xf] }
 0x809   : > { %v17313_v40 = vld [vmem:[#allocation9 + $0xf08] sm:$0xf]  ;;  %v17058_v37 = vor.u32 %v18757_v23, %v17057_v5  ;;  %10732 = vmatpush.bf16.msrb.mxu1 %v16802_v36  ;;  %v18393_v23 = vld [vmem:[#allocation9 + $0x1cc] sm:$0xf] }
 0x80a   : > { %v18821_v11 = vld [vmem:[#allocation9 + $0xf24] sm:$0xf0] }
 0x80b   : > { %v16513_v54 = vld [vmem:[#allocation9 + $0x8c8] sm:$0xf]  ;;  %v17314_v4 = vor.u32 %v18821_v11, %v17313_v40  ;;  %10745 = vmatpush.bf16.msrb.mxu2 %v17058_v37  ;;  %v15619_v40 = vld [vmem:[#allocation9 + $0x1e8] sm:$0xf0] }
 0x80c   : > { %v18621_v6 = vld [vmem:[#allocation9 + $0x8e4] sm:$0xf0]  ;;  %v18457_v11 = vld [vmem:[#allocation9 + $0x3cc] sm:$0xf] }
 0x80d   : > { %v16769_v34 = vld [vmem:[#allocation9 + $0xac8] sm:$0xf]  ;;  %v16514_v35 = vor.u32 %v18621_v6, %v16513_v54  ;;  %10758 = vmatpush.bf16.msrb.mxu3 %v17314_v4  ;;  %v15875_v37 = vld [vmem:[#allocation9 + $0x3e8] sm:$0xf0] }
 0x80e   : > { %v18685_v56 = vld [vmem:[#allocation9 + $0xae4] sm:$0xf0]  ;;  %v18521_v54 = vld [vmem:[#allocation9 + $0x5cc] sm:$0xf] }
 0x80f   : > { %v17025_v46 = vld [vmem:[#allocation9 + $0xcc8] sm:$0xf]  ;;  %v16770_v29 = vor.u32 %v18685_v56, %v16769_v34  ;;  %10720 = vmatpush.bf16.msrb.mxu0 %v16514_v35  ;;  %v16131_v6 = vld [vmem:[#allocation9 + $0x5e8] sm:$0xf0] }
 0x810   : > { %v18749_v51 = vld [vmem:[#allocation9 + $0xce4] sm:$0xf0]  ;;  %v18585_v56 = vld [vmem:[#allocation9 + $0x7cc] sm:$0xf] }
 0x811   : > { %v17281_v22 = vld [vmem:[#allocation9 + $0xec8] sm:$0xf]  ;;  %v17026_v50 = vor.u32 %v18749_v51, %v17025_v46  ;;  %10733 = vmatpush.bf16.msrb.mxu1 %v16770_v29  ;;  %v16387_v46 = vld [vmem:[#allocation9 + $0x7e8] sm:$0xf0]  ;;  %v10491_v51 = vpop.f32.mrf.mxu2  ;;  %v15878_v29 = vor.u32 %v18457_v11, %v15875_v37 }
 0x812   : > { %v18813_v48 = vld [vmem:[#allocation9 + $0xee4] sm:$0xf0]  ;;  %v10492_v35 = vadd.f32 %v10491_v51, %v10479_v47  ;;  %v15747_v51 = vld [vmem:[#allocation9 + $0x2e8] sm:$0xf0] }
 0x813   : > { %v16481_v42 = vld [vmem:[#allocation9 + $0x888] sm:$0xf]  ;;  %v17282_v38 = vor.u32 %v18813_v48, %v17281_v22  ;;  %10746 = vmatpush.bf16.msrb.mxu2 %v17026_v50  ;;  %v15622_v48 = vor.u32 %v18393_v23, %v15619_v40  ;;  %v16134_v50 = vor.u32 %v18521_v54, %v16131_v6  ;;  %v18561_v23 = vld [vmem:[#allocation9 + $0x70c] sm:$0xf] }
 0x814   : > { %v18613_v53 = vld [vmem:[#allocation9 + $0x8a4] sm:$0xf0]  ;;  %v16291_v40 = vld [vmem:[#allocation9 + $0x728] sm:$0xf0] }
 0x815   : > { %v16737_v20 = vld [vmem:[#allocation9 + $0xa88] sm:$0xf]  ;;  %v16482_v17 = vor.u32 %v18613_v53, %v16481_v42  ;;  %10759 = vmatpush.bf16.msrb.mxu3 %v17282_v38  ;;  %v10504_v42 = vpop.f32.mrf.mxu3  ;;  %v18385_v53 = vld [vmem:[#allocation9 + $0x18c] sm:$0xf]  ;;  %v16390_v38 = vor.u32 %v18585_v56, %v16387_v46  ;;  %v16294_v46 = vor.u32 %v18561_v23, %v16291_v40 }
 0x816   : > { %v18677_v58 = vld [vmem:[#allocation9 + $0xaa4] sm:$0xf0]  ;;  %v18361_v54 = vld [vmem:[#allocation9 + $0xcc] sm:$0xf] }
 0x817   : > { %v16993_v49 = vld [vmem:[#allocation9 + $0xc88] sm:$0xf]  ;;  %v16738_v52 = vor.u32 %v18677_v58, %v16737_v20  ;;  %10721 = vmatpush.bf16.msrb.mxu0 %v16482_v17  ;;  %v15587_v20 = vld [vmem:[#allocation9 + $0x1a8] sm:$0xf0]  ;;  %v10467_v17 = vpop.f32.mrf.mxu0 }
 0x818   : > { %v18741_v25 = vld [vmem:[#allocation9 + $0xca4] sm:$0xf0]  ;;  %v18449_v58 = vld [vmem:[#allocation9 + $0x38c] sm:$0xf] }
 0x819   : > { %v17249_v41 = vld [vmem:[#allocation9 + $0xe88] sm:$0xf]  ;;  %v16994_v1 = vor.u32 %v18741_v25, %v16993_v49  ;;  %10734 = vmatpush.bf16.msrb.mxu1 %v16738_v52  ;;  %v15843_v49 = vld [vmem:[#allocation9 + $0x3a8] sm:$0xf0]  ;;  %v10493_v33 = vpop.f32.mrf.mxu2 }
 0x81a   : > { %v18805_v57 = vld [vmem:[#allocation9 + $0xea4] sm:$0xf0]  ;;  %v18513_v25 = vld [vmem:[#allocation9 + $0x58c] sm:$0xf] }
 0x81b   : > { %v16449_v59 = vld [vmem:[#allocation9 + $0x848] sm:$0xf]  ;;  %v17250_v60 = vor.u32 %v18805_v57, %v17249_v41  ;;  %10747 = vmatpush.bf16.msrb.mxu2 %v16994_v1  ;;  %v16099_v41 = vld [vmem:[#allocation9 + $0x5a8] sm:$0xf0]  ;;  %v10505_v57 = vadd.f32 %v10504_v42, %v10492_v35  ;;  %v10480_v1 = vpop.f32.mrf.mxu1 }
 0x81c   : > { %v18605_v24 = vld [vmem:[#allocation9 + $0x864] sm:$0xf0]  ;;  %v16355_v52 = vld [vmem:[#allocation9 + $0x7a8] sm:$0xf0]  ;;  %v16102_v12 = vor.u32 %v18513_v25, %v16099_v41 }
 0x81d   : > { %v16705_v28 = vld [vmem:[#allocation9 + $0xa48] sm:$0xf]  ;;  %v16450_v55 = vor.u32 %v18605_v24, %v16449_v59  ;;  %10760 = vmatpush.bf16.msrb.mxu3 %v17250_v60  ;;  %v18577_v59 = vld [vmem:[#allocation9 + $0x78c] sm:$0xf]  ;;  %v15590_v24 = vor.u32 %v18385_v53, %v15587_v20 }
 0x81e   : > { %v18669_v16 = vld [vmem:[#allocation9 + $0xa64] sm:$0xf0]  ;;  %v18377_v60 = vld [vmem:[#allocation9 + $0x14c] sm:$0xf] }
 0x81f   : > { %v16961_v8 = vld [vmem:[#allocation9 + $0xc48] sm:$0xf]  ;;  %v16706_v3 = vor.u32 %v18669_v16, %v16705_v28  ;;  %10722 = vmatpush.bf16.msrb.mxu0 %v16450_v55  ;;  %v15846_v28 = vor.u32 %v18449_v58, %v15843_v49  ;;  %v15555_v16 = vld [vmem:[#allocation9 + $0x168] sm:$0xf0]  ;;  %v10517_v47 = vpop.f32.mrf.mxu0 }
 0x820   : > { %v18733_v2 = vld [vmem:[#allocation9 + $0xc64] sm:$0xf0]  ;;  %v16067_v55 = vld [vmem:[#allocation9 + $0x568] sm:$0xf0] }
 0x821   : > { %v17217_v7 = vld [vmem:[#allocation9 + $0xe48] sm:$0xf]  ;;  %v16962_v43 = vor.u32 %v18733_v2, %v16961_v8  ;;  %10735 = vmatpush.bf16.msrb.mxu1 %v16706_v3  ;;  %v18441_v8 = vld [vmem:[#allocation9 + $0x34c] sm:$0xf]  ;;  %v16358_v2 = vor.u32 %v18577_v59, %v16355_v52  ;;  %v15558_v3 = vor.u32 %v18377_v60, %v15555_v16  ;;  %v10543_v25 = vpop.f32.mrf.mxu2 }
 0x822   : > { %v18797_v14 = vld [vmem:[#allocation9 + $0xe64] sm:$0xf0]  ;;  %v15491_v6 = vld [vmem:[#allocation9 + $0xe8] sm:$0xf0] }
 0x823   : > { %v16417_v0 = vld [vmem:[#allocation9 + $0x808] sm:$0xf]  ;;  %v17218_v26 = vor.u32 %v18797_v14, %v17217_v7  ;;  %10748 = vmatpush.bf16.msrb.mxu2 %v16962_v43  ;;  %v15811_v7 = vld [vmem:[#allocation9 + $0x368] sm:$0xf0]  ;;  %v10506_v43 = vpop.f32.mrf.mxu3  ;;  %v10530_v56 = vpop.f32.mrf.mxu1 }
 0x824   : > { %v18597_v61 = vld [vmem:[#allocation9 + $0x824] sm:$0xf0]  ;;  %v18505_v14 = vld [vmem:[#allocation9 + $0x54c] sm:$0xf] }
 0x825   : > { %v16673_v45 = vld [vmem:[#allocation9 + $0xa08] sm:$0xf]  ;;  %v16418_v36 = vor.u32 %v18597_v61, %v16417_v0  ;;  %10761 = vmatpush.bf16.msrb.mxu3 %v17218_v26  ;;  %v18569_v0 = vld [vmem:[#allocation9 + $0x74c] sm:$0xf] }
 0x826   : > { %v18661_v9 = vld [vmem:[#allocation9 + $0xa24] sm:$0xf0]  ;;  %v16323_v61 = vld [vmem:[#allocation9 + $0x768] sm:$0xf0] }
 0x827   : > { %v16929_v31 = vld [vmem:[#allocation9 + $0xc08] sm:$0xf]  ;;  %v16674_v34 = vor.u32 %v18661_v9, %v16673_v45  ;;  %10723 = vmatpush.bf16.msrb.mxu0 %v16418_v36  ;;  %v15814_v45 = vor.u32 %v18441_v8, %v15811_v7  ;;  %v16070_v9 = vor.u32 %v18505_v14, %v16067_v55  ;;  %v16326_v26 = vor.u32 %v18569_v0, %v16323_v61  ;;  %v18553_v35 = vld [vmem:[#allocation9 + $0x6cc] sm:$0xf]  ;;  %v10519_v16 = vpop.f32.mrf.mxu0 }
 0x828   : > { %v18725_v32 = vld [vmem:[#allocation9 + $0xc24] sm:$0xf0]  ;;  %v16259_v42 = vld [vmem:[#allocation9 + $0x6e8] sm:$0xf0] }
 0x829   : > { %v17185_v63 = vld [vmem:[#allocation9 + $0xe08] sm:$0xf]  ;;  %v16930_v4 = vor.u32 %v18725_v32, %v16929_v31  ;;  %10736 = vmatpush.bf16.msrb.mxu1 %v16674_v34  ;;  %v18369_v31 = vld [vmem:[#allocation9 + $0x10c] sm:$0xf]  ;;  %v16262_v41 = vor.u32 %v18553_v35, %v16259_v42  ;;  %v10545_v40 = vpop.f32.mrf.mxu2 }
 0x82a   : > { %v18789_v5 = vld [vmem:[#allocation9 + $0xe24] sm:$0xf0]  ;;  %10724 = vmatmul.bf16.vlgmr.msrb.gmra.mxu0 %v21624_v13  ;;  %v15779_v32 = vld [vmem:[#allocation9 + $0x328] sm:$0xf0]  ;;  %v15526_v11 = vor.u32 %v18369_v31, %v15523_v21 }
 0x82b   : > { %v17186_v22 = vor.u32 %v18789_v5, %v17185_v63  ;;  %10749 = vmatpush.bf16.msrb.mxu2 %v16930_v4  ;;  %10768 = vmatpush.bf16.msra.mxu0 %v15622_v48  ;;  %v18497_v63 = vld [vmem:[#allocation9 + $0x50c] sm:$0xf]  ;;  %v15782_v36 = vor.u32 %v18433_v30, %v15779_v32  ;;  %v10518_v4 = vadd.f32 %v10517_v47, %v10505_v57  ;;  %v10556_v1 = vpop.f32.mrf.mxu3  ;;  %v10532_v0 = vpop.f32.mrf.mxu1 }
 0x82c   : > { %10737 = vmatmul.bf16.vlgmr.msrb.gmra.mxu1 %v21628_v62  ;;  %v16035_v5 = vld [vmem:[#allocation9 + $0x528] sm:$0xf0] }
 0x82d   : > { %10762 = vmatpush.bf16.msrb.mxu3 %v17186_v22  ;;  %10781 = vmatpush.bf16.msra.mxu1 %v15878_v29  ;;  %v16038_v37 = vor.u32 %v18497_v63, %v16035_v5  ;;  %v18425_v34 = vld [vmem:[#allocation9 + $0x2cc] sm:$0xf]  ;;  %v10531_v29 = vadd.f32 %v10530_v56, %v10518_v4 }
 0x82e   : > { %10750 = vmatmul.bf16.vlgmr.msrb.gmra.mxu2 %v21622_v10  ;;  %v18489_v22 = vld [vmem:[#allocation9 + $0x4cc] sm:$0xf]  ;;  %v15750_v53 = vor.u32 %v18425_v34, %v15747_v51 }
 0x82f   : > { %10794 = vmatpush.bf16.msra.mxu2 %v16134_v50  ;;  %10769 = vmatpush.bf16.msra.mxu0 %v15590_v24  ;;  %v16003_v48 = vld [vmem:[#allocation9 + $0x4e8] sm:$0xf0]  ;;  %v15494_v50 = vor.u32 %v18361_v54, %v15491_v6  ;;  %v10544_v52 = vadd.f32 %v10543_v25, %v10531_v29 }
 0x830   : > { %10763 = vmatmul.bf16.vlgmr.msrb.gmra.mxu3 %v21626_v18  ;;  %v16006_v20 = vor.u32 %v18489_v22, %v16003_v48  ;;  %v18353_v58 = vld [vmem:[#allocation9 + $0x8c] sm:$0xf] }
 0x831   : > { %10807 = vmatpush.bf16.msra.mxu3 %v16390_v38  ;;  %10782 = vmatpush.bf16.msra.mxu1 %v15846_v28  ;;  %v15459_v38 = vld [vmem:[#allocation9 + $0xa8] sm:$0xf0]  ;;  %v21653_v60 = vadd.f32 %v10556_v1, %v10544_v52 }
 0x832   : > { %v18417_v49 = vld [vmem:[#allocation9 + $0x28c] sm:$0xf] }
 0x833   : > { %10795 = vmatpush.bf16.msra.mxu2 %v16102_v12  ;;  %10770 = vmatpush.bf16.msra.mxu0 %v15558_v3  ;;  %v15715_v57 = vld [vmem:[#allocation9 + $0x2a8] sm:$0xf0]  ;;  %v15462_v12 = vor.u32 %v18353_v58, %v15459_v38  ;;  %v10558_v54 = vpop.f32.mrf.mxu3 }
 0x834   : > { %v18481_v17 = vld [vmem:[#allocation9 + $0x48c] sm:$0xf]  ;;  %v15718_v8 = vor.u32 %v18417_v49, %v15715_v57 }
 0x835   : > { %10808 = vmatpush.bf16.msra.mxu3 %v16358_v2  ;;  %10783 = vmatpush.bf16.msra.mxu1 %v15814_v45  ;;  %v15971_v59 = vld [vmem:[#allocation9 + $0x4a8] sm:$0xf0] }
 0x836   : > { %v18545_v24 = vld [vmem:[#allocation9 + $0x68c] sm:$0xf]  ;;  %v15974_v2 = vor.u32 %v18481_v17, %v15971_v59 }
 0x837   : > { %10796 = vmatpush.bf16.msra.mxu2 %v16070_v9  ;;  %10771 = vmatpush.bf16.msra.mxu0 %v15526_v11  ;;  %v16227_v28 = vld [vmem:[#allocation9 + $0x6a8] sm:$0xf0] }
 0x838   : > { %v18345_v7 = vld [vmem:[#allocation9 + $0x4c] sm:$0xf]  ;;  %v16230_v61 = vor.u32 %v18545_v24, %v16227_v28 }
 0x839   : > { %10809 = vmatpush.bf16.msra.mxu3 %v16326_v26  ;;  %10784 = vmatpush.bf16.msra.mxu1 %v15782_v36  ;;  %v15427_v14 = vld [vmem:[#allocation9 + $0x68] sm:$0xf0] }
 0x83a   : > { %v18409_v55 = vld [vmem:[#allocation9 + $0x24c] sm:$0xf]  ;;  %v15430_v31 = vor.u32 %v18345_v7, %v15427_v14 }
 0x83b   : > { %10797 = vmatpush.bf16.msra.mxu2 %v16038_v37  ;;  %10772 = vmatpush.bf16.msra.mxu0 %v15494_v50  ;;  %v15683_v33 = vld [vmem:[#allocation9 + $0x268] sm:$0xf0] }
 0x83c   : > { %v18473_v3 = vld [vmem:[#allocation9 + $0x44c] sm:$0xf]  ;;  %v15686_v26 = vor.u32 %v18409_v55, %v15683_v33 }
 0x83d   : > { %10810 = vmatpush.bf16.msra.mxu3 %v16294_v46  ;;  %10785 = vmatpush.bf16.msra.mxu1 %v15750_v53  ;;  %v15939_v43 = vld [vmem:[#allocation9 + $0x468] sm:$0xf0] }
 0x83e   : > { %v18537_v45 = vld [vmem:[#allocation9 + $0x64c] sm:$0xf]  ;;  %v15942_v32 = vor.u32 %v18473_v3, %v15939_v43 }
 0x83f   : > { %10798 = vmatpush.bf16.msra.mxu2 %v16006_v20  ;;  %v16195_v9 = vld [vmem:[#allocation9 + $0x668] sm:$0xf0]  ;;  %10773 = vmatpush.bf16.msra.mxu0 %v15462_v12 }
 0x840   : > { %v18337_v21 = vld [vmem:[#allocation9 + $0xc] sm:$0xf]  ;;  %v16198_v11 = vor.u32 %v18537_v45, %v16195_v9 }
 0x841   : > { %10811 = vmatpush.bf16.msra.mxu3 %v16262_v41  ;;  %v15395_v30 = vld [vmem:[#allocation9 + $0x28] sm:$0xf0]  ;;  %10786 = vmatpush.bf16.msra.mxu1 %v15718_v8 }
 0x842   : > { %v18401_v63 = vld [vmem:[#allocation9 + $0x20c] sm:$0xf]  ;;  %v15398_v56 = vor.u32 %v18337_v21, %v15395_v30  ;;  %v7881_v30 = vperm.slane %v21646_v15, 1 }
 0x843   : > { %10799 = vmatpush.bf16.msra.mxu2 %v15974_v2  ;;  %v15651_v5 = vld [vmem:[#allocation9 + $0x228] sm:$0xf0]  ;;  %10774 = vmatpush.bf16.msra.mxu0 %v15430_v31 }
 0x844   : > { %v18465_v23 = vld [vmem:[#allocation9 + $0x40c] sm:$0xf]  ;;  %v15654_v48 = vor.u32 %v18401_v63, %v15651_v5 }
 0x845   : > { %10812 = vmatpush.bf16.msra.mxu3 %v16230_v61  ;;  %v15907_v47 = vld [vmem:[#allocation9 + $0x428] sm:$0xf0]  ;;  %10787 = vmatpush.bf16.msra.mxu1 %v15686_v26 }
 0x846   : > { %v18529_v36 = vld [vmem:[#allocation9 + $0x60c] sm:$0xf]  ;;  %v15910_v35 = vor.u32 %v18465_v23, %v15907_v47  ;;  %v10569_v47 = vpop.f32.mrf.mxu0 }
 0x847   : > { %v16163_v37 = vld [vmem:[#allocation9 + $0x628] sm:$0xf0]  ;;  %10800 = vmatpush.bf16.msra.mxu2 %v15942_v32  ;;  %10775 = vmatpush.bf16.msra.mxu0 %v15398_v56  ;;  %v10582_v56 = vpop.f32.mrf.mxu1 }
 0x848   : > { %v18649_v6 = vld [vmem:[#allocation9 + $0x9cc] sm:$0xf]  ;;  %v16166_v50 = vor.u32 %v18529_v36, %v16163_v37 }
 0x849   : > { %v16643_v34 = vld [vmem:[#allocation9 + $0x9e8] sm:$0xf0]  ;;  %10813 = vmatpush.bf16.msra.mxu3 %v16198_v11  ;;  %10788 = vmatpush.bf16.msra.mxu1 %v15654_v48 }
 0x84a   : > { %v18713_v4 = vld [vmem:[#allocation9 + $0xbcc] sm:$0xf]  ;;  %v16646_v53 = vor.u32 %v18649_v6, %v16643_v34  ;;  %10776 = vmatmul.bf16.vlgmr.msra.gmra.mxu0 %v21608_v19 }
 0x84b   : > { %v16899_v46 = vld [vmem:[#allocation9 + $0xbe8] sm:$0xf0]  ;;  %10801 = vmatpush.bf16.msra.mxu2 %v15910_v35 }
 0x84c   : > { %v18777_v51 = vld [vmem:[#allocation9 + $0xdcc] sm:$0xf]  ;;  %v16902_v20 = vor.u32 %v18713_v4, %v16899_v46  ;;  %10820 = vmatpush.bf16.msrb.mxu0 %v16646_v53  ;;  %10789 = vmatmul.bf16.vlgmr.msra.gmra.mxu1 %v21613_v39  ;;  %v10570_v4 = vadd.f32 %v10569_v47, %v7881_v30 }
 0x84d   : > { %v17155_v22 = vld [vmem:[#allocation9 + $0xde8] sm:$0xf0]  ;;  %10814 = vmatpush.bf16.msra.mxu3 %v16166_v50 }
 0x84e   : > { %v18841_v42 = vld [vmem:[#allocation9 + $0xfcc] sm:$0xf]  ;;  %v17158_v58 = vor.u32 %v18777_v51, %v17155_v22  ;;  %10833 = vmatpush.bf16.msrb.mxu1 %v16902_v20  ;;  %10802 = vmatmul.bf16.vlgmr.msra.gmra.mxu2 %v21606_v44 }
 0x84f   : > { %v17411_v29 = vld [vmem:[#allocation9 + $0xfe8] sm:$0xf0] }
 0x850   : > { %v18641_v38 = vld [vmem:[#allocation9 + $0x98c] sm:$0xf]  ;;  %v17414_v41 = vor.u32 %v18841_v42, %v17411_v29  ;;  %10846 = vmatpush.bf16.msrb.mxu2 %v17158_v58  ;;  %10815 = vmatmul.bf16.vlgmr.msra.gmra.mxu3 %v21610_v27  ;;  %v10583_v42 = vadd.f32 %v10582_v56, %v10570_v4  ;;  %v15881_v4 = vld [vmem:[#allocation9 + $0x3d0] sm:$0xf] }
 0x851   : > { %v16611_v49 = vld [vmem:[#allocation9 + $0x9a8] sm:$0xf0] }
 0x852   : > { %v18705_v25 = vld [vmem:[#allocation9 + $0xb8c] sm:$0xf]  ;;  %v16614_v24 = vor.u32 %v18641_v38, %v16611_v49  ;;  %10859 = vmatpush.bf16.msrb.mxu3 %v17414_v41  ;;  %v10595_v49 = vpop.f32.mrf.mxu2 }
 0x853   : > { %v16867_v57 = vld [vmem:[#allocation9 + $0xba8] sm:$0xf0] }
 0x854   : > { %v18769_v17 = vld [vmem:[#allocation9 + $0xd8c] sm:$0xf]  ;;  %v16870_v28 = vor.u32 %v18705_v25, %v16867_v57  ;;  %10821 = vmatpush.bf16.msrb.mxu0 %v16614_v24 }
 0x855   : > { %v17123_v59 = vld [vmem:[#allocation9 + $0xda8] sm:$0xf0] }
 0x856   : > { %v18833_v52 = vld [vmem:[#allocation9 + $0xf8c] sm:$0xf]  ;;  %v17126_v12 = vor.u32 %v18769_v17, %v17123_v59  ;;  %10834 = vmatpush.bf16.msrb.mxu1 %v16870_v28  ;;  %v10596_v59 = vadd.f32 %v10595_v49, %v10583_v42  ;;  %v18590_v42 = vld [vmem:[#allocation9 + $0x7ec] sm:$0xf0] }
 0x857   : > { %v17379_v1 = vld [vmem:[#allocation9 + $0xfa8] sm:$0xf0]  ;;  %v15849_v49 = vld [vmem:[#allocation9 + $0x390] sm:$0xf] }
 0x858   : > { %v18633_v16 = vld [vmem:[#allocation9 + $0x94c] sm:$0xf]  ;;  %v17382_v7 = vor.u32 %v18833_v52, %v17379_v1  ;;  %10847 = vmatpush.bf16.msrb.mxu2 %v17126_v12  ;;  %v10608_v52 = vpop.f32.mrf.mxu3 }
 0x859   : > { %v16579_v8 = vld [vmem:[#allocation9 + $0x968] sm:$0xf0]  ;;  %v21660_v12 = vadd.f32 %v10608_v52, %v10596_v59  ;;  %v16361_v59 = vld [vmem:[#allocation9 + $0x790] sm:$0xf] }
 0x85a   : > { %v18697_v2 = vld [vmem:[#allocation9 + $0xb4c] sm:$0xf]  ;;  %v16582_v3 = vor.u32 %v18633_v16, %v16579_v8  ;;  %10860 = vmatpush.bf16.msrb.mxu3 %v17382_v7  ;;  %v10571_v16 = vpop.f32.mrf.mxu0  ;;  %v18582_v52 = vld [vmem:[#allocation9 + $0x7ac] sm:$0xf0] }
 0x85b   : > { %v16835_v14 = vld [vmem:[#allocation9 + $0xb68] sm:$0xf0]  ;;  %v15561_v16 = vld [vmem:[#allocation9 + $0x150] sm:$0xf] }
 0x85c   : > { %v18761_v55 = vld [vmem:[#allocation9 + $0xd4c] sm:$0xf]  ;;  %v16838_v45 = vor.u32 %v18697_v2, %v16835_v14  ;;  %10822 = vmatpush.bf16.msrb.mxu0 %v16582_v3 }
 0x85d   : > { %v17091_v0 = vld [vmem:[#allocation9 + $0xd68] sm:$0xf0] }
 0x85e   : > { %v18825_v61 = vld [vmem:[#allocation9 + $0xf4c] sm:$0xf]  ;;  %v17094_v9 = vor.u32 %v18761_v55, %v17091_v0  ;;  %10835 = vmatpush.bf16.msrb.mxu1 %v16838_v45  ;;  %v10584_v0 = vpop.f32.mrf.mxu1 }
 0x85f   : > { %v17347_v33 = vld [vmem:[#allocation9 + $0xf68] sm:$0xf0]  ;;  %v18510_v0 = vld [vmem:[#allocation9 + $0x56c] sm:$0xf0] }
 0x860   : > { %v18625_v43 = vld [vmem:[#allocation9 + $0x90c] sm:$0xf]  ;;  %v17350_v26 = vor.u32 %v18825_v61, %v17347_v33  ;;  %10848 = vmatpush.bf16.msrb.mxu2 %v17094_v9 }
 0x861   : > { %v16547_v31 = vld [vmem:[#allocation9 + $0x928] sm:$0xf0] }
 0x862   : > { %v18689_v21 = vld [vmem:[#allocation9 + $0xb0c] sm:$0xf]  ;;  %v16550_v11 = vor.u32 %v18625_v43, %v16547_v31  ;;  %10861 = vmatpush.bf16.msrb.mxu3 %v17350_v26 }
 0x863   : > { %v16803_v32 = vld [vmem:[#allocation9 + $0xb28] sm:$0xf0] }
 0x864   : > { %v18753_v63 = vld [vmem:[#allocation9 + $0xd0c] sm:$0xf]  ;;  %v16806_v36 = vor.u32 %v18689_v21, %v16803_v32  ;;  %10823 = vmatpush.bf16.msrb.mxu0 %v16550_v11 }
 0x865   : > { %v17059_v5 = vld [vmem:[#allocation9 + $0xd28] sm:$0xf0] }
 0x866   : > { %v18817_v23 = vld [vmem:[#allocation9 + $0xf0c] sm:$0xf]  ;;  %v17062_v37 = vor.u32 %v18753_v63, %v17059_v5  ;;  %10836 = vmatpush.bf16.msrb.mxu1 %v16806_v36 }
 0x867   : > { %v17315_v40 = vld [vmem:[#allocation9 + $0xf28] sm:$0xf0] }
 0x868   : > { %v18617_v54 = vld [vmem:[#allocation9 + $0x8cc] sm:$0xf]  ;;  %v17318_v15 = vor.u32 %v18817_v23, %v17315_v40  ;;  %10849 = vmatpush.bf16.msrb.mxu2 %v17062_v37  ;;  %v10597_v40 = vpop.f32.mrf.mxu2 }
 0x869   : > { %v16515_v6 = vld [vmem:[#allocation9 + $0x8e8] sm:$0xf0] }
 0x86a   : > { %v18681_v34 = vld [vmem:[#allocation9 + $0xacc] sm:$0xf]  ;;  %v16518_v29 = vor.u32 %v18617_v54, %v16515_v6  ;;  %10862 = vmatpush.bf16.msrb.mxu3 %v17318_v15  ;;  %v10610_v54 = vpop.f32.mrf.mxu3  ;;  %v15625_v6 = vld [vmem:[#allocation9 + $0x1d0] sm:$0xf] }
 0x86b   : > { %v16771_v46 = vld [vmem:[#allocation9 + $0xae8] sm:$0xf0]  ;;  %v18462_v15 = vld [vmem:[#allocation9 + $0x3ec] sm:$0xf0] }
 0x86c   : > { %v18745_v51 = vld [vmem:[#allocation9 + $0xccc] sm:$0xf]  ;;  %v16774_v50 = vor.u32 %v18681_v34, %v16771_v46  ;;  %10824 = vmatpush.bf16.msrb.mxu0 %v16518_v29  ;;  %v18398_v34 = vld [vmem:[#allocation9 + $0x1ec] sm:$0xf0] }
 0x86d   : > { %v17027_v22 = vld [vmem:[#allocation9 + $0xce8] sm:$0xf0]  ;;  %v16137_v46 = vld [vmem:[#allocation9 + $0x5d0] sm:$0xf] }
 0x86e   : > { %v18809_v48 = vld [vmem:[#allocation9 + $0xecc] sm:$0xf]  ;;  %v17030_v53 = vor.u32 %v18745_v51, %v17027_v22  ;;  %10837 = vmatpush.bf16.msrb.mxu1 %v16774_v50  ;;  %v18526_v51 = vld [vmem:[#allocation9 + $0x5ec] sm:$0xf0]  ;;  %v15626_v50 = vor.u32 %v18398_v34, %v15625_v6 }
 0x86f   : > { %v17283_v35 = vld [vmem:[#allocation9 + $0xee8] sm:$0xf0]  ;;  %v18366_v54 = vld [vmem:[#allocation9 + $0xec] sm:$0xf0] }
 0x870   : > { %v18609_v20 = vld [vmem:[#allocation9 + $0x88c] sm:$0xf]  ;;  %v17286_v25 = vor.u32 %v18809_v48, %v17283_v35  ;;  %10850 = vmatpush.bf16.msrb.mxu2 %v17030_v53  ;;  %v16393_v35 = vld [vmem:[#allocation9 + $0x7d0] sm:$0xf]  ;;  %v15882_v53 = vor.u32 %v18462_v15, %v15881_v4  ;;  %v10634_v4 = vpop.f32.mrf.mxu1 }
 0x871   : > { %v16483_v58 = vld [vmem:[#allocation9 + $0x8a8] sm:$0xf0]  ;;  %v15753_v6 = vld [vmem:[#allocation9 + $0x2d0] sm:$0xf] }
 0x872   : > { %v18673_v38 = vld [vmem:[#allocation9 + $0xa8c] sm:$0xf]  ;;  %v16486_v28 = vor.u32 %v18609_v20, %v16483_v58  ;;  %10863 = vmatpush.bf16.msrb.mxu3 %v17286_v25  ;;  %v16138_v20 = vor.u32 %v18526_v51, %v16137_v46  ;;  %v15593_v58 = vld [vmem:[#allocation9 + $0x190] sm:$0xf]  ;;  %v16394_v25 = vor.u32 %v18590_v42, %v16393_v35 }
 0x873   : > { %v16739_v41 = vld [vmem:[#allocation9 + $0xaa8] sm:$0xf0]  ;;  %v18430_v15 = vld [vmem:[#allocation9 + $0x2ec] sm:$0xf0] }
 0x874   : > { %v18737_v57 = vld [vmem:[#allocation9 + $0xc8c] sm:$0xf]  ;;  %v16742_v8 = vor.u32 %v18673_v38, %v16739_v41  ;;  %10825 = vmatpush.bf16.msrb.mxu0 %v16486_v28  ;;  %v18390_v38 = vld [vmem:[#allocation9 + $0x1ac] sm:$0xf0] }
 0x875   : > { %v16995_v17 = vld [vmem:[#allocation9 + $0xca8] sm:$0xf0]  ;;  %v18454_v41 = vld [vmem:[#allocation9 + $0x3ac] sm:$0xf0] }
 0x876   : > { %v18801_v1 = vld [vmem:[#allocation9 + $0xe8c] sm:$0xf]  ;;  %v16998_v2 = vor.u32 %v18737_v57, %v16995_v17  ;;  %10838 = vmatpush.bf16.msrb.mxu1 %v16742_v8  ;;  %v16105_v57 = vld [vmem:[#allocation9 + $0x590] sm:$0xf] }
 0x877   : > { %v17251_v24 = vld [vmem:[#allocation9 + $0xea8] sm:$0xf0]  ;;  %v18518_v17 = vld [vmem:[#allocation9 + $0x5ac] sm:$0xf0] }
 0x878   : > { %v18601_v7 = vld [vmem:[#allocation9 + $0x84c] sm:$0xf]  ;;  %v17254_v61 = vor.u32 %v18801_v1, %v17251_v24  ;;  %10851 = vmatpush.bf16.msrb.mxu2 %v16998_v2  ;;  %v15594_v1 = vor.u32 %v18390_v38, %v15593_v58  ;;  %v15850_v24 = vor.u32 %v18454_v41, %v15849_v49  ;;  %v16106_v28 = vor.u32 %v18518_v17, %v16105_v57  ;;  %v18382_v8 = vld [vmem:[#allocation9 + $0x16c] sm:$0xf0]  ;;  %v10647_v38 = vpop.f32.mrf.mxu2  ;;  %v10660_v17 = vpop.f32.mrf.mxu3 }
 0x879   : > { %v16451_v14 = vld [vmem:[#allocation9 + $0x868] sm:$0xf0]  ;;  %v15817_v2 = vld [vmem:[#allocation9 + $0x350] sm:$0xf] }
 0x87a   : > { %v18665_v55 = vld [vmem:[#allocation9 + $0xa4c] sm:$0xf]  ;;  %v16454_v31 = vor.u32 %v18601_v7, %v16451_v14  ;;  %10864 = vmatpush.bf16.msrb.mxu3 %v17254_v61  ;;  %v16362_v7 = vor.u32 %v18582_v52, %v16361_v59  ;;  %v18446_v14 = vld [vmem:[#allocation9 + $0x36c] sm:$0xf0] }
 0x87b   : > { %v16707_v33 = vld [vmem:[#allocation9 + $0xa68] sm:$0xf0]  ;;  %v16329_v61 = vld [vmem:[#allocation9 + $0x750] sm:$0xf] }
 0x87c   : > { %v18729_v3 = vld [vmem:[#allocation9 + $0xc4c] sm:$0xf]  ;;  %v16710_v26 = vor.u32 %v18665_v55, %v16707_v33  ;;  %10826 = vmatpush.bf16.msrb.mxu0 %v16454_v31  ;;  %v16073_v55 = vld [vmem:[#allocation9 + $0x550] sm:$0xf] }
 0x87d   : > { %v16963_v43 = vld [vmem:[#allocation9 + $0xc68] sm:$0xf0]  ;;  %v18574_v33 = vld [vmem:[#allocation9 + $0x76c] sm:$0xf0] }
 0x87e   : > { %v18793_v45 = vld [vmem:[#allocation9 + $0xe4c] sm:$0xf]  ;;  %v16966_v32 = vor.u32 %v18729_v3, %v16963_v43  ;;  %10839 = vmatpush.bf16.msrb.mxu1 %v16710_v26  ;;  %v15562_v3 = vor.u32 %v18382_v8, %v15561_v16  ;;  %v15818_v43 = vor.u32 %v18446_v14, %v15817_v2  ;;  %v18374_v31 = vld [vmem:[#allocation9 + $0x12c] sm:$0xf0] }
 0x87f   : > { %v17219_v9 = vld [vmem:[#allocation9 + $0xe68] sm:$0xf0]  ;;  %v18438_v26 = vld [vmem:[#allocation9 + $0x32c] sm:$0xf0] }
 0x880   : > { %v18593_v21 = vld [vmem:[#allocation9 + $0x80c] sm:$0xf]  ;;  %v17222_v11 = vor.u32 %v18793_v45, %v17219_v9  ;;  %10852 = vmatpush.bf16.msrb.mxu2 %v16966_v32  ;;  %v16074_v45 = vor.u32 %v18510_v0, %v16073_v55  ;;  %v15529_v9 = vld [vmem:[#allocation9 + $0x110] sm:$0xf]  ;;  %v10636_v55 = vpop.f32.mrf.mxu1 }
 0x881   : > { %v16419_v30 = vld [vmem:[#allocation9 + $0x828] sm:$0xf0]  ;;  %v16041_v32 = vld [vmem:[#allocation9 + $0x510] sm:$0xf]  ;;  %v15530_v40 = vor.u32 %v18374_v31, %v15529_v9 }
 0x882   : > { %v18657_v63 = vld [vmem:[#allocation9 + $0xa0c] sm:$0xf]  ;;  %v16422_v56 = vor.u32 %v18593_v21, %v16419_v30  ;;  %10865 = vmatpush.bf16.msrb.mxu3 %v17222_v11  ;;  %v15785_v21 = vld [vmem:[#allocation9 + $0x310] sm:$0xf]  ;;  %v16330_v30 = vor.u32 %v18574_v33, %v16329_v61  ;;  %v10621_v11 = vpop.f32.mrf.mxu0 }
 0x883   : > { %v16675_v5 = vld [vmem:[#allocation9 + $0xa28] sm:$0xf0]  ;;  %v10622_v34 = vadd.f32 %v10621_v11, %v21660_v12  ;;  %v16009_v46 = vld [vmem:[#allocation9 + $0x4d0] sm:$0xf] }
 0x884   : > { %v18721_v23 = vld [vmem:[#allocation9 + $0xc0c] sm:$0xf]  ;;  %v16678_v22 = vor.u32 %v18657_v63, %v16675_v5  ;;  %10827 = vmatpush.bf16.msrb.mxu0 %v16422_v56  ;;  %v18502_v63 = vld [vmem:[#allocation9 + $0x52c] sm:$0xf0] }
 0x885   : > { %v16931_v47 = vld [vmem:[#allocation9 + $0xc28] sm:$0xf0]  ;;  %v16297_v5 = vld [vmem:[#allocation9 + $0x710] sm:$0xf]  ;;  %v10635_v35 = vadd.f32 %v10634_v4, %v10622_v34 }
 0x886   : > { %v18785_v36 = vld [vmem:[#allocation9 + $0xe0c] sm:$0xf]  ;;  %v16934_v48 = vor.u32 %v18721_v23, %v16931_v47  ;;  %10840 = vmatpush.bf16.msrb.mxu1 %v16678_v22  ;;  %v18566_v23 = vld [vmem:[#allocation9 + $0x72c] sm:$0xf0]  ;;  %v15786_v47 = vor.u32 %v18438_v26, %v15785_v21 }
 0x887   : > { %v17187_v37 = vld [vmem:[#allocation9 + $0xe28] sm:$0xf0]  ;;  %10828 = vmatmul.bf16.vlgmr.msrb.gmra.mxu0 %v21624_v13  ;;  %v16298_v56 = vor.u32 %v18566_v23, %v16297_v5  ;;  %v18494_v51 = vld [vmem:[#allocation9 + $0x4ec] sm:$0xf0]  ;;  %v10648_v57 = vadd.f32 %v10647_v38, %v10635_v35  ;;  %v10649_v23 = vpop.f32.mrf.mxu2 }
 0x888   : > { %v17190_v29 = vor.u32 %v18785_v36, %v17187_v37  ;;  %10853 = vmatpush.bf16.msrb.mxu2 %v16934_v48  ;;  %10872 = vmatpush.bf16.msra.mxu0 %v15626_v50  ;;  %v16042_v36 = vor.u32 %v18502_v63, %v16041_v32  ;;  %v15497_v37 = vld [vmem:[#allocation9 + $0xd0] sm:$0xf]  ;;  %v16010_v50 = vor.u32 %v18494_v51, %v16009_v46 }
 0x889   : > { %10841 = vmatmul.bf16.vlgmr.msrb.gmra.mxu1 %v21628_v62  ;;  %v16265_v22 = vld [vmem:[#allocation9 + $0x6d0] sm:$0xf]  ;;  %v15498_v42 = vor.u32 %v18366_v54, %v15497_v37  ;;  %v10662_v37 = vpop.f32.mrf.mxu3 }
 0x88a   : > { %10866 = vmatpush.bf16.msrb.mxu3 %v17190_v29  ;;  %10885 = vmatpush.bf16.msra.mxu1 %v15882_v53  ;;  %v18558_v48 = vld [vmem:[#allocation9 + $0x6ec] sm:$0xf0]  ;;  %v15754_v29 = vor.u32 %v18430_v15, %v15753_v6 }
 0x88b   : > { %10854 = vmatmul.bf16.vlgmr.msrb.gmra.mxu2 %v21622_v10  ;;  %v15465_v53 = vld [vmem:[#allocation9 + $0x90] sm:$0xf]  ;;  %v16266_v12 = vor.u32 %v18558_v48, %v16265_v22 }
 0x88c   : > { %10898 = vmatpush.bf16.msra.mxu2 %v16138_v20  ;;  %10873 = vmatpush.bf16.msra.mxu0 %v15594_v1  ;;  %v18358_v20 = vld [vmem:[#allocation9 + $0xac] sm:$0xf0] }
 0x88d   : > { %10867 = vmatmul.bf16.vlgmr.msrb.gmra.mxu3 %v21626_v18  ;;  %v15721_v58 = vld [vmem:[#allocation9 + $0x290] sm:$0xf]  ;;  %v15466_v1 = vor.u32 %v18358_v20, %v15465_v53 }
 0x88e   : > { %10911 = vmatpush.bf16.msra.mxu3 %v16394_v25  ;;  %10886 = vmatpush.bf16.msra.mxu1 %v15850_v24  ;;  %v18422_v49 = vld [vmem:[#allocation9 + $0x2ac] sm:$0xf0]  ;;  %v21667_v24 = vadd.f32 %v10660_v17, %v10648_v57 }
 0x88f   : > { %v15977_v25 = vld [vmem:[#allocation9 + $0x490] sm:$0xf]  ;;  %v15722_v16 = vor.u32 %v18422_v49, %v15721_v58 }
 0x890   : > { %10899 = vmatpush.bf16.msra.mxu2 %v16106_v28  ;;  %10874 = vmatpush.bf16.msra.mxu0 %v15562_v3  ;;  %v18486_v41 = vld [vmem:[#allocation9 + $0x4ac] sm:$0xf0]  ;;  %v10623_v28 = vpop.f32.mrf.mxu0 }
 0x891   : > { %v16233_v59 = vld [vmem:[#allocation9 + $0x690] sm:$0xf]  ;;  %v15978_v8 = vor.u32 %v18486_v41, %v15977_v25 }
 0x892   : > { %10912 = vmatpush.bf16.msra.mxu3 %v16362_v7  ;;  %10887 = vmatpush.bf16.msra.mxu1 %v15818_v43  ;;  %v18550_v52 = vld [vmem:[#allocation9 + $0x6ac] sm:$0xf0] }
 0x893   : > { %v15433_v2 = vld [vmem:[#allocation9 + $0x50] sm:$0xf]  ;;  %v16234_v0 = vor.u32 %v18550_v52, %v16233_v59 }
 0x894   : > { %10900 = vmatpush.bf16.msra.mxu2 %v16074_v45  ;;  %10875 = vmatpush.bf16.msra.mxu0 %v15530_v40  ;;  %v18350_v7 = vld [vmem:[#allocation9 + $0x6c] sm:$0xf0] }
 0x895   : > { %v15689_v14 = vld [vmem:[#allocation9 + $0x250] sm:$0xf]  ;;  %v15434_v9 = vor.u32 %v18350_v7, %v15433_v2 }
 0x896   : > { %10913 = vmatpush.bf16.msra.mxu3 %v16330_v30  ;;  %10888 = vmatpush.bf16.msra.mxu1 %v15786_v47  ;;  %v18414_v61 = vld [vmem:[#allocation9 + $0x26c] sm:$0xf0] }
 0x897   : > { %v15945_v33 = vld [vmem:[#allocation9 + $0x450] sm:$0xf]  ;;  %v15690_v30 = vor.u32 %v18414_v61, %v15689_v14 }
 0x898   : > { %10901 = vmatpush.bf16.msra.mxu2 %v16042_v36  ;;  %10876 = vmatpush.bf16.msra.mxu0 %v15498_v42  ;;  %v18478_v3 = vld [vmem:[#allocation9 + $0x46c] sm:$0xf0] }
 0x899   : > { %v16201_v43 = vld [vmem:[#allocation9 + $0x650] sm:$0xf]  ;;  %v15946_v26 = vor.u32 %v18478_v3, %v15945_v33 }
 0x89a   : > { %10914 = vmatpush.bf16.msra.mxu3 %v16298_v56  ;;  %10889 = vmatpush.bf16.msra.mxu1 %v15754_v29  ;;  %v18542_v45 = vld [vmem:[#allocation9 + $0x66c] sm:$0xf0] }
 0x89b   : > { %v15401_v31 = vld [vmem:[#allocation9 + $0x10] sm:$0xf]  ;;  %v16202_v40 = vor.u32 %v18542_v45, %v16201_v43 }
 0x89c   : > { %10902 = vmatpush.bf16.msra.mxu2 %v16010_v50  ;;  %10877 = vmatpush.bf16.msra.mxu0 %v15466_v1  ;;  %v18342_v21 = vld [vmem:[#allocation9 + $0x2c] sm:$0xf0] }
 0x89d   : > { %v15657_v32 = vld [vmem:[#allocation9 + $0x210] sm:$0xf]  ;;  %v15402_v4 = vor.u32 %v18342_v21, %v15401_v31 }
 0x89e   : > { %10915 = vmatpush.bf16.msra.mxu3 %v16266_v12  ;;  %10890 = vmatpush.bf16.msra.mxu1 %v15722_v16  ;;  %v18406_v63 = vld [vmem:[#allocation9 + $0x22c] sm:$0xf0] }
 0x89f   : > { %v15913_v5 = vld [vmem:[#allocation9 + $0x410] sm:$0xf]  ;;  %v15658_v51 = vor.u32 %v18406_v63, %v15657_v32 }
 0x8a0   : > { %10903 = vmatpush.bf16.msra.mxu2 %v15978_v8  ;;  %v18470_v11 = vld [vmem:[#allocation9 + $0x42c] sm:$0xf0]  ;;  %10878 = vmatpush.bf16.msra.mxu0 %v15434_v9 }
 0x8a1   : > { %v16169_v47 = vld [vmem:[#allocation9 + $0x610] sm:$0xf]  ;;  %v15914_v22 = vor.u32 %v18470_v11, %v15913_v5 }
 0x8a2   : > { %10916 = vmatpush.bf16.msra.mxu3 %v16234_v0  ;;  %v18534_v36 = vld [vmem:[#allocation9 + $0x62c] sm:$0xf0]  ;;  %10891 = vmatpush.bf16.msra.mxu1 %v15690_v30 }
 0x8a3   : > { %v16649_v54 = vld [vmem:[#allocation9 + $0x9d0] sm:$0xf]  ;;  %v16170_v42 = vor.u32 %v18534_v36, %v16169_v47 }
 0x8a4   : > { %v18654_v6 = vld [vmem:[#allocation9 + $0x9ec] sm:$0xf0]  ;;  %10904 = vmatpush.bf16.msra.mxu2 %v15946_v26  ;;  %10879 = vmatpush.bf16.msra.mxu0 %v15402_v4 }
 0x8a5   : > { %v16905_v34 = vld [vmem:[#allocation9 + $0xbd0] sm:$0xf]  ;;  %v16650_v29 = vor.u32 %v18654_v6, %v16649_v54  ;;  %v21675_v6 = vpop.f32.mrf.mxu1 }
 0x8a6   : > { %v18718_v56 = vld [vmem:[#allocation9 + $0xbec] sm:$0xf0]  ;;  %10917 = vmatpush.bf16.msra.mxu3 %v16202_v40  ;;  %10892 = vmatpush.bf16.msra.mxu1 %v15658_v51  ;;  %v21673_v40 = vpop.f32.mrf.mxu0 }
 0x8a7   : > { %v17161_v15 = vld [vmem:[#allocation9 + $0xdd0] sm:$0xf]  ;;  %v16906_v50 = vor.u32 %v18718_v56, %v16905_v34  ;;  %10880 = vmatmul.bf16.vlgmr.msra.gmra.mxu0 %v21608_v19 }
 0x8a8   : > { %v18782_v46 = vld [vmem:[#allocation9 + $0xdec] sm:$0xf0]  ;;  %10905 = vmatpush.bf16.msra.mxu2 %v15914_v22  ;;  %10924 = vmatpush.bf16.msrb.mxu0 %v16650_v29 }
 0x8a9   : > { %v17417_v48 = vld [vmem:[#allocation9 + $0xfd0] sm:$0xf]  ;;  %v17162_v53 = vor.u32 %v18782_v46, %v17161_v15  ;;  %10893 = vmatmul.bf16.vlgmr.msra.gmra.mxu1 %v21613_v39 }
 0x8aa   : > { %v18846_v35 = vld [vmem:[#allocation9 + $0xfec] sm:$0xf0]  ;;  %10918 = vmatpush.bf16.msra.mxu3 %v16170_v42  ;;  %10937 = vmatpush.bf16.msrb.mxu1 %v16906_v50 }
 0x8ab   : > { %v16617_v20 = vld [vmem:[#allocation9 + $0x990] sm:$0xf]  ;;  %v17418_v12 = vor.u32 %v18846_v35, %v17417_v48  ;;  %10906 = vmatmul.bf16.vlgmr.msra.gmra.mxu2 %v21606_v44 }
 0x8ac   : > { %v18646_v58 = vld [vmem:[#allocation9 + $0x9ac] sm:$0xf0]  ;;  %10950 = vmatpush.bf16.msrb.mxu2 %v17162_v53  ;;  %v21677_v53 = vpop.f32.mrf.mxu2 }
 0x8ad   : > { %v16873_v38 = vld [vmem:[#allocation9 + $0xb90] sm:$0xf]  ;;  %v16618_v59 = vor.u32 %v18646_v58, %v16617_v20  ;;  %10919 = vmatmul.bf16.vlgmr.msra.gmra.mxu3 %v21610_v27 }
 0x8ae   : > { %v18710_v49 = vld [vmem:[#allocation9 + $0xbac] sm:$0xf0]  ;;  %10963 = vmatpush.bf16.msrb.mxu3 %v17418_v12 }
 0x8af   : > { %v17129_v25 = vld [vmem:[#allocation9 + $0xd90] sm:$0xf]  ;;  %v16874_v52 = vor.u32 %v18710_v49, %v16873_v38  ;;  %10925 = vmatpush.bf16.msrb.mxu0 %v16618_v59  ;;  %v21679_v49 = vpop.f32.mrf.mxu3 }
 0x8b0   : > { %v18774_v41 = vld [vmem:[#allocation9 + $0xdac] sm:$0xf0] }
 0x8b1   : > { %v17385_v57 = vld [vmem:[#allocation9 + $0xf90] sm:$0xf]  ;;  %v17130_v1 = vor.u32 %v18774_v41, %v17129_v25  ;;  %10938 = vmatpush.bf16.msrb.mxu1 %v16874_v52 }
 0x8b2   : > { %v18838_v17 = vld [vmem:[#allocation9 + $0xfac] sm:$0xf0] }
 0x8b3   : > { %v16585_v28 = vld [vmem:[#allocation9 + $0x950] sm:$0xf]  ;;  %v17386_v2 = vor.u32 %v18838_v17, %v17385_v57  ;;  %10951 = vmatpush.bf16.msrb.mxu2 %v17130_v1  ;;  %v10675_v17 = vpop.f32.mrf.mxu0 }
 0x8b4   : > { %v18638_v16 = vld [vmem:[#allocation9 + $0x96c] sm:$0xf0]  ;;  %v18514_v17 = vld [vmem:[#allocation9 + $0x594] sm:$0xf] }
 0x8b5   : > { %v16841_v8 = vld [vmem:[#allocation9 + $0xb50] sm:$0xf]  ;;  %v16586_v33 = vor.u32 %v18638_v16, %v16585_v28  ;;  %10964 = vmatpush.bf16.msrb.mxu3 %v17386_v2 }
 0x8b6   : > { %v18702_v7 = vld [vmem:[#allocation9 + $0xb6c] sm:$0xf0] }
 0x8b7   : > { %v17097_v14 = vld [vmem:[#allocation9 + $0xd50] sm:$0xf]  ;;  %v16842_v3 = vor.u32 %v18702_v7, %v16841_v8  ;;  %10926 = vmatpush.bf16.msrb.mxu0 %v16586_v33  ;;  %v10688_v8 = vpop.f32.mrf.mxu1  ;;  %v21681_v33 = vld [vmem:[#allocation11] sm:$0xff] }
 0x8b8   : > { %v18766_v55 = vld [vmem:[#allocation9 + $0xd6c] sm:$0xf0] }
 0x8b9   : > { %v17353_v0 = vld [vmem:[#allocation9 + $0xf50] sm:$0xf]  ;;  %v17098_v43 = vor.u32 %v18766_v55, %v17097_v14  ;;  %10939 = vmatpush.bf16.msrb.mxu1 %v16842_v3  ;;  %v7882_v3 = vperm.slane %v21681_v33, 2 }
 0x8ba   : > { %v18830_v61 = vld [vmem:[#allocation9 + $0xf6c] sm:$0xf0] }
 0x8bb   : > { %v16553_v45 = vld [vmem:[#allocation9 + $0x910] sm:$0xf]  ;;  %v17354_v21 = vor.u32 %v18830_v61, %v17353_v0  ;;  %10952 = vmatpush.bf16.msrb.mxu2 %v17098_v43 }
 0x8bc   : > { %v18630_v9 = vld [vmem:[#allocation9 + $0x92c] sm:$0xf0] }
 0x8bd   : > { %v16809_v31 = vld [vmem:[#allocation9 + $0xb10] sm:$0xf]  ;;  %v16554_v23 = vor.u32 %v18630_v9, %v16553_v45  ;;  %10965 = vmatpush.bf16.msrb.mxu3 %v17354_v21 }
 0x8be   : > { %v18694_v30 = vld [vmem:[#allocation9 + $0xb2c] sm:$0xf0] }
 0x8bf   : > { %v17065_v26 = vld [vmem:[#allocation9 + $0xd10] sm:$0xf]  ;;  %v16810_v11 = vor.u32 %v18694_v30, %v16809_v31  ;;  %10927 = vmatpush.bf16.msrb.mxu0 %v16554_v23 }
 0x8c0   : > { %v18758_v32 = vld [vmem:[#allocation9 + $0xd2c] sm:$0xf0] }
 0x8c1   : > { %v17321_v63 = vld [vmem:[#allocation9 + $0xf10] sm:$0xf]  ;;  %v17066_v47 = vor.u32 %v18758_v32, %v17065_v26  ;;  %10940 = vmatpush.bf16.msrb.mxu1 %v16810_v11 }
 0x8c2   : > { %v18822_v5 = vld [vmem:[#allocation9 + $0xf2c] sm:$0xf0] }
 0x8c3   : > { %v16521_v36 = vld [vmem:[#allocation9 + $0x8d0] sm:$0xf]  ;;  %v17322_v34 = vor.u32 %v18822_v5, %v17321_v63  ;;  %10953 = vmatpush.bf16.msrb.mxu2 %v17066_v47  ;;  %v10701_v63 = vpop.f32.mrf.mxu2 }
 0x8c4   : > { %v18622_v37 = vld [vmem:[#allocation9 + $0x8ec] sm:$0xf0] }
 0x8c5   : > { %v16777_v54 = vld [vmem:[#allocation9 + $0xad0] sm:$0xf]  ;;  %v16522_v22 = vor.u32 %v18622_v37, %v16521_v36  ;;  %10966 = vmatpush.bf16.msrb.mxu3 %v17322_v34  ;;  %v10714_v36 = vpop.f32.mrf.mxu3  ;;  %v18394_v37 = vld [vmem:[#allocation9 + $0x1d4] sm:$0xf] }
 0x8c6   : > { %v18686_v4 = vld [vmem:[#allocation9 + $0xaec] sm:$0xf0]  ;;  %v18458_v34 = vld [vmem:[#allocation9 + $0x3d4] sm:$0xf] }
 0x8c7   : > { %v17033_v56 = vld [vmem:[#allocation9 + $0xcd0] sm:$0xf]  ;;  %v16778_v48 = vor.u32 %v18686_v4, %v16777_v54  ;;  %10928 = vmatpush.bf16.msrb.mxu0 %v16522_v22  ;;  %v15627_v54 = vld [vmem:[#allocation9 + $0x1f0] sm:$0xf0]  ;;  %v10674_v4 = vadd.f32 %v21673_v40, %v7882_v3 }
 0x8c8   : > { %v18750_v15 = vld [vmem:[#allocation9 + $0xcec] sm:$0xf0]  ;;  %v16075_v3 = vld [vmem:[#allocation9 + $0x570] sm:$0xf0] }
 0x8c9   : > { %v17289_v46 = vld [vmem:[#allocation9 + $0xed0] sm:$0xf]  ;;  %v17034_v35 = vor.u32 %v18750_v15, %v17033_v56  ;;  %10941 = vmatpush.bf16.msrb.mxu1 %v16778_v48  ;;  %v15883_v15 = vld [vmem:[#allocation9 + $0x3f0] sm:$0xf0]  ;;  %v10687_v40 = vadd.f32 %v21675_v6, %v10674_v4 }
 0x8ca   : > { %v18814_v51 = vld [vmem:[#allocation9 + $0xeec] sm:$0xf0]  ;;  %v15563_v6 = vld [vmem:[#allocation9 + $0x170] sm:$0xf0] }
 0x8cb   : > { %v16489_v42 = vld [vmem:[#allocation9 + $0x890] sm:$0xf]  ;;  %v17290_v20 = vor.u32 %v18814_v51, %v17289_v46  ;;  %10954 = vmatpush.bf16.msrb.mxu2 %v17034_v35  ;;  %v18522_v46 = vld [vmem:[#allocation9 + $0x5d4] sm:$0xf] }
 0x8cc   : > { %v18614_v29 = vld [vmem:[#allocation9 + $0x8ac] sm:$0xf0]  ;;  %v16139_v51 = vld [vmem:[#allocation9 + $0x5f0] sm:$0xf0] }
 0x8cd   : > { %v16745_v50 = vld [vmem:[#allocation9 + $0xa90] sm:$0xf]  ;;  %v16490_v57 = vor.u32 %v18614_v29, %v16489_v42  ;;  %10967 = vmatpush.bf16.msrb.mxu3 %v17290_v20  ;;  %v18586_v35 = vld [vmem:[#allocation9 + $0x7d4] sm:$0xf]  ;;  %v15886_v20 = vor.u32 %v18458_v34, %v15883_v15 }
 0x8ce   : > { %v18678_v58 = vld [vmem:[#allocation9 + $0xaac] sm:$0xf0]  ;;  %v16395_v42 = vld [vmem:[#allocation9 + $0x7f0] sm:$0xf0] }
 0x8cf   : > { %v17001_v38 = vld [vmem:[#allocation9 + $0xc90] sm:$0xf]  ;;  %v16746_v59 = vor.u32 %v18678_v58, %v16745_v50  ;;  %10929 = vmatpush.bf16.msrb.mxu0 %v16490_v57  ;;  %v15630_v50 = vor.u32 %v18394_v37, %v15627_v54  ;;  %v16142_v58 = vor.u32 %v18522_v46, %v16139_v51  ;;  %v15851_v57 = vld [vmem:[#allocation9 + $0x3b0] sm:$0xf0]  ;;  %v10725_v54 = vpop.f32.mrf.mxu0  ;;  %v10738_v51 = vpop.f32.mrf.mxu1 }
 0x8d0   : > { %v18742_v12 = vld [vmem:[#allocation9 + $0xcac] sm:$0xf0]  ;;  %v16299_v36 = vld [vmem:[#allocation9 + $0x730] sm:$0xf0] }
 0x8d1   : > { %v17257_v25 = vld [vmem:[#allocation9 + $0xe90] sm:$0xf]  ;;  %v17002_v52 = vor.u32 %v18742_v12, %v17001_v38  ;;  %10942 = vmatpush.bf16.msrb.mxu1 %v16746_v59  ;;  %v18386_v38 = vld [vmem:[#allocation9 + $0x194] sm:$0xf] }
 0x8d2   : > { %v18806_v41 = vld [vmem:[#allocation9 + $0xeac] sm:$0xf0]  ;;  %v15595_v12 = vld [vmem:[#allocation9 + $0x1b0] sm:$0xf0] }
 0x8d3   : > { %v16457_v1 = vld [vmem:[#allocation9 + $0x850] sm:$0xf]  ;;  %v17258_v2 = vor.u32 %v18806_v41, %v17257_v25  ;;  %10955 = vmatpush.bf16.msrb.mxu2 %v17002_v52  ;;  %v18450_v25 = vld [vmem:[#allocation9 + $0x394] sm:$0xf]  ;;  %v16398_v41 = vor.u32 %v18586_v35, %v16395_v42 }
 0x8d4   : > { %v18606_v28 = vld [vmem:[#allocation9 + $0x86c] sm:$0xf0]  ;;  %v16107_v59 = vld [vmem:[#allocation9 + $0x5b0] sm:$0xf0] }
 0x8d5   : > { %v16713_v16 = vld [vmem:[#allocation9 + $0xa50] sm:$0xf]  ;;  %v16458_v43 = vor.u32 %v18606_v28, %v16457_v1  ;;  %10968 = vmatpush.bf16.msrb.mxu3 %v17258_v2  ;;  %v18578_v52 = vld [vmem:[#allocation9 + $0x794] sm:$0xf]  ;;  %v15598_v28 = vor.u32 %v18386_v38, %v15595_v12  ;;  %v16110_v8 = vor.u32 %v18514_v17, %v16107_v59  ;;  %v10700_v2 = vadd.f32 %v21677_v53, %v10687_v40 }
 0x8d6   : > { %v18670_v7 = vld [vmem:[#allocation9 + $0xa6c] sm:$0xf0]  ;;  %v16363_v1 = vld [vmem:[#allocation9 + $0x7b0] sm:$0xf0] }
 0x8d7   : > { %v16969_v14 = vld [vmem:[#allocation9 + $0xc50] sm:$0xf]  ;;  %v16714_v31 = vor.u32 %v18670_v7, %v16713_v16  ;;  %10930 = vmatpush.bf16.msrb.mxu0 %v16458_v43  ;;  %v15854_v16 = vor.u32 %v18450_v25, %v15851_v57  ;;  %v18378_v7 = vld [vmem:[#allocation9 + $0x154] sm:$0xf]  ;;  %v10751_v57 = vpop.f32.mrf.mxu2 }
 0x8d8   : > { %v18734_v55 = vld [vmem:[#allocation9 + $0xc6c] sm:$0xf0]  ;;  %v18570_v43 = vld [vmem:[#allocation9 + $0x754] sm:$0xf] }
 0x8d9   : > { %v17225_v0 = vld [vmem:[#allocation9 + $0xe50] sm:$0xf]  ;;  %v16970_v21 = vor.u32 %v18734_v55, %v16969_v14  ;;  %10943 = vmatpush.bf16.msrb.mxu1 %v16714_v31  ;;  %v18442_v14 = vld [vmem:[#allocation9 + $0x354] sm:$0xf]  ;;  %v16366_v55 = vor.u32 %v18578_v52, %v16363_v1 }
 0x8da   : > { %v18798_v61 = vld [vmem:[#allocation9 + $0xe6c] sm:$0xf0]  ;;  %v15499_v15 = vld [vmem:[#allocation9 + $0xf0] sm:$0xf0] }
 0x8db   : > { %v16425_v45 = vld [vmem:[#allocation9 + $0x810] sm:$0xf]  ;;  %v17226_v5 = vor.u32 %v18798_v61, %v17225_v0  ;;  %10956 = vmatpush.bf16.msrb.mxu2 %v16970_v21  ;;  %v15819_v0 = vld [vmem:[#allocation9 + $0x370] sm:$0xf0]  ;;  %v10713_v21 = vadd.f32 %v21679_v49, %v10700_v2 }
 0x8dc   : > { %v18598_v9 = vld [vmem:[#allocation9 + $0x82c] sm:$0xf0]  ;;  %v18506_v61 = vld [vmem:[#allocation9 + $0x554] sm:$0xf]  ;;  %v15822_v53 = vor.u32 %v18442_v14, %v15819_v0  ;;  %v10727_v14 = vpop.f32.mrf.mxu0 }
 0x8dd   : > { %v16681_v30 = vld [vmem:[#allocation9 + $0xa10] sm:$0xf]  ;;  %v16426_v56 = vor.u32 %v18598_v9, %v16425_v45  ;;  %10969 = vmatpush.bf16.msrb.mxu3 %v17226_v5  ;;  %v16331_v45 = vld [vmem:[#allocation9 + $0x770] sm:$0xf0]  ;;  %v15566_v9 = vor.u32 %v18378_v7, %v15563_v6  ;;  %v16078_v31 = vor.u32 %v18506_v61, %v16075_v3  ;;  %v10726_v46 = vadd.f32 %v10725_v54, %v10713_v21 }
 0x8de   : > { %v18662_v26 = vld [vmem:[#allocation9 + $0xa2c] sm:$0xf0]  ;;  %v16334_v63 = vor.u32 %v18570_v43, %v16331_v45  ;;  %v15787_v5 = vld [vmem:[#allocation9 + $0x330] sm:$0xf0]  ;;  %v10740_v45 = vpop.f32.mrf.mxu1 }
 0x8df   : > { %v16937_v32 = vld [vmem:[#allocation9 + $0xc10] sm:$0xf]  ;;  %v16682_v22 = vor.u32 %v18662_v26, %v16681_v30  ;;  %10931 = vmatpush.bf16.msrb.mxu0 %v16426_v56  ;;  %v18370_v30 = vld [vmem:[#allocation9 + $0x114] sm:$0xf]  ;;  %v10753_v54 = vpop.f32.mrf.mxu2 }
 0x8e0   : > { %v18726_v23 = vld [vmem:[#allocation9 + $0xc2c] sm:$0xf0]  ;;  %v15531_v26 = vld [vmem:[#allocation9 + $0x130] sm:$0xf0] }
 0x8e1   : > { %v17193_v11 = vld [vmem:[#allocation9 + $0xe10] sm:$0xf]  ;;  %v16938_v48 = vor.u32 %v18726_v23, %v16937_v32  ;;  %10944 = vmatpush.bf16.msrb.mxu1 %v16682_v22  ;;  %v18434_v32 = vld [vmem:[#allocation9 + $0x314] sm:$0xf]  ;;  %v15534_v37 = vor.u32 %v18370_v30, %v15531_v26 }
 0x8e2   : > { %v18790_v47 = vld [vmem:[#allocation9 + $0xe2c] sm:$0xf0]  ;;  %10932 = vmatmul.bf16.vlgmr.msrb.gmra.mxu0 %v21624_v13  ;;  %v18498_v23 = vld [vmem:[#allocation9 + $0x514] sm:$0xf]  ;;  %v15790_v34 = vor.u32 %v18434_v32, %v15787_v5 }
 0x8e3   : > { %v17194_v29 = vor.u32 %v18790_v47, %v17193_v11  ;;  %10957 = vmatpush.bf16.msrb.mxu2 %v16938_v48  ;;  %10976 = vmatpush.bf16.msra.mxu0 %v15630_v50  ;;  %v16043_v11 = vld [vmem:[#allocation9 + $0x530] sm:$0xf0] }
 0x8e4   : > { %10945 = vmatmul.bf16.vlgmr.msrb.gmra.mxu1 %v21628_v62  ;;  %v18562_v47 = vld [vmem:[#allocation9 + $0x714] sm:$0xf]  ;;  %v16046_v4 = vor.u32 %v18498_v23, %v16043_v11 }
 0x8e5   : > { %10970 = vmatpush.bf16.msrb.mxu3 %v17194_v29  ;;  %10989 = vmatpush.bf16.msra.mxu1 %v15886_v20  ;;  %v18362_v56 = vld [vmem:[#allocation9 + $0xd4] sm:$0xf]  ;;  %v16302_v22 = vor.u32 %v18562_v47, %v16299_v36  ;;  %v10739_v20 = vadd.f32 %v10738_v51, %v10726_v46 }
 0x8e6   : > { %10958 = vmatmul.bf16.vlgmr.msrb.gmra.mxu2 %v21622_v10  ;;  %v18426_v49 = vld [vmem:[#allocation9 + $0x2d4] sm:$0xf] }
 0x8e7   : > { %11002 = vmatpush.bf16.msra.mxu2 %v16142_v58  ;;  %10977 = vmatpush.bf16.msra.mxu0 %v15598_v28  ;;  %v15755_v48 = vld [vmem:[#allocation9 + $0x2f0] sm:$0xf0]  ;;  %v15502_v58 = vor.u32 %v18362_v56, %v15499_v15  ;;  %v10752_v28 = vadd.f32 %v10751_v57, %v10739_v20 }
 0x8e8   : > { %10971 = vmatmul.bf16.vlgmr.msrb.gmra.mxu3 %v21626_v18  ;;  %v18490_v35 = vld [vmem:[#allocation9 + $0x4d4] sm:$0xf]  ;;  %v15758_v38 = vor.u32 %v18426_v49, %v15755_v48 }
 0x8e9   : > { %11015 = vmatpush.bf16.msra.mxu3 %v16398_v41  ;;  %10990 = vmatpush.bf16.msra.mxu1 %v15854_v16  ;;  %v16011_v42 = vld [vmem:[#allocation9 + $0x4f0] sm:$0xf0]  ;;  %v10764_v16 = vpop.f32.mrf.mxu3 }
 0x8ea   : > { %v18554_v29 = vld [vmem:[#allocation9 + $0x6d4] sm:$0xf]  ;;  %v16014_v12 = vor.u32 %v18490_v35, %v16011_v42  ;;  %v21692_v6 = vadd.f32 %v10764_v16, %v10752_v28 }
 0x8eb   : > { %11003 = vmatpush.bf16.msra.mxu2 %v16110_v8  ;;  %10978 = vmatpush.bf16.msra.mxu0 %v15566_v9  ;;  %v16267_v50 = vld [vmem:[#allocation9 + $0x6f0] sm:$0xf0] }
 0x8ec   : > { %v18354_v25 = vld [vmem:[#allocation9 + $0x94] sm:$0xf]  ;;  %v16270_v17 = vor.u32 %v18554_v29, %v16267_v50 }
 0x8ed   : > { %11016 = vmatpush.bf16.msra.mxu3 %v16366_v55  ;;  %10991 = vmatpush.bf16.msra.mxu1 %v15822_v53  ;;  %v15467_v40 = vld [vmem:[#allocation9 + $0xb0] sm:$0xf0] }
 0x8ee   : > { %v18418_v41 = vld [vmem:[#allocation9 + $0x294] sm:$0xf]  ;;  %v15470_v7 = vor.u32 %v18354_v25, %v15467_v40 }
 0x8ef   : > { %11004 = vmatpush.bf16.msra.mxu2 %v16078_v31  ;;  %10979 = vmatpush.bf16.msra.mxu0 %v15534_v37  ;;  %v15723_v59 = vld [vmem:[#allocation9 + $0x2b0] sm:$0xf0] }
 0x8f0   : > { %v18482_v52 = vld [vmem:[#allocation9 + $0x494] sm:$0xf]  ;;  %v15726_v55 = vor.u32 %v18418_v41, %v15723_v59 }
 0x8f1   : > { %11017 = vmatpush.bf16.msra.mxu3 %v16334_v63  ;;  %10992 = vmatpush.bf16.msra.mxu1 %v15790_v34  ;;  %v15979_v1 = vld [vmem:[#allocation9 + $0x4b0] sm:$0xf0]  ;;  %v10766_v49 = vpop.f32.mrf.mxu3 }
 0x8f2   : > { %v18546_v8 = vld [vmem:[#allocation9 + $0x694] sm:$0xf]  ;;  %v15982_v0 = vor.u32 %v18482_v52, %v15979_v1 }
 0x8f3   : > { %11005 = vmatpush.bf16.msra.mxu2 %v16046_v4  ;;  %v16235_v2 = vld [vmem:[#allocation9 + $0x6b0] sm:$0xf0]  ;;  %10980 = vmatpush.bf16.msra.mxu0 %v15502_v58 }
 0x8f4   : > { %v18346_v61 = vld [vmem:[#allocation9 + $0x54] sm:$0xf]  ;;  %v16238_v9 = vor.u32 %v18546_v8, %v16235_v2 }
 0x8f5   : > { %11018 = vmatpush.bf16.msra.mxu3 %v16302_v22  ;;  %10993 = vmatpush.bf16.msra.mxu1 %v15758_v38  ;;  %v15435_v3 = vld [vmem:[#allocation9 + $0x70] sm:$0xf0] }
 0x8f6   : > { %v18410_v43 = vld [vmem:[#allocation9 + $0x254] sm:$0xf]  ;;  %v15438_v32 = vor.u32 %v18346_v61, %v15435_v3 }
 0x8f7   : > { %11006 = vmatpush.bf16.msra.mxu2 %v16014_v12  ;;  %v15691_v53 = vld [vmem:[#allocation9 + $0x270] sm:$0xf0]  ;;  %10981 = vmatpush.bf16.msra.mxu0 %v15470_v7 }
 0x8f8   : > { %v18474_v31 = vld [vmem:[#allocation9 + $0x454] sm:$0xf]  ;;  %v15694_v23 = vor.u32 %v18410_v43, %v15691_v53 }
 0x8f9   : > { %11019 = vmatpush.bf16.msra.mxu3 %v16270_v17  ;;  %v15947_v21 = vld [vmem:[#allocation9 + $0x470] sm:$0xf0]  ;;  %10994 = vmatpush.bf16.msra.mxu1 %v15726_v55 }
 0x8fa   : > { %v18538_v30 = vld [vmem:[#allocation9 + $0x654] sm:$0xf]  ;;  %v15950_v11 = vor.u32 %v18474_v31, %v15947_v21 }
 0x8fb   : > { %v16203_v26 = vld [vmem:[#allocation9 + $0x670] sm:$0xf0]  ;;  %11007 = vmatpush.bf16.msra.mxu2 %v15982_v0  ;;  %10982 = vmatpush.bf16.msra.mxu0 %v15438_v32 }
 0x8fc   : > { %v18338_v63 = vld [vmem:[#allocation9 + $0x14] sm:$0xf]  ;;  %v16206_v34 = vor.u32 %v18538_v30, %v16203_v26 }
 0x8fd   : > { %v15403_v5 = vld [vmem:[#allocation9 + $0x30] sm:$0xf0]  ;;  %11020 = vmatpush.bf16.msra.mxu3 %v16238_v9  ;;  %10995 = vmatpush.bf16.msra.mxu1 %v15694_v23 }
 0x8fe   : > { %v18402_v47 = vld [vmem:[#allocation9 + $0x214] sm:$0xf]  ;;  %v15406_v48 = vor.u32 %v18338_v63, %v15403_v5 }
 0x8ff   : > { %v15659_v36 = vld [vmem:[#allocation9 + $0x230] sm:$0xf0]  ;;  %11008 = vmatpush.bf16.msra.mxu2 %v15950_v11  ;;  %v7883_v11 = vperm.slane %v21681_v33, 3 }
 0x900   : > { %v18466_v37 = vld [vmem:[#allocation9 + $0x414] sm:$0xf]  ;;  %v15662_v50 = vor.u32 %v18402_v47, %v15659_v36  ;;  %10983 = vmatpush.bf16.msra.mxu0 %v15406_v48 }
 0x901   : > { %v15915_v4 = vld [vmem:[#allocation9 + $0x430] sm:$0xf0]  ;;  %11021 = vmatpush.bf16.msra.mxu3 %v16206_v34 }
 0x902   : > { %v18530_v56 = vld [vmem:[#allocation9 + $0x614] sm:$0xf]  ;;  %v15918_v20 = vor.u32 %v18466_v37, %v15915_v4  ;;  %10996 = vmatpush.bf16.msra.mxu1 %v15662_v50 }
 0x903   : > { %v16171_v15 = vld [vmem:[#allocation9 + $0x630] sm:$0xf0]  ;;  %10984 = vmatmul.bf16.vlgmr.msra.gmra.mxu0 %v21608_v19 }
 0x904   : > { %v18650_v46 = vld [vmem:[#allocation9 + $0x9d4] sm:$0xf]  ;;  %v16174_v12 = vor.u32 %v18530_v56, %v16171_v15  ;;  %11009 = vmatpush.bf16.msra.mxu2 %v15918_v20  ;;  %v10777_v15 = vpop.f32.mrf.mxu0 }
 0x905   : > { %v16651_v51 = vld [vmem:[#allocation9 + $0x9f0] sm:$0xf0]  ;;  %10997 = vmatmul.bf16.vlgmr.msra.gmra.mxu1 %v21613_v39 }
 0x906   : > { %v18714_v22 = vld [vmem:[#allocation9 + $0xbd4] sm:$0xf]  ;;  %v16654_v25 = vor.u32 %v18650_v46, %v16651_v51  ;;  %11022 = vmatpush.bf16.msra.mxu3 %v16174_v12 }
 0x907   : > { %v16907_v35 = vld [vmem:[#allocation9 + $0xbf0] sm:$0xf0]  ;;  %11010 = vmatmul.bf16.vlgmr.msra.gmra.mxu2 %v21606_v44 }
 0x908   : > { %v18778_v42 = vld [vmem:[#allocation9 + $0xdd4] sm:$0xf]  ;;  %v16910_v40 = vor.u32 %v18714_v22, %v16907_v35  ;;  %11028 = vmatpush.bf16.msrb.mxu0 %v16654_v25  ;;  %v10778_v35 = vadd.f32 %v10777_v15, %v7883_v11 }
 0x909   : > { %v17163_v29 = vld [vmem:[#allocation9 + $0xdf0] sm:$0xf0]  ;;  %11023 = vmatmul.bf16.vlgmr.msra.gmra.mxu3 %v21610_v27 }
 0x90a   : > { %v18842_v58 = vld [vmem:[#allocation9 + $0xfd4] sm:$0xf]  ;;  %v17166_v41 = vor.u32 %v18778_v42, %v17163_v29  ;;  %11041 = vmatpush.bf16.msrb.mxu1 %v16910_v40  ;;  %v10790_v42 = vpop.f32.mrf.mxu1 }
 0x90b   : > { %v17419_v38 = vld [vmem:[#allocation9 + $0xff0] sm:$0xf0]  ;;  %v10791_v12 = vadd.f32 %v10790_v42, %v10778_v35  ;;  %v15633_v35 = vld [vmem:[#allocation9 + $0x1d8] sm:$0xf] }
 0x90c   : > { %v18642_v57 = vld [vmem:[#allocation9 + $0x994] sm:$0xf]  ;;  %v17422_v52 = vor.u32 %v18842_v58, %v17419_v38  ;;  %11054 = vmatpush.bf16.msrb.mxu2 %v17166_v41  ;;  %v18399_v42 = vld [vmem:[#allocation9 + $0x1f4] sm:$0xf0] }
 0x90d   : > { %v16619_v17 = vld [vmem:[#allocation9 + $0x9b0] sm:$0xf0] }
 0x90e   : > { %v18706_v59 = vld [vmem:[#allocation9 + $0xb94] sm:$0xf]  ;;  %v16622_v7 = vor.u32 %v18642_v57, %v16619_v17  ;;  %11067 = vmatpush.bf16.msrb.mxu3 %v17422_v52  ;;  %v10803_v52 = vpop.f32.mrf.mxu2 }
 0x90f   : > { %v16875_v1 = vld [vmem:[#allocation9 + $0xbb0] sm:$0xf0] }
 0x910   : > { %v18770_v28 = vld [vmem:[#allocation9 + $0xd94] sm:$0xf]  ;;  %v16878_v14 = vor.u32 %v18706_v59, %v16875_v1  ;;  %11029 = vmatpush.bf16.msrb.mxu0 %v16622_v7  ;;  %v10816_v7 = vpop.f32.mrf.mxu3 }
 0x911   : > { %v17131_v16 = vld [vmem:[#allocation9 + $0xdb0] sm:$0xf0] }
 0x912   : > { %v18834_v8 = vld [vmem:[#allocation9 + $0xf94] sm:$0xf]  ;;  %v17134_v55 = vor.u32 %v18770_v28, %v17131_v16  ;;  %11042 = vmatpush.bf16.msrb.mxu1 %v16878_v14 }
 0x913   : > { %v17387_v2 = vld [vmem:[#allocation9 + $0xfb0] sm:$0xf0] }
 0x914   : > { %v18634_v0 = vld [vmem:[#allocation9 + $0x954] sm:$0xf]  ;;  %v17390_v43 = vor.u32 %v18834_v8, %v17387_v2  ;;  %11055 = vmatpush.bf16.msrb.mxu2 %v17134_v55  ;;  %v10804_v2 = vadd.f32 %v10803_v52, %v10791_v12  ;;  %v15601_v52 = vld [vmem:[#allocation9 + $0x198] sm:$0xf] }
 0x915   : > { %v16587_v61 = vld [vmem:[#allocation9 + $0x970] sm:$0xf0] }
 0x916   : > { %v18698_v3 = vld [vmem:[#allocation9 + $0xb54] sm:$0xf]  ;;  %v16590_v30 = vor.u32 %v18634_v0, %v16587_v61  ;;  %11068 = vmatpush.bf16.msrb.mxu3 %v17390_v43  ;;  %v21699_v61 = vadd.f32 %v10816_v7, %v10804_v2  ;;  %v10805_v15 = vpop.f32.mrf.mxu2  ;;  %v16113_v2 = vld [vmem:[#allocation9 + $0x598] sm:$0xf] }
 0x917   : > { %v16843_v45 = vld [vmem:[#allocation9 + $0xb70] sm:$0xf0]  ;;  %v18519_v7 = vld [vmem:[#allocation9 + $0x5b4] sm:$0xf0] }
 0x918   : > { %v18762_v9 = vld [vmem:[#allocation9 + $0xd54] sm:$0xf]  ;;  %v16846_v32 = vor.u32 %v18698_v3, %v16843_v45  ;;  %11030 = vmatpush.bf16.msrb.mxu0 %v16590_v30  ;;  %v10779_v3 = vpop.f32.mrf.mxu0  ;;  %v16305_v15 = vld [vmem:[#allocation9 + $0x718] sm:$0xf] }
 0x919   : > { %v17099_v53 = vld [vmem:[#allocation9 + $0xd70] sm:$0xf0] }
 0x91a   : > { %v18826_v31 = vld [vmem:[#allocation9 + $0xf54] sm:$0xf]  ;;  %v17102_v63 = vor.u32 %v18762_v9, %v17099_v53  ;;  %11043 = vmatpush.bf16.msrb.mxu1 %v16846_v32 }
 0x91b   : > { %v17355_v21 = vld [vmem:[#allocation9 + $0xf70] sm:$0xf0] }
 0x91c   : > { %v18626_v26 = vld [vmem:[#allocation9 + $0x914] sm:$0xf]  ;;  %v17358_v47 = vor.u32 %v18826_v31, %v17355_v21  ;;  %11056 = vmatpush.bf16.msrb.mxu2 %v17102_v63  ;;  %v10792_v21 = vpop.f32.mrf.mxu1 }
 0x91d   : > { %v16555_v5 = vld [vmem:[#allocation9 + $0x930] sm:$0xf0]  ;;  %v18447_v21 = vld [vmem:[#allocation9 + $0x374] sm:$0xf0] }
 0x91e   : > { %v18690_v23 = vld [vmem:[#allocation9 + $0xb14] sm:$0xf]  ;;  %v16558_v56 = vor.u32 %v18626_v26, %v16555_v5  ;;  %11069 = vmatpush.bf16.msrb.mxu3 %v17358_v47 }
 0x91f   : > { %v16811_v36 = vld [vmem:[#allocation9 + $0xb30] sm:$0xf0] }
 0x920   : > { %v18754_v37 = vld [vmem:[#allocation9 + $0xd14] sm:$0xf]  ;;  %v16814_v49 = vor.u32 %v18690_v23, %v16811_v36  ;;  %11031 = vmatpush.bf16.msrb.mxu0 %v16558_v56 }
 0x921   : > { %v17067_v54 = vld [vmem:[#allocation9 + $0xd30] sm:$0xf0] }
 0x922   : > { %v18818_v34 = vld [vmem:[#allocation9 + $0xf14] sm:$0xf]  ;;  %v17070_v46 = vor.u32 %v18754_v37, %v17067_v54  ;;  %11044 = vmatpush.bf16.msrb.mxu1 %v16814_v49 }
 0x923   : > { %v17323_v4 = vld [vmem:[#allocation9 + $0xf30] sm:$0xf0] }
 0x924   : > { %v18618_v51 = vld [vmem:[#allocation9 + $0x8d4] sm:$0xf]  ;;  %v17326_v33 = vor.u32 %v18818_v34, %v17323_v4  ;;  %11057 = vmatpush.bf16.msrb.mxu2 %v17070_v46 }
 0x925   : > { %v16523_v22 = vld [vmem:[#allocation9 + $0x8f0] sm:$0xf0] }
 0x926   : > { %v18682_v48 = vld [vmem:[#allocation9 + $0xad4] sm:$0xf]  ;;  %v16526_v25 = vor.u32 %v18618_v51, %v16523_v22  ;;  %11070 = vmatpush.bf16.msrb.mxu3 %v17326_v33  ;;  %v15889_v33 = vld [vmem:[#allocation9 + $0x3d8] sm:$0xf] }
 0x927   : > { %v16779_v29 = vld [vmem:[#allocation9 + $0xaf0] sm:$0xf0] }
 0x928   : > { %v18746_v50 = vld [vmem:[#allocation9 + $0xcd4] sm:$0xf]  ;;  %v16782_v40 = vor.u32 %v18682_v48, %v16779_v29  ;;  %11032 = vmatpush.bf16.msrb.mxu0 %v16526_v25  ;;  %v10818_v48 = vpop.f32.mrf.mxu3  ;;  %v16401_v25 = vld [vmem:[#allocation9 + $0x7d8] sm:$0xf] }
 0x929   : > { %v17035_v20 = vld [vmem:[#allocation9 + $0xcf0] sm:$0xf0] }
 0x92a   : > { %v18810_v58 = vld [vmem:[#allocation9 + $0xed4] sm:$0xf]  ;;  %v17038_v41 = vor.u32 %v18746_v50, %v17035_v20  ;;  %11045 = vmatpush.bf16.msrb.mxu1 %v16782_v40  ;;  %v18463_v50 = vld [vmem:[#allocation9 + $0x3f4] sm:$0xf0] }
 0x92b   : > { %v17291_v38 = vld [vmem:[#allocation9 + $0xef0] sm:$0xf0]  ;;  %v16145_v20 = vld [vmem:[#allocation9 + $0x5d8] sm:$0xf] }
 0x92c   : > { %v18610_v57 = vld [vmem:[#allocation9 + $0x894] sm:$0xf]  ;;  %v17294_v1 = vor.u32 %v18810_v58, %v17291_v38  ;;  %11058 = vmatpush.bf16.msrb.mxu2 %v17038_v41  ;;  %v18527_v58 = vld [vmem:[#allocation9 + $0x5f4] sm:$0xf0] }
 0x92d   : > { %v16491_v17 = vld [vmem:[#allocation9 + $0x8b0] sm:$0xf0]  ;;  %v18591_v40 = vld [vmem:[#allocation9 + $0x7f4] sm:$0xf0] }
 0x92e   : > { %v18674_v59 = vld [vmem:[#allocation9 + $0xa94] sm:$0xf]  ;;  %v16494_v0 = vor.u32 %v18610_v57, %v16491_v17  ;;  %11071 = vmatpush.bf16.msrb.mxu3 %v17294_v1  ;;  %v15634_v57 = vor.u32 %v18399_v42, %v15633_v35  ;;  %v15890_v17 = vor.u32 %v18463_v50, %v15889_v33  ;;  %v18391_v1 = vld [vmem:[#allocation9 + $0x1b4] sm:$0xf0]  ;;  %v10842_v50 = vpop.f32.mrf.mxu1 }
 0x92f   : > { %v16747_v28 = vld [vmem:[#allocation9 + $0xab0] sm:$0xf0]  ;;  %v15505_v35 = vld [vmem:[#allocation9 + $0xd8] sm:$0xf] }
 0x930   : > { %v18738_v16 = vld [vmem:[#allocation9 + $0xc94] sm:$0xf]  ;;  %v16750_v43 = vor.u32 %v18674_v59, %v16747_v28  ;;  %11033 = vmatpush.bf16.msrb.mxu0 %v16494_v0  ;;  %v16146_v59 = vor.u32 %v18527_v58, %v16145_v20  ;;  %v15857_v28 = vld [vmem:[#allocation9 + $0x398] sm:$0xf]  ;;  %v15602_v0 = vor.u32 %v18391_v1, %v15601_v52 }
 0x931   : > { %v17003_v8 = vld [vmem:[#allocation9 + $0xcb0] sm:$0xf0]  ;;  %v18367_v42 = vld [vmem:[#allocation9 + $0xf4] sm:$0xf0] }
 0x932   : > { %v18802_v14 = vld [vmem:[#allocation9 + $0xe94] sm:$0xf]  ;;  %v17006_v45 = vor.u32 %v18738_v16, %v17003_v8  ;;  %11046 = vmatpush.bf16.msrb.mxu1 %v16750_v43  ;;  %v16402_v16 = vor.u32 %v18591_v40, %v16401_v25  ;;  %v18455_v8 = vld [vmem:[#allocation9 + $0x3b4] sm:$0xf0]  ;;  %v16114_v43 = vor.u32 %v18519_v7, %v16113_v2 }
 0x933   : > { %v17259_v55 = vld [vmem:[#allocation9 + $0xeb0] sm:$0xf0]  ;;  %v15858_v3 = vor.u32 %v18455_v8, %v15857_v28  ;;  %v15761_v33 = vld [vmem:[#allocation9 + $0x2d8] sm:$0xf] }
 0x934   : > { %v18602_v9 = vld [vmem:[#allocation9 + $0x854] sm:$0xf]  ;;  %v17262_v30 = vor.u32 %v18802_v14, %v17259_v55  ;;  %11059 = vmatpush.bf16.msrb.mxu2 %v17006_v45  ;;  %v16369_v14 = vld [vmem:[#allocation9 + $0x798] sm:$0xf] }
 0x935   : > { %v16459_v53 = vld [vmem:[#allocation9 + $0x870] sm:$0xf0]  ;;  %v18583_v55 = vld [vmem:[#allocation9 + $0x7b4] sm:$0xf0] }
 0x936   : > { %v18666_v31 = vld [vmem:[#allocation9 + $0xa54] sm:$0xf]  ;;  %v16462_v11 = vor.u32 %v18602_v9, %v16459_v53  ;;  %11072 = vmatpush.bf16.msrb.mxu3 %v17262_v30  ;;  %v15569_v45 = vld [vmem:[#allocation9 + $0x158] sm:$0xf] }
 0x937   : > { %v16715_v26 = vld [vmem:[#allocation9 + $0xa70] sm:$0xf0]  ;;  %v18383_v9 = vld [vmem:[#allocation9 + $0x174] sm:$0xf0] }
 0x938   : > { %v18730_v32 = vld [vmem:[#allocation9 + $0xc54] sm:$0xf]  ;;  %v16718_v37 = vor.u32 %v18666_v31, %v16715_v26  ;;  %11034 = vmatpush.bf16.msrb.mxu0 %v16462_v11  ;;  %v15825_v53 = vld [vmem:[#allocation9 + $0x358] sm:$0xf]  ;;  %v16370_v31 = vor.u32 %v18583_v55, %v16369_v14  ;;  %v10868_v55 = vpop.f32.mrf.mxu3 }
 0x939   : > { %v16971_v63 = vld [vmem:[#allocation9 + $0xc70] sm:$0xf0]  ;;  %v16081_v30 = vld [vmem:[#allocation9 + $0x558] sm:$0xf] }
 0x93a   : > { %v18794_v5 = vld [vmem:[#allocation9 + $0xe54] sm:$0xf]  ;;  %v16974_v54 = vor.u32 %v18730_v32, %v16971_v63  ;;  %11047 = vmatpush.bf16.msrb.mxu1 %v16718_v37  ;;  %v18511_v26 = vld [vmem:[#allocation9 + $0x574] sm:$0xf0] }
 0x93b   : > { %v17227_v23 = vld [vmem:[#allocation9 + $0xe70] sm:$0xf0]  ;;  %v16337_v32 = vld [vmem:[#allocation9 + $0x758] sm:$0xf]  ;;  %v16082_v11 = vor.u32 %v18511_v26, %v16081_v30 }
 0x93c   : > { %v18594_v47 = vld [vmem:[#allocation9 + $0x814] sm:$0xf]  ;;  %v17230_v49 = vor.u32 %v18794_v5, %v17227_v23  ;;  %11060 = vmatpush.bf16.msrb.mxu2 %v16974_v54  ;;  %v18575_v63 = vld [vmem:[#allocation9 + $0x774] sm:$0xf0]  ;;  %v15570_v5 = vor.u32 %v18383_v9, %v15569_v45  ;;  %v15826_v23 = vor.u32 %v18447_v21, %v15825_v53 }
 0x93d   : > { %v16427_v36 = vld [vmem:[#allocation9 + $0x830] sm:$0xf0]  ;;  %v15793_v37 = vld [vmem:[#allocation9 + $0x318] sm:$0xf]  ;;  %v16338_v54 = vor.u32 %v18575_v63, %v16337_v32  ;;  %v10844_v32 = vpop.f32.mrf.mxu1 }
 0x93e   : > { %v18658_v34 = vld [vmem:[#allocation9 + $0xa14] sm:$0xf]  ;;  %v16430_v29 = vor.u32 %v18594_v47, %v16427_v36  ;;  %11073 = vmatpush.bf16.msrb.mxu3 %v17230_v49  ;;  %v15537_v47 = vld [vmem:[#allocation9 + $0x118] sm:$0xf] }
 0x93f   : > { %v16683_v4 = vld [vmem:[#allocation9 + $0xa30] sm:$0xf0]  ;;  %v18375_v36 = vld [vmem:[#allocation9 + $0x134] sm:$0xf0] }
 0x940   : > { %v18722_v56 = vld [vmem:[#allocation9 + $0xc14] sm:$0xf]  ;;  %v16686_v38 = vor.u32 %v18658_v34, %v16683_v4  ;;  %11035 = vmatpush.bf16.msrb.mxu0 %v16430_v29  ;;  %v18439_v34 = vld [vmem:[#allocation9 + $0x334] sm:$0xf0] }
 0x941   : > { %v16939_v46 = vld [vmem:[#allocation9 + $0xc30] sm:$0xf0]  ;;  %v16049_v4 = vld [vmem:[#allocation9 + $0x518] sm:$0xf] }
 0x942   : > { %v18786_v51 = vld [vmem:[#allocation9 + $0xe14] sm:$0xf]  ;;  %v16942_v12 = vor.u32 %v18722_v56, %v16939_v46  ;;  %11048 = vmatpush.bf16.msrb.mxu1 %v16686_v38  ;;  %v18503_v56 = vld [vmem:[#allocation9 + $0x534] sm:$0xf0]  ;;  %v15538_v46 = vor.u32 %v18375_v36, %v15537_v47 }
 0x943   : > { %v17195_v22 = vld [vmem:[#allocation9 + $0xe30] sm:$0xf0]  ;;  %11036 = vmatmul.bf16.vlgmr.msrb.gmra.mxu0 %v21624_v13  ;;  %v18567_v49 = vld [vmem:[#allocation9 + $0x734] sm:$0xf0]  ;;  %v16050_v48 = vor.u32 %v18503_v56, %v16049_v4 }
 0x944   : > { %v17198_v41 = vor.u32 %v18786_v51, %v17195_v22  ;;  %11061 = vmatpush.bf16.msrb.mxu2 %v16942_v12  ;;  %11080 = vmatpush.bf16.msra.mxu0 %v15634_v57  ;;  %v10829_v51 = vpop.f32.mrf.mxu0  ;;  %v15794_v22 = vor.u32 %v18439_v34, %v15793_v37  ;;  %v16306_v20 = vor.u32 %v18567_v49, %v16305_v15  ;;  %v18431_v58 = vld [vmem:[#allocation9 + $0x2f4] sm:$0xf0] }
 0x945   : > { %11049 = vmatmul.bf16.vlgmr.msrb.gmra.mxu1 %v21628_v62  ;;  %v10830_v29 = vadd.f32 %v10829_v51, %v21699_v61  ;;  %v16017_v38 = vld [vmem:[#allocation9 + $0x4d8] sm:$0xf]  ;;  %v15506_v57 = vor.u32 %v18367_v42, %v15505_v35 }
 0x946   : > { %11074 = vmatpush.bf16.msrb.mxu3 %v17198_v41  ;;  %11093 = vmatpush.bf16.msra.mxu1 %v15890_v17  ;;  %v18495_v12 = vld [vmem:[#allocation9 + $0x4f4] sm:$0xf0]  ;;  %v15762_v17 = vor.u32 %v18431_v58, %v15761_v33  ;;  %v10870_v33 = vpop.f32.mrf.mxu3 }
 0x947   : > { %11062 = vmatmul.bf16.vlgmr.msrb.gmra.mxu2 %v21622_v10  ;;  %v16273_v25 = vld [vmem:[#allocation9 + $0x6d8] sm:$0xf]  ;;  %v10843_v41 = vadd.f32 %v10842_v50, %v10830_v29 }
 0x948   : > { %11106 = vmatpush.bf16.msra.mxu2 %v16146_v59  ;;  %11081 = vmatpush.bf16.msra.mxu0 %v15602_v0  ;;  %v18559_v40 = vld [vmem:[#allocation9 + $0x6f4] sm:$0xf0]  ;;  %v16018_v59 = vor.u32 %v18495_v12, %v16017_v38 }
 0x949   : > { %11075 = vmatmul.bf16.vlgmr.msrb.gmra.mxu3 %v21626_v18  ;;  %v15473_v52 = vld [vmem:[#allocation9 + $0x98] sm:$0xf]  ;;  %v16274_v61 = vor.u32 %v18559_v40, %v16273_v25 }
 0x94a   : > { %11119 = vmatpush.bf16.msra.mxu3 %v16402_v16  ;;  %11094 = vmatpush.bf16.msra.mxu1 %v15858_v3  ;;  %v18359_v1 = vld [vmem:[#allocation9 + $0xb4] sm:$0xf0]  ;;  %v10855_v16 = vpop.f32.mrf.mxu2 }
 0x94b   : > { %v15729_v28 = vld [vmem:[#allocation9 + $0x298] sm:$0xf]  ;;  %v10856_v14 = vadd.f32 %v10855_v16, %v10843_v41 }
 0x94c   : > { %11107 = vmatpush.bf16.msra.mxu2 %v16114_v43  ;;  %11082 = vmatpush.bf16.msra.mxu0 %v15570_v5  ;;  %v18423_v8 = vld [vmem:[#allocation9 + $0x2b4] sm:$0xf0]  ;;  %v15474_v43 = vor.u32 %v18359_v1, %v15473_v52  ;;  %v10831_v9 = vpop.f32.mrf.mxu0 }
 0x94d   : > { %v15985_v2 = vld [vmem:[#allocation9 + $0x498] sm:$0xf]  ;;  %v21706_v45 = vadd.f32 %v10868_v55, %v10856_v14  ;;  %v15730_v53 = vor.u32 %v18423_v8, %v15729_v28 }
 0x94e   : > { %11120 = vmatpush.bf16.msra.mxu3 %v16370_v31  ;;  %11095 = vmatpush.bf16.msra.mxu1 %v15826_v23  ;;  %v18487_v7 = vld [vmem:[#allocation9 + $0x4b4] sm:$0xf0] }
 0x94f   : > { %v16241_v0 = vld [vmem:[#allocation9 + $0x698] sm:$0xf]  ;;  %v15986_v31 = vor.u32 %v18487_v7, %v15985_v2 }
 0x950   : > { %11108 = vmatpush.bf16.msra.mxu2 %v16082_v11  ;;  %11083 = vmatpush.bf16.msra.mxu0 %v15538_v46  ;;  %v18551_v3 = vld [vmem:[#allocation9 + $0x6b4] sm:$0xf0] }
 0x951   : > { %v15441_v21 = vld [vmem:[#allocation9 + $0x58] sm:$0xf]  ;;  %v16242_v63 = vor.u32 %v18551_v3, %v16241_v0 }
 0x952   : > { %11121 = vmatpush.bf16.msra.mxu3 %v16338_v54  ;;  %11096 = vmatpush.bf16.msra.mxu1 %v15794_v22  ;;  %v18351_v30 = vld [vmem:[#allocation9 + $0x74] sm:$0xf0]  ;;  %v10857_v51 = vpop.f32.mrf.mxu2 }
 0x953   : > { %v15697_v26 = vld [vmem:[#allocation9 + $0x258] sm:$0xf]  ;;  %v15442_v37 = vor.u32 %v18351_v30, %v15441_v21 }
 0x954   : > { %11109 = vmatpush.bf16.msra.mxu2 %v16050_v48  ;;  %11084 = vmatpush.bf16.msra.mxu0 %v15506_v57  ;;  %v18415_v5 = vld [vmem:[#allocation9 + $0x274] sm:$0xf0]  ;;  %v10881_v33 = vpop.f32.mrf.mxu0 }
 0x955   : > { %v15953_v23 = vld [vmem:[#allocation9 + $0x458] sm:$0xf]  ;;  %v15698_v4 = vor.u32 %v18415_v5, %v15697_v26 }
 0x956   : > { %11122 = vmatpush.bf16.msra.mxu3 %v16306_v20  ;;  %11097 = vmatpush.bf16.msra.mxu1 %v15762_v17  ;;  %v18479_v11 = vld [vmem:[#allocation9 + $0x474] sm:$0xf0] }
 0x957   : > { %v16209_v47 = vld [vmem:[#allocation9 + $0x658] sm:$0xf]  ;;  %v15954_v56 = vor.u32 %v18479_v11, %v15953_v23 }
 0x958   : > { %11110 = vmatpush.bf16.msra.mxu2 %v16018_v59  ;;  %v18543_v36 = vld [vmem:[#allocation9 + $0x674] sm:$0xf0]  ;;  %11085 = vmatpush.bf16.msra.mxu0 %v15474_v43 }
 0x959   : > { %v15409_v54 = vld [vmem:[#allocation9 + $0x18] sm:$0xf]  ;;  %v16210_v22 = vor.u32 %v18543_v36, %v16209_v47 }
 0x95a   : > { %11123 = vmatpush.bf16.msra.mxu3 %v16274_v61  ;;  %v18343_v34 = vld [vmem:[#allocation9 + $0x34] sm:$0xf0]  ;;  %11098 = vmatpush.bf16.msra.mxu1 %v15730_v53 }
 0x95b   : > { %v15665_v15 = vld [vmem:[#allocation9 + $0x218] sm:$0xf]  ;;  %v15410_v58 = vor.u32 %v18343_v34, %v15409_v54 }
 0x95c   : > { %11111 = vmatpush.bf16.msra.mxu2 %v15986_v31  ;;  %v18407_v49 = vld [vmem:[#allocation9 + $0x234] sm:$0xf0]  ;;  %11086 = vmatpush.bf16.msra.mxu0 %v15442_v37 }
 0x95d   : > { %v15921_v46 = vld [vmem:[#allocation9 + $0x418] sm:$0xf]  ;;  %v15666_v40 = vor.u32 %v18407_v49, %v15665_v15 }
 0x95e   : > { %11124 = vmatpush.bf16.msra.mxu3 %v16242_v63  ;;  %v18471_v48 = vld [vmem:[#allocation9 + $0x434] sm:$0xf0]  ;;  %11099 = vmatpush.bf16.msra.mxu1 %v15698_v4 }
 0x95f   : > { %v16177_v35 = vld [vmem:[#allocation9 + $0x618] sm:$0xf]  ;;  %v15922_v41 = vor.u32 %v18471_v48, %v15921_v46 }
 0x960   : > { %v18535_v42 = vld [vmem:[#allocation9 + $0x634] sm:$0xf0]  ;;  %11112 = vmatpush.bf16.msra.mxu2 %v15954_v56  ;;  %11087 = vmatpush.bf16.msra.mxu0 %v15410_v58  ;;  %v21712_v56 = vld [vmem:[#allocation11] sm:$0xff] }
 0x961   : > { %v16657_v29 = vld [vmem:[#allocation9 + $0x9d8] sm:$0xf]  ;;  %v16178_v59 = vor.u32 %v18535_v42, %v16177_v35  ;;  %v7884_v15 = vperm.slane %v21712_v56, 4 }
 0x962   : > { %v18655_v50 = vld [vmem:[#allocation9 + $0x9f4] sm:$0xf0]  ;;  %11125 = vmatpush.bf16.msra.mxu3 %v16210_v22  ;;  %11100 = vmatpush.bf16.msra.mxu1 %v15666_v40 }
 0x963   : > { %v16913_v20 = vld [vmem:[#allocation9 + $0xbd8] sm:$0xf]  ;;  %v16658_v52 = vor.u32 %v18655_v50, %v16657_v29  ;;  %11088 = vmatmul.bf16.vlgmr.msra.gmra.mxu0 %v21608_v19 }
 0x964   : > { %v18719_v38 = vld [vmem:[#allocation9 + $0xbf4] sm:$0xf0]  ;;  %11113 = vmatpush.bf16.msra.mxu2 %v15922_v41 }
 0x965   : > { %v17169_v12 = vld [vmem:[#allocation9 + $0xdd8] sm:$0xf]  ;;  %v16914_v1 = vor.u32 %v18719_v38, %v16913_v20  ;;  %11132 = vmatpush.bf16.msrb.mxu0 %v16658_v52  ;;  %11101 = vmatmul.bf16.vlgmr.msra.gmra.mxu1 %v21613_v39 }
 0x966   : > { %v18783_v25 = vld [vmem:[#allocation9 + $0xdf4] sm:$0xf0]  ;;  %11126 = vmatpush.bf16.msra.mxu3 %v16178_v59 }
 0x967   : > { %v17425_v57 = vld [vmem:[#allocation9 + $0xfd8] sm:$0xf]  ;;  %v17170_v28 = vor.u32 %v18783_v25, %v17169_v12  ;;  %11145 = vmatpush.bf16.msrb.mxu1 %v16914_v1  ;;  %11114 = vmatmul.bf16.vlgmr.msra.gmra.mxu2 %v21606_v44  ;;  %v10882_v12 = vadd.f32 %v10881_v33, %v7884_v15  ;;  %v10894_v25 = vpop.f32.mrf.mxu1 }
 0x968   : > { %v18847_v17 = vld [vmem:[#allocation9 + $0xff4] sm:$0xf0] }
 0x969   : > { %v16625_v16 = vld [vmem:[#allocation9 + $0x998] sm:$0xf]  ;;  %v17426_v2 = vor.u32 %v18847_v17, %v17425_v57  ;;  %11158 = vmatpush.bf16.msrb.mxu2 %v17170_v28  ;;  %11127 = vmatmul.bf16.vlgmr.msra.gmra.mxu3 %v21610_v27  ;;  %v10895_v1 = vadd.f32 %v10894_v25, %v10882_v12 }
 0x96a   : > { %v18647_v61 = vld [vmem:[#allocation9 + $0x9b4] sm:$0xf0] }
 0x96b   : > { %v16881_v8 = vld [vmem:[#allocation9 + $0xb98] sm:$0xf]  ;;  %v16626_v43 = vor.u32 %v18647_v61, %v16625_v16  ;;  %11171 = vmatpush.bf16.msrb.mxu3 %v17426_v2 }
 0x96c   : > { %v18711_v7 = vld [vmem:[#allocation9 + $0xbb4] sm:$0xf0] }
 0x96d   : > { %v17137_v14 = vld [vmem:[#allocation9 + $0xd98] sm:$0xf]  ;;  %v16882_v9 = vor.u32 %v18711_v7, %v16881_v8  ;;  %11133 = vmatpush.bf16.msrb.mxu0 %v16626_v43 }
 0x96e   : > { %v18775_v55 = vld [vmem:[#allocation9 + $0xdb4] sm:$0xf0] }
 0x96f   : > { %v17393_v0 = vld [vmem:[#allocation9 + $0xf98] sm:$0xf]  ;;  %v17138_v53 = vor.u32 %v18775_v55, %v17137_v14  ;;  %11146 = vmatpush.bf16.msrb.mxu1 %v16882_v9  ;;  %v10907_v14 = vpop.f32.mrf.mxu2 }
 0x970   : > { %v18839_v3 = vld [vmem:[#allocation9 + $0xfb4] sm:$0xf0]  ;;  %v10908_v9 = vadd.f32 %v10907_v14, %v10895_v1  ;;  %v16147_v1 = vld [vmem:[#allocation9 + $0x5f8] sm:$0xf0] }
 0x971   : > { %v16593_v31 = vld [vmem:[#allocation9 + $0x958] sm:$0xf]  ;;  %v17394_v26 = vor.u32 %v18839_v3, %v17393_v0  ;;  %11159 = vmatpush.bf16.msrb.mxu2 %v17138_v53  ;;  %v10920_v53 = vpop.f32.mrf.mxu3 }
 0x972   : > { %v18639_v21 = vld [vmem:[#allocation9 + $0x974] sm:$0xf0] }
 0x973   : > { %v16849_v30 = vld [vmem:[#allocation9 + $0xb58] sm:$0xf]  ;;  %v16594_v47 = vor.u32 %v18639_v21, %v16593_v31  ;;  %11172 = vmatpush.bf16.msrb.mxu3 %v17394_v26  ;;  %v21715_v26 = vadd.f32 %v10920_v53, %v10908_v9  ;;  %v15859_v53 = vld [vmem:[#allocation9 + $0x3b8] sm:$0xf0] }
 0x974   : > { %v18703_v32 = vld [vmem:[#allocation9 + $0xb74] sm:$0xf0] }
 0x975   : > { %v17105_v63 = vld [vmem:[#allocation9 + $0xd58] sm:$0xf]  ;;  %v16850_v37 = vor.u32 %v18703_v32, %v16849_v30  ;;  %11134 = vmatpush.bf16.msrb.mxu0 %v16594_v47  ;;  %v10883_v32 = vpop.f32.mrf.mxu0 }
 0x976   : > { %v18767_v5 = vld [vmem:[#allocation9 + $0xd74] sm:$0xf0]  ;;  %v16371_v32 = vld [vmem:[#allocation9 + $0x7b8] sm:$0xf0] }
 0x977   : > { %v17361_v23 = vld [vmem:[#allocation9 + $0xf58] sm:$0xf]  ;;  %v17106_v54 = vor.u32 %v18767_v5, %v17105_v63  ;;  %11147 = vmatpush.bf16.msrb.mxu1 %v16850_v37 }
 0x978   : > { %v18831_v11 = vld [vmem:[#allocation9 + $0xf74] sm:$0xf0] }
 0x979   : > { %v16561_v36 = vld [vmem:[#allocation9 + $0x918] sm:$0xf]  ;;  %v17362_v49 = vor.u32 %v18831_v11, %v17361_v23  ;;  %11160 = vmatpush.bf16.msrb.mxu2 %v17106_v54  ;;  %v10922_v25 = vpop.f32.mrf.mxu3 }
 0x97a   : > { %v18631_v34 = vld [vmem:[#allocation9 + $0x934] sm:$0xf0] }
 0x97b   : > { %v16817_v4 = vld [vmem:[#allocation9 + $0xb18] sm:$0xf]  ;;  %v16562_v42 = vor.u32 %v18631_v34, %v16561_v36  ;;  %11173 = vmatpush.bf16.msrb.mxu3 %v17362_v49  ;;  %v10896_v36 = vpop.f32.mrf.mxu1 }
 0x97c   : > { %v18695_v46 = vld [vmem:[#allocation9 + $0xb34] sm:$0xf0]  ;;  %v18443_v36 = vld [vmem:[#allocation9 + $0x35c] sm:$0xf] }
 0x97d   : > { %v17073_v51 = vld [vmem:[#allocation9 + $0xd18] sm:$0xf]  ;;  %v16818_v29 = vor.u32 %v18695_v46, %v16817_v4  ;;  %11135 = vmatpush.bf16.msrb.mxu0 %v16562_v42  ;;  %v10933_v25 = vpop.f32.mrf.mxu0 }
 0x97e   : > { %v18759_v22 = vld [vmem:[#allocation9 + $0xd34] sm:$0xf0] }
 0x97f   : > { %v17329_v48 = vld [vmem:[#allocation9 + $0xf18] sm:$0xf]  ;;  %v17074_v50 = vor.u32 %v18759_v22, %v17073_v51  ;;  %11148 = vmatpush.bf16.msrb.mxu1 %v16818_v29 }
 0x980   : > { %v18823_v35 = vld [vmem:[#allocation9 + $0xf34] sm:$0xf0] }
 0x981   : > { %v16529_v20 = vld [vmem:[#allocation9 + $0x8d8] sm:$0xf]  ;;  %v17330_v40 = vor.u32 %v18823_v35, %v17329_v48  ;;  %11161 = vmatpush.bf16.msrb.mxu2 %v17074_v50  ;;  %v10909_v50 = vpop.f32.mrf.mxu2 }
 0x982   : > { %v18623_v58 = vld [vmem:[#allocation9 + $0x8f4] sm:$0xf0]  ;;  %v18499_v50 = vld [vmem:[#allocation9 + $0x51c] sm:$0xf] }
 0x983   : > { %v16785_v38 = vld [vmem:[#allocation9 + $0xad8] sm:$0xf]  ;;  %v16530_v28 = vor.u32 %v18623_v58, %v16529_v20  ;;  %11174 = vmatpush.bf16.msrb.mxu3 %v17330_v40  ;;  %v18395_v40 = vld [vmem:[#allocation9 + $0x1dc] sm:$0xf] }
 0x984   : > { %v18687_v41 = vld [vmem:[#allocation9 + $0xaf4] sm:$0xf0] }
 0x985   : > { %v17041_v57 = vld [vmem:[#allocation9 + $0xcd8] sm:$0xf]  ;;  %v16786_v16 = vor.u32 %v18687_v41, %v16785_v38  ;;  %11136 = vmatpush.bf16.msrb.mxu0 %v16530_v28  ;;  %v15635_v41 = vld [vmem:[#allocation9 + $0x1f8] sm:$0xf0] }
 0x986   : > { %v18751_v17 = vld [vmem:[#allocation9 + $0xcf4] sm:$0xf0] }
 0x987   : > { %v17297_v59 = vld [vmem:[#allocation9 + $0xed8] sm:$0xf]  ;;  %v17042_v61 = vor.u32 %v18751_v17, %v17041_v57  ;;  %11149 = vmatpush.bf16.msrb.mxu1 %v16786_v16  ;;  %v18459_v57 = vld [vmem:[#allocation9 + $0x3dc] sm:$0xf] }
 0x988   : > { %v18815_v52 = vld [vmem:[#allocation9 + $0xef4] sm:$0xf0] }
 0x989   : > { %v16497_v8 = vld [vmem:[#allocation9 + $0x898] sm:$0xf]  ;;  %v17298_v55 = vor.u32 %v18815_v52, %v17297_v59  ;;  %11162 = vmatpush.bf16.msrb.mxu2 %v17042_v61  ;;  %v15891_v59 = vld [vmem:[#allocation9 + $0x3f8] sm:$0xf0] }
 0x98a   : > { %v18615_v2 = vld [vmem:[#allocation9 + $0x8b4] sm:$0xf0]  ;;  %v18523_v52 = vld [vmem:[#allocation9 + $0x5dc] sm:$0xf]  ;;  %v15894_v14 = vor.u32 %v18459_v57, %v15891_v59 }
 0x98b   : > { %v16753_v7 = vld [vmem:[#allocation9 + $0xa98] sm:$0xf]  ;;  %v16498_v30 = vor.u32 %v18615_v2, %v16497_v8  ;;  %11175 = vmatpush.bf16.msrb.mxu3 %v17298_v55  ;;  %v18587_v61 = vld [vmem:[#allocation9 + $0x7dc] sm:$0xf]  ;;  %v16150_v55 = vor.u32 %v18523_v52, %v16147_v1  ;;  %v10934_v52 = vadd.f32 %v10933_v25, %v21715_v26  ;;  %v10946_v1 = vpop.f32.mrf.mxu1 }
 0x98c   : > { %v18679_v0 = vld [vmem:[#allocation9 + $0xab4] sm:$0xf0]  ;;  %v16403_v8 = vld [vmem:[#allocation9 + $0x7f8] sm:$0xf0] }
 0x98d   : > { %v17009_v3 = vld [vmem:[#allocation9 + $0xc98] sm:$0xf]  ;;  %v16754_v63 = vor.u32 %v18679_v0, %v16753_v7  ;;  %11137 = vmatpush.bf16.msrb.mxu0 %v16498_v30  ;;  %v15638_v7 = vor.u32 %v18395_v40, %v15635_v41  ;;  %v18387_v0 = vld [vmem:[#allocation9 + $0x19c] sm:$0xf]  ;;  %v16406_v9 = vor.u32 %v18587_v61, %v16403_v8 }
 0x98e   : > { %v18743_v43 = vld [vmem:[#allocation9 + $0xcb4] sm:$0xf0]  ;;  %v18579_v30 = vld [vmem:[#allocation9 + $0x79c] sm:$0xf] }
 0x98f   : > { %v17265_v31 = vld [vmem:[#allocation9 + $0xe98] sm:$0xf]  ;;  %v17010_v5 = vor.u32 %v18743_v43, %v17009_v3  ;;  %11150 = vmatpush.bf16.msrb.mxu1 %v16754_v63  ;;  %v15603_v3 = vld [vmem:[#allocation9 + $0x1b8] sm:$0xf0] }
 0x990   : > { %v18807_v21 = vld [vmem:[#allocation9 + $0xeb4] sm:$0xf0]  ;;  %v18451_v43 = vld [vmem:[#allocation9 + $0x39c] sm:$0xf]  ;;  %v15606_v63 = vor.u32 %v18387_v0, %v15603_v3 }
 0x991   : > { %v16465_v23 = vld [vmem:[#allocation9 + $0x858] sm:$0xf]  ;;  %v17266_v37 = vor.u32 %v18807_v21, %v17265_v31  ;;  %11163 = vmatpush.bf16.msrb.mxu2 %v17010_v5  ;;  %v18515_v31 = vld [vmem:[#allocation9 + $0x59c] sm:$0xf]  ;;  %v15862_v5 = vor.u32 %v18451_v43, %v15859_v53 }
 0x992   : > { %v18607_v11 = vld [vmem:[#allocation9 + $0x874] sm:$0xf0]  ;;  %v16115_v21 = vld [vmem:[#allocation9 + $0x5b8] sm:$0xf0] }
 0x993   : > { %v16721_v47 = vld [vmem:[#allocation9 + $0xa58] sm:$0xf]  ;;  %v16466_v46 = vor.u32 %v18607_v11, %v16465_v23  ;;  %11176 = vmatpush.bf16.msrb.mxu3 %v17266_v37  ;;  %v16118_v23 = vor.u32 %v18515_v31, %v16115_v21  ;;  %v18379_v11 = vld [vmem:[#allocation9 + $0x15c] sm:$0xf]  ;;  %v16374_v37 = vor.u32 %v18579_v30, %v16371_v32  ;;  %v10959_v31 = vpop.f32.mrf.mxu2 }
 0x994   : > { %v18671_v54 = vld [vmem:[#allocation9 + $0xa74] sm:$0xf0]  ;;  %v18363_v57 = vld [vmem:[#allocation9 + $0xdc] sm:$0xf] }
 0x995   : > { %v16977_v34 = vld [vmem:[#allocation9 + $0xc58] sm:$0xf]  ;;  %v16722_v48 = vor.u32 %v18671_v54, %v16721_v47  ;;  %11138 = vmatpush.bf16.msrb.mxu0 %v16466_v46  ;;  %v15571_v47 = vld [vmem:[#allocation9 + $0x178] sm:$0xf0] }
 0x996   : > { %v18735_v4 = vld [vmem:[#allocation9 + $0xc74] sm:$0xf0]  ;;  %v15827_v54 = vld [vmem:[#allocation9 + $0x378] sm:$0xf0]  ;;  %v15574_v46 = vor.u32 %v18379_v11, %v15571_v47 }
 0x997   : > { %v17233_v15 = vld [vmem:[#allocation9 + $0xe58] sm:$0xf]  ;;  %v16978_v35 = vor.u32 %v18735_v4, %v16977_v34  ;;  %11151 = vmatpush.bf16.msrb.mxu1 %v16722_v48  ;;  %v18507_v34 = vld [vmem:[#allocation9 + $0x55c] sm:$0xf] }
 0x998   : > { %v18799_v49 = vld [vmem:[#allocation9 + $0xe74] sm:$0xf0]  ;;  %v16083_v4 = vld [vmem:[#allocation9 + $0x578] sm:$0xf0] }
 0x999   : > { %v16433_v51 = vld [vmem:[#allocation9 + $0x818] sm:$0xf]  ;;  %v17234_v20 = vor.u32 %v18799_v49, %v17233_v15  ;;  %11164 = vmatpush.bf16.msrb.mxu2 %v16978_v35  ;;  %v18571_v15 = vld [vmem:[#allocation9 + $0x75c] sm:$0xf] }
 0x99a   : > { %v18599_v22 = vld [vmem:[#allocation9 + $0x834] sm:$0xf0]  ;;  %v16339_v49 = vld [vmem:[#allocation9 + $0x778] sm:$0xf0] }
 0x99b   : > { %v16689_v42 = vld [vmem:[#allocation9 + $0xa18] sm:$0xf]  ;;  %v16434_v17 = vor.u32 %v18599_v22, %v16433_v51  ;;  %11177 = vmatpush.bf16.msrb.mxu3 %v17234_v20  ;;  %v15830_v51 = vor.u32 %v18443_v36, %v15827_v54  ;;  %v16086_v22 = vor.u32 %v18507_v34, %v16083_v4  ;;  %v18371_v48 = vld [vmem:[#allocation9 + $0x11c] sm:$0xf] }
 0x99c   : > { %v18663_v33 = vld [vmem:[#allocation9 + $0xa34] sm:$0xf0]  ;;  %v15539_v35 = vld [vmem:[#allocation9 + $0x138] sm:$0xf0] }
 0x99d   : > { %v16945_v29 = vld [vmem:[#allocation9 + $0xc18] sm:$0xf]  ;;  %v16690_v28 = vor.u32 %v18663_v33, %v16689_v42  ;;  %11139 = vmatpush.bf16.msrb.mxu0 %v16434_v17  ;;  %v18435_v42 = vld [vmem:[#allocation9 + $0x31c] sm:$0xf]  ;;  %v16342_v33 = vor.u32 %v18571_v15, %v16339_v49 }
 0x99e   : > { %v18727_v58 = vld [vmem:[#allocation9 + $0xc34] sm:$0xf0]  ;;  %v16051_v20 = vld [vmem:[#allocation9 + $0x538] sm:$0xf0] }
 0x99f   : > { %v17201_v38 = vld [vmem:[#allocation9 + $0xe18] sm:$0xf]  ;;  %v16946_v16 = vor.u32 %v18727_v58, %v16945_v29  ;;  %11152 = vmatpush.bf16.msrb.mxu1 %v16690_v28  ;;  %v15795_v29 = vld [vmem:[#allocation9 + $0x338] sm:$0xf0]  ;;  %v16054_v41 = vor.u32 %v18499_v50, %v16051_v20 }
 0x9a0   : > { %v18791_v12 = vld [vmem:[#allocation9 + $0xe34] sm:$0xf0]  ;;  %11140 = vmatmul.bf16.vlgmr.msrb.gmra.mxu0 %v21624_v13  ;;  %v18563_v58 = vld [vmem:[#allocation9 + $0x71c] sm:$0xf]  ;;  %v15798_v40 = vor.u32 %v18435_v42, %v15795_v29 }
 0x9a1   : > { %v17202_v2 = vor.u32 %v18791_v12, %v17201_v38  ;;  %11165 = vmatpush.bf16.msrb.mxu2 %v16946_v16  ;;  %11184 = vmatpush.bf16.msra.mxu0 %v15638_v7  ;;  %v16307_v38 = vld [vmem:[#allocation9 + $0x738] sm:$0xf0]  ;;  %v15542_v12 = vor.u32 %v18371_v48, %v15539_v35 }
 0x9a2   : > { %11153 = vmatmul.bf16.vlgmr.msrb.gmra.mxu1 %v21628_v62  ;;  %v15507_v17 = vld [vmem:[#allocation9 + $0xf8] sm:$0xf0]  ;;  %v16310_v28 = vor.u32 %v18563_v58, %v16307_v38 }
 0x9a3   : > { %11178 = vmatpush.bf16.msrb.mxu3 %v17202_v2  ;;  %11197 = vmatpush.bf16.msra.mxu1 %v15894_v14  ;;  %v18427_v59 = vld [vmem:[#allocation9 + $0x2dc] sm:$0xf]  ;;  %v10947_v14 = vadd.f32 %v10946_v1, %v10934_v52 }
 0x9a4   : > { %11166 = vmatmul.bf16.vlgmr.msrb.gmra.mxu2 %v21622_v10  ;;  %v15763_v16 = vld [vmem:[#allocation9 + $0x2f8] sm:$0xf0] }
 0x9a5   : > { %11210 = vmatpush.bf16.msra.mxu2 %v16150_v55  ;;  %11185 = vmatpush.bf16.msra.mxu0 %v15606_v63  ;;  %v18491_v61 = vld [vmem:[#allocation9 + $0x4dc] sm:$0xf]  ;;  %v15510_v55 = vor.u32 %v18363_v57, %v15507_v17  ;;  %v15766_v0 = vor.u32 %v18427_v59, %v15763_v16  ;;  %v10960_v63 = vadd.f32 %v10959_v31, %v10947_v14 }
 0x9a6   : > { %11179 = vmatmul.bf16.vlgmr.msrb.gmra.mxu3 %v21626_v18  ;;  %v16019_v8 = vld [vmem:[#allocation9 + $0x4f8] sm:$0xf0] }
 0x9a7   : > { %11223 = vmatpush.bf16.msra.mxu3 %v16406_v9  ;;  %11198 = vmatpush.bf16.msra.mxu1 %v15862_v5  ;;  %v18555_v2 = vld [vmem:[#allocation9 + $0x6dc] sm:$0xf]  ;;  %v16022_v3 = vor.u32 %v18491_v61, %v16019_v8  ;;  %v10972_v5 = vpop.f32.mrf.mxu3 }
 0x9a8   : > { %v16275_v7 = vld [vmem:[#allocation9 + $0x6f8] sm:$0xf0]  ;;  %v21722_v36 = vadd.f32 %v10972_v5, %v10960_v63 }
 0x9a9   : > { %11211 = vmatpush.bf16.msra.mxu2 %v16118_v23  ;;  %11186 = vmatpush.bf16.msra.mxu0 %v15574_v46  ;;  %v18355_v43 = vld [vmem:[#allocation9 + $0x9c] sm:$0xf]  ;;  %v16278_v26 = vor.u32 %v18555_v2, %v16275_v7  ;;  %v10948_v46 = vpop.f32.mrf.mxu1 }
 0x9aa   : > { %v15475_v9 = vld [vmem:[#allocation9 + $0xb8] sm:$0xf0] }
 0x9ab   : > { %11224 = vmatpush.bf16.msra.mxu3 %v16374_v37  ;;  %11199 = vmatpush.bf16.msra.mxu1 %v15830_v51  ;;  %v18419_v53 = vld [vmem:[#allocation9 + $0x29c] sm:$0xf]  ;;  %v15478_v47 = vor.u32 %v18355_v43, %v15475_v9  ;;  %v10935_v37 = vpop.f32.mrf.mxu0 }
 0x9ac   : > { %v15731_v21 = vld [vmem:[#allocation9 + $0x2b8] sm:$0xf0] }
 0x9ad   : > { %11212 = vmatpush.bf16.msra.mxu2 %v16086_v22  ;;  %11187 = vmatpush.bf16.msra.mxu0 %v15542_v12  ;;  %v18483_v30 = vld [vmem:[#allocation9 + $0x49c] sm:$0xf]  ;;  %v15734_v54 = vor.u32 %v18419_v53, %v15731_v21 }
 0x9ae   : > { %v15987_v32 = vld [vmem:[#allocation9 + $0x4b8] sm:$0xf0] }
 0x9af   : > { %11225 = vmatpush.bf16.msra.mxu3 %v16342_v33  ;;  %11200 = vmatpush.bf16.msra.mxu1 %v15798_v40  ;;  %v18547_v23 = vld [vmem:[#allocation9 + $0x69c] sm:$0xf]  ;;  %v15990_v34 = vor.u32 %v18483_v30, %v15987_v32  ;;  %v10974_v1 = vpop.f32.mrf.mxu3 }
 0x9b0   : > { %v16243_v11 = vld [vmem:[#allocation9 + $0x6b8] sm:$0xf0] }
 0x9b1   : > { %11213 = vmatpush.bf16.msra.mxu2 %v16054_v41  ;;  %11188 = vmatpush.bf16.msra.mxu0 %v15510_v55  ;;  %v18347_v4 = vld [vmem:[#allocation9 + $0x5c] sm:$0xf]  ;;  %v16246_v51 = vor.u32 %v18547_v23, %v16243_v11  ;;  %v10961_v41 = vpop.f32.mrf.mxu2 }
 0x9b2   : > { %v15443_v15 = vld [vmem:[#allocation9 + $0x78] sm:$0xf0] }
 0x9b3   : > { %11226 = vmatpush.bf16.msra.mxu3 %v16310_v28  ;;  %11201 = vmatpush.bf16.msra.mxu1 %v15766_v0  ;;  %v18411_v49 = vld [vmem:[#allocation9 + $0x25c] sm:$0xf]  ;;  %v15446_v29 = vor.u32 %v18347_v4, %v15443_v15 }
 0x9b4   : > { %v15699_v22 = vld [vmem:[#allocation9 + $0x278] sm:$0xf0] }
 0x9b5   : > { %11214 = vmatpush.bf16.msra.mxu2 %v16022_v3  ;;  %v18475_v48 = vld [vmem:[#allocation9 + $0x45c] sm:$0xf]  ;;  %11189 = vmatpush.bf16.msra.mxu0 %v15478_v47  ;;  %v15702_v58 = vor.u32 %v18411_v49, %v15699_v22 }
 0x9b6   : > { %v15955_v35 = vld [vmem:[#allocation9 + $0x478] sm:$0xf0] }
 0x9b7   : > { %11227 = vmatpush.bf16.msra.mxu3 %v16278_v26  ;;  %v18539_v42 = vld [vmem:[#allocation9 + $0x65c] sm:$0xf]  ;;  %11202 = vmatpush.bf16.msra.mxu1 %v15734_v54  ;;  %v15958_v38 = vor.u32 %v18475_v48, %v15955_v35 }
 0x9b8   : > { %v16211_v33 = vld [vmem:[#allocation9 + $0x678] sm:$0xf0] }
 0x9b9   : > { %v18339_v50 = vld [vmem:[#allocation9 + $0x1c] sm:$0xf]  ;;  %11215 = vmatpush.bf16.msra.mxu2 %v15990_v34  ;;  %v16214_v57 = vor.u32 %v18539_v42, %v16211_v33  ;;  %11190 = vmatpush.bf16.msra.mxu0 %v15446_v29 }
 0x9ba   : > { %v15411_v20 = vld [vmem:[#allocation9 + $0x38] sm:$0xf0] }
 0x9bb   : > { %v18403_v12 = vld [vmem:[#allocation9 + $0x21c] sm:$0xf]  ;;  %11228 = vmatpush.bf16.msra.mxu3 %v16246_v51  ;;  %v15414_v8 = vor.u32 %v18339_v50, %v15411_v20  ;;  %11203 = vmatpush.bf16.msra.mxu1 %v15702_v58 }
 0x9bc   : > { %v15667_v25 = vld [vmem:[#allocation9 + $0x238] sm:$0xf0] }
 0x9bd   : > { %v18467_v40 = vld [vmem:[#allocation9 + $0x41c] sm:$0xf]  ;;  %11216 = vmatpush.bf16.msra.mxu2 %v15958_v38  ;;  %v15670_v55 = vor.u32 %v18403_v12, %v15667_v25  ;;  %11191 = vmatpush.bf16.msra.mxu0 %v15414_v8  ;;  %v7885_v12 = vperm.slane %v21712_v56, 5  ;;  %v10998_v8 = vpop.f32.mrf.mxu1 }
 0x9be   : > { %v15923_v17 = vld [vmem:[#allocation9 + $0x438] sm:$0xf0] }
 0x9bf   : > { %v18531_v59 = vld [vmem:[#allocation9 + $0x61c] sm:$0xf]  ;;  %v15926_v0 = vor.u32 %v18467_v40, %v15923_v17  ;;  %11229 = vmatpush.bf16.msra.mxu3 %v16214_v57  ;;  %11204 = vmatpush.bf16.msra.mxu1 %v15670_v55 }
 0x9c0   : > { %v16179_v52 = vld [vmem:[#allocation9 + $0x638] sm:$0xf0]  ;;  %11192 = vmatmul.bf16.vlgmr.msra.gmra.mxu0 %v21608_v19 }
 0x9c1   : > { %v18651_v28 = vld [vmem:[#allocation9 + $0x9dc] sm:$0xf]  ;;  %v16182_v9 = vor.u32 %v18531_v59, %v16179_v52  ;;  %11217 = vmatpush.bf16.msra.mxu2 %v15926_v0  ;;  %v10985_v59 = vpop.f32.mrf.mxu0 }
 0x9c2   : > { %v16659_v16 = vld [vmem:[#allocation9 + $0x9f8] sm:$0xf0]  ;;  %11205 = vmatmul.bf16.vlgmr.msra.gmra.mxu1 %v21613_v39 }
 0x9c3   : > { %v18715_v61 = vld [vmem:[#allocation9 + $0xbdc] sm:$0xf]  ;;  %v16662_v53 = vor.u32 %v18651_v28, %v16659_v16  ;;  %11230 = vmatpush.bf16.msra.mxu3 %v16182_v9 }
 0x9c4   : > { %v16915_v2 = vld [vmem:[#allocation9 + $0xbf8] sm:$0xf0]  ;;  %11218 = vmatmul.bf16.vlgmr.msra.gmra.mxu2 %v21606_v44 }
 0x9c5   : > { %v18779_v7 = vld [vmem:[#allocation9 + $0xddc] sm:$0xf]  ;;  %v16918_v31 = vor.u32 %v18715_v61, %v16915_v2  ;;  %11236 = vmatpush.bf16.msrb.mxu0 %v16662_v53  ;;  %v10986_v61 = vadd.f32 %v10985_v59, %v7885_v12 }
 0x9c6   : > { %v17171_v14 = vld [vmem:[#allocation9 + $0xdf8] sm:$0xf0]  ;;  %11231 = vmatmul.bf16.vlgmr.msra.gmra.mxu3 %v21610_v27 }
 0x9c7   : > { %v18843_v3 = vld [vmem:[#allocation9 + $0xfdc] sm:$0xf]  ;;  %v17174_v26 = vor.u32 %v18779_v7, %v17171_v14  ;;  %11249 = vmatpush.bf16.msrb.mxu1 %v16918_v31 }
 0x9c8   : > { %v17427_v43 = vld [vmem:[#allocation9 + $0xff8] sm:$0xf0] }
 0x9c9   : > { %v18643_v21 = vld [vmem:[#allocation9 + $0x99c] sm:$0xf]  ;;  %v17430_v63 = vor.u32 %v18843_v3, %v17427_v43  ;;  %11262 = vmatpush.bf16.msrb.mxu2 %v17174_v26  ;;  %v10999_v3 = vadd.f32 %v10998_v8, %v10986_v61 }
 0x9ca   : > { %v16627_v30 = vld [vmem:[#allocation9 + $0x9b8] sm:$0xf0] }
 0x9cb   : > { %v18707_v32 = vld [vmem:[#allocation9 + $0xb9c] sm:$0xf]  ;;  %v16630_v54 = vor.u32 %v18643_v21, %v16627_v30  ;;  %11275 = vmatpush.bf16.msrb.mxu3 %v17430_v63  ;;  %v11011_v30 = vpop.f32.mrf.mxu2 }
 0x9cc   : > { %v16883_v5 = vld [vmem:[#allocation9 + $0xbb8] sm:$0xf0] }
 0x9cd   : > { %v18771_v23 = vld [vmem:[#allocation9 + $0xd9c] sm:$0xf]  ;;  %v16886_v34 = vor.u32 %v18707_v32, %v16883_v5  ;;  %11237 = vmatpush.bf16.msrb.mxu0 %v16630_v54 }
 0x9ce   : > { %v17139_v11 = vld [vmem:[#allocation9 + $0xdb8] sm:$0xf0] }
 0x9cf   : > { %v18835_v47 = vld [vmem:[#allocation9 + $0xf9c] sm:$0xf]  ;;  %v17142_v4 = vor.u32 %v18771_v23, %v17139_v11  ;;  %11250 = vmatpush.bf16.msrb.mxu1 %v16886_v34  ;;  %v11012_v11 = vadd.f32 %v11011_v30, %v10999_v3  ;;  %v11342_v3 = vld [vmem:[%s22190_s5 + $0x170] sm:$0xff]  ;;  %v11323_v30 = vld [vmem:[%s22190_s5 + $0xd8] sm:$0xff] }
 0x9d0   : > { %v17395_v37 = vld [vmem:[#allocation9 + $0xfb8] sm:$0xf0] }
 0x9d1   : > { %v18635_v15 = vld [vmem:[#allocation9 + $0x95c] sm:$0xf]  ;;  %v17398_v51 = vor.u32 %v18835_v47, %v17395_v37  ;;  %11263 = vmatpush.bf16.msrb.mxu2 %v17142_v4  ;;  %v11024_v47 = vpop.f32.mrf.mxu3 }
 0x9d2   : > { %v16595_v49 = vld [vmem:[#allocation9 + $0x978] sm:$0xf0]  ;;  %v21729_v4 = vadd.f32 %v11024_v47, %v11012_v11  ;;  %v11322_v47 = vld [vmem:[%s22190_s5 + $0xd0] sm:$0xff] }
 0x9d3   : > { %v18699_v46 = vld [vmem:[#allocation9 + $0xb5c] sm:$0xf]  ;;  %v16598_v29 = vor.u32 %v18635_v15, %v16595_v49  ;;  %11276 = vmatpush.bf16.msrb.mxu3 %v17398_v51  ;;  %v10987_v15 = vpop.f32.mrf.mxu0 }
 0x9d4   : > { %v16851_v22 = vld [vmem:[#allocation9 + $0xb78] sm:$0xf0]  ;;  %v11321_v15 = vld [vmem:[%s22190_s5 + $0xc8] sm:$0xff] }
 0x9d5   : > { %v18763_v48 = vld [vmem:[#allocation9 + $0xd5c] sm:$0xf]  ;;  %v16854_v20 = vor.u32 %v18699_v46, %v16851_v22  ;;  %11238 = vmatpush.bf16.msrb.mxu0 %v16598_v29 }
 0x9d6   : > { %v17107_v35 = vld [vmem:[#allocation9 + $0xd78] sm:$0xf0] }
 0x9d7   : > { %v18827_v42 = vld [vmem:[#allocation9 + $0xf5c] sm:$0xf]  ;;  %v17110_v58 = vor.u32 %v18763_v48, %v17107_v35  ;;  %11251 = vmatpush.bf16.msrb.mxu1 %v16854_v20  ;;  %v11000_v35 = vpop.f32.mrf.mxu1 }
 0x9d8   : > { %v17363_v33 = vld [vmem:[#allocation9 + $0xf78] sm:$0xf0] }
 0x9d9   : > { %v18627_v50 = vld [vmem:[#allocation9 + $0x91c] sm:$0xf]  ;;  %v17366_v25 = vor.u32 %v18827_v42, %v17363_v33  ;;  %11264 = vmatpush.bf16.msrb.mxu2 %v17110_v58 }
 0x9da   : > { %v16563_v38 = vld [vmem:[#allocation9 + $0x938] sm:$0xf0] }
 0x9db   : > { %v18691_v44 = vld [vmem:[#allocation9 + $0xb1c] sm:$0xf]  ;;  %v16566_v17 = vor.u32 %v18627_v50, %v16563_v38  ;;  %11277 = vmatpush.bf16.msrb.mxu3 %v17366_v25 }
 0x9dc   : > { %v16819_v40 = vld [vmem:[#allocation9 + $0xb38] sm:$0xf0] }
 0x9dd   : > { %v18755_v41 = vld [vmem:[#allocation9 + $0xd1c] sm:$0xf]  ;;  %v16822_v39 = vor.u32 %v18691_v44, %v16819_v40  ;;  %11239 = vmatpush.bf16.msrb.mxu0 %v16566_v17 }
 0x9de   : > { %v17075_v19 = vld [vmem:[#allocation9 + $0xd38] sm:$0xf0] }
 0x9df   : > { %v18819_v57 = vld [vmem:[#allocation9 + $0xf1c] sm:$0xf]  ;;  %v17078_v52 = vor.u32 %v18755_v41, %v17075_v19  ;;  %11252 = vmatpush.bf16.msrb.mxu1 %v16822_v39  ;;  %v11013_v19 = vpop.f32.mrf.mxu2  ;;  %v11026_v39 = vpop.f32.mrf.mxu3 }
 0x9e0   : > { %v17331_v27 = vld [vmem:[#allocation9 + $0xf38] sm:$0xf0]  ;;  %v21800_v11 = vpop.f32.mrf.mxu1  ;;  %v11301_v19 = vld [vmem:[%s22190_s5 + $0x28] sm:$0xff] }
 0x9e1   : > { %v18619_v1 = vld [vmem:[#allocation9 + $0x8dc] sm:$0xf]  ;;  %v17334_v56 = vor.u32 %v18819_v57, %v17331_v27  ;;  %11265 = vmatpush.bf16.msrb.mxu2 %v17078_v52 }
 0x9e2   : > { %v16531_v28 = vld [vmem:[#allocation9 + $0x8f8] sm:$0xf0] }
 0x9e3   : > { %v18683_v16 = vld [vmem:[#allocation9 + $0xadc] sm:$0xf]  ;;  %v16534_v43 = vor.u32 %v18619_v1, %v16531_v28  ;;  %11278 = vmatpush.bf16.msrb.mxu3 %v17334_v56  ;;  %v11311_v56 = vld [vmem:[%s22190_s5 + $0x78] sm:$0xff] }
 0x9e4   : > { %v16787_v2 = vld [vmem:[#allocation9 + $0xaf8] sm:$0xf0] }
 0x9e5   : > { %v18747_v7 = vld [vmem:[#allocation9 + $0xcdc] sm:$0xf]  ;;  %v16790_v9 = vor.u32 %v18683_v16, %v16787_v2  ;;  %11240 = vmatpush.bf16.msrb.mxu0 %v16534_v43  ;;  %v11327_v2 = vld [vmem:[%s22190_s5 + $0xf8] sm:$0xff]  ;;  %v11358_v43 = vld [vmem:[%s22190_s5 + $0x1f0] sm:$0xff] }
 0x9e6   : > { %v17043_v14 = vld [vmem:[#allocation9 + $0xcf8] sm:$0xf0] }
 0x9e7   : > { %v18811_v55 = vld [vmem:[#allocation9 + $0xedc] sm:$0xf]  ;;  %v17046_v53 = vor.u32 %v18747_v7, %v17043_v14  ;;  %11253 = vmatpush.bf16.msrb.mxu1 %v16790_v9  ;;  %v11343_v7 = vld [vmem:[%s22190_s5 + $0x178] sm:$0xff]  ;;  %v11325_v9 = vld [vmem:[%s22190_s5 + $0xe8] sm:$0xff] }
 0x9e8   : > { %v17299_v0 = vld [vmem:[#allocation9 + $0xef8] sm:$0xf0]  ;;  %v11359_v14 = vld [vmem:[%s22190_s5 + $0x1f8] sm:$0xff] }
 0x9e9   : > { %v18611_v31 = vld [vmem:[#allocation9 + $0x89c] sm:$0xf]  ;;  %v17302_v32 = vor.u32 %v18811_v55, %v17299_v0  ;;  %11266 = vmatpush.bf16.msrb.mxu2 %v17046_v53  ;;  %v11310_v55 = vld [vmem:[%s22190_s5 + $0x70] sm:$0xff] }
 0x9ea   : > { %v16499_v26 = vld [vmem:[#allocation9 + $0x8b8] sm:$0xf0]  ;;  %v11326_v0 = vld [vmem:[%s22190_s5 + $0xf0] sm:$0xff] }
 0x9eb   : > { %v18675_v21 = vld [vmem:[#allocation9 + $0xa9c] sm:$0xf]  ;;  %v16502_v34 = vor.u32 %v18611_v31, %v16499_v26  ;;  %11279 = vmatpush.bf16.msrb.mxu3 %v17302_v32  ;;  %v11339_v32 = vld [vmem:[%s22190_s5 + $0x158] sm:$0xff] }
 0x9ec   : > { %v16755_v63 = vld [vmem:[#allocation9 + $0xab8] sm:$0xf0] }
 0x9ed   : > { %v18739_v5 = vld [vmem:[#allocation9 + $0xc9c] sm:$0xf]  ;;  %v16758_v49 = vor.u32 %v18675_v21, %v16755_v63  ;;  %11241 = vmatpush.bf16.msrb.mxu0 %v16502_v34  ;;  %v11307_v21 = vld [vmem:[%s22190_s5 + $0x58] sm:$0xff]  ;;  %v21792_v63 = vpop.f32.mrf.mxu0  ;;  %v11305_v34 = vld [vmem:[%s22190_s5 + $0x48] sm:$0xff] }
 0x9ee   : > { %v17011_v23 = vld [vmem:[#allocation9 + $0xcb8] sm:$0xf0] }
 0x9ef   : > { %v18803_v37 = vld [vmem:[#allocation9 + $0xe9c] sm:$0xf]  ;;  %v17014_v46 = vor.u32 %v18739_v5, %v17011_v23  ;;  %11254 = vmatpush.bf16.msrb.mxu1 %v16758_v49  ;;  %v11355_v5 = vld [vmem:[%s22190_s5 + $0x1d8] sm:$0xff]  ;;  %v11306_v23 = vld [vmem:[%s22190_s5 + $0x50] sm:$0xff] }
 0x9f0   : > { %v17267_v54 = vld [vmem:[#allocation9 + $0xeb8] sm:$0xf0]  ;;  %v11337_v49 = vld [vmem:[%s22190_s5 + $0x148] sm:$0xff] }
 0x9f1   : > { %v18603_v51 = vld [vmem:[#allocation9 + $0x85c] sm:$0xf]  ;;  %v17270_v42 = vor.u32 %v18803_v37, %v17267_v54  ;;  %11267 = vmatpush.bf16.msrb.mxu2 %v17014_v46  ;;  %v11338_v37 = vld [vmem:[%s22190_s5 + $0x150] sm:$0xff]  ;;  %v11353_v46 = vld [vmem:[%s22190_s5 + $0x1c8] sm:$0xff] }
 0x9f2   : > { %v16467_v22 = vld [vmem:[#allocation9 + $0x878] sm:$0xf0]  ;;  %v11354_v54 = vld [vmem:[%s22190_s5 + $0x1d0] sm:$0xff] }
 0x9f3   : > { %v18667_v48 = vld [vmem:[#allocation9 + $0xa5c] sm:$0xf]  ;;  %v16470_v38 = vor.u32 %v18603_v51, %v16467_v22  ;;  %11280 = vmatpush.bf16.msrb.mxu3 %v17270_v42  ;;  %v21826_v22 = vpop.f32.mrf.mxu2  ;;  %v21834_v42 = vpop.f32.mrf.mxu3 }
 0x9f4   : > { %v16723_v33 = vld [vmem:[#allocation9 + $0xa78] sm:$0xf0] }
 0x9f5   : > { %v18731_v29 = vld [vmem:[#allocation9 + $0xc5c] sm:$0xf]  ;;  %v16726_v44 = vor.u32 %v18667_v48, %v16723_v33  ;;  %11242 = vmatpush.bf16.msrb.mxu0 %v16470_v38  ;;  %v11351_v38 = vld [vmem:[%s22190_s5 + $0x1b8] sm:$0xff] }
 0x9f6   : > { %v16979_v50 = vld [vmem:[#allocation9 + $0xc78] sm:$0xf0] }
 0x9f7   : > { %v18795_v20 = vld [vmem:[#allocation9 + $0xe5c] sm:$0xf]  ;;  %v16982_v12 = vor.u32 %v18731_v29, %v16979_v50  ;;  %11255 = vmatpush.bf16.msrb.mxu1 %v16726_v44  ;;  %v11303_v29 = vld [vmem:[%s22190_s5 + $0x38] sm:$0xff]  ;;  %v11302_v44 = vld [vmem:[%s22190_s5 + $0x30] sm:$0xff] }
 0x9f8   : > { %v17235_v58 = vld [vmem:[#allocation9 + $0xe78] sm:$0xf0]  ;;  %v11319_v50 = vld [vmem:[%s22190_s5 + $0xb8] sm:$0xff] }
 0x9f9   : > { %v18595_v25 = vld [vmem:[#allocation9 + $0x81c] sm:$0xf]  ;;  %v17238_v57 = vor.u32 %v18795_v20, %v17235_v58  ;;  %11268 = vmatpush.bf16.msrb.mxu2 %v16982_v12  ;;  %v11335_v20 = vld [vmem:[%s22190_s5 + $0x138] sm:$0xff]  ;;  %v11039_v58 = vpop.f32.mrf.mxu0  ;;  %v11052_v12 = vpop.f32.mrf.mxu1 }
 0x9fa   : > { %v16435_v40 = vld [vmem:[#allocation9 + $0x838] sm:$0xf0]  ;;  %v11402_v58 = vld [vmem:[%s22190_s5 + $0x350] sm:$0xff] }
 0x9fb   : > { %v18659_v41 = vld [vmem:[#allocation9 + $0xa1c] sm:$0xf]  ;;  %v16438_v28 = vor.u32 %v18595_v25, %v16435_v40  ;;  %11281 = vmatpush.bf16.msrb.mxu3 %v17238_v57  ;;  %v11318_v25 = vld [vmem:[%s22190_s5 + $0xb0] sm:$0xff]  ;;  %v11317_v57 = vld [vmem:[%s22190_s5 + $0xa8] sm:$0xff]  ;;  %v11065_v39 = vpop.f32.mrf.mxu2 }
 0x9fc   : > { %v16691_v27 = vld [vmem:[#allocation9 + $0xa38] sm:$0xf0]  ;;  %v11334_v40 = vld [vmem:[%s22190_s5 + $0x130] sm:$0xff]  ;;  %v11038_v39 = vadd.f32 %v21792_v63, %v21729_v4 }
 0x9fd   : > { %v18723_v17 = vld [vmem:[#allocation9 + $0xc1c] sm:$0xf]  ;;  %v16694_v16 = vor.u32 %v18659_v41, %v16691_v27  ;;  %11243 = vmatpush.bf16.msrb.mxu0 %v16438_v28  ;;  %v11350_v41 = vld [vmem:[%s22190_s5 + $0x1b0] sm:$0xff]  ;;  %v11333_v27 = vld [vmem:[%s22190_s5 + $0x128] sm:$0xff]  ;;  %v11078_v28 = vpop.f32.mrf.mxu3 }
 0x9fe   : > { %v16947_v59 = vld [vmem:[#allocation9 + $0xc38] sm:$0xf0]  ;;  %v11366_v28 = vld [vmem:[%s22190_s5 + $0x230] sm:$0xff] }
 0x9ff   : > { %v18787_v52 = vld [vmem:[#allocation9 + $0xe1c] sm:$0xf]  ;;  %v16950_v61 = vor.u32 %v18723_v17, %v16947_v59  ;;  %11256 = vmatpush.bf16.msrb.mxu1 %v16694_v16  ;;  %v11349_v17 = vld [vmem:[%s22190_s5 + $0x1a8] sm:$0xff]  ;;  %v11382_v4 = vld [vmem:[%s22190_s5 + $0x2b0] sm:$0xff] }
 0xa00   : > { %v17203_v1 = vld [vmem:[#allocation9 + $0xe38] sm:$0xf0]  ;;  %11244 = vmatmul.bf16.vlgmr.msrb.gmra.mxu0 %v21624_v13  ;;  %v11309_v13 = vld [vmem:[%s22190_s5 + $0x68] sm:$0xff] }
 0xa01   : > { %v17206_v8 = vor.u32 %v18787_v52, %v17203_v1  ;;  %11269 = vmatpush.bf16.msrb.mxu2 %v16950_v61  ;;  %11428 = vmatpush.msra.mxu0 %v11311_v56  ;;  %v11308_v53 = vld [vmem:[%s22190_s5 + $0x60] sm:$0xff]  ;;  %v11299_v61 = vld [vmem:[%s22190_s5 + $0x18] sm:$0xff] }
 0xa02   : > { %11257 = vmatmul.bf16.vlgmr.msrb.gmra.mxu1 %v21628_v62  ;;  %v11341_v62 = vld [vmem:[%s22190_s5 + $0x168] sm:$0xff]  ;;  %v11340_v31 = vld [vmem:[%s22190_s5 + $0x160] sm:$0xff]  ;;  %v11331_v56 = vld [vmem:[%s22190_s5 + $0x118] sm:$0xff] }
 0xa03   : > { %11282 = vmatpush.bf16.msrb.mxu3 %v17206_v8  ;;  %11448 = vmatpush.msra.mxu1 %v11327_v2  ;;  %v11356_v26 = vld [vmem:[%s22190_s5 + $0x1e0] sm:$0xff]  ;;  %v11315_v8 = vld [vmem:[%s22190_s5 + $0x98] sm:$0xff] }
 0xa04   : > { %11270 = vmatmul.bf16.vlgmr.msrb.gmra.mxu2 %v21622_v10  ;;  %11429 = vmatpush.msra.mxu0 %v11310_v55  ;;  %v11357_v10 = vld [vmem:[%s22190_s5 + $0x1e8] sm:$0xff]  ;;  %v11304_v51 = vld [vmem:[%s22190_s5 + $0x40] sm:$0xff]  ;;  %v11347_v2 = vld [vmem:[%s22190_s5 + $0x198] sm:$0xff] }
 0xa05   : > { %11468 = vmatpush.msra.mxu2 %v11343_v7  ;;  %11449 = vmatpush.msra.mxu1 %v11326_v0  ;;  %v11320_v48 = vld [vmem:[%s22190_s5 + $0xc0] sm:$0xff]  ;;  %v11298_v7 = vld [vmem:[%s22190_s5 + $0x10] sm:$0xff] }
 0xa06   : > { %11283 = vmatmul.bf16.vlgmr.msrb.gmra.mxu3 %v21626_v18  ;;  %11430 = vmatpush.msra.mxu0 %v11309_v13  ;;  %v11324_v18 = vld [vmem:[%s22190_s5 + $0xe0] sm:$0xff]  ;;  %v11330_v55 = vld [vmem:[%s22190_s5 + $0x110] sm:$0xff]  ;;  %v11329_v13 = vld [vmem:[%s22190_s5 + $0x108] sm:$0xff] }
 0xa07   : > { %11488 = vmatpush.msra.mxu3 %v11359_v14  ;;  %11469 = vmatpush.msra.mxu2 %v11342_v3  ;;  %v11336_v35 = vld [vmem:[%s22190_s5 + $0x140] sm:$0xff]  ;;  %v11314_v14 = vld [vmem:[%s22190_s5 + $0x90] sm:$0xff]  ;;  %v11297_v3 = vld [vmem:[%s22190_s5 + $0x8] sm:$0xff] }
 0xa08   : > { %11450 = vmatpush.msra.mxu1 %v11325_v9  ;;  %11431 = vmatpush.msra.mxu0 %v11308_v53  ;;  %v11352_v33 = vld [vmem:[%s22190_s5 + $0x1c0] sm:$0xff]  ;;  %v11346_v0 = vld [vmem:[%s22190_s5 + $0x190] sm:$0xff]  ;;  %v11345_v9 = vld [vmem:[%s22190_s5 + $0x188] sm:$0xff] }
 0xa09   : > { %11489 = vmatpush.msra.mxu3 %v11358_v43  ;;  %11470 = vmatpush.msra.mxu2 %v11341_v62  ;;  %v11300_v59 = vld [vmem:[%s22190_s5 + $0x20] sm:$0xff]  ;;  %v11313_v43 = vld [vmem:[%s22190_s5 + $0x88] sm:$0xff] }
 0xa0a   : > { %11451 = vmatpush.msra.mxu1 %v11324_v18  ;;  %11432 = vmatpush.msra.mxu0 %v11307_v21  ;;  %v11316_v52 = vld [vmem:[%s22190_s5 + $0xa0] sm:$0xff]  ;;  %v11290_v21 = vmax.f32 %v21692_v6, 0.0  ;;  %v11374_v6 = vld [vmem:[%s22190_s5 + $0x270] sm:$0xff] }
 0xa0b   : > { %11490 = vmatpush.msra.mxu3 %v11357_v10  ;;  %11471 = vmatpush.msra.mxu2 %v11340_v31  ;;  %v11332_v1 = vld [vmem:[%s22190_s5 + $0x120] sm:$0xff]  ;;  %v11288_v31 = vmax.f32 %v21653_v60, 0.0  ;;  %v11391_v60 = vld [vmem:[%s22190_s5 + $0x2f8] sm:$0xff] }
 0xa0c   : > { %11452 = vmatpush.msra.mxu1 %v11323_v30  ;;  %11433 = vmatpush.msra.mxu0 %v11306_v23  ;;  %v11348_v16 = vld [vmem:[%s22190_s5 + $0x1a0] sm:$0xff]  ;;  %v11375_v30 = vld [vmem:[%s22190_s5 + $0x278] sm:$0xff]  ;;  %v11373_v23 = vld [vmem:[%s22190_s5 + $0x268] sm:$0xff] }
 0xa0d   : > { %11491 = vmatpush.msra.mxu3 %v11356_v26  ;;  %11472 = vmatpush.msra.mxu2 %v11339_v32  ;;  %v11296_v62 = vld [vmem:[%s22190_s5] sm:$0xff]  ;;  %v11289_v26 = vmax.f32 %v21667_v24, 0.0  ;;  %v11291_v32 = vmax.f32 %v21706_v45, 0.0  ;;  %v11407_v24 = vld [vmem:[%s22190_s5 + $0x378] sm:$0xff]  ;;  %v11390_v45 = vld [vmem:[%s22190_s5 + $0x2f0] sm:$0xff] }
 0xa0e   : > { %11453 = vmatpush.msra.mxu1 %v11322_v47  ;;  %11434 = vmatpush.msra.mxu0 %v11305_v34  ;;  %v11312_v10 = vld [vmem:[%s22190_s5 + $0x80] sm:$0xff]  ;;  %v11389_v47 = vld [vmem:[%s22190_s5 + $0x2e8] sm:$0xff] }
 0xa0f   : > { %11492 = vmatpush.msra.mxu3 %v11355_v5  ;;  %11473 = vmatpush.msra.mxu2 %v11338_v37  ;;  %v11328_v53 = vld [vmem:[%s22190_s5 + $0x100] sm:$0xff]  ;;  %v11406_v5 = vld [vmem:[%s22190_s5 + $0x370] sm:$0xff]  ;;  %v11089_v37 = vpop.f32.mrf.mxu0 }
 0xa10   : > { %11454 = vmatpush.msra.mxu1 %v11321_v15  ;;  %11435 = vmatpush.msra.mxu0 %v11304_v51  ;;  %v11344_v18 = vld [vmem:[%s22190_s5 + $0x180] sm:$0xff]  ;;  %v21969_v15 = vpop.f32.mrf.mxu1  ;;  %v11371_v51 = vld [vmem:[%s22190_s5 + $0x258] sm:$0xff] }
 0xa11   : > { %11493 = vmatpush.msra.mxu3 %v11354_v54  ;;  %11474 = vmatpush.msra.mxu2 %v11337_v49  ;;  %v11405_v54 = vld [vmem:[%s22190_s5 + $0x368] sm:$0xff]  ;;  %v11372_v34 = vld [vmem:[%s22190_s5 + $0x260] sm:$0xff] }
 0xa12   : > { %11455 = vmatpush.msra.mxu1 %v11320_v48  ;;  %11436 = vmatpush.msra.mxu0 %v11303_v29  ;;  %v11388_v49 = vld [vmem:[%s22190_s5 + $0x2e0] sm:$0xff]  ;;  %v11387_v48 = vld [vmem:[%s22190_s5 + $0x2d8] sm:$0xff]  ;;  %v21989_v29 = vpop.f32.mrf.mxu2 }
 0xa13   : > { %11494 = vmatpush.msra.mxu3 %v11353_v46  ;;  %11475 = vmatpush.msra.mxu2 %v11336_v35  ;;  %v11404_v46 = vld [vmem:[%s22190_s5 + $0x360] sm:$0xff]  ;;  %v11403_v35 = vld [vmem:[%s22190_s5 + $0x358] sm:$0xff] }
 0xa14   : > { %11456 = vmatpush.msra.mxu1 %v11319_v50  ;;  %11437 = vmatpush.msra.mxu0 %v11302_v44  ;;  %v11386_v50 = vld [vmem:[%s22190_s5 + $0x2d0] sm:$0xff]  ;;  %v11385_v44 = vld [vmem:[%s22190_s5 + $0x2c8] sm:$0xff] }
 0xa15   : > { %11495 = vmatpush.msra.mxu3 %v11352_v33  ;;  %11476 = vmatpush.msra.mxu2 %v11335_v20  ;;  %v11370_v33 = vld [vmem:[%s22190_s5 + $0x250] sm:$0xff]  ;;  %v21994_v20 = vpop.f32.mrf.mxu3 }
 0xa16   : > { %11457 = vmatpush.msra.mxu1 %v11318_v25  ;;  %11438 = vmatpush.msra.mxu0 %v11301_v19  ;;  %v11401_v25 = vld [vmem:[%s22190_s5 + $0x348] sm:$0xff]  ;;  %v11384_v19 = vld [vmem:[%s22190_s5 + $0x2c0] sm:$0xff] }
 0xa17   : > { %11496 = vmatpush.msra.mxu3 %v11351_v38  ;;  %11477 = vmatpush.msra.mxu2 %v11334_v40  ;;  %v11369_v38 = vld [vmem:[%s22190_s5 + $0x248] sm:$0xff]  ;;  %v11091_v12 = vpop.f32.mrf.mxu0  ;;  %v11368_v40 = vld [vmem:[%s22190_s5 + $0x240] sm:$0xff] }
 0xa18   : > { %11458 = vmatpush.msra.mxu1 %v11317_v57  ;;  %11439 = vmatpush.msra.mxu0 %v11300_v59  ;;  %v11400_v57 = vld [vmem:[%s22190_s5 + $0x340] sm:$0xff] }
 0xa19   : > { %11497 = vmatpush.msra.mxu3 %v11350_v41  ;;  %11478 = vmatpush.msra.mxu2 %v11333_v27  ;;  %v11104_v41 = vpop.f32.mrf.mxu1  ;;  %v11367_v27 = vld [vmem:[%s22190_s5 + $0x238] sm:$0xff]  ;;  %v11416_v12 = vld [vmem:[%s22190_s5 + $0x3c0] sm:$0xff] }
 0xa1a   : > { %11459 = vmatpush.msra.mxu1 %v11316_v52  ;;  %11440 = vmatpush.msra.mxu0 %v11299_v61  ;;  %v11383_v52 = vld [vmem:[%s22190_s5 + $0x2b8] sm:$0xff]  ;;  %v11398_v61 = vld [vmem:[%s22190_s5 + $0x330] sm:$0xff] }
 0xa1b   : > { %11498 = vmatpush.msra.mxu3 %v11349_v17  ;;  %11479 = vmatpush.msra.mxu2 %v11332_v1  ;;  %v22020_v17 = vld [vmem:[#allocation11] sm:$0xff]  ;;  %v11399_v1 = vld [vmem:[%s22190_s5 + $0x338] sm:$0xff]  ;;  %v11414_v41 = vld [vmem:[%s22190_s5 + $0x3b0] sm:$0xff] }
 0xa1c   : > { %11460 = vmatpush.msra.mxu1 %v11315_v8  ;;  %11441 = vmatpush.msra.mxu0 %v11298_v7  ;;  %v7886_v59 = vperm.slane %v22020_v17, 6  ;;  %v11365_v8 = vld [vmem:[%s22190_s5 + $0x228] sm:$0xff] }
 0xa1d   : > { %11499 = vmatpush.msra.mxu3 %v11348_v16  ;;  %11480 = vmatpush.msra.mxu2 %v11331_v56  ;;  %v11117_v16 = vpop.f32.mrf.mxu2  ;;  %v11130_v63 = vpop.f32.mrf.mxu3  ;;  %v11381_v7 = vld [vmem:[%s22190_s5 + $0x2a8] sm:$0xff] }
 0xa1e   : > { %11461 = vmatpush.msra.mxu1 %v11314_v14  ;;  %11442 = vmatpush.msra.mxu0 %v11297_v3  ;;  %v11090_v56 = vadd.f32 %v11089_v37, %v7886_v59  ;;  %v11397_v14 = vld [vmem:[%s22190_s5 + $0x328] sm:$0xff]  ;;  %v11363_v3 = vld [vmem:[%s22190_s5 + $0x218] sm:$0xff]  ;;  %v11410_v16 = vld [vmem:[%s22190_s5 + $0x390] sm:$0xff] }
 0xa1f   : > { %11500 = vmatpush.msra.mxu3 %v11347_v2  ;;  %11481 = vmatpush.msra.mxu2 %v11330_v55  ;;  %v11051_v2 = vadd.f32 %v21800_v11, %v11038_v39  ;;  %v11364_v55 = vld [vmem:[%s22190_s5 + $0x220] sm:$0xff] }
 0xa20   : > { %11462 = vmatpush.msra.mxu1 %v11313_v43  ;;  %11443 = vmatpush.msra.mxu0 %v11296_v62  ;;  %v11380_v11 = vld [vmem:[%s22190_s5 + $0x2a0] sm:$0xff]  ;;  %v11103_v43 = vadd.f32 %v21969_v15, %v11090_v56  ;;  %v11395_v62 = vld [vmem:[%s22190_s5 + $0x318] sm:$0xff] }
 0xa21   : > { %11501 = vmatpush.msra.mxu3 %v11346_v0  ;;  %11482 = vmatpush.msra.mxu2 %v11329_v13  ;;  %v11396_v0 = vld [vmem:[%s22190_s5 + $0x320] sm:$0xff]  ;;  %v11064_v13 = vadd.f32 %v21826_v22, %v11051_v2  ;;  %v11378_v22 = vld [vmem:[%s22190_s5 + $0x290] sm:$0xff] }
 0xa22   : > { %11463 = vmatpush.msra.mxu1 %v11312_v10  ;;  %11444 = vmatmul.f32.vlgmr.msra.gmra.mxu0 %v11288_v31  ;;  %v11362_v10 = vld [vmem:[%s22190_s5 + $0x210] sm:$0xff]  ;;  %v11361_v31 = vld [vmem:[%s22190_s5 + $0x208] sm:$0xff]  ;;  %v11408_v63 = vld [vmem:[%s22190_s5 + $0x380] sm:$0xff] }
 0xa23   : > { %11502 = vmatpush.msra.mxu3 %v11345_v9  ;;  %11483 = vmatpush.msra.mxu2 %v11328_v53  ;;  %v11379_v9 = vld [vmem:[%s22190_s5 + $0x298] sm:$0xff]  ;;  %v11394_v53 = vld [vmem:[%s22190_s5 + $0x310] sm:$0xff] }
 0xa24   : > { %11464 = vmatmul.f32.vlgmr.msra.gmra.mxu1 %v11289_v26  ;;  %11484 = vmatmul.f32.vlgmr.msra.gmra.mxu2 %v11290_v21  ;;  %v11077_v26 = vadd.f32 %v21834_v42, %v11064_v13  ;;  %v11377_v21 = vld [vmem:[%s22190_s5 + $0x288] sm:$0xff]  ;;  %v11376_v42 = vld [vmem:[%s22190_s5 + $0x280] sm:$0xff] }
 0xa25   : > { %11503 = vmatpush.msra.mxu3 %v11344_v18  ;;  %11508 = vmatpush.msrb.mxu0 %v11375_v30  ;;  %v11116_v18 = vadd.f32 %v21989_v29, %v11103_v43  ;;  %v11393_v30 = vld [vmem:[%s22190_s5 + $0x308] sm:$0xff] }
 0xa26   : > { %11504 = vmatmul.f32.vlgmr.msra.gmra.mxu3 %v11291_v32  ;;  %11528 = vmatpush.msrb.mxu1 %v11391_v60  ;;  %v11360_v32 = vld [vmem:[%s22190_s5 + $0x200] sm:$0xff]  ;;  %v11292_v60 = vmax.f32 %v21722_v36, 0.0  ;;  %v11423_v36 = vld [vmem:[%s22190_s5 + $0x3f8] sm:$0xff] }
 0xa27   : > { %11548 = vmatpush.msrb.mxu2 %v11407_v24  ;;  %11509 = vmatpush.msrb.mxu0 %v11374_v6  ;;  %v11129_v24 = vadd.f32 %v21994_v20, %v11116_v18  ;;  %v11392_v6 = vld [vmem:[%s22190_s5 + $0x300] sm:$0xff]  ;;  %v11418_v20 = vld [vmem:[%s22190_s5 + $0x3d0] sm:$0xff] }
 0xa28   : > { %11529 = vmatpush.msrb.mxu1 %v11390_v45  ;;  %v11293_v45 = vmax.f32 %v11077_v26, 0.0  ;;  %11568 = vmatpush.msrb.mxu3 %v11423_v36  ;;  %v18955_v26 = vld [vmem:[#allocation12] ss:$0 sm:$0xff] }
 0xa29   : > { %11549 = vmatpush.msrb.mxu2 %v11406_v5  ;;  %11510 = vmatpush.msrb.mxu0 %v11373_v23  ;;  %v11141_v5 = vpop.f32.mrf.mxu0  ;;  %v11180_v15 = vpop.f32.mrf.mxu3 }
 0xa2a   : > { %11530 = vmatpush.msrb.mxu1 %v11389_v47  ;;  %v11142_v23 = vadd.f32 %v11141_v5, %v11129_v24  ;;  %v11154_v47 = vpop.f32.mrf.mxu1 }
 0xa2b   : > { %11550 = vmatpush.msrb.mxu2 %v11405_v54  ;;  %11511 = vmatpush.msrb.mxu0 %v11372_v34  ;;  %v11167_v54 = vpop.f32.mrf.mxu2 }
 0xa2c   : > { %11531 = vmatpush.msrb.mxu1 %v11388_v49  ;;  %v11155_v37 = vadd.f32 %v11154_v47, %v11142_v23  ;;  %v11422_v49 = vld [vmem:[%s22190_s5 + $0x3f0] sm:$0xff] }
 0xa2d   : > { %11551 = vmatpush.msrb.mxu2 %v11404_v46  ;;  %11512 = vmatpush.msrb.mxu0 %v11371_v51  ;;  %v11421_v46 = vld [vmem:[%s22190_s5 + $0x3e8] sm:$0xff] }
 0xa2e   : > { %11532 = vmatpush.msrb.mxu1 %v11387_v48  ;;  %v11168_v34 = vadd.f32 %v11167_v54, %v11155_v37  ;;  %11569 = vmatpush.msrb.mxu3 %v11422_v49 }
 0xa2f   : > { %11552 = vmatpush.msrb.mxu2 %v11403_v35  ;;  %11513 = vmatpush.msrb.mxu0 %v11370_v33  ;;  %v11420_v35 = vld [vmem:[%s22190_s5 + $0x3e0] sm:$0xff] }
 0xa30   : > { %11533 = vmatpush.msrb.mxu1 %v11386_v50  ;;  %v11181_v51 = vadd.f32 %v11180_v15, %v11168_v34  ;;  %11570 = vmatpush.msrb.mxu3 %v11421_v46  ;;  %v11419_v50 = vld [vmem:[%s22190_s5 + $0x3d8] sm:$0xff] }
 0xa31   : > { %11553 = vmatpush.msrb.mxu2 %v11402_v58  ;;  %11514 = vmatpush.msrb.mxu0 %v11369_v38  ;;  %v11143_v48 = vpop.f32.mrf.mxu0  ;;  %v11182_v38 = vpop.f32.mrf.mxu3 }
 0xa32   : > { %11534 = vmatpush.msrb.mxu1 %v11385_v44  ;;  %v11156_v33 = vpop.f32.mrf.mxu1  ;;  %v11294_v29 = vmax.f32 %v11181_v51, 0.0  ;;  %11571 = vmatpush.msrb.mxu3 %v11420_v35  ;;  %v11417_v44 = vld [vmem:[%s22190_s5 + $0x3c8] sm:$0xff] }
 0xa33   : > { %11554 = vmatpush.msrb.mxu2 %v11401_v25  ;;  %11515 = vmatpush.msrb.mxu0 %v11368_v40  ;;  %v11169_v58 = vpop.f32.mrf.mxu2  ;;  %v11415_v25 = vld [vmem:[%s22190_s5 + $0x3b8] sm:$0xff]  ;;  %v11614_v33 = vlaneseq }
 0xa34   : > { %11535 = vmatpush.msrb.mxu1 %v11384_v19  ;;  %11572 = vmatpush.msrb.mxu3 %v11419_v50  ;;  %v11413_v19 = vld [vmem:[%s22190_s5 + $0x3a8] sm:$0xff] }
 0xa35   : > { %11555 = vmatpush.msrb.mxu2 %v11400_v57  ;;  %11516 = vmatpush.msrb.mxu0 %v11367_v27  ;;  %v11412_v27 = vld [vmem:[%s22190_s5 + $0x3a0] sm:$0xff]  ;;  %v11615_v38 = vshrl.u32 %v11614_v33, 7 }
 0xa36   : > { %11536 = vmatpush.msrb.mxu1 %v11383_v52  ;;  %11573 = vmatpush.msrb.mxu3 %v11418_v20 }
 0xa37   : > { %11556 = vmatpush.msrb.mxu2 %v11399_v1  ;;  %11517 = vmatpush.msrb.mxu0 %v11366_v28  ;;  %v11411_v1 = vld [vmem:[%s22190_s5 + $0x398] sm:$0xff]  ;;  %vm11624_vm3 = vcmp.eq.s32.totalorder %v11615_v38, 0  ;;  %vm11634_vm4 = vcmp.eq.s32.totalorder %v11615_v38, 1 }
 0xa38   : > { %11537 = vmatpush.msrb.mxu1 %v11382_v4  ;;  %11574 = vmatpush.msrb.mxu3 %v11417_v44  ;;  %v11409_v4 = vld [vmem:[%s22190_s5 + $0x388] sm:$0xff] }
 0xa39   : > { %11557 = vmatpush.msrb.mxu2 %v11398_v61  ;;  %11518 = vmatpush.msrb.mxu0 %v11365_v8  ;;  %v7887_v61 = vperm.slane %v22020_v17, 7 }
 0xa3a   : > { %11538 = vmatpush.msrb.mxu1 %v11381_v7  ;;  %11575 = vmatpush.msrb.mxu3 %v11416_v12 }
 0xa3b   : > { %11558 = vmatpush.msrb.mxu2 %v11397_v14  ;;  %11519 = vmatpush.msrb.mxu0 %v11364_v55 }
 0xa3c   : > { %11539 = vmatpush.msrb.mxu1 %v11380_v11  ;;  %11576 = vmatpush.msrb.mxu3 %v11415_v25 }
 0xa3d   : > { %11559 = vmatpush.msrb.mxu2 %v11396_v0  ;;  %11520 = vmatpush.msrb.mxu0 %v11363_v3  ;;  %v11193_v40 = vpop.f32.mrf.mxu0 }
 0xa3e   : > { %11540 = vmatpush.msrb.mxu1 %v11379_v9  ;;  %11577 = vmatpush.msrb.mxu3 %v11414_v41  ;;  %v11194_v2 = vadd.f32 %v11193_v40, %v7887_v61 }
 0xa3f   : > { %11560 = vmatpush.msrb.mxu2 %v11395_v62  ;;  %11521 = vmatpush.msrb.mxu0 %v11362_v10  ;;  %v11206_v57 = vpop.f32.mrf.mxu1 }
 0xa40   : > { %11541 = vmatpush.msrb.mxu1 %v11378_v22  ;;  %11578 = vmatpush.msrb.mxu3 %v11413_v19  ;;  %v11207_v7 = vadd.f32 %v11206_v57, %v11194_v2 }
 0xa41   : > { %11561 = vmatpush.msrb.mxu2 %v11394_v53  ;;  %11522 = vmatpush.msrb.mxu0 %v11361_v31 }
 0xa42   : > { %11542 = vmatpush.msrb.mxu1 %v11377_v21  ;;  %11579 = vmatpush.msrb.mxu3 %v11412_v27 }
 0xa43   : > { %11562 = vmatpush.msrb.mxu2 %v11393_v30  ;;  %11523 = vmatpush.msrb.mxu0 %v11360_v32 }
 0xa44   : > { %11543 = vmatpush.msrb.mxu1 %v11376_v42  ;;  %11524 = vmatmul.f32.vlgmr.msrb.gmra.mxu0 %v11292_v60 }
 0xa45   : > { %11544 = vmatmul.f32.vlgmr.msrb.gmra.mxu1 %v11293_v45  ;;  %11563 = vmatpush.msrb.mxu2 %v11392_v6  ;;  %v11195_v52 = vpop.f32.mrf.mxu0 }
 0xa46   : > { %11564 = vmatmul.f32.vlgmr.msrb.gmra.mxu2 %v11294_v29  ;;  %11580 = vmatpush.msrb.mxu3 %v11411_v1 }
 0xa47   : > { %v11219_v59 = vpop.f32.mrf.mxu2  ;;  %v11208_v28 = vpop.f32.mrf.mxu1 }
 0xa48   : > { %11581 = vmatpush.msrb.mxu3 %v11410_v16  ;;  %v11220_v14 = vadd.f32 %v11219_v59, %v11207_v7 }
 0xa49   : > { %v11232_v39 = vpop.f32.mrf.mxu3 }
 0xa4a   : > { %11582 = vmatpush.msrb.mxu3 %v11409_v4  ;;  %v11233_v55 = vadd.f32 %v11232_v39, %v11220_v14 }
 0xa4c   : > { %11583 = vmatpush.msrb.mxu3 %v11408_v63 }
 0xa4f   : > { %v11221_v8 = vpop.f32.mrf.mxu2 }
 0xa51   : > { %v11234_v56 = vpop.f32.mrf.mxu3 }
 0xa7d   : > { %v11245_v11 = vpop.f32.mrf.mxu0 }
 0xa7e   : > { %v11246_v3 = vadd.f32 %v11245_v11, %v11233_v55 }
 0xa7f   : > { %v11258_v0 = vpop.f32.mrf.mxu1 }
 0xa80   : > { %v11259_v43 = vadd.f32 %v11258_v0, %v11246_v3 }
 0xa85   : > { %v11247_v10 = vpop.f32.mrf.mxu0 }
 0xa87   : > { %v11271_v13 = vpop.f32.mrf.mxu2  ;;  %v11260_v22 = vpop.f32.mrf.mxu1 }
 0xa88   : > { %v11272_v9 = vadd.f32 %v11271_v13, %v11259_v43 }
 0xa89   : > { %v11284_v62 = vpop.f32.mrf.mxu3 }
 0xa8a   : > { %v11285_v53 = vadd.f32 %v11284_v62, %v11272_v9 }
 0xa8c   : > { %v11295_v18 = vmax.f32 %v11285_v53, 0.0 }
 0xa8e   : > { %11584 = vmatmul.f32.vlgmr.msrb.gmra.mxu3 %v11295_v18 }
 0xa8f   : > { %v11273_v17 = vpop.f32.mrf.mxu2 }
 0xa91   : > { %v11286_v31 = vpop.f32.mrf.mxu3 }
 0xa9f   : > { %v11445_v21 = vpop.f32.mrf.mxu0 }
 0xaa0   : > { %v11446_v30 = vadd.f32 %v18955_v26, %v11445_v21 }
 0xaa1   : > { %v11465_v32 = vpop.f32.mrf.mxu1 }
 0xaa2   : > { %v11466_v60 = vadd.f32 %v11465_v32, %v11446_v30 }
 0xaa7   : > { %v11485_v42 = vpop.f32.mrf.mxu2 }
 0xaa8   : > { %v11486_v24 = vadd.f32 %v11485_v42, %v11466_v60 }
 0xaa9   : > { %v11505_v6 = vpop.f32.mrf.mxu3 }
 0xaaa   : > { %v11506_v5 = vadd.f32 %v11505_v6, %v11486_v24 }
 0xac1   : > { %v11525_v45 = vpop.f32.mrf.mxu0 }
 0xac2   : > { %v11526_v23 = vadd.f32 %v11525_v45, %v11506_v5  ;;  %v11545_v47 = vpop.f32.mrf.mxu1 }
 0xac4   : > { %v11546_v36 = vadd.f32 %v11545_v47, %v11526_v23 }
 0xac9   : > { %v11565_v37 = vpop.f32.mrf.mxu2 }
 0xaca   : > { %v11566_v54 = vadd.f32 %v11565_v37, %v11546_v36 }
 0xb11   : > { %v11585_v34 = vpop.f32.mrf.mxu3 }
 0xb12   : > { %v11586_v15 = vadd.f32 %v11585_v34, %v11566_v54 }
 0xb14   : > { %v11617_v49 = vsel %vm11616_vm0, %v11586_v15, -inf  ;;  %v11627_v46 = vsel %vm11626_vm1, %v11586_v15, -inf  ;;  %v11589_v51 = vsel %vm11588_vm2, %v11586_v15, -inf }
 0xb15   : > { %v11618_v48 = vrot.slane %v11617_v49, 4  ;;  %v11628_v35 = vrot.slane %v11627_v46, 4  ;;  %11590 = vmax.xlane.f32.xlu0 %v11589_v51 }
 0xb17   : > { %v11619_v29 = vmax.f32 %v11617_v49, %v11618_v48  ;;  %v11629_v50 = vmax.f32 %v11627_v46, %v11628_v35 }
 0xb19   : > { %v11620_v20 = vrot.slane %v11619_v29, 2  ;;  %v11630_v58 = vrot.slane %v11629_v50, 2 }
 0xb1b   : > { %v11621_v44 = vmax.f32 %v11619_v29, %v11620_v20  ;;  %v11631_v12 = vmax.f32 %v11629_v50, %v11630_v58 }
 0xb1d   : > { %v11622_v25 = vrot.slane %v11621_v44, 1  ;;  %v11632_v40 = vrot.slane %v11631_v12, 1 }
 0xb1f   : > { %v11623_v41 = vmax.f32 %v11621_v44, %v11622_v25  ;;  %v11633_v19 = vmax.f32 %v11631_v12, %v11632_v40 }
 0xb21   : > { %v11625_v57 = vsel %vm11624_vm3, %v11623_v41, 0.0 }
 0xb22   : > { %v11635_v27 = vsel %vm11634_vm4, %v11633_v19, %v11625_v57 }
 0xb23   : > { %11637 = vst.msk [vmem:[#allocation14] sm:$0x3] %vm11636_vm5, %v11635_v27 }
 0xb88   : > { %v11591_v59 = vpop.xlane.xlu0 %11590 }
 0xb89   : > { %v11592_v39 = vsub.f32 %v11586_v15, %v11591_v59 }
 0xb8b   : > { %v11593_v52 = vmul.f32 1.442695, %v11592_v39 }
 0xb8d   : > { %18956 = vpow2.f32 %v11593_v52 }
 0xb93   : > { %v18957_v1 = vpop.eup %18956 }
 0xb94   : > { %v11595_v28 = vsel %vm11588_vm2, %v18957_v1, 0.0 }
 0xb95   : > { %11596 = vadd.xlane.f32.xlu0 %v11595_v28 }
 0xc08   : > { %v11597_v16 = vpop.xlane.xlu0 %11596 }
 0xc09   : > { %18958 = vrcp.f32 %v11597_v16  ;;  %v11609_v8 = vand.u32 2147483648, %v11597_v16  ;;  %v11607_v2 = vand.u32 2147483647, %v11597_v16  ;;  %vm11603_vm7 = vweird.f32 %v11597_v16 }
 0xc0b   : > { %v11610_v14 = vor.u32 1.1754944e-38, %v11609_v8  ;;  %vm11608_vm9 = vcmp.eq.f32.partialorder %v11607_v2, 8.507059e+37 }
 0xc0f   : > { %v18959_v4 = vpop.eup %18958 }
 0xc10   : > { %v11599_v63 = vmul.f32 %v18959_v4, %v11597_v16  ;;  %vm11604_vm6 = vweird.f32 %v18959_v4 }
 0xc11   : > { %vm11605_vm8 = vmor %vm11603_vm7, %vm11604_vm6 }
 0xc12   : > { %v11600_v61 = vsub.f32 1.0, %v11599_v63 }
 0xc14   : > { %v11601_v56 = vmul.f32 %v18959_v4, %v11600_v61 }
 0xc16   : > { %v11602_v7 = vadd.f32 %v18959_v4, %v11601_v56 }
 0xc18   : > { %v11606_v55 = vsel %vm11605_vm8, %v18959_v4, %v11602_v7 }
 0xc19   : > { %v11611_v11 = vsel %vm11608_vm9, %v11610_v14, %v11606_v55 }
 0xc1a   : > { %v11612_v0 = vmul.f32 %v18957_v1, %v11611_v11 }
 0xc1c   : > { %11613 = vst.msk [vmem:[#allocation15] sm:$0xff] %vm11588_vm2, %v11612_v0 }
 0xc1d PF: > { %p18910_p3 = scmp.eq.s32.totalorder %s19337_s12, 6  ;;  %s19266_s15 = smov [#allocation14]  }
 0xc1e   : > { %s11644_s23 = sshll.u32 %s19266_s15, 4  ;;  %s11646_s13 = sshll.u32 %s22192_s7, 4  ;;  %s11645_s23 = int_to_ptr.vmem [resolvable:$true] %s11644_s23  ;;  %s11647_s13 = int_to_ptr.hbm [resolvable:$true] %s11646_s13 }
 0xc1f   : > { %18874 = dma.vmem_to_hbm [thread:$0]  (%p18910_p3), %s11645_s23, 32, %s11647_s13, [#allocation5]  }
 0xc20   : > { %s11658_s11 = sshll.u32 %s22193_s8, 4  ;;  %s19267_s14 = smov [#allocation15]   ;;  %s11659_s11 = int_to_ptr.hbm [resolvable:$true] %s11658_s11 }
 0xc21   : > { %s11656_s19 = sshll.u32 %s19267_s14, 4  ;;  %s11657_s19 = int_to_ptr.vmem [resolvable:$true] %s11656_s19 }
 0xc22   : > { %18876 = dma.vmem_to_hbm [thread:$0]  (%p18910_p3), %s11657_s19, 128, %s11659_s11, [#allocation16]  }
 0xc23   : > { %19236 = dma.done.wait (%p18910_p3), [#allocation5], 32  }
 0xc24   : > { %19238 = vsyncadd (%p18910_p3), [#allocation5], 4294967264 }
 0xc25   : > { %19240 = dma.done.wait (%p18910_p3), [#allocation16], 128  }
 0xc26   : > { %19242 = vsyncadd (%p18910_p3), [#allocation16], 4294967168 }
 0xc27 PF: > { %p26_p4 = scmp.ge.s32.totalorder %s19376_s18, 9   ;;  %s22208_s27 = smov %s19249_s28 }
 0xc28   : > { %s22209_s28 = smov %s19253_s29  ;;  %s22210_s29 = smov %s19388_s24 }
 0xc29   : > { %s22211_s30 = smov %s19376_s18  ;;  %28 = sbr.rel (!%p26_p4) target bundleno = 13 (0xd), region = 130 }
 0xc2e   :  { %11677 = vsyncpa [#allocation4], 1 }
 0xc2f   :  { %11679 = vsyncpa [#allocation4 + $0x1], 1 }
 0xc30   :  { %11680 = vsyncpa [#allocation7], 1 }
 0xc31   :  { %11682 = vsyncpa [#allocation7 + $0x1], 1 }
 0xc32   :  { %11683 = vsyncpa [#allocation10], 1 }
 0xc33   :  { %11684 = vsyncpa [#allocation13], 1 }
 0xc34   :  { %11685 = vsyncpa [#allocation5], 1 }
 0xc35   :  { %11687 = vsyncpa [#allocation5 + $0x1], 1 }
 0xc36   :  { %11688 = vsyncpa [#allocation16], 1 }

</bundles_post_ra>
